<compile_context>
chip_gen: v5e
topology: v5e:2x2
jax: 0.10.0
libtpu: 0.0.40
codegen_flags: <defaults>
</compile_context>

<pallas_src>
import functools

import jax
import jax.numpy as jnp
from jax import lax
from jax.experimental import pallas as pl
from jax.experimental.pallas import tpu as pltpu

_BN_EPS = 1e-5


# ----------------------------------------------------------------------------
# In-kernel helpers
# ----------------------------------------------------------------------------

def _mean_invstd_rows(x):
    """Training-mode BatchNorm statistics over rows of an (M, C) f32 tensor."""
    mean = jnp.mean(x, axis=0, keepdims=True)
    var = jnp.mean((x - mean) ** 2, axis=0, keepdims=True)
    return mean, lax.rsqrt(var + _BN_EPS)


def _maxpool2x2(x, H, W, N):
    """2x2 / stride-2 max pool on a (H*W*N, C) position-major activation."""
    outs = []
    for pi in range(H // 2):
        for pj in range(W // 2):
            ps = ((2 * pi) * W + 2 * pj, (2 * pi) * W + 2 * pj + 1,
                  (2 * pi + 1) * W + 2 * pj, (2 * pi + 1) * W + 2 * pj + 1)
            m = x[ps[0] * N:(ps[0] + 1) * N, :]
            for p in ps[1:]:
                m = jnp.maximum(m, x[p * N:(p + 1) * N, :])
            outs.append(m)
    return jnp.concatenate(outs, axis=0)            # ((H//2)*(W//2)*N, C)


def _conv3x3_kfold(x, H, W, N, w_ref, b_ref):
    """3x3 'same' conv as ONE (H*W*N, 9*Cin) @ (9*Cin, Cout) MXU matmul.

    x: (H*W*N, Cin) f32, rows position-major ((i, j) major, frame minor).
    The im2col LHS is assembled from vreg-aligned row blocks in f32 (zero
    blocks implement the zero padding) and cast to bf16 once; a single
    K = 9*Cin matmul streams through the MXU (no per-tap accumulate adds).
    Weight rows are ordered k = (dh*3 + dw)*Cin + ci.
    """
    Cin = x.shape[1]
    cols = []
    for dh in range(3):
        dy = dh - 1
        for dw in range(3):
            dx = dw - 1
            rows = []
            for i in range(H):
                si = i + dy
                if not (0 <= si < H):
                    rows.append(jnp.zeros((W * N, Cin), jnp.float32))
                    continue
                base = si * W * N
                if dx == 0:
                    rows.append(x[base:base + W * N, :])
                elif dx < 0:
                    rows.append(jnp.zeros((N, Cin), jnp.float32))
                    rows.append(x[base:base + (W - 1) * N, :])
                else:
                    rows.append(x[base + N:base + W * N, :])
                    rows.append(jnp.zeros((N, Cin), jnp.float32))
            cols.append(jnp.concatenate(rows, axis=0))      # (H*W*N, Cin)
    lhs = jnp.concatenate(cols, axis=1).astype(jnp.bfloat16)  # (H*W*N, 9*Cin)
    return (jnp.dot(lhs, w_ref[...], preferred_element_type=jnp.float32)
            + b_ref[...])


# ----------------------------------------------------------------------------
# Kernel factories (closures carry the static shape parameters)
# ----------------------------------------------------------------------------

def _make_gru_kernel(B, L, H):
    """Fused GRU encoder: x-projection + recurrence + last-valid-state select."""

    def kernel(emb_ref, wih_ref, bih_ref, whh_ref, bhh_ref, last_ref,
               o_ref, xp_scr):
        # All-timestep input projection in one MXU matmul (bf16 operands).
        xp_scr[...] = (jnp.dot(emb_ref[...].astype(jnp.bfloat16), wih_ref[...],
                               preferred_element_type=jnp.float32)
                       + bih_ref[...])
        whh = whh_ref[...]          # f32 recurrent weights (accuracy)
        bhh = bhh_ref[...]
        last = last_ref[...]        # (B, 1) int32: index of last valid token

        def step(t, carry):
            h, out = carry
            # rows b*L + t for each batch b (nn.GRU gate order [r, z, n])
            x_t = jnp.concatenate(
                [xp_scr[pl.ds(b * L + t, 1), :] for b in range(B)], axis=0)
            hp = jnp.dot(h, whh, preferred_element_type=jnp.float32) + bhh
            r = jax.nn.sigmoid(x_t[:, :H] + hp[:, :H])
            z = jax.nn.sigmoid(x_t[:, H:2 * H] + hp[:, H:2 * H])
            n = jnp.tanh(x_t[:, 2 * H:] + r * hp[:, 2 * H:])
            h_new = (1.0 - z) * n + z * h
            out = jnp.where(last == t, h_new, out)   # keep h at t == lengths-1
            return (h_new, out)

        _, out = lax.fori_loop(
            0, L, step,
            (jnp.zeros((B, H), jnp.float32), jnp.zeros((B, H), jnp.float32)))
        o_ref[...] = out

    return kernel


def _make_image_kernel(N, Ho, Wo, S):
    """Whole image path in ONE kernel:

    stage1 (conv2x2 + BN + ReLU + pool) -> stage2 (conv3x3 + BN + ReLU + pool)
    -> FiLM gamma/beta Linears -> FiLM module 0 (+res) -> FiLM module 1 (+res)
    -> spatial max + ReLU.   Activations kept as (P*N, C) position-major f32.
    """
    H1, W1 = Ho // 2, Wo // 2
    H2, W2 = H1 // 2, W1 // 2
    P2 = H2 * W2

    def kernel(patch_ref, w1_ref, b1_ref, w2_ref, b2_ref,
               f0c1w_ref, f0c1b_ref, f0c2w_ref, f0c2b_ref,
               f1c1w_ref, f1c1b_ref, f1c2w_ref, f1c2b_ref,
               text_ref, flw_ref, flb_ref, o_ref):
        # ---- stage 1: 2x2 conv as ONE (Ho*Wo*N, K) @ (K, 128) MXU matmul ----
        h = (jnp.dot(patch_ref[...].astype(jnp.bfloat16), w1_ref[...],
                     preferred_element_type=jnp.float32) + b1_ref[...])
        # BN stats over the FULL conv output; pooling the raw output first is
        # valid because BN (gamma=1 => positive scale) + ReLU are monotone.
        mean, inv = _mean_invstd_rows(h)
        x = jnp.maximum((_maxpool2x2(h, Ho, Wo, N) - mean) * inv, 0.0)

        # ---- stage 2: 3x3 conv (taps folded into K) + BN + ReLU + pool ----
        h = _conv3x3_kfold(x, H1, W1, N, w2_ref, b2_ref)
        mean, inv = _mean_invstd_rows(h)
        x = jnp.maximum((_maxpool2x2(h, H1, W1, N) - mean) * inv, 0.0)

        # ---- FiLM gamma/beta for both modules from the instruction code ----
        g = (jnp.dot(text_ref[...].astype(jnp.bfloat16), flw_ref[...],
                     preferred_element_type=jnp.float32) + flb_ref[...])  # (B, 4C)
        B = g.shape[0]
        # per-frame (row n = b*S + s) broadcast of the per-batch gamma/beta
        gb = jnp.concatenate(
            [g[b:b + 1, :] for b in range(B) for _ in range(S)], axis=0)   # (N, 4C)

        off = 0
        for (c1w, c1b, c2w, c2b) in (
                (f0c1w_ref, f0c1b_ref, f0c2w_ref, f0c2b_ref),
                (f1c1w_ref, f1c1b_ref, f1c2w_ref, f1c2b_ref)):
            C2 = c2w.shape[1]
            assert x.shape[1] == C2, "residual add needs in_channels == out_features"
            gam = gb[:, off:off + C2]
            bet = gb[:, off + C2:off + 2 * C2]
            off += 2 * C2
            # relu(bn1(conv1(x)))
            h = _conv3x3_kfold(x, H2, W2, N, c1w, c1b)
            mean, inv = _mean_invstd_rows(h)
            h = jnp.maximum((h - mean) * inv, 0.0)
            # conv2, FiLM modulation (broadcast (N, C2) over spatial blocks)
            h = _conv3x3_kfold(h, H2, W2, N, c2w, c2b)
            h = (h.reshape(P2, N, C2) * gam[None] + bet[None]).reshape(P2 * N, C2)
            # relu(bn2(.)) + residual
            mean, inv = _mean_invstd_rows(h)
            x = jnp.maximum((h - mean) * inv, 0.0) + x

        # ---- spatial max + relu -> (N, C) ----
        feat = x[0:N, :]
        for p in range(1, P2):
            feat = jnp.maximum(feat, x[p * N:(p + 1) * N, :])
        o_ref[...] = jnp.maximum(feat, 0.0)

    return kernel


def _make_lstm_head_kernel(B, S, Hm):
    """Fused LSTM memory (x-projection + recurrence) + 2-layer head."""

    def kernel(feat_ref, wih_ref, bih_ref, whh_ref, bhh_ref,
               hw1_ref, hb1_ref, hw2_ref, hb2_ref, o_ref, xp_scr, h_scr):
        xp_scr[...] = (jnp.dot(feat_ref[...].astype(jnp.bfloat16), wih_ref[...],
                               preferred_element_type=jnp.float32)
                       + bih_ref[...])
        whh = whh_ref[...]          # f32 recurrent weights (accuracy)
        bhh = bhh_ref[...]

        def step(t, carry):
            h, c = carry
            x_t = jnp.concatenate(
                [xp_scr[pl.ds(b * S + t, 1), :] for b in range(B)], axis=0)
            gates = x_t + jnp.dot(h, whh, preferred_element_type=jnp.float32) + bhh
            i = jax.nn.sigmoid(gates[:, :Hm])
            f = jax.nn.sigmoid(gates[:, Hm:2 * Hm])
            g = jnp.tanh(gates[:, 2 * Hm:3 * Hm])
            o = jax.nn.sigmoid(gates[:, 3 * Hm:])
            c_new = f * c + i * g
            h_new = o * jnp.tanh(c_new)
            h_scr[t] = h_new                        # (B, Hm) at time t
            return (h_new, c_new)

        lax.fori_loop(0, S, step,
                      (jnp.zeros((B, Hm), jnp.float32),
                       jnp.zeros((B, Hm), jnp.float32)))

        # reorder (S, B, Hm) -> rows n = b*S + s, then the fused head
        hs = h_scr[...]
        h_all = jnp.concatenate(
            [hs[s, b:b + 1, :] for b in range(B) for s in range(S)], axis=0)
        hid = jnp.tanh(jnp.dot(h_all.astype(jnp.bfloat16), hw1_ref[...],
                               preferred_element_type=jnp.float32) + hb1_ref[...])
        # lane-dense (N, 128) padded logits; sliced to num_actions in wrapper
        o_ref[...] = (jnp.dot(hid.astype(jnp.bfloat16), hw2_ref[...],
                              preferred_element_type=jnp.float32) + hb2_ref[...])

    return kernel


# ----------------------------------------------------------------------------
# Parameters (deterministic synthetic init; kernel-friendly layouts)
# ----------------------------------------------------------------------------

def init_params(key, num_actions=7, instr_dim=128, image_dim=128,
                memory_dim=128, vocab=40):
    keys = iter(jax.random.split(key, 64))

    def nxt():
        return next(keys)

    def conv3x3_w(cin, cout):
        fan_in = 9 * cin
        w = jax.random.normal(nxt(), (3, 3, cin, cout), jnp.float32) / (fan_in ** 0.5)
        return w.reshape(9 * cin, cout).astype(jnp.bfloat16)   # rows: (dh,dw,ci)

    def norm_linear(in_f, out_f):
        # mimics initialize_parameters: N(0,1) rows normalized, bias = 0
        wm = jax.random.normal(nxt(), (out_f, in_f), jnp.float32)
        wm = wm / jnp.sqrt(jnp.sum(wm ** 2, axis=1, keepdims=True))
        return wm.T, jnp.zeros((1, out_f), jnp.float32)        # stored (in, out)

    def uni(shape, k):
        return jax.random.uniform(nxt(), shape, jnp.float32, -k, k)

    p = {}
    p["embedding"] = jax.random.normal(nxt(), (vocab, instr_dim), jnp.float32)

    kg = 1.0 / (instr_dim ** 0.5)
    p["gru"] = dict(
        w_ih=uni((instr_dim, 3 * instr_dim), kg).astype(jnp.bfloat16),
        w_hh=uni((instr_dim, 3 * instr_dim), kg),               # f32 recurrent
        b_ih=uni((1, 3 * instr_dim), kg),
        b_hh=uni((1, 3 * instr_dim), kg),
    )

    # stage-1 conv: 2x2, cin=3 -> 128; rows ordered ((dh,dw) tap, ci),
    # zero-padded K 12 -> 16 for clean bf16 packing.
    w1 = jax.random.normal(nxt(), (2, 2, 3, 128), jnp.float32) / (12 ** 0.5)
    w1 = w1.reshape(12, 128)
    p["ic1_w"] = jnp.concatenate(
        [w1, jnp.zeros((4, 128), jnp.float32)], axis=0).astype(jnp.bfloat16)
    p["ic1_b"] = jnp.zeros((1, 128), jnp.float32)
    p["ic2_w"] = conv3x3_w(128, 128)                            # (1152, 128)
    p["ic2_b"] = jnp.zeros((1, 128), jnp.float32)

    films, lin_w, lin_b = [], [], []
    num_module = 2
    for ni in range(num_module):
        out_f = 128 if ni < num_module - 1 else image_dim
        films.append(dict(
            conv1_w=conv3x3_w(128, 128), conv1_b=jnp.zeros((1, 128), jnp.float32),
            conv2_w=conv3x3_w(128, out_f), conv2_b=jnp.zeros((1, out_f), jnp.float32),
        ))
        gw, gb = norm_linear(instr_dim, out_f)                  # FiLM "weight"
        bw, bb = norm_linear(instr_dim, out_f)                  # FiLM "bias"
        lin_w += [gw, bw]
        lin_b += [gb, bb]
    p["films"] = films
    # all four FiLM gamma/beta Linears batched into one matmul
    p["film_lin_w"] = jnp.concatenate(lin_w, axis=1).astype(jnp.bfloat16)  # (D, 512)
    p["film_lin_b"] = jnp.concatenate(lin_b, axis=1)                       # (1, 512)

    km = 1.0 / (memory_dim ** 0.5)
    p["lstm"] = dict(
        w_ih=uni((image_dim, 4 * memory_dim), km).astype(jnp.bfloat16),
        w_hh=uni((memory_dim, 4 * memory_dim), km),             # f32 recurrent
        b_ih=uni((1, 4 * memory_dim), km),
        b_hh=uni((1, 4 * memory_dim), km),
    )

    hw1, hb1 = norm_linear(image_dim, 64)
    hw2, hb2 = norm_linear(64, num_actions)
    pad = 128 - num_actions                                     # lane-dense head
    p["head_w1"] = hw1.astype(jnp.bfloat16)
    p["head_b1"] = hb1
    p["head_w2"] = jnp.concatenate(
        [hw2, jnp.zeros((64, pad), jnp.float32)], axis=1).astype(jnp.bfloat16)
    p["head_b2"] = jnp.concatenate([hb2, jnp.zeros((1, pad), jnp.float32)], axis=1)
    return p


# ----------------------------------------------------------------------------
# Full forward pass (matches BabyAIModel.forward, res=True, unidirectional)
# ----------------------------------------------------------------------------

def babyai_forward(params, image, mission, num_actions=7):
    """image: (B, S, 3, h, w) float, mission: (B, L) int32 token ids."""
    B, S, c, h, w = image.shape
    N = B * S
    L = mission.shape[1]

    # ---- instruction encoder --------------------------------------------
    # TODO(synk): embedding lookup is a data-dependent gather; stays in XLA.
    lengths = jnp.sum(mission != 0, axis=1)
    last_idx = (jnp.maximum(lengths, 1) - 1).astype(jnp.int32).reshape(B, 1)
    D = params["embedding"].shape[1]
    emb = params["embedding"][mission].reshape(B * L, D)

    gru = params["gru"]
    Hg = gru["w_hh"].shape[0]
    text = pl.pallas_call(
        _make_gru_kernel(B, L, Hg),
        out_shape=jax.ShapeDtypeStruct((B, Hg), jnp.float32),
        scratch_shapes=[pltpu.VMEM((B * L, 3 * Hg), jnp.float32)],
    )(emb, gru["w_ih"], gru["b_ih"], gru["w_hh"], gru["b_hh"], last_idx)

    # ---- image path ------------------------------------------------------
    # TODO(synk): tiny (~31 KB) im2col for the 2x2 stage-1 conv is built in
    # the XLA wrapper (rows ordered (i, j, frame), cols ordered (tap, ci)).
    Ho, Wo = h + 1, w + 1                       # 2x2 conv, stride 1, pad 1
    x = image.reshape(N, c, h, w).astype(jnp.float32)
    xpad = jnp.pad(x, ((0, 0), (0, 0), (1, 1), (1, 1)))
    taps = [xpad[:, :, dh:dh + Ho, dw:dw + Wo]
            for dh in range(2) for dw in range(2)]
    patch = jnp.stack(taps, axis=1)                             # (N, 4, c, Ho, Wo)
    patch = patch.transpose(3, 4, 0, 1, 2).reshape(Ho * Wo * N, 4 * c)
    kpad = params["ic1_w"].shape[0] - 4 * c
    if kpad:
        patch = jnp.pad(patch, ((0, 0), (0, kpad)))

    f0, f1 = params["films"]
    feat = pl.pallas_call(
        _make_image_kernel(N, Ho, Wo, S),
        out_shape=jax.ShapeDtypeStruct((N, f1["conv2_w"].shape[1]), jnp.float32),
    )(patch, params["ic1_w"], params["ic1_b"], params["ic2_w"], params["ic2_b"],
      f0["conv1_w"], f0["conv1_b"], f0["conv2_w"], f0["conv2_b"],
      f1["conv1_w"], f1["conv1_b"], f1["conv2_w"], f1["conv2_b"],
      text, params["film_lin_w"], params["film_lin_b"])

    # ---- LSTM memory + head (fused, lane-dense padded output) ------------
    lstm = params["lstm"]
    Hm = lstm["w_hh"].shape[0]
    Apad = params["head_w2"].shape[1]
    logits_pad = pl.pallas_call(
        _make_lstm_head_kernel(B, S, Hm),
        out_shape=jax.ShapeDtypeStruct((N, Apad), jnp.float32),
        scratch_shapes=[pltpu.VMEM((N, 4 * Hm), jnp.float32),
                        pltpu.VMEM((S, B, Hm), jnp.float32)],
    )(feat, lstm["w_ih"], lstm["b_ih"], lstm["w_hh"], lstm["b_hh"],
      params["head_w1"], params["head_b1"], params["head_w2"], params["head_b2"])

    logits = logits_pad[:, :num_actions].reshape(B, S, num_actions)
    return logits, None, None


# ----------------------------------------------------------------------------
# Demo
# ----------------------------------------------------------------------------

if __name__ == "__main__":
    key = jax.random.PRNGKey(0)
    k_params, k_img, k_txt = jax.random.split(key, 3)

    B, S, C_IN, HW, L, NUM_ACTIONS = 2, 4, 3, 8, 8, 7

    params = init_params(k_params, num_actions=NUM_ACTIONS)
    image = jax.random.uniform(k_img, (B, S, C_IN, HW, HW), jnp.float32, 0.0, 1.0)
    mission = jax.random.randint(k_txt, (B, L), 1, 40, jnp.int32)  # nonzero tokens

    fwd = jax.jit(functools.partial(babyai_forward, num_actions=NUM_ACTIONS))
    logits, _, _ = fwd(params, image, mission)
    logits = jax.block_until_ready(logits)

    assert logits.shape == (B, S, NUM_ACTIONS)
    assert bool(jnp.all(jnp.isfinite(logits)))
    print("KERNEL_OK")
</pallas_src>

<mosaic_0001>
module attributes {stable_mosaic.version = 11 : i64} {
  func.func @kernel(%arg0: memref<648x16xf32, #tpu.memory_space<vmem>>, %arg1: memref<16x128xbf16, #tpu.memory_space<vmem>>, %arg2: memref<1x128xf32, #tpu.memory_space<vmem>>, %arg3: memref<1152x128xbf16, #tpu.memory_space<vmem>>, %arg4: memref<1x128xf32, #tpu.memory_space<vmem>>, %arg5: memref<1152x128xbf16, #tpu.memory_space<vmem>>, %arg6: memref<1x128xf32, #tpu.memory_space<vmem>>, %arg7: memref<1152x128xbf16, #tpu.memory_space<vmem>>, %arg8: memref<1x128xf32, #tpu.memory_space<vmem>>, %arg9: memref<1152x128xbf16, #tpu.memory_space<vmem>>, %arg10: memref<1x128xf32, #tpu.memory_space<vmem>>, %arg11: memref<1152x128xbf16, #tpu.memory_space<vmem>>, %arg12: memref<1x128xf32, #tpu.memory_space<vmem>>, %arg13: memref<2x128xf32, #tpu.memory_space<vmem>>, %arg14: memref<128x512xbf16, #tpu.memory_space<vmem>>, %arg15: memref<1x512xf32, #tpu.memory_space<vmem>>, %arg16: memref<8x128xf32, #tpu.memory_space<vmem>>) attributes {dimension_semantics = [], scalar_prefetch = 0 : i64, scratch_operands = 0 : i64, tpu.core_type = #tpu.core_type<tc>} {
    %c0 = arith.constant 0 : index
    %c0_0 = arith.constant 0 : index
    %0 = vector.load %arg0[%c0, %c0_0] : memref<648x16xf32, #tpu.memory_space<vmem>>, vector<648x16xf32>
    %1 = arith.truncf %0 : vector<648x16xf32> to vector<648x16xbf16>
    %c0_1 = arith.constant 0 : index
    %c0_2 = arith.constant 0 : index
    %2 = vector.load %arg1[%c0_1, %c0_2] : memref<16x128xbf16, #tpu.memory_space<vmem>>, vector<16x128xbf16>
    %cst = arith.constant dense<0.000000e+00> : vector<648x128xf32>
    %3 = tpu.matmul %1, %2, %cst {dimension_numbers = #tpu.dot_dimension_numbers<[1], [0], [0], [1], [0, 0, 1, 1], [], []>} : vector<648x16xbf16>, vector<16x128xbf16>, vector<648x128xf32> -> vector<648x128xf32>
    %c0_3 = arith.constant 0 : index
    %c0_4 = arith.constant 0 : index
    %4 = vector.load %arg2[%c0_3, %c0_4] : memref<1x128xf32, #tpu.memory_space<vmem>>, vector<1x128xf32>
    %5 = vector.broadcast %4 : vector<1x128xf32> to vector<648x128xf32>
    %6 = arith.addf %3, %5 : vector<648x128xf32>
    %cst_5 = arith.constant dense<0.000000e+00> : vector<128xf32>
    %7 = vector.multi_reduction <add>, %6, %cst_5 [0] : vector<648x128xf32> to vector<128xf32>
    %8 = vector.shape_cast %7 : vector<128xf32> to vector<1x128xf32>
    %cst_6 = arith.constant 6.480000e+02 : f32
    %9 = vector.broadcast %cst_6 : f32 to vector<1x128xf32>
    %10 = arith.divf %8, %9 : vector<1x128xf32>
    %11 = vector.broadcast %10 : vector<1x128xf32> to vector<648x128xf32>
    %12 = arith.subf %6, %11 : vector<648x128xf32>
    %13 = arith.mulf %12, %12 : vector<648x128xf32>
    %cst_7 = arith.constant dense<0.000000e+00> : vector<128xf32>
    %14 = vector.multi_reduction <add>, %13, %cst_7 [0] : vector<648x128xf32> to vector<128xf32>
    %15 = vector.shape_cast %14 : vector<128xf32> to vector<1x128xf32>
    %cst_8 = arith.constant 6.480000e+02 : f32
    %16 = vector.broadcast %cst_8 : f32 to vector<1x128xf32>
    %17 = arith.divf %15, %16 : vector<1x128xf32>
    %cst_9 = arith.constant 9.99999974E-6 : f32
    %18 = vector.broadcast %cst_9 : f32 to vector<1x128xf32>
    %19 = arith.addf %17, %18 : vector<1x128xf32>
    %20 = math.rsqrt %19 : vector<1x128xf32>
    %21 = vector.extract_strided_slice %6 {offsets = [0, 0], sizes = [8, 128], strides = [1, 1]} : vector<648x128xf32> to vector<8x128xf32>
    %22 = vector.extract_strided_slice %6 {offsets = [8, 0], sizes = [8, 128], strides = [1, 1]} : vector<648x128xf32> to vector<8x128xf32>
    %23 = arith.maximumf %21, %22 : vector<8x128xf32>
    %24 = vector.extract_strided_slice %6 {offsets = [72, 0], sizes = [8, 128], strides = [1, 1]} : vector<648x128xf32> to vector<8x128xf32>
    %25 = arith.maximumf %23, %24 : vector<8x128xf32>
    %26 = vector.extract_strided_slice %6 {offsets = [80, 0], sizes = [8, 128], strides = [1, 1]} : vector<648x128xf32> to vector<8x128xf32>
    %27 = arith.maximumf %25, %26 : vector<8x128xf32>
    %28 = vector.extract_strided_slice %6 {offsets = [16, 0], sizes = [8, 128], strides = [1, 1]} : vector<648x128xf32> to vector<8x128xf32>
    %29 = vector.extract_strided_slice %6 {offsets = [24, 0], sizes = [8, 128], strides = [1, 1]} : vector<648x128xf32> to vector<8x128xf32>
    %30 = arith.maximumf %28, %29 : vector<8x128xf32>
    %31 = vector.extract_strided_slice %6 {offsets = [88, 0], sizes = [8, 128], strides = [1, 1]} : vector<648x128xf32> to vector<8x128xf32>
    %32 = arith.maximumf %30, %31 : vector<8x128xf32>
    %33 = vector.extract_strided_slice %6 {offsets = [96, 0], sizes = [8, 128], strides = [1, 1]} : vector<648x128xf32> to vector<8x128xf32>
    %34 = arith.maximumf %32, %33 : vector<8x128xf32>
    %35 = vector.extract_strided_slice %6 {offsets = [32, 0], sizes = [8, 128], strides = [1, 1]} : vector<648x128xf32> to vector<8x128xf32>
    %36 = vector.extract_strided_slice %6 {offsets = [40, 0], sizes = [8, 128], strides = [1, 1]} : vector<648x128xf32> to vector<8x128xf32>
    %37 = arith.maximumf %35, %36 : vector<8x128xf32>
    %38 = vector.extract_strided_slice %6 {offsets = [104, 0], sizes = [8, 128], strides = [1, 1]} : vector<648x128xf32> to vector<8x128xf32>
    %39 = arith.maximumf %37, %38 : vector<8x128xf32>
    %40 = vector.extract_strided_slice %6 {offsets = [112, 0], sizes = [8, 128], strides = [1, 1]} : vector<648x128xf32> to vector<8x128xf32>
    %41 = arith.maximumf %39, %40 : vector<8x128xf32>
    %42 = vector.extract_strided_slice %6 {offsets = [48, 0], sizes = [8, 128], strides = [1, 1]} : vector<648x128xf32> to vector<8x128xf32>
    %43 = vector.extract_strided_slice %6 {offsets = [56, 0], sizes = [8, 128], strides = [1, 1]} : vector<648x128xf32> to vector<8x128xf32>
    %44 = arith.maximumf %42, %43 : vector<8x128xf32>
    %45 = vector.extract_strided_slice %6 {offsets = [120, 0], sizes = [8, 128], strides = [1, 1]} : vector<648x128xf32> to vector<8x128xf32>
    %46 = arith.maximumf %44, %45 : vector<8x128xf32>
    %47 = vector.extract_strided_slice %6 {offsets = [128, 0], sizes = [8, 128], strides = [1, 1]} : vector<648x128xf32> to vector<8x128xf32>
    %48 = arith.maximumf %46, %47 : vector<8x128xf32>
    %49 = vector.extract_strided_slice %6 {offsets = [144, 0], sizes = [8, 128], strides = [1, 1]} : vector<648x128xf32> to vector<8x128xf32>
    %50 = vector.extract_strided_slice %6 {offsets = [152, 0], sizes = [8, 128], strides = [1, 1]} : vector<648x128xf32> to vector<8x128xf32>
    %51 = arith.maximumf %49, %50 : vector<8x128xf32>
    %52 = vector.extract_strided_slice %6 {offsets = [216, 0], sizes = [8, 128], strides = [1, 1]} : vector<648x128xf32> to vector<8x128xf32>
    %53 = arith.maximumf %51, %52 : vector<8x128xf32>
    %54 = vector.extract_strided_slice %6 {offsets = [224, 0], sizes = [8, 128], strides = [1, 1]} : vector<648x128xf32> to vector<8x128xf32>
    %55 = arith.maximumf %53, %54 : vector<8x128xf32>
    %56 = vector.extract_strided_slice %6 {offsets = [160, 0], sizes = [8, 128], strides = [1, 1]} : vector<648x128xf32> to vector<8x128xf32>
    %57 = vector.extract_strided_slice %6 {offsets = [168, 0], sizes = [8, 128], strides = [1, 1]} : vector<648x128xf32> to vector<8x128xf32>
    %58 = arith.maximumf %56, %57 : vector<8x128xf32>
    %59 = vector.extract_strided_slice %6 {offsets = [232, 0], sizes = [8, 128], strides = [1, 1]} : vector<648x128xf32> to vector<8x128xf32>
    %60 = arith.maximumf %58, %59 : vector<8x128xf32>
    %61 = vector.extract_strided_slice %6 {offsets = [240, 0], sizes = [8, 128], strides = [1, 1]} : vector<648x128xf32> to vector<8x128xf32>
    %62 = arith.maximumf %60, %61 : vector<8x128xf32>
    %63 = vector.extract_strided_slice %6 {offsets = [176, 0], sizes = [8, 128], strides = [1, 1]} : vector<648x128xf32> to vector<8x128xf32>
    %64 = vector.extract_strided_slice %6 {offsets = [184, 0], sizes = [8, 128], strides = [1, 1]} : vector<648x128xf32> to vector<8x128xf32>
    %65 = arith.maximumf %63, %64 : vector<8x128xf32>
    %66 = vector.extract_strided_slice %6 {offsets = [248, 0], sizes = [8, 128], strides = [1, 1]} : vector<648x128xf32> to vector<8x128xf32>
    %67 = arith.maximumf %65, %66 : vector<8x128xf32>
    %68 = vector.extract_strided_slice %6 {offsets = [256, 0], sizes = [8, 128], strides = [1, 1]} : vector<648x128xf32> to vector<8x128xf32>
    %69 = arith.maximumf %67, %68 : vector<8x128xf32>
    %70 = vector.extract_strided_slice %6 {offsets = [192, 0], sizes = [8, 128], strides = [1, 1]} : vector<648x128xf32> to vector<8x128xf32>
    %71 = vector.extract_strided_slice %6 {offsets = [200, 0], sizes = [8, 128], strides = [1, 1]} : vector<648x128xf32> to vector<8x128xf32>
    %72 = arith.maximumf %70, %71 : vector<8x128xf32>
    %73 = vector.extract_strided_slice %6 {offsets = [264, 0], sizes = [8, 128], strides = [1, 1]} : vector<648x128xf32> to vector<8x128xf32>
    %74 = arith.maximumf %72, %73 : vector<8x128xf32>
    %75 = vector.extract_strided_slice %6 {offsets = [272, 0], sizes = [8, 128], strides = [1, 1]} : vector<648x128xf32> to vector<8x128xf32>
    %76 = arith.maximumf %74, %75 : vector<8x128xf32>
    %77 = vector.extract_strided_slice %6 {offsets = [288, 0], sizes = [8, 128], strides = [1, 1]} : vector<648x128xf32> to vector<8x128xf32>
    %78 = vector.extract_strided_slice %6 {offsets = [296, 0], sizes = [8, 128], strides = [1, 1]} : vector<648x128xf32> to vector<8x128xf32>
    %79 = arith.maximumf %77, %78 : vector<8x128xf32>
    %80 = vector.extract_strided_slice %6 {offsets = [360, 0], sizes = [8, 128], strides = [1, 1]} : vector<648x128xf32> to vector<8x128xf32>
    %81 = arith.maximumf %79, %80 : vector<8x128xf32>
    %82 = vector.extract_strided_slice %6 {offsets = [368, 0], sizes = [8, 128], strides = [1, 1]} : vector<648x128xf32> to vector<8x128xf32>
    %83 = arith.maximumf %81, %82 : vector<8x128xf32>
    %84 = vector.extract_strided_slice %6 {offsets = [304, 0], sizes = [8, 128], strides = [1, 1]} : vector<648x128xf32> to vector<8x128xf32>
    %85 = vector.extract_strided_slice %6 {offsets = [312, 0], sizes = [8, 128], strides = [1, 1]} : vector<648x128xf32> to vector<8x128xf32>
    %86 = arith.maximumf %84, %85 : vector<8x128xf32>
    %87 = vector.extract_strided_slice %6 {offsets = [376, 0], sizes = [8, 128], strides = [1, 1]} : vector<648x128xf32> to vector<8x128xf32>
    %88 = arith.maximumf %86, %87 : vector<8x128xf32>
    %89 = vector.extract_strided_slice %6 {offsets = [384, 0], sizes = [8, 128], strides = [1, 1]} : vector<648x128xf32> to vector<8x128xf32>
    %90 = arith.maximumf %88, %89 : vector<8x128xf32>
    %91 = vector.extract_strided_slice %6 {offsets = [320, 0], sizes = [8, 128], strides = [1, 1]} : vector<648x128xf32> to vector<8x128xf32>
    %92 = vector.extract_strided_slice %6 {offsets = [328, 0], sizes = [8, 128], strides = [1, 1]} : vector<648x128xf32> to vector<8x128xf32>
    %93 = arith.maximumf %91, %92 : vector<8x128xf32>
    %94 = vector.extract_strided_slice %6 {offsets = [392, 0], sizes = [8, 128], strides = [1, 1]} : vector<648x128xf32> to vector<8x128xf32>
    %95 = arith.maximumf %93, %94 : vector<8x128xf32>
    %96 = vector.extract_strided_slice %6 {offsets = [400, 0], sizes = [8, 128], strides = [1, 1]} : vector<648x128xf32> to vector<8x128xf32>
    %97 = arith.maximumf %95, %96 : vector<8x128xf32>
    %98 = vector.extract_strided_slice %6 {offsets = [336, 0], sizes = [8, 128], strides = [1, 1]} : vector<648x128xf32> to vector<8x128xf32>
    %99 = vector.extract_strided_slice %6 {offsets = [344, 0], sizes = [8, 128], strides = [1, 1]} : vector<648x128xf32> to vector<8x128xf32>
    %100 = arith.maximumf %98, %99 : vector<8x128xf32>
    %101 = vector.extract_strided_slice %6 {offsets = [408, 0], sizes = [8, 128], strides = [1, 1]} : vector<648x128xf32> to vector<8x128xf32>
    %102 = arith.maximumf %100, %101 : vector<8x128xf32>
    %103 = vector.extract_strided_slice %6 {offsets = [416, 0], sizes = [8, 128], strides = [1, 1]} : vector<648x128xf32> to vector<8x128xf32>
    %104 = arith.maximumf %102, %103 : vector<8x128xf32>
    %105 = vector.extract_strided_slice %6 {offsets = [432, 0], sizes = [8, 128], strides = [1, 1]} : vector<648x128xf32> to vector<8x128xf32>
    %106 = vector.extract_strided_slice %6 {offsets = [440, 0], sizes = [8, 128], strides = [1, 1]} : vector<648x128xf32> to vector<8x128xf32>
    %107 = arith.maximumf %105, %106 : vector<8x128xf32>
    %108 = vector.extract_strided_slice %6 {offsets = [504, 0], sizes = [8, 128], strides = [1, 1]} : vector<648x128xf32> to vector<8x128xf32>
    %109 = arith.maximumf %107, %108 : vector<8x128xf32>
    %110 = vector.extract_strided_slice %6 {offsets = [512, 0], sizes = [8, 128], strides = [1, 1]} : vector<648x128xf32> to vector<8x128xf32>
    %111 = arith.maximumf %109, %110 : vector<8x128xf32>
    %112 = vector.extract_strided_slice %6 {offsets = [448, 0], sizes = [8, 128], strides = [1, 1]} : vector<648x128xf32> to vector<8x128xf32>
    %113 = vector.extract_strided_slice %6 {offsets = [456, 0], sizes = [8, 128], strides = [1, 1]} : vector<648x128xf32> to vector<8x128xf32>
    %114 = arith.maximumf %112, %113 : vector<8x128xf32>
    %115 = vector.extract_strided_slice %6 {offsets = [520, 0], sizes = [8, 128], strides = [1, 1]} : vector<648x128xf32> to vector<8x128xf32>
    %116 = arith.maximumf %114, %115 : vector<8x128xf32>
    %117 = vector.extract_strided_slice %6 {offsets = [528, 0], sizes = [8, 128], strides = [1, 1]} : vector<648x128xf32> to vector<8x128xf32>
    %118 = arith.maximumf %116, %117 : vector<8x128xf32>
    %119 = vector.extract_strided_slice %6 {offsets = [464, 0], sizes = [8, 128], strides = [1, 1]} : vector<648x128xf32> to vector<8x128xf32>
    %120 = vector.extract_strided_slice %6 {offsets = [472, 0], sizes = [8, 128], strides = [1, 1]} : vector<648x128xf32> to vector<8x128xf32>
    %121 = arith.maximumf %119, %120 : vector<8x128xf32>
    %122 = vector.extract_strided_slice %6 {offsets = [536, 0], sizes = [8, 128], strides = [1, 1]} : vector<648x128xf32> to vector<8x128xf32>
    %123 = arith.maximumf %121, %122 : vector<8x128xf32>
    %124 = vector.extract_strided_slice %6 {offsets = [544, 0], sizes = [8, 128], strides = [1, 1]} : vector<648x128xf32> to vector<8x128xf32>
    %125 = arith.maximumf %123, %124 : vector<8x128xf32>
    %126 = vector.extract_strided_slice %6 {offsets = [480, 0], sizes = [8, 128], strides = [1, 1]} : vector<648x128xf32> to vector<8x128xf32>
    %127 = vector.extract_strided_slice %6 {offsets = [488, 0], sizes = [8, 128], strides = [1, 1]} : vector<648x128xf32> to vector<8x128xf32>
    %128 = arith.maximumf %126, %127 : vector<8x128xf32>
    %129 = vector.extract_strided_slice %6 {offsets = [552, 0], sizes = [8, 128], strides = [1, 1]} : vector<648x128xf32> to vector<8x128xf32>
    %130 = arith.maximumf %128, %129 : vector<8x128xf32>
    %131 = vector.extract_strided_slice %6 {offsets = [560, 0], sizes = [8, 128], strides = [1, 1]} : vector<648x128xf32> to vector<8x128xf32>
    %132 = arith.maximumf %130, %131 : vector<8x128xf32>
    %133 = tpu.concatenate %27, %34, %41, %48, %55, %62, %69, %76, %83, %90, %97, %104, %111, %118, %125, %132 in 0 : vector<8x128xf32>, vector<8x128xf32>, vector<8x128xf32>, vector<8x128xf32>, vector<8x128xf32>, vector<8x128xf32>, vector<8x128xf32>, vector<8x128xf32>, vector<8x128xf32>, vector<8x128xf32>, vector<8x128xf32>, vector<8x128xf32>, vector<8x128xf32>, vector<8x128xf32>, vector<8x128xf32>, vector<8x128xf32> -> vector<128x128xf32>
    %134 = vector.broadcast %10 : vector<1x128xf32> to vector<128x128xf32>
    %135 = arith.subf %133, %134 : vector<128x128xf32>
    %136 = vector.broadcast %20 : vector<1x128xf32> to vector<128x128xf32>
    %137 = arith.mulf %135, %136 : vector<128x128xf32>
    %cst_10 = arith.constant 0.000000e+00 : f32
    %138 = vector.broadcast %cst_10 : f32 to vector<128x128xf32>
    %139 = arith.maximumf %137, %138 : vector<128x128xf32>
    %cst_11 = arith.constant 0.000000e+00 : f32
    %140 = vector.broadcast %cst_11 : f32 to vector<32x128xf32>
    %cst_12 = arith.constant 0.000000e+00 : f32
    %141 = vector.broadcast %cst_12 : f32 to vector<8x128xf32>
    %142 = vector.extract_strided_slice %139 {offsets = [0, 0], sizes = [24, 128], strides = [1, 1]} : vector<128x128xf32> to vector<24x128xf32>
    %cst_13 = arith.constant 0.000000e+00 : f32
    %143 = vector.broadcast %cst_13 : f32 to vector<8x128xf32>
    %144 = vector.extract_strided_slice %139 {offsets = [32, 0], sizes = [24, 128], strides = [1, 1]} : vector<128x128xf32> to vector<24x128xf32>
    %cst_14 = arith.constant 0.000000e+00 : f32
    %145 = vector.broadcast %cst_14 : f32 to vector<8x128xf32>
    %146 = vector.extract_strided_slice %139 {offsets = [64, 0], sizes = [24, 128], strides = [1, 1]} : vector<128x128xf32> to vector<24x128xf32>
    %147 = tpu.concatenate %140, %141, %142, %143, %144, %145, %146 in 0 : vector<32x128xf32>, vector<8x128xf32>, vector<24x128xf32>, vector<8x128xf32>, vector<24x128xf32>, vector<8x128xf32>, vector<24x128xf32> -> vector<128x128xf32>
    %cst_15 = arith.constant 0.000000e+00 : f32
    %148 = vector.broadcast %cst_15 : f32 to vector<32x128xf32>
    %149 = vector.extract_strided_slice %139 {offsets = [0, 0], sizes = [32, 128], strides = [1, 1]} : vector<128x128xf32> to vector<32x128xf32>
    %150 = vector.extract_strided_slice %139 {offsets = [32, 0], sizes = [32, 128], strides = [1, 1]} : vector<128x128xf32> to vector<32x128xf32>
    %151 = vector.extract_strided_slice %139 {offsets = [64, 0], sizes = [32, 128], strides = [1, 1]} : vector<128x128xf32> to vector<32x128xf32>
    %152 = tpu.concatenate %148, %149, %150, %151 in 0 : vector<32x128xf32>, vector<32x128xf32>, vector<32x128xf32>, vector<32x128xf32> -> vector<128x128xf32>
    %cst_16 = arith.constant 0.000000e+00 : f32
    %153 = vector.broadcast %cst_16 : f32 to vector<32x128xf32>
    %154 = vector.extract_strided_slice %139 {offsets = [8, 0], sizes = [24, 128], strides = [1, 1]} : vector<128x128xf32> to vector<24x128xf32>
    %cst_17 = arith.constant 0.000000e+00 : f32
    %155 = vector.broadcast %cst_17 : f32 to vector<8x128xf32>
    %156 = vector.extract_strided_slice %139 {offsets = [40, 0], sizes = [24, 128], strides = [1, 1]} : vector<128x128xf32> to vector<24x128xf32>
    %cst_18 = arith.constant 0.000000e+00 : f32
    %157 = vector.broadcast %cst_18 : f32 to vector<8x128xf32>
    %158 = vector.extract_strided_slice %139 {offsets = [72, 0], sizes = [24, 128], strides = [1, 1]} : vector<128x128xf32> to vector<24x128xf32>
    %cst_19 = arith.constant 0.000000e+00 : f32
    %159 = vector.broadcast %cst_19 : f32 to vector<8x128xf32>
    %160 = tpu.concatenate %153, %154, %155, %156, %157, %158, %159 in 0 : vector<32x128xf32>, vector<24x128xf32>, vector<8x128xf32>, vector<24x128xf32>, vector<8x128xf32>, vector<24x128xf32>, vector<8x128xf32> -> vector<128x128xf32>
    %cst_20 = arith.constant 0.000000e+00 : f32
    %161 = vector.broadcast %cst_20 : f32 to vector<8x128xf32>
    %162 = vector.extract_strided_slice %139 {offsets = [0, 0], sizes = [24, 128], strides = [1, 1]} : vector<128x128xf32> to vector<24x128xf32>
    %cst_21 = arith.constant 0.000000e+00 : f32
    %163 = vector.broadcast %cst_21 : f32 to vector<8x128xf32>
    %164 = vector.extract_strided_slice %139 {offsets = [32, 0], sizes = [24, 128], strides = [1, 1]} : vector<128x128xf32> to vector<24x128xf32>
    %cst_22 = arith.constant 0.000000e+00 : f32
    %165 = vector.broadcast %cst_22 : f32 to vector<8x128xf32>
    %166 = vector.extract_strided_slice %139 {offsets = [64, 0], sizes = [24, 128], strides = [1, 1]} : vector<128x128xf32> to vector<24x128xf32>
    %cst_23 = arith.constant 0.000000e+00 : f32
    %167 = vector.broadcast %cst_23 : f32 to vector<8x128xf32>
    %168 = vector.extract_strided_slice %139 {offsets = [96, 0], sizes = [24, 128], strides = [1, 1]} : vector<128x128xf32> to vector<24x128xf32>
    %169 = tpu.concatenate %161, %162, %163, %164, %165, %166, %167, %168 in 0 : vector<8x128xf32>, vector<24x128xf32>, vector<8x128xf32>, vector<24x128xf32>, vector<8x128xf32>, vector<24x128xf32>, vector<8x128xf32>, vector<24x128xf32> -> vector<128x128xf32>
    %170 = vector.extract_strided_slice %139 {offsets = [0, 0], sizes = [32, 128], strides = [1, 1]} : vector<128x128xf32> to vector<32x128xf32>
    %171 = vector.extract_strided_slice %139 {offsets = [32, 0], sizes = [32, 128], strides = [1, 1]} : vector<128x128xf32> to vector<32x128xf32>
    %172 = vector.extract_strided_slice %139 {offsets = [64, 0], sizes = [32, 128], strides = [1, 1]} : vector<128x128xf32> to vector<32x128xf32>
    %173 = vector.extract_strided_slice %139 {offsets = [96, 0], sizes = [32, 128], strides = [1, 1]} : vector<128x128xf32> to vector<32x128xf32>
    %174 = tpu.concatenate %170, %171, %172, %173 in 0 : vector<32x128xf32>, vector<32x128xf32>, vector<32x128xf32>, vector<32x128xf32> -> vector<128x128xf32>
    %175 = vector.extract_strided_slice %139 {offsets = [8, 0], sizes = [24, 128], strides = [1, 1]} : vector<128x128xf32> to vector<24x128xf32>
    %cst_24 = arith.constant 0.000000e+00 : f32
    %176 = vector.broadcast %cst_24 : f32 to vector<8x128xf32>
    %177 = vector.extract_strided_slice %139 {offsets = [40, 0], sizes = [24, 128], strides = [1, 1]} : vector<128x128xf32> to vector<24x128xf32>
    %cst_25 = arith.constant 0.000000e+00 : f32
    %178 = vector.broadcast %cst_25 : f32 to vector<8x128xf32>
    %179 = vector.extract_strided_slice %139 {offsets = [72, 0], sizes = [24, 128], strides = [1, 1]} : vector<128x128xf32> to vector<24x128xf32>
    %cst_26 = arith.constant 0.000000e+00 : f32
    %180 = vector.broadcast %cst_26 : f32 to vector<8x128xf32>
    %181 = vector.extract_strided_slice %139 {offsets = [104, 0], sizes = [24, 128], strides = [1, 1]} : vector<128x128xf32> to vector<24x128xf32>
    %cst_27 = arith.constant 0.000000e+00 : f32
    %182 = vector.broadcast %cst_27 : f32 to vector<8x128xf32>
    %183 = tpu.concatenate %175, %176, %177, %178, %179, %180, %181, %182 in 0 : vector<24x128xf32>, vector<8x128xf32>, vector<24x128xf32>, vector<8x128xf32>, vector<24x128xf32>, vector<8x128xf32>, vector<24x128xf32>, vector<8x128xf32> -> vector<128x128xf32>
    %cst_28 = arith.constant 0.000000e+00 : f32
    %184 = vector.broadcast %cst_28 : f32 to vector<8x128xf32>
    %185 = vector.extract_strided_slice %139 {offsets = [32, 0], sizes = [24, 128], strides = [1, 1]} : vector<128x128xf32> to vector<24x128xf32>
    %cst_29 = arith.constant 0.000000e+00 : f32
    %186 = vector.broadcast %cst_29 : f32 to vector<8x128xf32>
    %187 = vector.extract_strided_slice %139 {offsets = [64, 0], sizes = [24, 128], strides = [1, 1]} : vector<128x128xf32> to vector<24x128xf32>
    %cst_30 = arith.constant 0.000000e+00 : f32
    %188 = vector.broadcast %cst_30 : f32 to vector<8x128xf32>
    %189 = vector.extract_strided_slice %139 {offsets = [96, 0], sizes = [24, 128], strides = [1, 1]} : vector<128x128xf32> to vector<24x128xf32>
    %cst_31 = arith.constant 0.000000e+00 : f32
    %190 = vector.broadcast %cst_31 : f32 to vector<32x128xf32>
    %191 = tpu.concatenate %184, %185, %186, %187, %188, %189, %190 in 0 : vector<8x128xf32>, vector<24x128xf32>, vector<8x128xf32>, vector<24x128xf32>, vector<8x128xf32>, vector<24x128xf32>, vector<32x128xf32> -> vector<128x128xf32>
    %192 = vector.extract_strided_slice %139 {offsets = [32, 0], sizes = [32, 128], strides = [1, 1]} : vector<128x128xf32> to vector<32x128xf32>
    %193 = vector.extract_strided_slice %139 {offsets = [64, 0], sizes = [32, 128], strides = [1, 1]} : vector<128x128xf32> to vector<32x128xf32>
    %194 = vector.extract_strided_slice %139 {offsets = [96, 0], sizes = [32, 128], strides = [1, 1]} : vector<128x128xf32> to vector<32x128xf32>
    %cst_32 = arith.constant 0.000000e+00 : f32
    %195 = vector.broadcast %cst_32 : f32 to vector<32x128xf32>
    %196 = tpu.concatenate %192, %193, %194, %195 in 0 : vector<32x128xf32>, vector<32x128xf32>, vector<32x128xf32>, vector<32x128xf32> -> vector<128x128xf32>
    %197 = vector.extract_strided_slice %139 {offsets = [40, 0], sizes = [24, 128], strides = [1, 1]} : vector<128x128xf32> to vector<24x128xf32>
    %cst_33 = arith.constant 0.000000e+00 : f32
    %198 = vector.broadcast %cst_33 : f32 to vector<8x128xf32>
    %199 = vector.extract_strided_slice %139 {offsets = [72, 0], sizes = [24, 128], strides = [1, 1]} : vector<128x128xf32> to vector<24x128xf32>
    %cst_34 = arith.constant 0.000000e+00 : f32
    %200 = vector.broadcast %cst_34 : f32 to vector<8x128xf32>
    %201 = vector.extract_strided_slice %139 {offsets = [104, 0], sizes = [24, 128], strides = [1, 1]} : vector<128x128xf32> to vector<24x128xf32>
    %cst_35 = arith.constant 0.000000e+00 : f32
    %202 = vector.broadcast %cst_35 : f32 to vector<8x128xf32>
    %cst_36 = arith.constant 0.000000e+00 : f32
    %203 = vector.broadcast %cst_36 : f32 to vector<32x128xf32>
    %204 = tpu.concatenate %197, %198, %199, %200, %201, %202, %203 in 0 : vector<24x128xf32>, vector<8x128xf32>, vector<24x128xf32>, vector<8x128xf32>, vector<24x128xf32>, vector<8x128xf32>, vector<32x128xf32> -> vector<128x128xf32>
    %205 = tpu.concatenate %147, %152, %160, %169, %174, %183, %191, %196, %204 in 1 : vector<128x128xf32>, vector<128x128xf32>, vector<128x128xf32>, vector<128x128xf32>, vector<128x128xf32>, vector<128x128xf32>, vector<128x128xf32>, vector<128x128xf32>, vector<128x128xf32> -> vector<128x1152xf32>
    %206 = arith.truncf %205 : vector<128x1152xf32> to vector<128x1152xbf16>
    %c0_37 = arith.constant 0 : index
    %c0_38 = arith.constant 0 : index
    %207 = vector.load %arg3[%c0_37, %c0_38] : memref<1152x128xbf16, #tpu.memory_space<vmem>>, vector<1152x128xbf16>
    %cst_39 = arith.constant dense<0.000000e+00> : vector<128x128xf32>
    %208 = tpu.matmul %206, %207, %cst_39 {dimension_numbers = #tpu.dot_dimension_numbers<[1], [0], [0], [1], [0, 0, 1, 1], [], []>} : vector<128x1152xbf16>, vector<1152x128xbf16>, vector<128x128xf32> -> vector<128x128xf32>
    %c0_40 = arith.constant 0 : index
    %c0_41 = arith.constant 0 : index
    %209 = vector.load %arg4[%c0_40, %c0_41] : memref<1x128xf32, #tpu.memory_space<vmem>>, vector<1x128xf32>
    %210 = vector.broadcast %209 : vector<1x128xf32> to vector<128x128xf32>
    %211 = arith.addf %208, %210 : vector<128x128xf32>
    %cst_42 = arith.constant dense<0.000000e+00> : vector<128xf32>
    %212 = vector.multi_reduction <add>, %211, %cst_42 [0] : vector<128x128xf32> to vector<128xf32>
    %213 = vector.shape_cast %212 : vector<128xf32> to vector<1x128xf32>
    %cst_43 = arith.constant 1.280000e+02 : f32
    %214 = vector.broadcast %cst_43 : f32 to vector<1x128xf32>
    %215 = arith.divf %213, %214 : vector<1x128xf32>
    %216 = vector.broadcast %215 : vector<1x128xf32> to vector<128x128xf32>
    %217 = arith.subf %211, %216 : vector<128x128xf32>
    %218 = arith.mulf %217, %217 : vector<128x128xf32>
    %cst_44 = arith.constant dense<0.000000e+00> : vector<128xf32>
    %219 = vector.multi_reduction <add>, %218, %cst_44 [0] : vector<128x128xf32> to vector<128xf32>
    %220 = vector.shape_cast %219 : vector<128xf32> to vector<1x128xf32>
    %cst_45 = arith.constant 1.280000e+02 : f32
    %221 = vector.broadcast %cst_45 : f32 to vector<1x128xf32>
    %222 = arith.divf %220, %221 : vector<1x128xf32>
    %cst_46 = arith.constant 9.99999974E-6 : f32
    %223 = vector.broadcast %cst_46 : f32 to vector<1x128xf32>
    %224 = arith.addf %222, %223 : vector<1x128xf32>
    %225 = math.rsqrt %224 : vector<1x128xf32>
    %226 = vector.extract_strided_slice %211 {offsets = [0, 0], sizes = [8, 128], strides = [1, 1]} : vector<128x128xf32> to vector<8x128xf32>
    %227 = vector.extract_strided_slice %211 {offsets = [8, 0], sizes = [8, 128], strides = [1, 1]} : vector<128x128xf32> to vector<8x128xf32>
    %228 = arith.maximumf %226, %227 : vector<8x128xf32>
    %229 = vector.extract_strided_slice %211 {offsets = [32, 0], sizes = [8, 128], strides = [1, 1]} : vector<128x128xf32> to vector<8x128xf32>
    %230 = arith.maximumf %228, %229 : vector<8x128xf32>
    %231 = vector.extract_strided_slice %211 {offsets = [40, 0], sizes = [8, 128], strides = [1, 1]} : vector<128x128xf32> to vector<8x128xf32>
    %232 = arith.maximumf %230, %231 : vector<8x128xf32>
    %233 = vector.extract_strided_slice %211 {offsets = [16, 0], sizes = [8, 128], strides = [1, 1]} : vector<128x128xf32> to vector<8x128xf32>
    %234 = vector.extract_strided_slice %211 {offsets = [24, 0], sizes = [8, 128], strides = [1, 1]} : vector<128x128xf32> to vector<8x128xf32>
    %235 = arith.maximumf %233, %234 : vector<8x128xf32>
    %236 = vector.extract_strided_slice %211 {offsets = [48, 0], sizes = [8, 128], strides = [1, 1]} : vector<128x128xf32> to vector<8x128xf32>
    %237 = arith.maximumf %235, %236 : vector<8x128xf32>
    %238 = vector.extract_strided_slice %211 {offsets = [56, 0], sizes = [8, 128], strides = [1, 1]} : vector<128x128xf32> to vector<8x128xf32>
    %239 = arith.maximumf %237, %238 : vector<8x128xf32>
    %240 = vector.extract_strided_slice %211 {offsets = [64, 0], sizes = [8, 128], strides = [1, 1]} : vector<128x128xf32> to vector<8x128xf32>
    %241 = vector.extract_strided_slice %211 {offsets = [72, 0], sizes = [8, 128], strides = [1, 1]} : vector<128x128xf32> to vector<8x128xf32>
    %242 = arith.maximumf %240, %241 : vector<8x128xf32>
    %243 = vector.extract_strided_slice %211 {offsets = [96, 0], sizes = [8, 128], strides = [1, 1]} : vector<128x128xf32> to vector<8x128xf32>
    %244 = arith.maximumf %242, %243 : vector<8x128xf32>
    %245 = vector.extract_strided_slice %211 {offsets = [104, 0], sizes = [8, 128], strides = [1, 1]} : vector<128x128xf32> to vector<8x128xf32>
    %246 = arith.maximumf %244, %245 : vector<8x128xf32>
    %247 = vector.extract_strided_slice %211 {offsets = [80, 0], sizes = [8, 128], strides = [1, 1]} : vector<128x128xf32> to vector<8x128xf32>
    %248 = vector.extract_strided_slice %211 {offsets = [88, 0], sizes = [8, 128], strides = [1, 1]} : vector<128x128xf32> to vector<8x128xf32>
    %249 = arith.maximumf %247, %248 : vector<8x128xf32>
    %250 = vector.extract_strided_slice %211 {offsets = [112, 0], sizes = [8, 128], strides = [1, 1]} : vector<128x128xf32> to vector<8x128xf32>
    %251 = arith.maximumf %249, %250 : vector<8x128xf32>
    %252 = vector.extract_strided_slice %211 {offsets = [120, 0], sizes = [8, 128], strides = [1, 1]} : vector<128x128xf32> to vector<8x128xf32>
    %253 = arith.maximumf %251, %252 : vector<8x128xf32>
    %254 = tpu.concatenate %232, %239, %246, %253 in 0 : vector<8x128xf32>, vector<8x128xf32>, vector<8x128xf32>, vector<8x128xf32> -> vector<32x128xf32>
    %255 = vector.broadcast %215 : vector<1x128xf32> to vector<32x128xf32>
    %256 = arith.subf %254, %255 : vector<32x128xf32>
    %257 = vector.broadcast %225 : vector<1x128xf32> to vector<32x128xf32>
    %258 = arith.mulf %256, %257 : vector<32x128xf32>
    %cst_47 = arith.constant 0.000000e+00 : f32
    %259 = vector.broadcast %cst_47 : f32 to vector<32x128xf32>
    %260 = arith.maximumf %258, %259 : vector<32x128xf32>
    %c0_48 = arith.constant 0 : index
    %c0_49 = arith.constant 0 : index
    %261 = vector.load %arg13[%c0_48, %c0_49] : memref<2x128xf32, #tpu.memory_space<vmem>>, vector<2x128xf32>
    %262 = arith.truncf %261 : vector<2x128xf32> to vector<2x128xbf16>
    %c0_50 = arith.constant 0 : index
    %c0_51 = arith.constant 0 : index
    %263 = vector.load %arg14[%c0_50, %c0_51] : memref<128x512xbf16, #tpu.memory_space<vmem>>, vector<128x512xbf16>
    %cst_52 = arith.constant dense<0.000000e+00> : vector<2x512xf32>
    %264 = tpu.matmul %262, %263, %cst_52 {dimension_numbers = #tpu.dot_dimension_numbers<[1], [0], [0], [1], [0, 0, 1, 1], [], []>} : vector<2x128xbf16>, vector<128x512xbf16>, vector<2x512xf32> -> vector<2x512xf32>
    %c0_53 = arith.constant 0 : index
    %c0_54 = arith.constant 0 : index
    %265 = vector.load %arg15[%c0_53, %c0_54] : memref<1x512xf32, #tpu.memory_space<vmem>>, vector<1x512xf32>
    %266 = vector.broadcast %265 : vector<1x512xf32> to vector<2x512xf32>
    %267 = arith.addf %264, %266 : vector<2x512xf32>
    %268 = vector.extract_strided_slice %267 {offsets = [0, 0], sizes = [1, 512], strides = [1, 1]} : vector<2x512xf32> to vector<1x512xf32>
    %269 = vector.extract_strided_slice %267 {offsets = [0, 0], sizes = [1, 512], strides = [1, 1]} : vector<2x512xf32> to vector<1x512xf32>
    %270 = vector.extract_strided_slice %267 {offsets = [0, 0], sizes = [1, 512], strides = [1, 1]} : vector<2x512xf32> to vector<1x512xf32>
    %271 = vector.extract_strided_slice %267 {offsets = [0, 0], sizes = [1, 512], strides = [1, 1]} : vector<2x512xf32> to vector<1x512xf32>
    %272 = vector.extract_strided_slice %267 {offsets = [1, 0], sizes = [1, 512], strides = [1, 1]} : vector<2x512xf32> to vector<1x512xf32>
    %273 = vector.extract_strided_slice %267 {offsets = [1, 0], sizes = [1, 512], strides = [1, 1]} : vector<2x512xf32> to vector<1x512xf32>
    %274 = vector.extract_strided_slice %267 {offsets = [1, 0], sizes = [1, 512], strides = [1, 1]} : vector<2x512xf32> to vector<1x512xf32>
    %275 = vector.extract_strided_slice %267 {offsets = [1, 0], sizes = [1, 512], strides = [1, 1]} : vector<2x512xf32> to vector<1x512xf32>
    %276 = tpu.concatenate %268, %269, %270, %271, %272, %273, %274, %275 in 0 : vector<1x512xf32>, vector<1x512xf32>, vector<1x512xf32>, vector<1x512xf32>, vector<1x512xf32>, vector<1x512xf32>, vector<1x512xf32>, vector<1x512xf32> -> vector<8x512xf32>
    %277 = vector.extract_strided_slice %276 {offsets = [0, 0], sizes = [8, 128], strides = [1, 1]} : vector<8x512xf32> to vector<8x128xf32>
    %278 = vector.extract_strided_slice %276 {offsets = [0, 128], sizes = [8, 128], strides = [1, 1]} : vector<8x512xf32> to vector<8x128xf32>
    %cst_55 = arith.constant 0.000000e+00 : f32
    %279 = vector.broadcast %cst_55 : f32 to vector<16x128xf32>
    %cst_56 = arith.constant 0.000000e+00 : f32
    %280 = vector.broadcast %cst_56 : f32 to vector<8x128xf32>
    %281 = vector.extract_strided_slice %260 {offsets = [0, 0], sizes = [8, 128], strides = [1, 1]} : vector<32x128xf32> to vector<8x128xf32>
    %282 = tpu.concatenate %279, %280, %281 in 0 : vector<16x128xf32>, vector<8x128xf32>, vector<8x128xf32> -> vector<32x128xf32>
    %cst_57 = arith.constant 0.000000e+00 : f32
    %283 = vector.broadcast %cst_57 : f32 to vector<16x128xf32>
    %284 = vector.extract_strided_slice %260 {offsets = [0, 0], sizes = [16, 128], strides = [1, 1]} : vector<32x128xf32> to vector<16x128xf32>
    %285 = tpu.concatenate %283, %284 in 0 : vector<16x128xf32>, vector<16x128xf32> -> vector<32x128xf32>
    %cst_58 = arith.constant 0.000000e+00 : f32
    %286 = vector.broadcast %cst_58 : f32 to vector<16x128xf32>
    %287 = vector.extract_strided_slice %260 {offsets = [8, 0], sizes = [8, 128], strides = [1, 1]} : vector<32x128xf32> to vector<8x128xf32>
    %cst_59 = arith.constant 0.000000e+00 : f32
    %288 = vector.broadcast %cst_59 : f32 to vector<8x128xf32>
    %289 = tpu.concatenate %286, %287, %288 in 0 : vector<16x128xf32>, vector<8x128xf32>, vector<8x128xf32> -> vector<32x128xf32>
    %cst_60 = arith.constant 0.000000e+00 : f32
    %290 = vector.broadcast %cst_60 : f32 to vector<8x128xf32>
    %291 = vector.extract_strided_slice %260 {offsets = [0, 0], sizes = [8, 128], strides = [1, 1]} : vector<32x128xf32> to vector<8x128xf32>
    %cst_61 = arith.constant 0.000000e+00 : f32
    %292 = vector.broadcast %cst_61 : f32 to vector<8x128xf32>
    %293 = vector.extract_strided_slice %260 {offsets = [16, 0], sizes = [8, 128], strides = [1, 1]} : vector<32x128xf32> to vector<8x128xf32>
    %294 = tpu.concatenate %290, %291, %292, %293 in 0 : vector<8x128xf32>, vector<8x128xf32>, vector<8x128xf32>, vector<8x128xf32> -> vector<32x128xf32>
    %295 = vector.extract_strided_slice %260 {offsets = [0, 0], sizes = [16, 128], strides = [1, 1]} : vector<32x128xf32> to vector<16x128xf32>
    %296 = vector.extract_strided_slice %260 {offsets = [16, 0], sizes = [16, 128], strides = [1, 1]} : vector<32x128xf32> to vector<16x128xf32>
    %297 = tpu.concatenate %295, %296 in 0 : vector<16x128xf32>, vector<16x128xf32> -> vector<32x128xf32>
    %298 = vector.extract_strided_slice %260 {offsets = [8, 0], sizes = [8, 128], strides = [1, 1]} : vector<32x128xf32> to vector<8x128xf32>
    %cst_62 = arith.constant 0.000000e+00 : f32
    %299 = vector.broadcast %cst_62 : f32 to vector<8x128xf32>
    %300 = vector.extract_strided_slice %260 {offsets = [24, 0], sizes = [8, 128], strides = [1, 1]} : vector<32x128xf32> to vector<8x128xf32>
    %cst_63 = arith.constant 0.000000e+00 : f32
    %301 = vector.broadcast %cst_63 : f32 to vector<8x128xf32>
    %302 = tpu.concatenate %298, %299, %300, %301 in 0 : vector<8x128xf32>, vector<8x128xf32>, vector<8x128xf32>, vector<8x128xf32> -> vector<32x128xf32>
    %cst_64 = arith.constant 0.000000e+00 : f32
    %303 = vector.broadcast %cst_64 : f32 to vector<8x128xf32>
    %304 = vector.extract_strided_slice %260 {offsets = [16, 0], sizes = [8, 128], strides = [1, 1]} : vector<32x128xf32> to vector<8x128xf32>
    %cst_65 = arith.constant 0.000000e+00 : f32
    %305 = vector.broadcast %cst_65 : f32 to vector<16x128xf32>
    %306 = tpu.concatenate %303, %304, %305 in 0 : vector<8x128xf32>, vector<8x128xf32>, vector<16x128xf32> -> vector<32x128xf32>
    %307 = vector.extract_strided_slice %260 {offsets = [16, 0], sizes = [16, 128], strides = [1, 1]} : vector<32x128xf32> to vector<16x128xf32>
    %cst_66 = arith.constant 0.000000e+00 : f32
    %308 = vector.broadcast %cst_66 : f32 to vector<16x128xf32>
    %309 = tpu.concatenate %307, %308 in 0 : vector<16x128xf32>, vector<16x128xf32> -> vector<32x128xf32>
    %310 = vector.extract_strided_slice %260 {offsets = [24, 0], sizes = [8, 128], strides = [1, 1]} : vector<32x128xf32> to vector<8x128xf32>
    %cst_67 = arith.constant 0.000000e+00 : f32
    %311 = vector.broadcast %cst_67 : f32 to vector<8x128xf32>
    %cst_68 = arith.constant 0.000000e+00 : f32
    %312 = vector.broadcast %cst_68 : f32 to vector<16x128xf32>
    %313 = tpu.concatenate %310, %311, %312 in 0 : vector<8x128xf32>, vector<8x128xf32>, vector<16x128xf32> -> vector<32x128xf32>
    %314 = tpu.concatenate %282, %285, %289, %294, %297, %302, %306, %309, %313 in 1 : vector<32x128xf32>, vector<32x128xf32>, vector<32x128xf32>, vector<32x128xf32>, vector<32x128xf32>, vector<32x128xf32>, vector<32x128xf32>, vector<32x128xf32>, vector<32x128xf32> -> vector<32x1152xf32>
    %315 = arith.truncf %314 : vector<32x1152xf32> to vector<32x1152xbf16>
    %c0_69 = arith.constant 0 : index
    %c0_70 = arith.constant 0 : index
    %316 = vector.load %arg5[%c0_69, %c0_70] : memref<1152x128xbf16, #tpu.memory_space<vmem>>, vector<1152x128xbf16>
    %cst_71 = arith.constant dense<0.000000e+00> : vector<32x128xf32>
    %317 = tpu.matmul %315, %316, %cst_71 {dimension_numbers = #tpu.dot_dimension_numbers<[1], [0], [0], [1], [0, 0, 1, 1], [], []>} : vector<32x1152xbf16>, vector<1152x128xbf16>, vector<32x128xf32> -> vector<32x128xf32>
    %c0_72 = arith.constant 0 : index
    %c0_73 = arith.constant 0 : index
    %318 = vector.load %arg6[%c0_72, %c0_73] : memref<1x128xf32, #tpu.memory_space<vmem>>, vector<1x128xf32>
    %319 = vector.broadcast %318 : vector<1x128xf32> to vector<32x128xf32>
    %320 = arith.addf %317, %319 : vector<32x128xf32>
    %cst_74 = arith.constant dense<0.000000e+00> : vector<128xf32>
    %321 = vector.multi_reduction <add>, %320, %cst_74 [0] : vector<32x128xf32> to vector<128xf32>
    %322 = vector.shape_cast %321 : vector<128xf32> to vector<1x128xf32>
    %cst_75 = arith.constant 3.200000e+01 : f32
    %323 = vector.broadcast %cst_75 : f32 to vector<1x128xf32>
    %324 = arith.divf %322, %323 : vector<1x128xf32>
    %325 = vector.broadcast %324 : vector<1x128xf32> to vector<32x128xf32>
    %326 = arith.subf %320, %325 : vector<32x128xf32>
    %327 = arith.mulf %326, %326 : vector<32x128xf32>
    %cst_76 = arith.constant dense<0.000000e+00> : vector<128xf32>
    %328 = vector.multi_reduction <add>, %327, %cst_76 [0] : vector<32x128xf32> to vector<128xf32>
    %329 = vector.shape_cast %328 : vector<128xf32> to vector<1x128xf32>
    %cst_77 = arith.constant 3.200000e+01 : f32
    %330 = vector.broadcast %cst_77 : f32 to vector<1x128xf32>
    %331 = arith.divf %329, %330 : vector<1x128xf32>
    %cst_78 = arith.constant 9.99999974E-6 : f32
    %332 = vector.broadcast %cst_78 : f32 to vector<1x128xf32>
    %333 = arith.addf %331, %332 : vector<1x128xf32>
    %334 = math.rsqrt %333 : vector<1x128xf32>
    %335 = vector.broadcast %324 : vector<1x128xf32> to vector<32x128xf32>
    %336 = arith.subf %320, %335 : vector<32x128xf32>
    %337 = vector.broadcast %334 : vector<1x128xf32> to vector<32x128xf32>
    %338 = arith.mulf %336, %337 : vector<32x128xf32>
    %cst_79 = arith.constant 0.000000e+00 : f32
    %339 = vector.broadcast %cst_79 : f32 to vector<32x128xf32>
    %340 = arith.maximumf %338, %339 : vector<32x128xf32>
    %cst_80 = arith.constant 0.000000e+00 : f32
    %341 = vector.broadcast %cst_80 : f32 to vector<16x128xf32>
    %cst_81 = arith.constant 0.000000e+00 : f32
    %342 = vector.broadcast %cst_81 : f32 to vector<8x128xf32>
    %343 = vector.extract_strided_slice %340 {offsets = [0, 0], sizes = [8, 128], strides = [1, 1]} : vector<32x128xf32> to vector<8x128xf32>
    %344 = tpu.concatenate %341, %342, %343 in 0 : vector<16x128xf32>, vector<8x128xf32>, vector<8x128xf32> -> vector<32x128xf32>
    %cst_82 = arith.constant 0.000000e+00 : f32
    %345 = vector.broadcast %cst_82 : f32 to vector<16x128xf32>
    %346 = vector.extract_strided_slice %340 {offsets = [0, 0], sizes = [16, 128], strides = [1, 1]} : vector<32x128xf32> to vector<16x128xf32>
    %347 = tpu.concatenate %345, %346 in 0 : vector<16x128xf32>, vector<16x128xf32> -> vector<32x128xf32>
    %cst_83 = arith.constant 0.000000e+00 : f32
    %348 = vector.broadcast %cst_83 : f32 to vector<16x128xf32>
    %349 = vector.extract_strided_slice %340 {offsets = [8, 0], sizes = [8, 128], strides = [1, 1]} : vector<32x128xf32> to vector<8x128xf32>
    %cst_84 = arith.constant 0.000000e+00 : f32
    %350 = vector.broadcast %cst_84 : f32 to vector<8x128xf32>
    %351 = tpu.concatenate %348, %349, %350 in 0 : vector<16x128xf32>, vector<8x128xf32>, vector<8x128xf32> -> vector<32x128xf32>
    %cst_85 = arith.constant 0.000000e+00 : f32
    %352 = vector.broadcast %cst_85 : f32 to vector<8x128xf32>
    %353 = vector.extract_strided_slice %340 {offsets = [0, 0], sizes = [8, 128], strides = [1, 1]} : vector<32x128xf32> to vector<8x128xf32>
    %cst_86 = arith.constant 0.000000e+00 : f32
    %354 = vector.broadcast %cst_86 : f32 to vector<8x128xf32>
    %355 = vector.extract_strided_slice %340 {offsets = [16, 0], sizes = [8, 128], strides = [1, 1]} : vector<32x128xf32> to vector<8x128xf32>
    %356 = tpu.concatenate %352, %353, %354, %355 in 0 : vector<8x128xf32>, vector<8x128xf32>, vector<8x128xf32>, vector<8x128xf32> -> vector<32x128xf32>
    %357 = vector.extract_strided_slice %340 {offsets = [0, 0], sizes = [16, 128], strides = [1, 1]} : vector<32x128xf32> to vector<16x128xf32>
    %358 = vector.extract_strided_slice %340 {offsets = [16, 0], sizes = [16, 128], strides = [1, 1]} : vector<32x128xf32> to vector<16x128xf32>
    %359 = tpu.concatenate %357, %358 in 0 : vector<16x128xf32>, vector<16x128xf32> -> vector<32x128xf32>
    %360 = vector.extract_strided_slice %340 {offsets = [8, 0], sizes = [8, 128], strides = [1, 1]} : vector<32x128xf32> to vector<8x128xf32>
    %cst_87 = arith.constant 0.000000e+00 : f32
    %361 = vector.broadcast %cst_87 : f32 to vector<8x128xf32>
    %362 = vector.extract_strided_slice %340 {offsets = [24, 0], sizes = [8, 128], strides = [1, 1]} : vector<32x128xf32> to vector<8x128xf32>
    %cst_88 = arith.constant 0.000000e+00 : f32
    %363 = vector.broadcast %cst_88 : f32 to vector<8x128xf32>
    %364 = tpu.concatenate %360, %361, %362, %363 in 0 : vector<8x128xf32>, vector<8x128xf32>, vector<8x128xf32>, vector<8x128xf32> -> vector<32x128xf32>
    %cst_89 = arith.constant 0.000000e+00 : f32
    %365 = vector.broadcast %cst_89 : f32 to vector<8x128xf32>
    %366 = vector.extract_strided_slice %340 {offsets = [16, 0], sizes = [8, 128], strides = [1, 1]} : vector<32x128xf32> to vector<8x128xf32>
    %cst_90 = arith.constant 0.000000e+00 : f32
    %367 = vector.broadcast %cst_90 : f32 to vector<16x128xf32>
    %368 = tpu.concatenate %365, %366, %367 in 0 : vector<8x128xf32>, vector<8x128xf32>, vector<16x128xf32> -> vector<32x128xf32>
    %369 = vector.extract_strided_slice %340 {offsets = [16, 0], sizes = [16, 128], strides = [1, 1]} : vector<32x128xf32> to vector<16x128xf32>
    %cst_91 = arith.constant 0.000000e+00 : f32
    %370 = vector.broadcast %cst_91 : f32 to vector<16x128xf32>
    %371 = tpu.concatenate %369, %370 in 0 : vector<16x128xf32>, vector<16x128xf32> -> vector<32x128xf32>
    %372 = vector.extract_strided_slice %340 {offsets = [24, 0], sizes = [8, 128], strides = [1, 1]} : vector<32x128xf32> to vector<8x128xf32>
    %cst_92 = arith.constant 0.000000e+00 : f32
    %373 = vector.broadcast %cst_92 : f32 to vector<8x128xf32>
    %cst_93 = arith.constant 0.000000e+00 : f32
    %374 = vector.broadcast %cst_93 : f32 to vector<16x128xf32>
    %375 = tpu.concatenate %372, %373, %374 in 0 : vector<8x128xf32>, vector<8x128xf32>, vector<16x128xf32> -> vector<32x128xf32>
    %376 = tpu.concatenate %344, %347, %351, %356, %359, %364, %368, %371, %375 in 1 : vector<32x128xf32>, vector<32x128xf32>, vector<32x128xf32>, vector<32x128xf32>, vector<32x128xf32>, vector<32x128xf32>, vector<32x128xf32>, vector<32x128xf32>, vector<32x128xf32> -> vector<32x1152xf32>
    %377 = arith.truncf %376 : vector<32x1152xf32> to vector<32x1152xbf16>
    %c0_94 = arith.constant 0 : index
    %c0_95 = arith.constant 0 : index
    %378 = vector.load %arg7[%c0_94, %c0_95] : memref<1152x128xbf16, #tpu.memory_space<vmem>>, vector<1152x128xbf16>
    %cst_96 = arith.constant dense<0.000000e+00> : vector<32x128xf32>
    %379 = tpu.matmul %377, %378, %cst_96 {dimension_numbers = #tpu.dot_dimension_numbers<[1], [0], [0], [1], [0, 0, 1, 1], [], []>} : vector<32x1152xbf16>, vector<1152x128xbf16>, vector<32x128xf32> -> vector<32x128xf32>
    %c0_97 = arith.constant 0 : index
    %c0_98 = arith.constant 0 : index
    %380 = vector.load %arg8[%c0_97, %c0_98] : memref<1x128xf32, #tpu.memory_space<vmem>>, vector<1x128xf32>
    %381 = vector.broadcast %380 : vector<1x128xf32> to vector<32x128xf32>
    %382 = arith.addf %379, %381 : vector<32x128xf32>
    %383 = vector.shape_cast %382 : vector<32x128xf32> to vector<4x8x128xf32>
    %384 = vector.shape_cast %277 : vector<8x128xf32> to vector<1x8x128xf32>
    %385 = vector.broadcast %384 : vector<1x8x128xf32> to vector<4x8x128xf32>
    %386 = arith.mulf %383, %385 : vector<4x8x128xf32>
    %387 = vector.shape_cast %278 : vector<8x128xf32> to vector<1x8x128xf32>
    %388 = vector.broadcast %387 : vector<1x8x128xf32> to vector<4x8x128xf32>
    %389 = arith.addf %386, %388 : vector<4x8x128xf32>
    %390 = vector.shape_cast %389 : vector<4x8x128xf32> to vector<32x128xf32>
    %cst_99 = arith.constant dense<0.000000e+00> : vector<128xf32>
    %391 = vector.multi_reduction <add>, %390, %cst_99 [0] : vector<32x128xf32> to vector<128xf32>
    %392 = vector.shape_cast %391 : vector<128xf32> to vector<1x128xf32>
    %cst_100 = arith.constant 3.200000e+01 : f32
    %393 = vector.broadcast %cst_100 : f32 to vector<1x128xf32>
    %394 = arith.divf %392, %393 : vector<1x128xf32>
    %395 = vector.broadcast %394 : vector<1x128xf32> to vector<32x128xf32>
    %396 = arith.subf %390, %395 : vector<32x128xf32>
    %397 = arith.mulf %396, %396 : vector<32x128xf32>
    %cst_101 = arith.constant dense<0.000000e+00> : vector<128xf32>
    %398 = vector.multi_reduction <add>, %397, %cst_101 [0] : vector<32x128xf32> to vector<128xf32>
    %399 = vector.shape_cast %398 : vector<128xf32> to vector<1x128xf32>
    %cst_102 = arith.constant 3.200000e+01 : f32
    %400 = vector.broadcast %cst_102 : f32 to vector<1x128xf32>
    %401 = arith.divf %399, %400 : vector<1x128xf32>
    %cst_103 = arith.constant 9.99999974E-6 : f32
    %402 = vector.broadcast %cst_103 : f32 to vector<1x128xf32>
    %403 = arith.addf %401, %402 : vector<1x128xf32>
    %404 = math.rsqrt %403 : vector<1x128xf32>
    %405 = vector.broadcast %394 : vector<1x128xf32> to vector<32x128xf32>
    %406 = arith.subf %390, %405 : vector<32x128xf32>
    %407 = vector.broadcast %404 : vector<1x128xf32> to vector<32x128xf32>
    %408 = arith.mulf %406, %407 : vector<32x128xf32>
    %cst_104 = arith.constant 0.000000e+00 : f32
    %409 = vector.broadcast %cst_104 : f32 to vector<32x128xf32>
    %410 = arith.maximumf %408, %409 : vector<32x128xf32>
    %411 = arith.addf %410, %260 : vector<32x128xf32>
    %412 = vector.extract_strided_slice %276 {offsets = [0, 256], sizes = [8, 128], strides = [1, 1]} : vector<8x512xf32> to vector<8x128xf32>
    %413 = vector.extract_strided_slice %276 {offsets = [0, 384], sizes = [8, 128], strides = [1, 1]} : vector<8x512xf32> to vector<8x128xf32>
    %cst_105 = arith.constant 0.000000e+00 : f32
    %414 = vector.broadcast %cst_105 : f32 to vector<16x128xf32>
    %cst_106 = arith.constant 0.000000e+00 : f32
    %415 = vector.broadcast %cst_106 : f32 to vector<8x128xf32>
    %416 = vector.extract_strided_slice %411 {offsets = [0, 0], sizes = [8, 128], strides = [1, 1]} : vector<32x128xf32> to vector<8x128xf32>
    %417 = tpu.concatenate %414, %415, %416 in 0 : vector<16x128xf32>, vector<8x128xf32>, vector<8x128xf32> -> vector<32x128xf32>
    %cst_107 = arith.constant 0.000000e+00 : f32
    %418 = vector.broadcast %cst_107 : f32 to vector<16x128xf32>
    %419 = vector.extract_strided_slice %411 {offsets = [0, 0], sizes = [16, 128], strides = [1, 1]} : vector<32x128xf32> to vector<16x128xf32>
    %420 = tpu.concatenate %418, %419 in 0 : vector<16x128xf32>, vector<16x128xf32> -> vector<32x128xf32>
    %cst_108 = arith.constant 0.000000e+00 : f32
    %421 = vector.broadcast %cst_108 : f32 to vector<16x128xf32>
    %422 = vector.extract_strided_slice %411 {offsets = [8, 0], sizes = [8, 128], strides = [1, 1]} : vector<32x128xf32> to vector<8x128xf32>
    %cst_109 = arith.constant 0.000000e+00 : f32
    %423 = vector.broadcast %cst_109 : f32 to vector<8x128xf32>
    %424 = tpu.concatenate %421, %422, %423 in 0 : vector<16x128xf32>, vector<8x128xf32>, vector<8x128xf32> -> vector<32x128xf32>
    %cst_110 = arith.constant 0.000000e+00 : f32
    %425 = vector.broadcast %cst_110 : f32 to vector<8x128xf32>
    %426 = vector.extract_strided_slice %411 {offsets = [0, 0], sizes = [8, 128], strides = [1, 1]} : vector<32x128xf32> to vector<8x128xf32>
    %cst_111 = arith.constant 0.000000e+00 : f32
    %427 = vector.broadcast %cst_111 : f32 to vector<8x128xf32>
    %428 = vector.extract_strided_slice %411 {offsets = [16, 0], sizes = [8, 128], strides = [1, 1]} : vector<32x128xf32> to vector<8x128xf32>
    %429 = tpu.concatenate %425, %426, %427, %428 in 0 : vector<8x128xf32>, vector<8x128xf32>, vector<8x128xf32>, vector<8x128xf32> -> vector<32x128xf32>
    %430 = vector.extract_strided_slice %411 {offsets = [0, 0], sizes = [16, 128], strides = [1, 1]} : vector<32x128xf32> to vector<16x128xf32>
    %431 = vector.extract_strided_slice %411 {offsets = [16, 0], sizes = [16, 128], strides = [1, 1]} : vector<32x128xf32> to vector<16x128xf32>
    %432 = tpu.concatenate %430, %431 in 0 : vector<16x128xf32>, vector<16x128xf32> -> vector<32x128xf32>
    %433 = vector.extract_strided_slice %411 {offsets = [8, 0], sizes = [8, 128], strides = [1, 1]} : vector<32x128xf32> to vector<8x128xf32>
    %cst_112 = arith.constant 0.000000e+00 : f32
    %434 = vector.broadcast %cst_112 : f32 to vector<8x128xf32>
    %435 = vector.extract_strided_slice %411 {offsets = [24, 0], sizes = [8, 128], strides = [1, 1]} : vector<32x128xf32> to vector<8x128xf32>
    %cst_113 = arith.constant 0.000000e+00 : f32
    %436 = vector.broadcast %cst_113 : f32 to vector<8x128xf32>
    %437 = tpu.concatenate %433, %434, %435, %436 in 0 : vector<8x128xf32>, vector<8x128xf32>, vector<8x128xf32>, vector<8x128xf32> -> vector<32x128xf32>
    %cst_114 = arith.constant 0.000000e+00 : f32
    %438 = vector.broadcast %cst_114 : f32 to vector<8x128xf32>
    %439 = vector.extract_strided_slice %411 {offsets = [16, 0], sizes = [8, 128], strides = [1, 1]} : vector<32x128xf32> to vector<8x128xf32>
    %cst_115 = arith.constant 0.000000e+00 : f32
    %440 = vector.broadcast %cst_115 : f32 to vector<16x128xf32>
    %441 = tpu.concatenate %438, %439, %440 in 0 : vector<8x128xf32>, vector<8x128xf32>, vector<16x128xf32> -> vector<32x128xf32>
    %442 = vector.extract_strided_slice %411 {offsets = [16, 0], sizes = [16, 128], strides = [1, 1]} : vector<32x128xf32> to vector<16x128xf32>
    %cst_116 = arith.constant 0.000000e+00 : f32
    %443 = vector.broadcast %cst_116 : f32 to vector<16x128xf32>
    %444 = tpu.concatenate %442, %443 in 0 : vector<16x128xf32>, vector<16x128xf32> -> vector<32x128xf32>
    %445 = vector.extract_strided_slice %411 {offsets = [24, 0], sizes = [8, 128], strides = [1, 1]} : vector<32x128xf32> to vector<8x128xf32>
    %cst_117 = arith.constant 0.000000e+00 : f32
    %446 = vector.broadcast %cst_117 : f32 to vector<8x128xf32>
    %cst_118 = arith.constant 0.000000e+00 : f32
    %447 = vector.broadcast %cst_118 : f32 to vector<16x128xf32>
    %448 = tpu.concatenate %445, %446, %447 in 0 : vector<8x128xf32>, vector<8x128xf32>, vector<16x128xf32> -> vector<32x128xf32>
    %449 = tpu.concatenate %417, %420, %424, %429, %432, %437, %441, %444, %448 in 1 : vector<32x128xf32>, vector<32x128xf32>, vector<32x128xf32>, vector<32x128xf32>, vector<32x128xf32>, vector<32x128xf32>, vector<32x128xf32>, vector<32x128xf32>, vector<32x128xf32> -> vector<32x1152xf32>
    %450 = arith.truncf %449 : vector<32x1152xf32> to vector<32x1152xbf16>
    %c0_119 = arith.constant 0 : index
    %c0_120 = arith.constant 0 : index
    %451 = vector.load %arg9[%c0_119, %c0_120] : memref<1152x128xbf16, #tpu.memory_space<vmem>>, vector<1152x128xbf16>
    %cst_121 = arith.constant dense<0.000000e+00> : vector<32x128xf32>
    %452 = tpu.matmul %450, %451, %cst_121 {dimension_numbers = #tpu.dot_dimension_numbers<[1], [0], [0], [1], [0, 0, 1, 1], [], []>} : vector<32x1152xbf16>, vector<1152x128xbf16>, vector<32x128xf32> -> vector<32x128xf32>
    %c0_122 = arith.constant 0 : index
    %c0_123 = arith.constant 0 : index
    %453 = vector.load %arg10[%c0_122, %c0_123] : memref<1x128xf32, #tpu.memory_space<vmem>>, vector<1x128xf32>
    %454 = vector.broadcast %453 : vector<1x128xf32> to vector<32x128xf32>
    %455 = arith.addf %452, %454 : vector<32x128xf32>
    %cst_124 = arith.constant dense<0.000000e+00> : vector<128xf32>
    %456 = vector.multi_reduction <add>, %455, %cst_124 [0] : vector<32x128xf32> to vector<128xf32>
    %457 = vector.shape_cast %456 : vector<128xf32> to vector<1x128xf32>
    %cst_125 = arith.constant 3.200000e+01 : f32
    %458 = vector.broadcast %cst_125 : f32 to vector<1x128xf32>
    %459 = arith.divf %457, %458 : vector<1x128xf32>
    %460 = vector.broadcast %459 : vector<1x128xf32> to vector<32x128xf32>
    %461 = arith.subf %455, %460 : vector<32x128xf32>
    %462 = arith.mulf %461, %461 : vector<32x128xf32>
    %cst_126 = arith.constant dense<0.000000e+00> : vector<128xf32>
    %463 = vector.multi_reduction <add>, %462, %cst_126 [0] : vector<32x128xf32> to vector<128xf32>
    %464 = vector.shape_cast %463 : vector<128xf32> to vector<1x128xf32>
    %cst_127 = arith.constant 3.200000e+01 : f32
    %465 = vector.broadcast %cst_127 : f32 to vector<1x128xf32>
    %466 = arith.divf %464, %465 : vector<1x128xf32>
    %cst_128 = arith.constant 9.99999974E-6 : f32
    %467 = vector.broadcast %cst_128 : f32 to vector<1x128xf32>
    %468 = arith.addf %466, %467 : vector<1x128xf32>
    %469 = math.rsqrt %468 : vector<1x128xf32>
    %470 = vector.broadcast %459 : vector<1x128xf32> to vector<32x128xf32>
    %471 = arith.subf %455, %470 : vector<32x128xf32>
    %472 = vector.broadcast %469 : vector<1x128xf32> to vector<32x128xf32>
    %473 = arith.mulf %471, %472 : vector<32x128xf32>
    %cst_129 = arith.constant 0.000000e+00 : f32
    %474 = vector.broadcast %cst_129 : f32 to vector<32x128xf32>
    %475 = arith.maximumf %473, %474 : vector<32x128xf32>
    %cst_130 = arith.constant 0.000000e+00 : f32
    %476 = vector.broadcast %cst_130 : f32 to vector<16x128xf32>
    %cst_131 = arith.constant 0.000000e+00 : f32
    %477 = vector.broadcast %cst_131 : f32 to vector<8x128xf32>
    %478 = vector.extract_strided_slice %475 {offsets = [0, 0], sizes = [8, 128], strides = [1, 1]} : vector<32x128xf32> to vector<8x128xf32>
    %479 = tpu.concatenate %476, %477, %478 in 0 : vector<16x128xf32>, vector<8x128xf32>, vector<8x128xf32> -> vector<32x128xf32>
    %cst_132 = arith.constant 0.000000e+00 : f32
    %480 = vector.broadcast %cst_132 : f32 to vector<16x128xf32>
    %481 = vector.extract_strided_slice %475 {offsets = [0, 0], sizes = [16, 128], strides = [1, 1]} : vector<32x128xf32> to vector<16x128xf32>
    %482 = tpu.concatenate %480, %481 in 0 : vector<16x128xf32>, vector<16x128xf32> -> vector<32x128xf32>
    %cst_133 = arith.constant 0.000000e+00 : f32
    %483 = vector.broadcast %cst_133 : f32 to vector<16x128xf32>
    %484 = vector.extract_strided_slice %475 {offsets = [8, 0], sizes = [8, 128], strides = [1, 1]} : vector<32x128xf32> to vector<8x128xf32>
    %cst_134 = arith.constant 0.000000e+00 : f32
    %485 = vector.broadcast %cst_134 : f32 to vector<8x128xf32>
    %486 = tpu.concatenate %483, %484, %485 in 0 : vector<16x128xf32>, vector<8x128xf32>, vector<8x128xf32> -> vector<32x128xf32>
    %cst_135 = arith.constant 0.000000e+00 : f32
    %487 = vector.broadcast %cst_135 : f32 to vector<8x128xf32>
    %488 = vector.extract_strided_slice %475 {offsets = [0, 0], sizes = [8, 128], strides = [1, 1]} : vector<32x128xf32> to vector<8x128xf32>
    %cst_136 = arith.constant 0.000000e+00 : f32
    %489 = vector.broadcast %cst_136 : f32 to vector<8x128xf32>
    %490 = vector.extract_strided_slice %475 {offsets = [16, 0], sizes = [8, 128], strides = [1, 1]} : vector<32x128xf32> to vector<8x128xf32>
    %491 = tpu.concatenate %487, %488, %489, %490 in 0 : vector<8x128xf32>, vector<8x128xf32>, vector<8x128xf32>, vector<8x128xf32> -> vector<32x128xf32>
    %492 = vector.extract_strided_slice %475 {offsets = [0, 0], sizes = [16, 128], strides = [1, 1]} : vector<32x128xf32> to vector<16x128xf32>
    %493 = vector.extract_strided_slice %475 {offsets = [16, 0], sizes = [16, 128], strides = [1, 1]} : vector<32x128xf32> to vector<16x128xf32>
    %494 = tpu.concatenate %492, %493 in 0 : vector<16x128xf32>, vector<16x128xf32> -> vector<32x128xf32>
    %495 = vector.extract_strided_slice %475 {offsets = [8, 0], sizes = [8, 128], strides = [1, 1]} : vector<32x128xf32> to vector<8x128xf32>
    %cst_137 = arith.constant 0.000000e+00 : f32
    %496 = vector.broadcast %cst_137 : f32 to vector<8x128xf32>
    %497 = vector.extract_strided_slice %475 {offsets = [24, 0], sizes = [8, 128], strides = [1, 1]} : vector<32x128xf32> to vector<8x128xf32>
    %cst_138 = arith.constant 0.000000e+00 : f32
    %498 = vector.broadcast %cst_138 : f32 to vector<8x128xf32>
    %499 = tpu.concatenate %495, %496, %497, %498 in 0 : vector<8x128xf32>, vector<8x128xf32>, vector<8x128xf32>, vector<8x128xf32> -> vector<32x128xf32>
    %cst_139 = arith.constant 0.000000e+00 : f32
    %500 = vector.broadcast %cst_139 : f32 to vector<8x128xf32>
    %501 = vector.extract_strided_slice %475 {offsets = [16, 0], sizes = [8, 128], strides = [1, 1]} : vector<32x128xf32> to vector<8x128xf32>
    %cst_140 = arith.constant 0.000000e+00 : f32
    %502 = vector.broadcast %cst_140 : f32 to vector<16x128xf32>
    %503 = tpu.concatenate %500, %501, %502 in 0 : vector<8x128xf32>, vector<8x128xf32>, vector<16x128xf32> -> vector<32x128xf32>
    %504 = vector.extract_strided_slice %475 {offsets = [16, 0], sizes = [16, 128], strides = [1, 1]} : vector<32x128xf32> to vector<16x128xf32>
    %cst_141 = arith.constant 0.000000e+00 : f32
    %505 = vector.broadcast %cst_141 : f32 to vector<16x128xf32>
    %506 = tpu.concatenate %504, %505 in 0 : vector<16x128xf32>, vector<16x128xf32> -> vector<32x128xf32>
    %507 = vector.extract_strided_slice %475 {offsets = [24, 0], sizes = [8, 128], strides = [1, 1]} : vector<32x128xf32> to vector<8x128xf32>
    %cst_142 = arith.constant 0.000000e+00 : f32
    %508 = vector.broadcast %cst_142 : f32 to vector<8x128xf32>
    %cst_143 = arith.constant 0.000000e+00 : f32
    %509 = vector.broadcast %cst_143 : f32 to vector<16x128xf32>
    %510 = tpu.concatenate %507, %508, %509 in 0 : vector<8x128xf32>, vector<8x128xf32>, vector<16x128xf32> -> vector<32x128xf32>
    %511 = tpu.concatenate %479, %482, %486, %491, %494, %499, %503, %506, %510 in 1 : vector<32x128xf32>, vector<32x128xf32>, vector<32x128xf32>, vector<32x128xf32>, vector<32x128xf32>, vector<32x128xf32>, vector<32x128xf32>, vector<32x128xf32>, vector<32x128xf32> -> vector<32x1152xf32>
    %512 = arith.truncf %511 : vector<32x1152xf32> to vector<32x1152xbf16>
    %c0_144 = arith.constant 0 : index
    %c0_145 = arith.constant 0 : index
    %513 = vector.load %arg11[%c0_144, %c0_145] : memref<1152x128xbf16, #tpu.memory_space<vmem>>, vector<1152x128xbf16>
    %cst_146 = arith.constant dense<0.000000e+00> : vector<32x128xf32>
    %514 = tpu.matmul %512, %513, %cst_146 {dimension_numbers = #tpu.dot_dimension_numbers<[1], [0], [0], [1], [0, 0, 1, 1], [], []>} : vector<32x1152xbf16>, vector<1152x128xbf16>, vector<32x128xf32> -> vector<32x128xf32>
    %c0_147 = arith.constant 0 : index
    %c0_148 = arith.constant 0 : index
    %515 = vector.load %arg12[%c0_147, %c0_148] : memref<1x128xf32, #tpu.memory_space<vmem>>, vector<1x128xf32>
    %516 = vector.broadcast %515 : vector<1x128xf32> to vector<32x128xf32>
    %517 = arith.addf %514, %516 : vector<32x128xf32>
    %518 = vector.shape_cast %517 : vector<32x128xf32> to vector<4x8x128xf32>
    %519 = vector.shape_cast %412 : vector<8x128xf32> to vector<1x8x128xf32>
    %520 = vector.broadcast %519 : vector<1x8x128xf32> to vector<4x8x128xf32>
    %521 = arith.mulf %518, %520 : vector<4x8x128xf32>
    %522 = vector.shape_cast %413 : vector<8x128xf32> to vector<1x8x128xf32>
    %523 = vector.broadcast %522 : vector<1x8x128xf32> to vector<4x8x128xf32>
    %524 = arith.addf %521, %523 : vector<4x8x128xf32>
    %525 = vector.shape_cast %524 : vector<4x8x128xf32> to vector<32x128xf32>
    %cst_149 = arith.constant dense<0.000000e+00> : vector<128xf32>
    %526 = vector.multi_reduction <add>, %525, %cst_149 [0] : vector<32x128xf32> to vector<128xf32>
    %527 = vector.shape_cast %526 : vector<128xf32> to vector<1x128xf32>
    %cst_150 = arith.constant 3.200000e+01 : f32
    %528 = vector.broadcast %cst_150 : f32 to vector<1x128xf32>
    %529 = arith.divf %527, %528 : vector<1x128xf32>
    %530 = vector.broadcast %529 : vector<1x128xf32> to vector<32x128xf32>
    %531 = arith.subf %525, %530 : vector<32x128xf32>
    %532 = arith.mulf %531, %531 : vector<32x128xf32>
    %cst_151 = arith.constant dense<0.000000e+00> : vector<128xf32>
    %533 = vector.multi_reduction <add>, %532, %cst_151 [0] : vector<32x128xf32> to vector<128xf32>
    %534 = vector.shape_cast %533 : vector<128xf32> to vector<1x128xf32>
    %cst_152 = arith.constant 3.200000e+01 : f32
    %535 = vector.broadcast %cst_152 : f32 to vector<1x128xf32>
    %536 = arith.divf %534, %535 : vector<1x128xf32>
    %cst_153 = arith.constant 9.99999974E-6 : f32
    %537 = vector.broadcast %cst_153 : f32 to vector<1x128xf32>
    %538 = arith.addf %536, %537 : vector<1x128xf32>
    %539 = math.rsqrt %538 : vector<1x128xf32>
    %540 = vector.broadcast %529 : vector<1x128xf32> to vector<32x128xf32>
    %541 = arith.subf %525, %540 : vector<32x128xf32>
    %542 = vector.broadcast %539 : vector<1x128xf32> to vector<32x128xf32>
    %543 = arith.mulf %541, %542 : vector<32x128xf32>
    %cst_154 = arith.constant 0.000000e+00 : f32
    %544 = vector.broadcast %cst_154 : f32 to vector<32x128xf32>
    %545 = arith.maximumf %543, %544 : vector<32x128xf32>
    %546 = arith.addf %545, %411 : vector<32x128xf32>
    %547 = vector.extract_strided_slice %546 {offsets = [0, 0], sizes = [8, 128], strides = [1, 1]} : vector<32x128xf32> to vector<8x128xf32>
    %548 = vector.extract_strided_slice %546 {offsets = [8, 0], sizes = [8, 128], strides = [1, 1]} : vector<32x128xf32> to vector<8x128xf32>
    %549 = arith.maximumf %547, %548 : vector<8x128xf32>
    %550 = vector.extract_strided_slice %546 {offsets = [16, 0], sizes = [8, 128], strides = [1, 1]} : vector<32x128xf32> to vector<8x128xf32>
    %551 = arith.maximumf %549, %550 : vector<8x128xf32>
    %552 = vector.extract_strided_slice %546 {offsets = [24, 0], sizes = [8, 128], strides = [1, 1]} : vector<32x128xf32> to vector<8x128xf32>
    %553 = arith.maximumf %551, %552 : vector<8x128xf32>
    %cst_155 = arith.constant 0.000000e+00 : f32
    %554 = vector.broadcast %cst_155 : f32 to vector<8x128xf32>
    %555 = arith.maximumf %553, %554 : vector<8x128xf32>
    %c0_156 = arith.constant 0 : index
    %c0_157 = arith.constant 0 : index
    %556 = vector.load %arg16[%c0_156, %c0_157] : memref<8x128xf32, #tpu.memory_space<vmem>>, vector<8x128xf32>
    tpu.vector_store %arg16[%c0_156, %c0_157], %555 {strides = array<i32>} : memref<8x128xf32, #tpu.memory_space<vmem>>, vector<8x128xf32>,
    return
  }
}

module attributes {stable_mosaic.version = 11 : i64} {
  func.func @kernel(%arg0: memref<16x128xf32, #tpu.memory_space<vmem>>, %arg1: memref<128x384xbf16, #tpu.memory_space<vmem>>, %arg2: memref<1x384xf32, #tpu.memory_space<vmem>>, %arg3: memref<128x384xf32, #tpu.memory_space<vmem>>, %arg4: memref<1x384xf32, #tpu.memory_space<vmem>>, %arg5: memref<2x1xi32, #tpu.memory_space<vmem>>, %arg6: memref<2x128xf32, #tpu.memory_space<vmem>>, %arg7: memref<16x384xf32, #tpu.memory_space<vmem>>) attributes {dimension_semantics = [], scalar_prefetch = 0 : i64, scratch_operands = 1 : i64, tpu.core_type = #tpu.core_type<tc>} {
    %c0 = arith.constant 0 : index
    %c0_0 = arith.constant 0 : index
    %0 = vector.load %arg0[%c0, %c0_0] : memref<16x128xf32, #tpu.memory_space<vmem>>, vector<16x128xf32>
    %1 = arith.truncf %0 : vector<16x128xf32> to vector<16x128xbf16>
    %c0_1 = arith.constant 0 : index
    %c0_2 = arith.constant 0 : index
    %2 = vector.load %arg1[%c0_1, %c0_2] : memref<128x384xbf16, #tpu.memory_space<vmem>>, vector<128x384xbf16>
    %cst = arith.constant dense<0.000000e+00> : vector<16x384xf32>
    %3 = tpu.matmul %1, %2, %cst {dimension_numbers = #tpu.dot_dimension_numbers<[1], [0], [0], [1], [0, 0, 1, 1], [], []>} : vector<16x128xbf16>, vector<128x384xbf16>, vector<16x384xf32> -> vector<16x384xf32>
    %c0_3 = arith.constant 0 : index
    %c0_4 = arith.constant 0 : index
    %4 = vector.load %arg2[%c0_3, %c0_4] : memref<1x384xf32, #tpu.memory_space<vmem>>, vector<1x384xf32>
    %5 = vector.broadcast %4 : vector<1x384xf32> to vector<16x384xf32>
    %6 = arith.addf %3, %5 : vector<16x384xf32>
    %c0_5 = arith.constant 0 : index
    %c0_6 = arith.constant 0 : index
    %7 = vector.load %arg7[%c0_5, %c0_6] : memref<16x384xf32, #tpu.memory_space<vmem>>, vector<16x384xf32>
    tpu.vector_store %arg7[%c0_5, %c0_6], %6 {strides = array<i32>} : memref<16x384xf32, #tpu.memory_space<vmem>>, vector<16x384xf32>,
    %c0_7 = arith.constant 0 : index
    %c0_8 = arith.constant 0 : index
    %8 = vector.load %arg3[%c0_7, %c0_8] : memref<128x384xf32, #tpu.memory_space<vmem>>, vector<128x384xf32>
    %c0_9 = arith.constant 0 : index
    %c0_10 = arith.constant 0 : index
    %9 = vector.load %arg4[%c0_9, %c0_10] : memref<1x384xf32, #tpu.memory_space<vmem>>, vector<1x384xf32>
    %c0_11 = arith.constant 0 : index
    %c0_12 = arith.constant 0 : index
    %10 = vector.load %arg5[%c0_11, %c0_12] : memref<2x1xi32, #tpu.memory_space<vmem>>, vector<2x1xi32>
    %cst_13 = arith.constant 0.000000e+00 : f32
    %11 = vector.broadcast %cst_13 : f32 to vector<2x128xf32>
    %cst_14 = arith.constant 0.000000e+00 : f32
    %12 = vector.broadcast %cst_14 : f32 to vector<2x128xf32>
    %c0_i32 = arith.constant 0 : i32
    %c8_i32 = arith.constant 8 : i32
    %13 = arith.addi %c0_i32, %c8_i32 : i32
    %c1_i32 = arith.constant 1 : i32
    %14:2 = scf.for %arg8 = %c0_i32 to %13 step %c1_i32 iter_args(%arg9 = %11, %arg10 = %12) -> (vector<2x128xf32>, vector<2x128xf32>)  : i32 {
      %c0_i32_18 = arith.constant 0 : i32
      %16 = arith.addi %c0_i32_18, %arg8 : i32
      %17 = arith.index_cast %16 : i32 to index
      %c0_19 = arith.constant 0 : index
      %18 = vector.load %arg7[%17, %c0_19] : memref<16x384xf32, #tpu.memory_space<vmem>>, vector<1x384xf32>
      %c8_i32_20 = arith.constant 8 : i32
      %19 = arith.addi %c8_i32_20, %arg8 : i32
      %20 = arith.index_cast %19 : i32 to index
      %c0_21 = arith.constant 0 : index
      %21 = vector.load %arg7[%20, %c0_21] : memref<16x384xf32, #tpu.memory_space<vmem>>, vector<1x384xf32>
      %22 = tpu.concatenate %18, %21 in 0 : vector<1x384xf32>, vector<1x384xf32> -> vector<2x384xf32>
      %cst_22 = arith.constant dense<0.000000e+00> : vector<2x384xf32>
      %23 = tpu.matmul %arg9, %8, %cst_22 {dimension_numbers = #tpu.dot_dimension_numbers<[1], [0], [0], [1], [0, 0, 1, 1], [], []>} : vector<2x128xf32>, vector<128x384xf32>, vector<2x384xf32> -> vector<2x384xf32>
      %24 = vector.broadcast %9 : vector<1x384xf32> to vector<2x384xf32>
      %25 = arith.addf %23, %24 : vector<2x384xf32>
      %26 = vector.extract_strided_slice %22 {offsets = [0, 0], sizes = [2, 128], strides = [1, 1]} : vector<2x384xf32> to vector<2x128xf32>
      %27 = vector.extract_strided_slice %25 {offsets = [0, 0], sizes = [2, 128], strides = [1, 1]} : vector<2x384xf32> to vector<2x128xf32>
      %28 = arith.addf %26, %27 : vector<2x128xf32>
      %29 = arith.negf %28 : vector<2x128xf32>
      %30 = math.exp %29 : vector<2x128xf32>
      %cst_23 = arith.constant 1.000000e+00 : f32
      %31 = vector.broadcast %cst_23 : f32 to vector<2x128xf32>
      %32 = arith.addf %31, %30 : vector<2x128xf32>
      %33 = arith.divf %31, %32 : vector<2x128xf32>
      %34 = vector.extract_strided_slice %22 {offsets = [0, 128], sizes = [2, 128], strides = [1, 1]} : vector<2x384xf32> to vector<2x128xf32>
      %35 = vector.extract_strided_slice %25 {offsets = [0, 128], sizes = [2, 128], strides = [1, 1]} : vector<2x384xf32> to vector<2x128xf32>
      %36 = arith.addf %34, %35 : vector<2x128xf32>
      %37 = arith.negf %36 : vector<2x128xf32>
      %38 = math.exp %37 : vector<2x128xf32>
      %cst_24 = arith.constant 1.000000e+00 : f32
      %39 = vector.broadcast %cst_24 : f32 to vector<2x128xf32>
      %40 = arith.addf %39, %38 : vector<2x128xf32>
      %41 = arith.divf %39, %40 : vector<2x128xf32>
      %42 = vector.extract_strided_slice %22 {offsets = [0, 256], sizes = [2, 128], strides = [1, 1]} : vector<2x384xf32> to vector<2x128xf32>
      %43 = vector.extract_strided_slice %25 {offsets = [0, 256], sizes = [2, 128], strides = [1, 1]} : vector<2x384xf32> to vector<2x128xf32>
      %44 = arith.mulf %33, %43 : vector<2x128xf32>
      %45 = arith.addf %42, %44 : vector<2x128xf32>
      %46 = math.tanh %45 : vector<2x128xf32>
      %cst_25 = arith.constant 1.000000e+00 : f32
      %47 = vector.broadcast %cst_25 : f32 to vector<2x128xf32>
      %48 = arith.subf %47, %41 : vector<2x128xf32>
      %49 = arith.mulf %48, %46 : vector<2x128xf32>
      %50 = arith.mulf %41, %arg9 : vector<2x128xf32>
      %51 = arith.addf %49, %50 : vector<2x128xf32>
      %52 = vector.broadcast %arg8 : i32 to vector<2x1xi32>
      %53 = arith.cmpi eq, %10, %52 : vector<2x1xi32>
      %54 = vector.shape_cast %53 : vector<2x1xi1> to vector<2x1xi1>
      %55 = vector.broadcast %54 : vector<2x1xi1> to vector<2x128xi1>
      %56 = arith.select %55, %51, %arg10 : vector<2x128xi1>, vector<2x128xf32>
      scf.yield %51, %56 : vector<2x128xf32>, vector<2x128xf32>
    }
    %c8_i32_15 = arith.constant 8 : i32
    %c0_16 = arith.constant 0 : index
    %c0_17 = arith.constant 0 : index
    %15 = vector.load %arg6[%c0_16, %c0_17] : memref<2x128xf32, #tpu.memory_space<vmem>>, vector<2x128xf32>
    tpu.vector_store %arg6[%c0_16, %c0_17], %14#1 {strides = array<i32>} : memref<2x128xf32, #tpu.memory_space<vmem>>, vector<2x128xf32>,
    return
  }
}

module attributes {stable_mosaic.version = 11 : i64} {
  func.func @kernel(%arg0: memref<8x128xf32, #tpu.memory_space<vmem>>, %arg1: memref<128x512xbf16, #tpu.memory_space<vmem>>, %arg2: memref<1x512xf32, #tpu.memory_space<vmem>>, %arg3: memref<128x512xf32, #tpu.memory_space<vmem>>, %arg4: memref<1x512xf32, #tpu.memory_space<vmem>>, %arg5: memref<128x64xbf16, #tpu.memory_space<vmem>>, %arg6: memref<1x64xf32, #tpu.memory_space<vmem>>, %arg7: memref<64x128xbf16, #tpu.memory_space<vmem>>, %arg8: memref<1x128xf32, #tpu.memory_space<vmem>>, %arg9: memref<8x128xf32, #tpu.memory_space<vmem>>, %arg10: memref<8x512xf32, #tpu.memory_space<vmem>>, %arg11: memref<4x2x128xf32, #tpu.memory_space<vmem>>) attributes {dimension_semantics = [], scalar_prefetch = 0 : i64, scratch_operands = 2 : i64, tpu.core_type = #tpu.core_type<tc>} {
    %c0 = arith.constant 0 : index
    %c0_0 = arith.constant 0 : index
    %0 = vector.load %arg0[%c0, %c0_0] : memref<8x128xf32, #tpu.memory_space<vmem>>, vector<8x128xf32>
    %1 = arith.truncf %0 : vector<8x128xf32> to vector<8x128xbf16>
    %c0_1 = arith.constant 0 : index
    %c0_2 = arith.constant 0 : index
    %2 = vector.load %arg1[%c0_1, %c0_2] : memref<128x512xbf16, #tpu.memory_space<vmem>>, vector<128x512xbf16>
    %cst = arith.constant dense<0.000000e+00> : vector<8x512xf32>
    %3 = tpu.matmul %1, %2, %cst {dimension_numbers = #tpu.dot_dimension_numbers<[1], [0], [0], [1], [0, 0, 1, 1], [], []>} : vector<8x128xbf16>, vector<128x512xbf16>, vector<8x512xf32> -> vector<8x512xf32>
    %c0_3 = arith.constant 0 : index
    %c0_4 = arith.constant 0 : index
    %4 = vector.load %arg2[%c0_3, %c0_4] : memref<1x512xf32, #tpu.memory_space<vmem>>, vector<1x512xf32>
    %5 = vector.broadcast %4 : vector<1x512xf32> to vector<8x512xf32>
    %6 = arith.addf %3, %5 : vector<8x512xf32>
    %c0_5 = arith.constant 0 : index
    %c0_6 = arith.constant 0 : index
    %7 = vector.load %arg10[%c0_5, %c0_6] : memref<8x512xf32, #tpu.memory_space<vmem>>, vector<8x512xf32>
    tpu.vector_store %arg10[%c0_5, %c0_6], %6 {strides = array<i32>} : memref<8x512xf32, #tpu.memory_space<vmem>>, vector<8x512xf32>,
    %c0_7 = arith.constant 0 : index
    %c0_8 = arith.constant 0 : index
    %8 = vector.load %arg3[%c0_7, %c0_8] : memref<128x512xf32, #tpu.memory_space<vmem>>, vector<128x512xf32>
    %c0_9 = arith.constant 0 : index
    %c0_10 = arith.constant 0 : index
    %9 = vector.load %arg4[%c0_9, %c0_10] : memref<1x512xf32, #tpu.memory_space<vmem>>, vector<1x512xf32>
    %cst_11 = arith.constant 0.000000e+00 : f32
    %10 = vector.broadcast %cst_11 : f32 to vector<2x128xf32>
    %cst_12 = arith.constant 0.000000e+00 : f32
    %11 = vector.broadcast %cst_12 : f32 to vector<2x128xf32>
    %c0_i32 = arith.constant 0 : i32
    %c4_i32 = arith.constant 4 : i32
    %12 = arith.addi %c0_i32, %c4_i32 : i32
    %c1_i32 = arith.constant 1 : i32
    %13:2 = scf.for %arg12 = %c0_i32 to %12 step %c1_i32 iter_args(%arg13 = %10, %arg14 = %11) -> (vector<2x128xf32>, vector<2x128xf32>)  : i32 {
      %c0_i32_29 = arith.constant 0 : i32
      %46 = arith.addi %c0_i32_29, %arg12 : i32
      %47 = arith.index_cast %46 : i32 to index
      %c0_30 = arith.constant 0 : index
      %48 = vector.load %arg10[%47, %c0_30] : memref<8x512xf32, #tpu.memory_space<vmem>>, vector<1x512xf32>
      %c4_i32_31 = arith.constant 4 : i32
      %49 = arith.addi %c4_i32_31, %arg12 : i32
      %50 = arith.index_cast %49 : i32 to index
      %c0_32 = arith.constant 0 : index
      %51 = vector.load %arg10[%50, %c0_32] : memref<8x512xf32, #tpu.memory_space<vmem>>, vector<1x512xf32>
      %52 = tpu.concatenate %48, %51 in 0 : vector<1x512xf32>, vector<1x512xf32> -> vector<2x512xf32>
      %cst_33 = arith.constant dense<0.000000e+00> : vector<2x512xf32>
      %53 = tpu.matmul %arg13, %8, %cst_33 {dimension_numbers = #tpu.dot_dimension_numbers<[1], [0], [0], [1], [0, 0, 1, 1], [], []>} : vector<2x128xf32>, vector<128x512xf32>, vector<2x512xf32> -> vector<2x512xf32>
      %54 = arith.addf %52, %53 : vector<2x512xf32>
      %55 = vector.broadcast %9 : vector<1x512xf32> to vector<2x512xf32>
      %56 = arith.addf %54, %55 : vector<2x512xf32>
      %57 = vector.extract_strided_slice %56 {offsets = [0, 0], sizes = [2, 128], strides = [1, 1]} : vector<2x512xf32> to vector<2x128xf32>
      %58 = arith.negf %57 : vector<2x128xf32>
      %59 = math.exp %58 : vector<2x128xf32>
      %cst_34 = arith.constant 1.000000e+00 : f32
      %60 = vector.broadcast %cst_34 : f32 to vector<2x128xf32>
      %61 = arith.addf %60, %59 : vector<2x128xf32>
      %62 = arith.divf %60, %61 : vector<2x128xf32>
      %63 = vector.extract_strided_slice %56 {offsets = [0, 128], sizes = [2, 128], strides = [1, 1]} : vector<2x512xf32> to vector<2x128xf32>
      %64 = arith.negf %63 : vector<2x128xf32>
      %65 = math.exp %64 : vector<2x128xf32>
      %cst_35 = arith.constant 1.000000e+00 : f32
      %66 = vector.broadcast %cst_35 : f32 to vector<2x128xf32>
      %67 = arith.addf %66, %65 : vector<2x128xf32>
      %68 = arith.divf %66, %67 : vector<2x128xf32>
      %69 = vector.extract_strided_slice %56 {offsets = [0, 256], sizes = [2, 128], strides = [1, 1]} : vector<2x512xf32> to vector<2x128xf32>
      %70 = math.tanh %69 : vector<2x128xf32>
      %71 = vector.extract_strided_slice %56 {offsets = [0, 384], sizes = [2, 128], strides = [1, 1]} : vector<2x512xf32> to vector<2x128xf32>
      %72 = arith.negf %71 : vector<2x128xf32>
      %73 = math.exp %72 : vector<2x128xf32>
      %cst_36 = arith.constant 1.000000e+00 : f32
      %74 = vector.broadcast %cst_36 : f32 to vector<2x128xf32>
      %75 = arith.addf %74, %73 : vector<2x128xf32>
      %76 = arith.divf %74, %75 : vector<2x128xf32>
      %77 = arith.mulf %68, %arg14 : vector<2x128xf32>
      %78 = arith.mulf %62, %70 : vector<2x128xf32>
      %79 = arith.addf %77, %78 : vector<2x128xf32>
      %80 = math.tanh %79 : vector<2x128xf32>
      %81 = arith.mulf %76, %80 : vector<2x128xf32>
      %82 = arith.index_cast %arg12 : i32 to index
      %c0_37 = arith.constant 0 : index
      %c0_38 = arith.constant 0 : index
      %83 = vector.load %arg11[%82, %c0_37, %c0_38] : memref<4x2x128xf32, #tpu.memory_space<vmem>>, vector<1x2x128xf32>
      %84 = vector.shape_cast %83 : vector<1x2x128xf32> to vector<2x128xf32>
      %85 = vector.shape_cast %81 : vector<2x128xf32> to vector<1x2x128xf32>
      tpu.vector_store %arg11[%82, %c0_37, %c0_38], %85 {strides = array<i32>} : memref<4x2x128xf32, #tpu.memory_space<vmem>>, vector<1x2x128xf32>,
      scf.yield %81, %79 : vector<2x128xf32>, vector<2x128xf32>
    }
    %c4_i32_13 = arith.constant 4 : i32
    %c0_14 = arith.constant 0 : index
    %c0_15 = arith.constant 0 : index
    %c0_16 = arith.constant 0 : index
    %14 = vector.load %arg11[%c0_14, %c0_15, %c0_16] : memref<4x2x128xf32, #tpu.memory_space<vmem>>, vector<4x2x128xf32>
    %15 = vector.extract_strided_slice %14 {offsets = [0, 0, 0], sizes = [1, 1, 128], strides = [1, 1, 1]} : vector<4x2x128xf32> to vector<1x1x128xf32>
    %16 = vector.shape_cast %15 : vector<1x1x128xf32> to vector<1x128xf32>
    %17 = vector.extract_strided_slice %14 {offsets = [1, 0, 0], sizes = [1, 1, 128], strides = [1, 1, 1]} : vector<4x2x128xf32> to vector<1x1x128xf32>
    %18 = vector.shape_cast %17 : vector<1x1x128xf32> to vector<1x128xf32>
    %19 = vector.extract_strided_slice %14 {offsets = [2, 0, 0], sizes = [1, 1, 128], strides = [1, 1, 1]} : vector<4x2x128xf32> to vector<1x1x128xf32>
    %20 = vector.shape_cast %19 : vector<1x1x128xf32> to vector<1x128xf32>
    %21 = vector.extract_strided_slice %14 {offsets = [3, 0, 0], sizes = [1, 1, 128], strides = [1, 1, 1]} : vector<4x2x128xf32> to vector<1x1x128xf32>
    %22 = vector.shape_cast %21 : vector<1x1x128xf32> to vector<1x128xf32>
    %23 = vector.extract_strided_slice %14 {offsets = [0, 1, 0], sizes = [1, 1, 128], strides = [1, 1, 1]} : vector<4x2x128xf32> to vector<1x1x128xf32>
    %24 = vector.shape_cast %23 : vector<1x1x128xf32> to vector<1x128xf32>
    %25 = vector.extract_strided_slice %14 {offsets = [1, 1, 0], sizes = [1, 1, 128], strides = [1, 1, 1]} : vector<4x2x128xf32> to vector<1x1x128xf32>
    %26 = vector.shape_cast %25 : vector<1x1x128xf32> to vector<1x128xf32>
    %27 = vector.extract_strided_slice %14 {offsets = [2, 1, 0], sizes = [1, 1, 128], strides = [1, 1, 1]} : vector<4x2x128xf32> to vector<1x1x128xf32>
    %28 = vector.shape_cast %27 : vector<1x1x128xf32> to vector<1x128xf32>
    %29 = vector.extract_strided_slice %14 {offsets = [3, 1, 0], sizes = [1, 1, 128], strides = [1, 1, 1]} : vector<4x2x128xf32> to vector<1x1x128xf32>
    %30 = vector.shape_cast %29 : vector<1x1x128xf32> to vector<1x128xf32>
    %31 = tpu.concatenate %16, %18, %20, %22, %24, %26, %28, %30 in 0 : vector<1x128xf32>, vector<1x128xf32>, vector<1x128xf32>, vector<1x128xf32>, vector<1x128xf32>, vector<1x128xf32>, vector<1x128xf32>, vector<1x128xf32> -> vector<8x128xf32>
    %32 = arith.truncf %31 : vector<8x128xf32> to vector<8x128xbf16>
    %c0_17 = arith.constant 0 : index
    %c0_18 = arith.constant 0 : index
    %33 = vector.load %arg5[%c0_17, %c0_18] : memref<128x64xbf16, #tpu.memory_space<vmem>>, vector<128x64xbf16>
    %cst_19 = arith.constant dense<0.000000e+00> : vector<8x64xf32>
    %34 = tpu.matmul %32, %33, %cst_19 {dimension_numbers = #tpu.dot_dimension_numbers<[1], [0], [0], [1], [0, 0, 1, 1], [], []>} : vector<8x128xbf16>, vector<128x64xbf16>, vector<8x64xf32> -> vector<8x64xf32>
    %c0_20 = arith.constant 0 : index
    %c0_21 = arith.constant 0 : index
    %35 = vector.load %arg6[%c0_20, %c0_21] : memref<1x64xf32, #tpu.memory_space<vmem>>, vector<1x64xf32>
    %36 = vector.broadcast %35 : vector<1x64xf32> to vector<8x64xf32>
    %37 = arith.addf %34, %36 : vector<8x64xf32>
    %38 = math.tanh %37 : vector<8x64xf32>
    %39 = arith.truncf %38 : vector<8x64xf32> to vector<8x64xbf16>
    %c0_22 = arith.constant 0 : index
    %c0_23 = arith.constant 0 : index
    %40 = vector.load %arg7[%c0_22, %c0_23] : memref<64x128xbf16, #tpu.memory_space<vmem>>, vector<64x128xbf16>
    %cst_24 = arith.constant dense<0.000000e+00> : vector<8x128xf32>
    %41 = tpu.matmul %39, %40, %cst_24 {dimension_numbers = #tpu.dot_dimension_numbers<[1], [0], [0], [1], [0, 0, 1, 1], [], []>} : vector<8x64xbf16>, vector<64x128xbf16>, vector<8x128xf32> -> vector<8x128xf32>
    %c0_25 = arith.constant 0 : index
    %c0_26 = arith.constant 0 : index
    %42 = vector.load %arg8[%c0_25, %c0_26] : memref<1x128xf32, #tpu.memory_space<vmem>>, vector<1x128xf32>
    %43 = vector.broadcast %42 : vector<1x128xf32> to vector<8x128xf32>
    %44 = arith.addf %41, %43 : vector<8x128xf32>
    %c0_27 = arith.constant 0 : index
    %c0_28 = arith.constant 0 : index
    %45 = vector.load %arg9[%c0_27, %c0_28] : memref<8x128xf32, #tpu.memory_space<vmem>>, vector<8x128xf32>
    tpu.vector_store %arg9[%c0_27, %c0_28], %44 {strides = array<i32>} : memref<8x128xf32, #tpu.memory_space<vmem>>, vector<8x128xf32>,
    return
  }
}

</mosaic_0001>

<bundles_post_ra>
// kernel: babyai_forward.3
= control target key start
LH: loop header
LB: loop body
LE: loop exit
PB: predicated region body
PF: predicated region fallthrough
CT: control target
= control target key end

     0   :  { %s1193_s1 = inlined_call_operand.vmem [shape: bf16[128,384], index: 1, kind: input, shape index: {}]   ;;  %s1194_s6 = inlined_call_operand.vmem [shape: f32[2,128], index: 6, kind: output, shape index: {}]   ;;  %s1195_s0 = inlined_call_operand.vmem [shape: f32[16,128], index: 0, kind: input, shape index: {}]   ;;  %s1196_s3 = inlined_call_operand.vmem [shape: f32[128,384], index: 3, kind: input, shape index: {}]   ;;  %s1197_s2 = inlined_call_operand.vmem [shape: f32[1,384], index: 2, kind: input, shape index: {}]   ;;  %s1198_s4 = inlined_call_operand.vmem [shape: f32[1,384], index: 4, kind: input, shape index: {}]   ;;  %s1199_s5 = inlined_call_operand.vmem [shape: s32[2,1], index: 5, kind: input, shape index: {}]  }
   0x1   :  { %v567_v0 = vld [vmem:[%s1193_s1 + $0xa8] sm:$0xf]  ;;  %v603_v1 = vld [vmem:[%s1193_s1 + $0xb0] sm:$0xf0]  ;;  %v602_v2 = vld [vmem:[%s1193_s1 + $0xac] sm:$0xf] }
   0x2   :  { %v568_v3 = vor.u32 %v603_v1, %v567_v0  ;;  %v569_v4 = vld [vmem:[%s1193_s1 + $0xb4] sm:$0xf0]  ;;  %v575_v5 = vld [vmem:[%s1193_s1 + $0xb0] sm:$0xf]  ;;  %v604_v6 = vld [vmem:[%s1193_s1 + $0xb8] sm:$0xf0] }
   0x3   :  { %v572_v7 = vor.u32 %v602_v2, %v569_v4  ;;  %v576_v8 = vor.u32 %v604_v6, %v575_v5  ;;  %v555_v9 = vld [vmem:[%s1193_s1 + $0x90] sm:$0xf]  ;;  %v600_v10 = vld [vmem:[%s1193_s1 + $0x98] sm:$0xf0]  ;;  %v599_v11 = vld [vmem:[%s1193_s1 + $0x94] sm:$0xf] }
   0x4   :  { %194 = vmatpush.bf16.msra.mxu0 %v568_v3  ;;  %v556_v12 = vor.u32 %v600_v10, %v555_v9  ;;  %v557_v13 = vld [vmem:[%s1193_s1 + $0x9c] sm:$0xf0]  ;;  %v563_v14 = vld [vmem:[%s1193_s1 + $0x98] sm:$0xf]  ;;  %v601_v15 = vld [vmem:[%s1193_s1 + $0xa0] sm:$0xf0] }
   0x5   :  { %208 = vmatpush.bf16.msra.mxu1 %v572_v7  ;;  %222 = vmatpush.bf16.msra.mxu2 %v576_v8  ;;  %v560_v16 = vor.u32 %v599_v11, %v557_v13  ;;  %v564_v17 = vor.u32 %v601_v15, %v563_v14  ;;  %v543_v18 = vld [vmem:[%s1193_s1 + $0x78] sm:$0xf]  ;;  %v597_v19 = vld [vmem:[%s1193_s1 + $0x80] sm:$0xf0]  ;;  %v596_v20 = vld [vmem:[%s1193_s1 + $0x7c] sm:$0xf] }
   0x6   :  { %v545_v21 = vld [vmem:[%s1193_s1 + $0x84] sm:$0xf0]  ;;  %v551_v22 = vld [vmem:[%s1193_s1 + $0x80] sm:$0xf]  ;;  %v598_v23 = vld [vmem:[%s1193_s1 + $0x88] sm:$0xf0]  ;;  %v544_v24 = vor.u32 %v597_v19, %v543_v18 }
   0x7   :  { %v548_v25 = vor.u32 %v596_v20, %v545_v21  ;;  %v552_v26 = vor.u32 %v598_v23, %v551_v22  ;;  %v531_v27 = vld [vmem:[%s1193_s1 + $0x60] sm:$0xf]  ;;  %v594_v28 = vld [vmem:[%s1193_s1 + $0x68] sm:$0xf0]  ;;  %v593_v29 = vld [vmem:[%s1193_s1 + $0x64] sm:$0xf] }
   0x8   :  { %195 = vmatpush.bf16.msra.mxu0 %v556_v12  ;;  %v533_v30 = vld [vmem:[%s1193_s1 + $0x6c] sm:$0xf0]  ;;  %v539_v31 = vld [vmem:[%s1193_s1 + $0x68] sm:$0xf]  ;;  %v595_v32 = vld [vmem:[%s1193_s1 + $0x70] sm:$0xf0]  ;;  %v532_v33 = vor.u32 %v594_v28, %v531_v27 }
   0x9   :  { %209 = vmatpush.bf16.msra.mxu1 %v560_v16  ;;  %223 = vmatpush.bf16.msra.mxu2 %v564_v17  ;;  %v536_v34 = vor.u32 %v593_v29, %v533_v30  ;;  %v540_v35 = vor.u32 %v595_v32, %v539_v31  ;;  %v519_v36 = vld [vmem:[%s1193_s1 + $0x48] sm:$0xf]  ;;  %v591_v37 = vld [vmem:[%s1193_s1 + $0x50] sm:$0xf0]  ;;  %v590_v38 = vld [vmem:[%s1193_s1 + $0x4c] sm:$0xf] }
   0xa   :  { %v521_v39 = vld [vmem:[%s1193_s1 + $0x54] sm:$0xf0]  ;;  %v527_v40 = vld [vmem:[%s1193_s1 + $0x50] sm:$0xf]  ;;  %v592_v41 = vld [vmem:[%s1193_s1 + $0x58] sm:$0xf0]  ;;  %v520_v42 = vor.u32 %v591_v37, %v519_v36 }
   0xb   :  { %v524_v43 = vor.u32 %v590_v38, %v521_v39  ;;  %v528_v44 = vor.u32 %v592_v41, %v527_v40  ;;  %v507_v45 = vld [vmem:[%s1193_s1 + $0x30] sm:$0xf]  ;;  %v588_v46 = vld [vmem:[%s1193_s1 + $0x38] sm:$0xf0]  ;;  %v587_v47 = vld [vmem:[%s1193_s1 + $0x34] sm:$0xf] }
   0xc   :  { %196 = vmatpush.bf16.msra.mxu0 %v544_v24  ;;  %v509_v48 = vld [vmem:[%s1193_s1 + $0x3c] sm:$0xf0]  ;;  %v515_v49 = vld [vmem:[%s1193_s1 + $0x38] sm:$0xf]  ;;  %v589_v50 = vld [vmem:[%s1193_s1 + $0x40] sm:$0xf0]  ;;  %v508_v51 = vor.u32 %v588_v46, %v507_v45 }
   0xd   :  { %210 = vmatpush.bf16.msra.mxu1 %v548_v25  ;;  %224 = vmatpush.bf16.msra.mxu2 %v552_v26  ;;  %v512_v52 = vor.u32 %v587_v47, %v509_v48  ;;  %v516_v53 = vor.u32 %v589_v50, %v515_v49  ;;  %v495_v54 = vld [vmem:[%s1193_s1 + $0x18] sm:$0xf]  ;;  %v585_v55 = vld [vmem:[%s1193_s1 + $0x20] sm:$0xf0]  ;;  %v584_v56 = vld [vmem:[%s1193_s1 + $0x1c] sm:$0xf] }
   0xe   :  { %v497_v57 = vld [vmem:[%s1193_s1 + $0x24] sm:$0xf0]  ;;  %v503_v58 = vld [vmem:[%s1193_s1 + $0x20] sm:$0xf]  ;;  %v586_v59 = vld [vmem:[%s1193_s1 + $0x28] sm:$0xf0]  ;;  %v496_v60 = vor.u32 %v585_v55, %v495_v54 }
   0xf   :  { %v500_v61 = vor.u32 %v584_v56, %v497_v57  ;;  %v504_v62 = vor.u32 %v586_v59, %v503_v58  ;;  %v483_v63 = vld [vmem:[%s1193_s1] sm:$0xf]  ;;  %v582_v0 = vld [vmem:[%s1193_s1 + $0x8] sm:$0xf0]  ;;  %v581_v1 = vld [vmem:[%s1193_s1 + $0x4] sm:$0xf] }
  0x10   :  { %197 = vmatpush.bf16.msra.mxu0 %v532_v33  ;;  %v485_v2 = vld [vmem:[%s1193_s1 + $0xc] sm:$0xf0]  ;;  %v491_v3 = vld [vmem:[%s1193_s1 + $0x8] sm:$0xf]  ;;  %v583_v4 = vld [vmem:[%s1193_s1 + $0x10] sm:$0xf0]  ;;  %v484_v5 = vor.u32 %v582_v0, %v483_v63 }
  0x11   :  { %211 = vmatpush.bf16.msra.mxu1 %v536_v34  ;;  %225 = vmatpush.bf16.msra.mxu2 %v540_v35  ;;  %v23_v6 = vld [vmem:[%s1195_s0] sm:$0xff]  ;;  %v24_v7 = vld [vmem:[%s1195_s0 + $0x8] sm:$0xff]  ;;  %v488_v8 = vor.u32 %v581_v1, %v485_v2  ;;  %v492_v9 = vor.u32 %v583_v4, %v491_v3  ;;  %v864_v13 = vld [vmem:[%s1196_s3 + $0x10] sm:$0xff] }
  0x12   :  { %v25_v10 = vpack.c.bf16 %v24_v7, %v23_v6  ;;  %v854_v11 = vld [vmem:[%s1196_s3] sm:$0xff]  ;;  %v859_v12 = vld [vmem:[%s1196_s3 + $0x8] sm:$0xff]  ;;  %1204 = vst [vmem:[#allocation5_spill] sm:$0xff] %v864_v13  ;;  %v869_v14 = vld [vmem:[%s1196_s3 + $0x18] sm:$0xff]  ;;  %v1106_v13 = vmov 0.0  }
  0x13   :  { %1202 = vst [vmem:[#allocation3_spill] sm:$0xff] %v854_v11  ;;  %v874_v15 = vld [vmem:[%s1196_s3 + $0x20] sm:$0xff]  ;;  %v879_v16 = vld [vmem:[%s1196_s3 + $0x28] sm:$0xff]  ;;  %v884_v17 = vld [vmem:[%s1196_s3 + $0x30] sm:$0xff] }
  0x14   :  { %198 = vmatpush.bf16.msra.mxu0 %v520_v42  ;;  %1203 = vst [vmem:[#allocation4_spill] sm:$0xff] %v859_v12  ;;  %v889_v18 = vld [vmem:[%s1196_s3 + $0x38] sm:$0xff]  ;;  %v894_v19 = vld [vmem:[%s1196_s3 + $0x40] sm:$0xff]  ;;  %v899_v20 = vld [vmem:[%s1196_s3 + $0x48] sm:$0xff] }
  0x15   :  { %212 = vmatpush.bf16.msra.mxu1 %v524_v43  ;;  %226 = vmatpush.bf16.msra.mxu2 %v528_v44  ;;  %1205 = vst [vmem:[#allocation6_spill] sm:$0xff] %v869_v14  ;;  %v904_v21 = vld [vmem:[%s1196_s3 + $0x50] sm:$0xff]  ;;  %v909_v22 = vld [vmem:[%s1196_s3 + $0x58] sm:$0xff]  ;;  %v914_v23 = vld [vmem:[%s1196_s3 + $0x60] sm:$0xff] }
  0x16   :  { %1206 = vst [vmem:[#allocation7_spill] sm:$0xff] %v874_v15  ;;  %v919_v24 = vld [vmem:[%s1196_s3 + $0x68] sm:$0xff]  ;;  %v924_v25 = vld [vmem:[%s1196_s3 + $0x70] sm:$0xff]  ;;  %v929_v26 = vld [vmem:[%s1196_s3 + $0x78] sm:$0xff] }
  0x17   :  { %1207 = vst [vmem:[#allocation8_spill] sm:$0xff] %v879_v16  ;;  %v934_v27 = vld [vmem:[%s1196_s3 + $0x80] sm:$0xff]  ;;  %v939_v28 = vld [vmem:[%s1196_s3 + $0x88] sm:$0xff]  ;;  %v947_v30 = vld [vmem:[%s1196_s3 + $0x90] sm:$0xff] }
  0x18   :  { %199 = vmatpush.bf16.msra.mxu0 %v508_v51  ;;  %1208 = vst [vmem:[#allocation9_spill] sm:$0xff] %v884_v17  ;;  %v58_v29 = vld [vmem:[%s1197_s2] sm:$0x7]  ;;  %v952_v31 = vld [vmem:[%s1196_s3 + $0x98] sm:$0xff]  ;;  %v962_v33 = vld [vmem:[%s1196_s3 + $0xa8] sm:$0xff] }
  0x19   :  { %213 = vmatpush.bf16.msra.mxu1 %v512_v52  ;;  %227 = vmatpush.bf16.msra.mxu2 %v516_v53  ;;  %1209 = vst [vmem:[#allocation10_spill] sm:$0xff] %v889_v18  ;;  %v957_v32 = vld [vmem:[%s1196_s3 + $0xa0] sm:$0xff]  ;;  %v967_v34 = vld [vmem:[%s1196_s3 + $0xb0] sm:$0xff]  ;;  %v972_v35 = vld [vmem:[%s1196_s3 + $0xb8] sm:$0xff]  ;;  %v60_v45 = vperm.slane %v58_v29, 0  ;;  %v61_v49 = vperm.slane %v58_v29, 1 }
  0x1a   :  { %1210 = vst [vmem:[#allocation11_spill] sm:$0xff] %v894_v19  ;;  %v977_v36 = vld [vmem:[%s1196_s3 + $0xc0] sm:$0xff]  ;;  %v982_v37 = vld [vmem:[%s1196_s3 + $0xc8] sm:$0xff]  ;;  %v987_v38 = vld [vmem:[%s1196_s3 + $0xd0] sm:$0xff]  ;;  %v62_v4 = vperm.slane %v58_v29, 2 }
  0x1b   :  { %1211 = vst [vmem:[#allocation12_spill] sm:$0xff] %v899_v20  ;;  %v992_v39 = vld [vmem:[%s1196_s3 + $0xd8] sm:$0xff]  ;;  %v997_v40 = vld [vmem:[%s1196_s3 + $0xe0] sm:$0xff]  ;;  %v1002_v41 = vld [vmem:[%s1196_s3 + $0xe8] sm:$0xff] }
  0x1c   :  { %200 = vmatpush.bf16.msra.mxu0 %v496_v60  ;;  %v1007_v42 = vld [vmem:[%s1196_s3 + $0xf0] sm:$0xff]  ;;  %v1012_v43 = vld [vmem:[%s1196_s3 + $0xf8] sm:$0xff]  ;;  %v1017_v44 = vld [vmem:[%s1196_s3 + $0x100] sm:$0xff] }
  0x1d   :  { %214 = vmatpush.bf16.msra.mxu1 %v500_v61  ;;  %228 = vmatpush.bf16.msra.mxu2 %v504_v62  ;;  %v1022_v46 = vld [vmem:[%s1196_s3 + $0x108] sm:$0xff]  ;;  %v1027_v47 = vld [vmem:[%s1196_s3 + $0x110] sm:$0xff]  ;;  %v1032_v48 = vld [vmem:[%s1196_s3 + $0x118] sm:$0xff] }
  0x1e   :  { %v1037_v50 = vld [vmem:[%s1196_s3 + $0x120] sm:$0xff]  ;;  %v1042_v51 = vld [vmem:[%s1196_s3 + $0x128] sm:$0xff]  ;;  %v1047_v52 = vld [vmem:[%s1196_s3 + $0x130] sm:$0xff] }
  0x1f   :  { %v1052_v53 = vld [vmem:[%s1196_s3 + $0x138] sm:$0xff]  ;;  %v1057_v54 = vld [vmem:[%s1196_s3 + $0x140] sm:$0xff]  ;;  %v1062_v55 = vld [vmem:[%s1196_s3 + $0x148] sm:$0xff] }
  0x20   :  { %201 = vmatpush.bf16.msra.mxu0 %v484_v5  ;;  %v1067_v57 = vld [vmem:[%s1196_s3 + $0x150] sm:$0xff]  ;;  %v1072_v58 = vld [vmem:[%s1196_s3 + $0x158] sm:$0xff]  ;;  %v1077_v59 = vld [vmem:[%s1196_s3 + $0x160] sm:$0xff] }
  0x21   :  { %215 = vmatpush.bf16.msra.mxu1 %v488_v8  ;;  %229 = vmatpush.bf16.msra.mxu2 %v492_v9  ;;  %v1082_v62 = vld [vmem:[%s1196_s3 + $0x168] sm:$0xff]  ;;  %v1087_v63 = vld [vmem:[%s1196_s3 + $0x170] sm:$0xff]  ;;  %v1092_v0 = vld [vmem:[%s1196_s3 + $0x178] sm:$0xff]  ;;  %s1108_s3 = smov 0  }
  0x22   :  { %1212 = vst [vmem:[#allocation13_spill] sm:$0xff] %v1092_v0  ;;  %v1097_v2 = vld [vmem:[%s1198_s4] sm:$0x7] }
  0x23   :  { %202 = vmatmul.bf16.vlgmr.msra.gmra.mxu0 %v25_v10  ;;  %1213 = vst [vmem:[#allocation14_spill] sm:$0xff] %v1097_v2  ;;  %v1102_v3 = vld [vmem:[%s1199_s5] sm:$0x3]  ;;  %v1104_v2 = vmov 0.0  }
  0x24   :  { %216 = vmatmul.bf16.vlgmr.msra.gmra.mxu1 %v25_v10  ;;  %230 = vmatmul.bf16.vlgmr.msra.gmra.mxu2 %v25_v10  ;;  %1214 = vst [vmem:[#allocation15_spill] sm:$0xff] %v1102_v3 }
  0xa0   :  { %v203_v56 = vpop.f32.mrf.mxu0 }
  0xa1   :  { %v204_v60 = vadd.f32 %v203_v56, %v60_v45  ;;  %v217_v61 = vpop.f32.mrf.mxu1 }
  0xa2   :  { %v218_v1 = vadd.f32 %v217_v61, %v61_v49 }
  0xa3   :  { %236 = vst [vmem:[#allocation2] sm:$0xff] %v204_v60 }
  0xa4   :  { %237 = vst [vmem:[#allocation2 + $0x8] sm:$0xff] %v218_v1 }
  0xa7   :  { %v231_v5 = vpop.f32.mrf.mxu2 }
  0xa8   :  { %v232_v6 = vadd.f32 %v231_v5, %v62_v4  ;;  %v205_v7 = vpop.f32.mrf.mxu0 }
  0xa9   :  { %v206_v8 = vadd.f32 %v205_v7, %v60_v45  ;;  %v219_v9 = vpop.f32.mrf.mxu1 }
  0xaa   :  { %238 = vst [vmem:[#allocation2 + $0x10] sm:$0xff] %v232_v6  ;;  %v220_v10 = vadd.f32 %v219_v9, %v61_v49 }
  0xab   :  { %239 = vst [vmem:[#allocation2 + $0x18] sm:$0xff] %v206_v8 }
  0xac   :  { %240 = vst [vmem:[#allocation2 + $0x20] sm:$0xff] %v220_v10 }
  0xaf   :  { %v233_v56 = vpop.f32.mrf.mxu2 }
  0xb0   :  { %v234_v61 = vadd.f32 %v233_v56, %v62_v4 }
  0xb2   :  { %241 = vst [vmem:[#allocation2 + $0x28] sm:$0xff] %v234_v61 }
  0xb3 LB: > { %344 = vmatpush.msra.mxu0 %v1082_v62  ;;  %364 = vmatpush.msra.mxu1 %v1087_v63  ;;  %v1215_v0 = vld [vmem:[#allocation13_spill] sm:$0xff]  ;;  %v451_v29 = vstv %s663_s3  ;;  %v665_v45 = vmov 0   ;;  %v1216_v3 = vld [vmem:[#allocation15_spill] sm:$0xff]  ;;  %v1217_v20 = vld [vmem:[#allocation12_spill] sm:$0xff]  ;;  %s309_s4 = sadd.s32 8, %s663_s3  ;;  %s300_s5 = sshra.s32 %s663_s3, 3  ;;  %s663_s3 = sphi %s1108_s3, %s297_s3   ;;  %v659_v13 = vphi %v1106_v13, %v450_v13   ;;  %v655_v2 = vphi %v1104_v2, %v1228_v2  }
  0xb4   : > { %384 = vmatpush.msra.mxu2 %v1215_v0  ;;  %630 = vset.pattern.permute.xlu0 %v665_v45  ;;  %vm452_vm0 = vcmp.eq.s32.totalorder %v1216_v3, %v451_v29  ;;  %v1218_v17 = vld [vmem:[#allocation9_spill] sm:$0xff]  ;;  %v1219_v18 = vld [vmem:[#allocation10_spill] sm:$0xff]  ;;  %v1220_v19 = vld [vmem:[#allocation11_spill] sm:$0xff]  ;;  %s310_s20 = sshra.s32 %s309_s4, 3  ;;  %s577_s21 = smul.u32 24, %s300_s5  ;;  %vm333_vm1 = vcmask 1040384  }
  0xb5   : > { %345 = vmatpush.msra.mxu0 %v1067_v57  ;;  %365 = vmatpush.msra.mxu1 %v1072_v58  ;;  %v453_v49 = vsel %vm452_vm0, 1, %v665_v45  ;;  %v1221_v14 = vld [vmem:[#allocation6_spill] sm:$0xff]  ;;  %v1222_v15 = vld [vmem:[#allocation7_spill] sm:$0xff]  ;;  %v1223_v16 = vld [vmem:[#allocation8_spill] sm:$0xff]  ;;  %s578_s22 = smul.u32 24, %s310_s20  ;;  %s303_s23 = sand.u32 7, %s663_s3 }
  0xb6   : > { %385 = vmatpush.msra.mxu2 %v1077_v59  ;;  %455 = vperm.xlu0 %630, %v453_v49   ;;  %v1224_v11 = vld [vmem:[#allocation3_spill] sm:$0xff]  ;;  %v1225_v12 = vld [vmem:[#allocation4_spill] sm:$0xff]  ;;  %v1226_v60 = vld [vmem:[#allocation5_spill] sm:$0xff]  ;;  %s313_s24 = sand.u32 7, %s309_s4  ;;  %s306_s1 = sadd.s32 %s577_s21, %s303_s23 }
  0xb7   : > { %346 = vmatpush.msra.mxu0 %v1052_v53  ;;  %366 = vmatpush.msra.mxu1 %v1057_v54  ;;  %s316_s25 = sadd.s32 %s578_s22, %s313_s24  ;;  %s307_s26 = scalar_lea.vmem [#allocation2], %s306_s1  ;;  %v1227_v9 = vld [vmem:[#allocation14_spill] sm:$0xff] }
  0xb8   : > { %386 = vmatpush.msra.mxu2 %v1062_v55  ;;  %s317_s27 = scalar_lea.vmem [#allocation2], %s316_s25  ;;  %v338_v10 = vperm.slane %v1227_v9, 0  ;;  %v339_v56 = vperm.slane %v1227_v9, 1  ;;  %s297_s3 = sadd.s32 1, %s663_s3  }
  0xb9   : > { %347 = vmatpush.msra.mxu0 %v1037_v50  ;;  %367 = vmatpush.msra.mxu1 %v1042_v51  ;;  %v308_v1 = vld [vmem:[%s307_s26] ss:$8 sm:$0x7]  ;;  %p294_p0 = scmp.ge.s32.totalorder %s297_s3, 8  }
  0xba   : > { %387 = vmatpush.msra.mxu2 %v1047_v52  ;;  %v318_v4 = vld [vmem:[%s317_s27] ss:$8 sm:$0x7]  ;;  %v320_v5 = vperm.slane %v308_v1, 0  ;;  %v321_v7 = vperm.slane %v308_v1, 1 }
  0xbb   : > { %348 = vmatpush.msra.mxu0 %v1022_v46  ;;  %368 = vmatpush.msra.mxu1 %v1027_v47  ;;  %v327_v6 = vperm.slane %v318_v4, 0  ;;  %v328_v8 = vperm.slane %v318_v4, 1 }
  0xbc   : > { %388 = vmatpush.msra.mxu2 %v1032_v48 }
  0xbd   : > { %349 = vmatpush.msra.mxu0 %v1007_v42  ;;  %369 = vmatpush.msra.mxu1 %v1012_v43  ;;  %v334_v61 = vsel %vm333_vm1, %v320_v5, %v327_v6  ;;  %v335_v45 = vsel %vm333_vm1, %v321_v7, %v328_v8  ;;  %v340_v7 = vperm.slane %v1227_v9, 2 }
  0xbe   : > { %389 = vmatpush.msra.mxu2 %v1017_v44 }
  0xbf   : > { %350 = vmatpush.msra.mxu0 %v992_v39  ;;  %370 = vmatpush.msra.mxu1 %v997_v40 }
  0xc0   : > { %390 = vmatpush.msra.mxu2 %v1002_v41 }
  0xc1   : > { %351 = vmatpush.msra.mxu0 %v977_v36  ;;  %371 = vmatpush.msra.mxu1 %v982_v37 }
  0xc2   : > { %391 = vmatpush.msra.mxu2 %v987_v38 }
  0xc3   : > { %352 = vmatpush.msra.mxu0 %v962_v33  ;;  %372 = vmatpush.msra.mxu1 %v967_v34 }
  0xc4   : > { %392 = vmatpush.msra.mxu2 %v972_v35 }
  0xc5   : > { %353 = vmatpush.msra.mxu0 %v947_v30  ;;  %373 = vmatpush.msra.mxu1 %v952_v31 }
  0xc6   : > { %393 = vmatpush.msra.mxu2 %v957_v32 }
  0xc7   : > { %354 = vmatpush.msra.mxu0 %v929_v26  ;;  %374 = vmatpush.msra.mxu1 %v934_v27 }
  0xc8   : > { %394 = vmatpush.msra.mxu2 %v939_v28 }
  0xc9   : > { %355 = vmatpush.msra.mxu0 %v914_v23  ;;  %375 = vmatpush.msra.mxu1 %v919_v24 }
  0xca   : > { %395 = vmatpush.msra.mxu2 %v924_v25 }
  0xcb   : > { %356 = vmatpush.msra.mxu0 %v1217_v20  ;;  %376 = vmatpush.msra.mxu1 %v904_v21 }
  0xcc   : > { %396 = vmatpush.msra.mxu2 %v909_v22 }
  0xcd   : > { %357 = vmatpush.msra.mxu0 %v1218_v17  ;;  %377 = vmatpush.msra.mxu1 %v1219_v18 }
  0xce   : > { %397 = vmatpush.msra.mxu2 %v1220_v19 }
  0xcf   : > { %358 = vmatpush.msra.mxu0 %v1221_v14  ;;  %378 = vmatpush.msra.mxu1 %v1222_v15 }
  0xd0   : > { %398 = vmatpush.msra.mxu2 %v1223_v16 }
  0xd1   : > { %359 = vmatpush.msra.mxu0 %v1224_v11  ;;  %379 = vmatpush.msra.mxu1 %v1225_v12 }
  0xd2   : > { %360 = vmatmul.f32.vlgmr.msra.gmra.mxu0 %v659_v13  ;;  %380 = vmatmul.f32.vlgmr.msra.gmra.mxu1 %v659_v13 }
  0xd3   : > { %399 = vmatpush.msra.mxu2 %v1226_v60 }
  0xd4   : > { %400 = vmatmul.f32.vlgmr.msra.gmra.mxu2 %v659_v13 }
 0x14f   : > { %v361_v29 = vpop.f32.mrf.mxu0  ;;  %v381_v49 = vpop.f32.mrf.mxu1 }
 0x150   : > { %v362_v60 = vadd.f32 %v361_v29, %v338_v10  ;;  %v382_v0 = vadd.f32 %v381_v49, %v339_v56  ;;  %v322_v56 = vperm.slane %v308_v1, 2 }
 0x152   : > { %v404_v3 = vadd.f32 %v362_v60, %v334_v61  ;;  %v424_v11 = vadd.f32 %v382_v0, %v335_v45 }
 0x154   : > { %v579_v12 = vmul.f32 -1.442695, %v404_v3  ;;  %v580_v14 = vmul.f32 -1.442695, %v424_v11  ;;  %v329_v11 = vperm.slane %v318_v4, 2 }
 0x156   : > { %631 = vpow2.f32 %v579_v12  ;;  %v336_v45 = vsel %vm333_vm1, %v322_v56, %v329_v11 }
 0x157   : > { %633 = vpow2.f32 %v580_v14  ;;  %v401_v0 = vpop.f32.mrf.mxu2 }
 0x15c   : > { %v632_v15 = vpop.eup %631 }
 0x15d   : > { %v634_v16 = vpop.eup %633  ;;  %v408_v17 = vadd.f32 1.0, %v632_v15  ;;  %v402_v15 = vadd.f32 %v401_v0, %v340_v7 }
 0x15e   : > { %v428_v18 = vadd.f32 1.0, %v634_v16 }
 0x15f   : > { %635 = vrcp.f32 %v408_v17  ;;  %v420_v3 = vand.u32 2147483648, %v408_v17  ;;  %v418_v14 = vand.u32 2147483647, %v408_v17  ;;  %vm414_vm3 = vweird.f32 %v408_v17 }
 0x160   : > { %637 = vrcp.f32 %v428_v18  ;;  %vm434_vm6 = vweird.f32 %v428_v18  ;;  %v440_v1 = vand.u32 2147483648, %v428_v18  ;;  %v438_v4 = vand.u32 2147483647, %v428_v18 }
 0x161   : > { %v421_v29 = vor.u32 1.1754944e-38, %v420_v3  ;;  %vm419_vm5 = vcmp.eq.f32.partialorder %v418_v14, 8.507059e+37 }
 0x162   : > { %v441_v7 = vor.u32 1.1754944e-38, %v440_v1  ;;  %vm439_vm9 = vcmp.eq.f32.partialorder %v438_v4, 8.507059e+37 }
 0x165   : > { %v636_v19 = vpop.eup %635 }
 0x166   : > { %v638_v5 = vpop.eup %637  ;;  %v410_v6 = vmul.f32 %v636_v19, %v408_v17  ;;  %vm415_vm2 = vweird.f32 %v636_v19 }
 0x167   : > { %v430_v20 = vmul.f32 %v638_v5, %v428_v18  ;;  %vm416_vm4 = vmor %vm414_vm3, %vm415_vm2  ;;  %vm435_vm7 = vweird.f32 %v638_v5 }
 0x168   : > { %v411_v8 = vsub.f32 1.0, %v410_v6  ;;  %vm436_vm8 = vmor %vm434_vm6, %vm435_vm7 }
 0x169   : > { %v431_v10 = vsub.f32 1.0, %v430_v20 }
 0x16a   : > { %v412_v12 = vmul.f32 %v636_v19, %v411_v8 }
 0x16b   : > { %v432_v61 = vmul.f32 %v638_v5, %v431_v10  ;;  %v456_v10 = vpop.permute.xlu0 %455 }
 0x16c   : > { %v413_v16 = vadd.f32 %v636_v19, %v412_v12  ;;  %vm457_vm10 = vcmp.eq.s32.totalorder %v456_v10, 1 }
 0x16d   : > { %v433_v6 = vadd.f32 %v638_v5, %v432_v61 }
 0x16e   : > { %v417_v49 = vsel %vm416_vm4, %v636_v19, %v413_v16 }
 0x16f   : > { %v422_v60 = vsel %vm419_vm5, %v421_v29, %v417_v49  ;;  %v437_v9 = vsel %vm436_vm8, %v638_v5, %v433_v6 }
 0x170   : > { %v444_v20 = vmul.f32 %v422_v60, %v402_v15  ;;  %v442_v17 = vsel %vm439_vm9, %v441_v7, %v437_v9 }
 0x171   : > { %v447_v0 = vsub.f32 1.0, %v442_v17  ;;  %v449_v19 = vmul.f32 %v659_v13, %v442_v17 }
 0x172   : > { %v445_v8 = vadd.f32 %v444_v20, %v336_v45 }
 0x174   : > { %639 = vtanh.f32 %v445_v8 }
 0x17a   : > { %v640_v3 = vpop.eup %639 }
 0x17b   : > { %v448_v56 = vmul.f32 %v640_v3, %v447_v0 }
 0x17c   :  { %296 = sbr.rel (!%p294_p0) target bundleno = 179 (0xb3), region = 53 }
 0x17d   : > { %v450_v13 = vadd.f32 %v449_v19, %v448_v56  }
 0x17f   : > { %v458_v11 = vsel %vm457_vm10, %v450_v13, %v655_v2  }
 0x180   : > { %v1228_v2 = vmov %v458_v11  ;;  %459 = vst [vmem:[%s1194_s6] sm:$0x3] (%p294_p0), %v458_v11 }

// kernel: babyai_forward.5
= control target key start
LH: loop header
LB: loop body
LE: loop exit
PB: predicated region body
PF: predicated region fallthrough
CT: control target
= control target key end

     0   :  { %14 = vsyncpa [#allocation5], 0  ;;  %s1830_s0 = inlined_call_operand.vmem [shape: f32[8,128], index: 0, kind: input, shape index: {}]   ;;  %s1831_s1 = inlined_call_operand.vmem [shape: bf16[128,512], index: 1, kind: input, shape index: {}]   ;;  %s1832_s2 = inlined_call_operand.vmem [shape: f32[1,512], index: 2, kind: input, shape index: {}]   ;;  %s1833_s3 = inlined_call_operand.vmem [shape: f32[128,512], index: 3, kind: input, shape index: {}]   ;;  %s1834_s4 = inlined_call_operand.vmem [shape: f32[1,512], index: 4, kind: input, shape index: {}]   ;;  %s1835_s5 = inlined_call_operand.vmem [shape: bf16[128,64], index: 5, kind: input, shape index: {}]   ;;  %s1836_s6 = inlined_call_operand.vmem [shape: f32[1,64], index: 6, kind: input, shape index: {}]   ;;  %s1837_s7 = inlined_call_operand.vmem [shape: bf16[64,128], index: 7, kind: input, shape index: {}]   ;;  %s1838_s8 = inlined_call_operand.vmem [shape: f32[1,128], index: 8, kind: input, shape index: {}]   ;;  %s1839_s9 = inlined_call_operand.hbm [shape: f32[8,128], index: 9, kind: output, shape index: {}]  }
   0x1   :  { %v895_v0 = vld [vmem:[%s1831_s1 + $0xe0] sm:$0xf]  ;;  %v996_v1 = vld [vmem:[%s1831_s1 + $0xec] sm:$0xf0]  ;;  %v994_v3 = vld [vmem:[%s1831_s1 + $0xe4] sm:$0xf] }
   0x2   :  { %v896_v2 = vor.u32 %v996_v1, %v895_v0  ;;  %v897_v4 = vld [vmem:[%s1831_s1 + $0xf0] sm:$0xf0]  ;;  %v903_v5 = vld [vmem:[%s1831_s1 + $0xe8] sm:$0xf]  ;;  %v997_v7 = vld [vmem:[%s1831_s1 + $0xf4] sm:$0xf0] }
   0x3   :  { %v900_v6 = vor.u32 %v994_v3, %v897_v4  ;;  %v995_v8 = vld [vmem:[%s1831_s1 + $0xec] sm:$0xf]  ;;  %v905_v9 = vld [vmem:[%s1831_s1 + $0xf8] sm:$0xf0]  ;;  %v904_v10 = vor.u32 %v997_v7, %v903_v5  ;;  %v879_v12 = vld [vmem:[%s1831_s1 + $0xc0] sm:$0xf] }
   0x4   :  { %238 = vmatpush.bf16.msra.mxu0 %v896_v2  ;;  %v908_v11 = vor.u32 %v995_v8, %v905_v9  ;;  %v992_v13 = vld [vmem:[%s1831_s1 + $0xcc] sm:$0xf0]  ;;  %v990_v14 = vld [vmem:[%s1831_s1 + $0xc4] sm:$0xf]  ;;  %v881_v16 = vld [vmem:[%s1831_s1 + $0xd0] sm:$0xf0] }
   0x5   :  { %251 = vmatpush.bf16.msra.mxu1 %v900_v6  ;;  %v880_v15 = vor.u32 %v992_v13, %v879_v12  ;;  %v887_v17 = vld [vmem:[%s1831_s1 + $0xc8] sm:$0xf]  ;;  %v993_v18 = vld [vmem:[%s1831_s1 + $0xd4] sm:$0xf0]  ;;  %264 = vmatpush.bf16.msra.mxu2 %v904_v10  ;;  %v884_v19 = vor.u32 %v990_v14, %v881_v16  ;;  %v991_v21 = vld [vmem:[%s1831_s1 + $0xcc] sm:$0xf] }
   0x6   :  { %277 = vmatpush.bf16.msra.mxu3 %v908_v11  ;;  %v888_v20 = vor.u32 %v993_v18, %v887_v17  ;;  %v889_v22 = vld [vmem:[%s1831_s1 + $0xd8] sm:$0xf0]  ;;  %v863_v23 = vld [vmem:[%s1831_s1 + $0xa0] sm:$0xf]  ;;  %v988_v25 = vld [vmem:[%s1831_s1 + $0xac] sm:$0xf0] }
   0x7   :  { %v892_v24 = vor.u32 %v991_v21, %v889_v22  ;;  %v986_v26 = vld [vmem:[%s1831_s1 + $0xa4] sm:$0xf]  ;;  %v865_v27 = vld [vmem:[%s1831_s1 + $0xb0] sm:$0xf0]  ;;  %v864_v28 = vor.u32 %v988_v25, %v863_v23  ;;  %v871_v29 = vld [vmem:[%s1831_s1 + $0xa8] sm:$0xf] }
   0x8   :  { %239 = vmatpush.bf16.msra.mxu0 %v880_v15  ;;  %v989_v30 = vld [vmem:[%s1831_s1 + $0xb4] sm:$0xf0]  ;;  %v987_v31 = vld [vmem:[%s1831_s1 + $0xac] sm:$0xf]  ;;  %v868_v32 = vor.u32 %v986_v26, %v865_v27  ;;  %v873_v33 = vld [vmem:[%s1831_s1 + $0xb8] sm:$0xf0] }
   0x9   :  { %252 = vmatpush.bf16.msra.mxu1 %v884_v19  ;;  %v847_v34 = vld [vmem:[%s1831_s1 + $0x80] sm:$0xf]  ;;  %v984_v35 = vld [vmem:[%s1831_s1 + $0x8c] sm:$0xf0]  ;;  %265 = vmatpush.bf16.msra.mxu2 %v888_v20  ;;  %v872_v36 = vor.u32 %v989_v30, %v871_v29  ;;  %v876_v37 = vor.u32 %v987_v31, %v873_v33  ;;  %v982_v38 = vld [vmem:[%s1831_s1 + $0x84] sm:$0xf] }
   0xa   :  { %278 = vmatpush.bf16.msra.mxu3 %v892_v24  ;;  %v849_v39 = vld [vmem:[%s1831_s1 + $0x90] sm:$0xf0]  ;;  %v855_v40 = vld [vmem:[%s1831_s1 + $0x88] sm:$0xf]  ;;  %v985_v41 = vld [vmem:[%s1831_s1 + $0x94] sm:$0xf0]  ;;  %v848_v44 = vor.u32 %v984_v35, %v847_v34 }
   0xb   :  { %v983_v42 = vld [vmem:[%s1831_s1 + $0x8c] sm:$0xf]  ;;  %v857_v43 = vld [vmem:[%s1831_s1 + $0x98] sm:$0xf0]  ;;  %v852_v45 = vor.u32 %v982_v38, %v849_v39  ;;  %v831_v46 = vld [vmem:[%s1831_s1 + $0x60] sm:$0xf]  ;;  %v856_v48 = vor.u32 %v985_v41, %v855_v40 }
   0xc   :  { %240 = vmatpush.bf16.msra.mxu0 %v864_v28  ;;  %v980_v47 = vld [vmem:[%s1831_s1 + $0x6c] sm:$0xf0]  ;;  %v860_v49 = vor.u32 %v983_v42, %v857_v43  ;;  %v978_v50 = vld [vmem:[%s1831_s1 + $0x64] sm:$0xf]  ;;  %v833_v51 = vld [vmem:[%s1831_s1 + $0x70] sm:$0xf0] }
   0xd   :  { %253 = vmatpush.bf16.msra.mxu1 %v868_v32  ;;  %266 = vmatpush.bf16.msra.mxu2 %v872_v36  ;;  %v839_v52 = vld [vmem:[%s1831_s1 + $0x68] sm:$0xf]  ;;  %v981_v53 = vld [vmem:[%s1831_s1 + $0x74] sm:$0xf0]  ;;  %v979_v54 = vld [vmem:[%s1831_s1 + $0x6c] sm:$0xf]  ;;  %v832_v56 = vor.u32 %v980_v47, %v831_v46  ;;  %v836_v57 = vor.u32 %v978_v50, %v833_v51 }
   0xe   :  { %279 = vmatpush.bf16.msra.mxu3 %v876_v37  ;;  %v841_v55 = vld [vmem:[%s1831_s1 + $0x78] sm:$0xf0]  ;;  %v815_v58 = vld [vmem:[%s1831_s1 + $0x40] sm:$0xf]  ;;  %v976_v59 = vld [vmem:[%s1831_s1 + $0x4c] sm:$0xf0]  ;;  %v840_v60 = vor.u32 %v981_v53, %v839_v52 }
   0xf   :  { %v844_v61 = vor.u32 %v979_v54, %v841_v55  ;;  %v974_v62 = vld [vmem:[%s1831_s1 + $0x44] sm:$0xf]  ;;  %v817_v63 = vld [vmem:[%s1831_s1 + $0x50] sm:$0xf0]  ;;  %v823_v0 = vld [vmem:[%s1831_s1 + $0x48] sm:$0xf]  ;;  %v816_v4 = vor.u32 %v976_v59, %v815_v58 }
  0x10   :  { %241 = vmatpush.bf16.msra.mxu0 %v848_v44  ;;  %v977_v1 = vld [vmem:[%s1831_s1 + $0x54] sm:$0xf0]  ;;  %v975_v2 = vld [vmem:[%s1831_s1 + $0x4c] sm:$0xf]  ;;  %v825_v3 = vld [vmem:[%s1831_s1 + $0x58] sm:$0xf0]  ;;  %v820_v5 = vor.u32 %v974_v62, %v817_v63 }
  0x11   :  { %254 = vmatpush.bf16.msra.mxu1 %v852_v45  ;;  %267 = vmatpush.bf16.msra.mxu2 %v856_v48  ;;  %v799_v6 = vld [vmem:[%s1831_s1 + $0x20] sm:$0xf]  ;;  %v972_v7 = vld [vmem:[%s1831_s1 + $0x2c] sm:$0xf0]  ;;  %v824_v8 = vor.u32 %v977_v1, %v823_v0  ;;  %v828_v9 = vor.u32 %v975_v2, %v825_v3  ;;  %v970_v10 = vld [vmem:[%s1831_s1 + $0x24] sm:$0xf] }
  0x12   :  { %280 = vmatpush.bf16.msra.mxu3 %v860_v49  ;;  %v801_v11 = vld [vmem:[%s1831_s1 + $0x30] sm:$0xf0]  ;;  %v807_v12 = vld [vmem:[%s1831_s1 + $0x28] sm:$0xf]  ;;  %v973_v13 = vld [vmem:[%s1831_s1 + $0x34] sm:$0xf0]  ;;  %v800_v16 = vor.u32 %v972_v7, %v799_v6 }
  0x13   :  { %v971_v14 = vld [vmem:[%s1831_s1 + $0x2c] sm:$0xf]  ;;  %v809_v15 = vld [vmem:[%s1831_s1 + $0x38] sm:$0xf0]  ;;  %v804_v17 = vor.u32 %v970_v10, %v801_v11  ;;  %v783_v18 = vld [vmem:[%s1831_s1] sm:$0xf]  ;;  %v808_v20 = vor.u32 %v973_v13, %v807_v12 }
  0x14   :  { %242 = vmatpush.bf16.msra.mxu0 %v832_v56  ;;  %v968_v19 = vld [vmem:[%s1831_s1 + $0xc] sm:$0xf0]  ;;  %v812_v21 = vor.u32 %v971_v14, %v809_v15  ;;  %v966_v22 = vld [vmem:[%s1831_s1 + $0x4] sm:$0xf]  ;;  %v785_v23 = vld [vmem:[%s1831_s1 + $0x10] sm:$0xf0] }
  0x15   :  { %255 = vmatpush.bf16.msra.mxu1 %v836_v57  ;;  %268 = vmatpush.bf16.msra.mxu2 %v840_v60  ;;  %v791_v24 = vld [vmem:[%s1831_s1 + $0x8] sm:$0xf]  ;;  %v969_v25 = vld [vmem:[%s1831_s1 + $0x14] sm:$0xf0]  ;;  %v967_v26 = vld [vmem:[%s1831_s1 + $0xc] sm:$0xf]  ;;  %v784_v28 = vor.u32 %v968_v19, %v783_v18  ;;  %v788_v30 = vor.u32 %v966_v22, %v785_v23 }
  0x16   :  { %281 = vmatpush.bf16.msra.mxu3 %v844_v61  ;;  %v793_v27 = vld [vmem:[%s1831_s1 + $0x18] sm:$0xf0]  ;;  %v34_v29 = vld [vmem:[%s1830_s0] sm:$0xff]  ;;  %v792_v31 = vor.u32 %v969_v25, %v791_v24  ;;  %v1361_v35 = vld [vmem:[%s1833_s3 + $0x8] sm:$0xff] }
  0x17   :  { %v796_v32 = vor.u32 %v967_v26, %v793_v27  ;;  %v35_v33 = vpack.c.bf16 %v34_v29, %v34_v29  ;;  %v1356_v34 = vld [vmem:[%s1833_s3] sm:$0xff]  ;;  %1841 = vst [vmem:[#allocation8_spill] sm:$0xff] %v1361_v35  ;;  %v1366_v36 = vld [vmem:[%s1833_s3 + $0x10] sm:$0xff]  ;;  %v1371_v37 = vld [vmem:[%s1833_s3 + $0x18] sm:$0xff] }
  0x18   :  { %243 = vmatpush.bf16.msra.mxu0 %v816_v4  ;;  %1840 = vst [vmem:[#allocation7_spill] sm:$0xff] %v1356_v34  ;;  %v1376_v38 = vld [vmem:[%s1833_s3 + $0x20] sm:$0xff]  ;;  %v1381_v39 = vld [vmem:[%s1833_s3 + $0x28] sm:$0xff]  ;;  %v1386_v40 = vld [vmem:[%s1833_s3 + $0x30] sm:$0xff] }
  0x19   :  { %256 = vmatpush.bf16.msra.mxu1 %v820_v5  ;;  %269 = vmatpush.bf16.msra.mxu2 %v824_v8  ;;  %1842 = vst [vmem:[#allocation9_spill] sm:$0xff] %v1366_v36  ;;  %v1391_v41 = vld [vmem:[%s1833_s3 + $0x38] sm:$0xff]  ;;  %v1396_v42 = vld [vmem:[%s1833_s3 + $0x40] sm:$0xff]  ;;  %v1401_v43 = vld [vmem:[%s1833_s3 + $0x48] sm:$0xff] }
  0x1a   :  { %282 = vmatpush.bf16.msra.mxu3 %v828_v9  ;;  %1843 = vst [vmem:[#allocation10_spill] sm:$0xff] %v1371_v37  ;;  %v1406_v44 = vld [vmem:[%s1833_s3 + $0x50] sm:$0xff]  ;;  %v1411_v45 = vld [vmem:[%s1833_s3 + $0x58] sm:$0xff]  ;;  %v1416_v46 = vld [vmem:[%s1833_s3 + $0x60] sm:$0xff] }
  0x1b   :  { %1844 = vst [vmem:[#allocation11_spill] sm:$0xff] %v1376_v38  ;;  %v1421_v47 = vld [vmem:[%s1833_s3 + $0x68] sm:$0xff]  ;;  %v1426_v48 = vld [vmem:[%s1833_s3 + $0x70] sm:$0xff]  ;;  %v1431_v49 = vld [vmem:[%s1833_s3 + $0x78] sm:$0xff] }
  0x1c   :  { %244 = vmatpush.bf16.msra.mxu0 %v800_v16  ;;  %1845 = vst [vmem:[#allocation12_spill] sm:$0xff] %v1381_v39  ;;  %v1436_v50 = vld [vmem:[%s1833_s3 + $0x80] sm:$0xff]  ;;  %v1441_v51 = vld [vmem:[%s1833_s3 + $0x88] sm:$0xff]  ;;  %v1446_v52 = vld [vmem:[%s1833_s3 + $0x90] sm:$0xff] }
  0x1d   :  { %257 = vmatpush.bf16.msra.mxu1 %v804_v17  ;;  %270 = vmatpush.bf16.msra.mxu2 %v808_v20  ;;  %1846 = vst [vmem:[#allocation13_spill] sm:$0xff] %v1386_v40  ;;  %v1451_v53 = vld [vmem:[%s1833_s3 + $0x98] sm:$0xff]  ;;  %v1456_v54 = vld [vmem:[%s1833_s3 + $0xa0] sm:$0xff]  ;;  %v1461_v55 = vld [vmem:[%s1833_s3 + $0xa8] sm:$0xff] }
  0x1e   :  { %283 = vmatpush.bf16.msra.mxu3 %v812_v21  ;;  %1847 = vst [vmem:[#allocation14_spill] sm:$0xff] %v1391_v41  ;;  %v1466_v56 = vld [vmem:[%s1833_s3 + $0xb0] sm:$0xff]  ;;  %v1471_v57 = vld [vmem:[%s1833_s3 + $0xb8] sm:$0xff]  ;;  %v68_v58 = vld [vmem:[%s1832_s2] sm:$0xf] }
  0x1f   :  { %1848 = vst [vmem:[#allocation15_spill] sm:$0xff] %v1396_v42  ;;  %v1479_v59 = vld [vmem:[%s1833_s3 + $0xc0] sm:$0xff]  ;;  %v1484_v60 = vld [vmem:[%s1833_s3 + $0xc8] sm:$0xff]  ;;  %v1489_v61 = vld [vmem:[%s1833_s3 + $0xd0] sm:$0xff]  ;;  %v70_v10 = vperm.slane %v68_v58, 0  ;;  %v71_v14 = vperm.slane %v68_v58, 1 }
  0x20   :  { %245 = vmatpush.bf16.msra.mxu0 %v784_v28  ;;  %1849 = vst [vmem:[#allocation16_spill] sm:$0xff] %v1401_v43  ;;  %v1494_v62 = vld [vmem:[%s1833_s3 + $0xd8] sm:$0xff]  ;;  %v1499_v63 = vld [vmem:[%s1833_s3 + $0xe0] sm:$0xff]  ;;  %v1504_v0 = vld [vmem:[%s1833_s3 + $0xe8] sm:$0xff]  ;;  %v72_v37 = vperm.slane %v68_v58, 2  ;;  %v73_v35 = vperm.slane %v68_v58, 3 }
  0x21   :  { %258 = vmatpush.bf16.msra.mxu1 %v788_v30  ;;  %271 = vmatpush.bf16.msra.mxu2 %v792_v31  ;;  %1850 = vst [vmem:[#allocation17_spill] sm:$0xff] %v1406_v44  ;;  %v1509_v1 = vld [vmem:[%s1833_s3 + $0xf0] sm:$0xff]  ;;  %v1514_v2 = vld [vmem:[%s1833_s3 + $0xf8] sm:$0xff]  ;;  %v1519_v3 = vld [vmem:[%s1833_s3 + $0x100] sm:$0xff]  ;;  %v1681_v42 = vmov 0.0  }
  0x22   :  { %284 = vmatpush.bf16.msra.mxu3 %v796_v32  ;;  %1851 = vst [vmem:[#allocation18_spill] sm:$0xff] %v1411_v45  ;;  %v1524_v4 = vld [vmem:[%s1833_s3 + $0x108] sm:$0xff]  ;;  %v1529_v5 = vld [vmem:[%s1833_s3 + $0x110] sm:$0xff]  ;;  %v1534_v6 = vld [vmem:[%s1833_s3 + $0x118] sm:$0xff] }
  0x23   :  { %246 = vmatmul.bf16.vlgmr.msra.gmra.mxu0 %v35_v33  ;;  %1852 = vst [vmem:[#allocation19_spill] sm:$0xff] %v1426_v48  ;;  %v1539_v7 = vld [vmem:[%s1833_s3 + $0x120] sm:$0xff]  ;;  %v1544_v8 = vld [vmem:[%s1833_s3 + $0x128] sm:$0xff]  ;;  %v1549_v9 = vld [vmem:[%s1833_s3 + $0x130] sm:$0xff]  ;;  %v1683_v48 = vmov 0.0  }
  0x24   :  { %259 = vmatmul.bf16.vlgmr.msra.gmra.mxu1 %v35_v33  ;;  %272 = vmatmul.bf16.vlgmr.msra.gmra.mxu2 %v35_v33  ;;  %1853 = vst [vmem:[#allocation20_spill] sm:$0xff] %v1504_v0  ;;  %v1554_v11 = vld [vmem:[%s1833_s3 + $0x138] sm:$0xff]  ;;  %v1559_v12 = vld [vmem:[%s1833_s3 + $0x140] sm:$0xff]  ;;  %v1564_v13 = vld [vmem:[%s1833_s3 + $0x148] sm:$0xff] }
  0x25   :  { %285 = vmatmul.bf16.vlgmr.msra.gmra.mxu3 %v35_v33  ;;  %1854 = vst [vmem:[#allocation21_spill] sm:$0xff] %v1509_v1  ;;  %v1569_v15 = vld [vmem:[%s1833_s3 + $0x150] sm:$0xff]  ;;  %v1574_v16 = vld [vmem:[%s1833_s3 + $0x158] sm:$0xff]  ;;  %v1579_v17 = vld [vmem:[%s1833_s3 + $0x160] sm:$0xff] }
  0x26   :  { %1855 = vst [vmem:[#allocation22_spill] sm:$0xff] %v1514_v2  ;;  %v1584_v18 = vld [vmem:[%s1833_s3 + $0x168] sm:$0xff]  ;;  %v1589_v19 = vld [vmem:[%s1833_s3 + $0x170] sm:$0xff]  ;;  %v1594_v20 = vld [vmem:[%s1833_s3 + $0x178] sm:$0xff] }
  0x27   :  { %1856 = vst [vmem:[#allocation23_spill] sm:$0xff] %v1519_v3  ;;  %v1599_v22 = vld [vmem:[%s1833_s3 + $0x180] sm:$0xff]  ;;  %v1604_v23 = vld [vmem:[%s1833_s3 + $0x188] sm:$0xff]  ;;  %v1609_v24 = vld [vmem:[%s1833_s3 + $0x190] sm:$0xff] }
  0x28   :  { %1857 = vst [vmem:[#allocation24_spill] sm:$0xff] %v1524_v4  ;;  %v1614_v27 = vld [vmem:[%s1833_s3 + $0x198] sm:$0xff]  ;;  %v1619_v28 = vld [vmem:[%s1833_s3 + $0x1a0] sm:$0xff]  ;;  %v1624_v29 = vld [vmem:[%s1833_s3 + $0x1a8] sm:$0xff] }
  0x29   :  { %1858 = vst [vmem:[#allocation25_spill] sm:$0xff] %v1529_v5  ;;  %v1629_v31 = vld [vmem:[%s1833_s3 + $0x1b0] sm:$0xff]  ;;  %v1634_v32 = vld [vmem:[%s1833_s3 + $0x1b8] sm:$0xff]  ;;  %v1639_v33 = vld [vmem:[%s1833_s3 + $0x1c0] sm:$0xff] }
  0x2a   :  { %1859 = vst [vmem:[#allocation26_spill] sm:$0xff] %v1534_v6  ;;  %v1669_v36 = vld [vmem:[%s1833_s3 + $0x1f0] sm:$0xff]  ;;  %v1679_v34 = vld [vmem:[%s1834_s4] sm:$0xf] }
  0x2b   :  { %1860 = vst [vmem:[#allocation27_spill] sm:$0xff] %v1539_v7 }
  0x2c   :  { %1861 = vst [vmem:[#allocation28_spill] sm:$0xff] %v1544_v8 }
  0x2d   :  { %1862 = vst [vmem:[#allocation29_spill] sm:$0xff] %v1549_v9 }
  0x2e   :  { %1863 = vst [vmem:[#allocation30_spill] sm:$0xff] %v1554_v11 }
  0x2f   :  { %1864 = vst [vmem:[#allocation31_spill] sm:$0xff] %v1559_v12 }
  0x30   :  { %1865 = vst [vmem:[#allocation32_spill] sm:$0xff] %v1564_v13 }
  0xa0   :  { %v247_v21 = vpop.f32.mrf.mxu0 }
  0xa1   :  { %v248_v25 = vadd.f32 %v247_v21, %v70_v10  ;;  %v260_v26 = vpop.f32.mrf.mxu1  ;;  %v1644_v10 = vld [vmem:[%s1833_s3 + $0x1c8] sm:$0xff]  ;;  %v1654_v21 = vld [vmem:[%s1833_s3 + $0x1d8] sm:$0xff] }
  0xa2   :  { %v261_v30 = vadd.f32 %v260_v26, %v71_v14  ;;  %1866 = vst [vmem:[#allocation33_spill] sm:$0xff] %v1644_v10  ;;  %v1649_v14 = vld [vmem:[%s1833_s3 + $0x1d0] sm:$0xff]  ;;  %v1664_v26 = vld [vmem:[%s1833_s3 + $0x1e8] sm:$0xff] }
  0xa3   :  { %290 = vst [vmem:[#allocation2] sm:$0xff] %v248_v25  ;;  %v1659_v25 = vld [vmem:[%s1833_s3 + $0x1e0] sm:$0xff] }
  0xa4   :  { %291 = vst [vmem:[#allocation2 + $0x8] sm:$0xff] %v261_v30  ;;  %v1674_v30 = vld [vmem:[%s1833_s3 + $0x1f8] sm:$0xff]  ;;  %s1685_s3 = smov 0  }
  0xa7   :  { %v273_v40 = vpop.f32.mrf.mxu2 }
  0xa8   :  { %v286_v41 = vpop.f32.mrf.mxu3  ;;  %v274_v39 = vadd.f32 %v273_v40, %v72_v37  ;;  %v249_v44 = vpop.f32.mrf.mxu0 }
  0xa9   :  { %v287_v38 = vadd.f32 %v286_v41, %v73_v35  ;;  %v262_v45 = vpop.f32.mrf.mxu1 }
  0xaa   :  { %292 = vst [vmem:[#allocation2 + $0x10] sm:$0xff] %v274_v39 }
  0xab   :  { %293 = vst [vmem:[#allocation2 + $0x18] sm:$0xff] %v287_v38 }
  0xaf   :  { %v275_v43 = vpop.f32.mrf.mxu2 }
  0xb0   :  { %v288_v58 = vpop.f32.mrf.mxu3 }
  0xb1 LB: > { %409 = vmatpush.msra.mxu0 %v1659_v25  ;;  %429 = vmatpush.msra.mxu1 %v1664_v26  ;;  %v1867_v10 = vld [vmem:[#allocation33_spill] sm:$0xff]  ;;  %v1868_v12 = vld [vmem:[#allocation31_spill] sm:$0xff]  ;;  %v1869_v13 = vld [vmem:[#allocation32_spill] sm:$0xff]  ;;  %s376_s4 = sadd.s32 4, %s1105_s3  ;;  %s367_s24 = sshra.s32 %s1105_s3, 3  ;;  %vm404_vm0 = vcmask 1040384   ;;  %s1105_s3 = sphi %s1685_s3, %s364_s3   ;;  %v1101_v48 = vphi %v1683_v48, %v568_v48   ;;  %v1097_v42 = vphi %v1681_v42, %v566_v42  }
  0xb2   : > { %469 = vmatpush.msra.mxu3 %v1674_v30  ;;  %449 = vmatpush.msra.mxu2 %v1669_v36  ;;  %v1870_v7 = vld [vmem:[#allocation27_spill] sm:$0xff]  ;;  %v1871_v8 = vld [vmem:[#allocation28_spill] sm:$0xff]  ;;  %v1872_v11 = vld [vmem:[#allocation30_spill] sm:$0xff]  ;;  %s377_s25 = sshra.s32 %s376_s4, 3  ;;  %s370_s26 = sand.u32 7, %s1105_s3 }
  0xb3   : > { %410 = vmatpush.msra.mxu0 %v1639_v33  ;;  %430 = vmatpush.msra.mxu1 %v1867_v10  ;;  %v1873_v9 = vld [vmem:[#allocation29_spill] sm:$0xff]  ;;  %v1874_v3 = vld [vmem:[#allocation23_spill] sm:$0xff]  ;;  %v1875_v4 = vld [vmem:[#allocation24_spill] sm:$0xff]  ;;  %s998_s27 = sshll.u32 %s367_s24, 5  ;;  %s380_s28 = sand.u32 7, %s376_s4 }
  0xb4   : > { %470 = vmatpush.msra.mxu3 %v1654_v21  ;;  %450 = vmatpush.msra.mxu2 %v1649_v14  ;;  %v1876_v6 = vld [vmem:[#allocation26_spill] sm:$0xff]  ;;  %v1877_v5 = vld [vmem:[#allocation25_spill] sm:$0xff]  ;;  %v1878_v0 = vld [vmem:[#allocation20_spill] sm:$0xff]  ;;  %s999_s29 = sshll.u32 %s377_s25, 5  ;;  %s373_s30 = sadd.s32 %s998_s27, %s370_s26 }
  0xb5   : > { %411 = vmatpush.msra.mxu0 %v1619_v28  ;;  %431 = vmatpush.msra.mxu1 %v1624_v29  ;;  %v1879_v2 = vld [vmem:[#allocation22_spill] sm:$0xff]  ;;  %v1880_v1 = vld [vmem:[#allocation21_spill] sm:$0xff]  ;;  %v1881_v35 = vld [vmem:[#allocation19_spill] sm:$0xff]  ;;  %s383_s10 = sadd.s32 %s999_s29, %s380_s28  ;;  %s374_s11 = scalar_lea.vmem [#allocation2], %s373_s30 }
  0xb6   : > { %471 = vmatpush.msra.mxu3 %v1634_v32  ;;  %451 = vmatpush.msra.mxu2 %v1629_v31  ;;  %v1882_v37 = vld [vmem:[#allocation15_spill] sm:$0xff]  ;;  %v1883_v38 = vld [vmem:[#allocation16_spill] sm:$0xff]  ;;  %v1884_v39 = vld [vmem:[#allocation18_spill] sm:$0xff]  ;;  %s384_s12 = scalar_lea.vmem [#allocation2], %s383_s10  ;;  %s916_s1 = sshll.u32 %s1105_s3, 1 }
  0xb7   : > { %412 = vmatpush.msra.mxu0 %v1599_v22  ;;  %432 = vmatpush.msra.mxu1 %v1604_v23  ;;  %v1885_v40 = vld [vmem:[#allocation17_spill] sm:$0xff]  ;;  %v1886_v41 = vld [vmem:[#allocation11_spill] sm:$0xff]  ;;  %v1887_v43 = vld [vmem:[#allocation12_spill] sm:$0xff]  ;;  %s570_s13 = scalar_lea.vmem [#allocation3], %s916_s1  ;;  %s364_s3 = sadd.s32 1, %s1105_s3  }
  0xb8   : > { %472 = vmatpush.msra.mxu3 %v1614_v27  ;;  %452 = vmatpush.msra.mxu2 %v1609_v24  ;;  %v1888_v44 = vld [vmem:[#allocation14_spill] sm:$0xff]  ;;  %v1889_v45 = vld [vmem:[#allocation13_spill] sm:$0xff]  ;;  %v1890_v58 = vld [vmem:[#allocation7_spill] sm:$0xff]  ;;  %p361_p0 = scmp.ge.s32.totalorder %s364_s3, 4  }
  0xb9   : > { %413 = vmatpush.msra.mxu0 %v1579_v17  ;;  %433 = vmatpush.msra.mxu1 %v1584_v18  ;;  %vm596_vm13 = vcmask (%p361_p0), 1041408   ;;  %vm598_vm14 = vcmask (%p361_p0), 1042432   ;;  %vm600_vm15 = vcmask (%p361_p0), 1043456   ;;  %v1010_v17 = vld [vmem:[%s1837_s7 + $0x10] sm:$0xff] (%p361_p0)  ;;  %v1009_v18 = vld [vmem:[%s1837_s7 + $0x8] sm:$0xff] (%p361_p0)  ;;  %s1107_s14 = smov (%p361_p0), [#allocation4]  }
  0xba   : > { %473 = vmatpush.msra.mxu3 %v1594_v20  ;;  %453 = vmatpush.msra.mxu2 %v1589_v19  ;;  %v1008_v19 = vld [vmem:[%s1837_s7] sm:$0xff] (%p361_p0)  ;;  %s751_s15 = sshll.u32 (%p361_p0), %s1107_s14, 4  ;;  %s753_s17 = sshll.u32 (%p361_p0), %s1839_s9, 4  ;;  %s752_s15 = int_to_ptr.vmem [resolvable:$true] %s751_s15  ;;  %s754_s17 = int_to_ptr.hbm [resolvable:$true] %s753_s17 }
  0xbb   : > { %414 = vmatpush.msra.mxu0 %v1868_v12  ;;  %434 = vmatpush.msra.mxu1 %v1869_v13  ;;  %v1053_v20 = vld [vmem:[%s1836_s6] ss:$0 sm:$0xff] (%p361_p0) }
  0xbc   : > { %474 = vmatpush.msra.mxu3 %v1574_v16  ;;  %454 = vmatpush.msra.mxu2 %v1569_v15  ;;  %v1054_v29 = vld [vmem:[%s1838_s8] ss:$0 sm:$0xff] (%p361_p0) }
  0xbd   : > { %415 = vmatpush.msra.mxu0 %v1870_v7  ;;  %435 = vmatpush.msra.mxu1 %v1871_v8 }
  0xbe   : > { %475 = vmatpush.msra.mxu3 %v1872_v11  ;;  %455 = vmatpush.msra.mxu2 %v1873_v9 }
  0xbf   : > { %416 = vmatpush.msra.mxu0 %v1874_v3  ;;  %436 = vmatpush.msra.mxu1 %v1875_v4 }
  0xc0   : > { %476 = vmatpush.msra.mxu3 %v1876_v6  ;;  %456 = vmatpush.msra.mxu2 %v1877_v5 }
  0xc1   : > { %417 = vmatpush.msra.mxu0 %v1499_v63  ;;  %437 = vmatpush.msra.mxu1 %v1878_v0  ;;  %v1000_v63 = vld [vmem:[%s1835_s5] sm:$0xff] (%p361_p0) }
  0xc2   : > { %477 = vmatpush.msra.mxu3 %v1879_v2  ;;  %457 = vmatpush.msra.mxu2 %v1880_v1 }
  0xc3   : > { %418 = vmatpush.msra.mxu0 %v1479_v59  ;;  %438 = vmatpush.msra.mxu1 %v1484_v60  ;;  %v1001_v60 = vld [vmem:[%s1835_s5 + $0x8] sm:$0xff] (%p361_p0) }
  0xc4   : > { %478 = vmatpush.msra.mxu3 %v1494_v62  ;;  %458 = vmatpush.msra.mxu2 %v1489_v61 }
  0xc5   : > { %419 = vmatpush.msra.mxu0 %v1456_v54  ;;  %439 = vmatpush.msra.mxu1 %v1461_v55 }
  0xc6   : > { %479 = vmatpush.msra.mxu3 %v1471_v57  ;;  %459 = vmatpush.msra.mxu2 %v1466_v56  ;;  %v1002_v56 = vld [vmem:[%s1835_s5 + $0x10] sm:$0xff] (%p361_p0) }
  0xc7   : > { %420 = vmatpush.msra.mxu0 %v1436_v50  ;;  %440 = vmatpush.msra.mxu1 %v1441_v51 }
  0xc8   : > { %480 = vmatpush.msra.mxu3 %v1451_v53  ;;  %460 = vmatpush.msra.mxu2 %v1446_v52  ;;  %v1003_v52 = vld [vmem:[%s1835_s5 + $0x18] sm:$0xff] (%p361_p0) }
  0xc9   : > { %421 = vmatpush.msra.mxu0 %v1416_v46  ;;  %441 = vmatpush.msra.mxu1 %v1421_v47  ;;  %v1004_v47 = vld [vmem:[%s1835_s5 + $0x20] sm:$0xff] (%p361_p0) }
  0xca   : > { %481 = vmatpush.msra.mxu3 %v1431_v49  ;;  %461 = vmatpush.msra.mxu2 %v1881_v35  ;;  %v1891_v35 = vld [vmem:[#allocation8_spill] sm:$0xff] }
  0xcb   : > { %422 = vmatpush.msra.mxu0 %v1882_v37  ;;  %442 = vmatpush.msra.mxu1 %v1883_v38  ;;  %v1892_v37 = vld [vmem:[#allocation10_spill] sm:$0xff]  ;;  %v1893_v38 = vld [vmem:[#allocation9_spill] sm:$0xff] }
  0xcc   : > { %482 = vmatpush.msra.mxu3 %v1884_v39  ;;  %462 = vmatpush.msra.mxu2 %v1885_v40  ;;  %v375_v39 = vld [vmem:[%s374_s11] ss:$8 sm:$0xf] }
  0xcd   : > { %423 = vmatpush.msra.mxu0 %v1886_v41  ;;  %443 = vmatpush.msra.mxu1 %v1887_v43  ;;  %v385_v40 = vld [vmem:[%s384_s12] ss:$8 sm:$0xf]  ;;  %v387_v41 = vperm.slane %v375_v39, 0  ;;  %v390_v2 = vperm.slane %v375_v39, 3 }
  0xce   : > { %483 = vmatpush.msra.mxu3 %v1888_v44  ;;  %463 = vmatpush.msra.mxu2 %v1889_v45  ;;  %v396_v43 = vperm.slane %v385_v40, 0  ;;  %v388_v44 = vperm.slane %v375_v39, 1  ;;  %v397_v45 = vperm.slane %v385_v40, 1  ;;  %v399_v3 = vperm.slane %v385_v40, 3 }
  0xcf   : > { %424 = vmatpush.msra.mxu0 %v1890_v58  ;;  %444 = vmatpush.msra.mxu1 %v1891_v35  ;;  %v494_v58 = vperm.slane %v1679_v34, 0  ;;  %v398_v10 = vperm.slane %v385_v40, 2 }
  0xd0   : > { %484 = vmatpush.msra.mxu3 %v1892_v37  ;;  %425 = vmatmul.f32.vlgmr.msra.gmra.mxu0 %v1101_v48  ;;  %v406_v35 = vsel %vm404_vm0, %v388_v44, %v397_v45  ;;  %v408_v8 = vsel %vm404_vm0, %v390_v2, %v399_v3  ;;  %v389_v45 = vperm.slane %v375_v39, 2  ;;  %v496_v3 = vperm.slane %v1679_v34, 2 }
  0xd1   : > { %445 = vmatmul.f32.vlgmr.msra.gmra.mxu1 %v1101_v48  ;;  %485 = vmatmul.f32.vlgmr.msra.gmra.mxu3 %v1101_v48 }
  0xd2   : > { %464 = vmatpush.msra.mxu2 %v1893_v38  ;;  %v495_v38 = vperm.slane %v1679_v34, 1  ;;  %v407_v12 = vsel %vm404_vm0, %v389_v45, %v398_v10 }
  0xd3   : > { %465 = vmatmul.f32.vlgmr.msra.gmra.mxu2 %v1101_v48  ;;  %v405_v48 = vsel %vm404_vm0, %v387_v41, %v396_v43  ;;  %v497_v41 = vperm.slane %v1679_v34, 3  ;;  %v1005_v34 = vld [vmem:[%s1835_s5 + $0x28] sm:$0xff] (%p361_p0) }
 0x14d   : > { %v426_v37 = vpop.f32.mrf.mxu0 }
 0x14e   : > { %v489_v0 = vadd.f32 %v426_v37, %v405_v48  ;;  %v446_v1 = vpop.f32.mrf.mxu1 }
 0x14f   : > { %v490_v4 = vadd.f32 %v446_v1, %v406_v35 }
 0x150   : > { %v502_v5 = vadd.f32 %v494_v58, %v489_v0 }
 0x151   : > { %v503_v6 = vadd.f32 %v495_v38, %v490_v4 }
 0x152   : > { %v913_v7 = vmul.f32 -1.442695, %v502_v5 }
 0x153   : > { %v914_v9 = vmul.f32 -1.442695, %v503_v6 }
 0x154   : > { %1037 = vpow2.f32 %v913_v7  ;;  %v486_v43 = vpop.f32.mrf.mxu3 }
 0x155   : > { %1039 = vpow2.f32 %v914_v9  ;;  %v492_v44 = vadd.f32 %v486_v43, %v408_v8 }
 0x156   : > { %v466_v1 = vpop.f32.mrf.mxu2 }
 0x157   : > { %v505_v11 = vadd.f32 %v497_v41, %v492_v44  ;;  %v491_v2 = vadd.f32 %v466_v1, %v407_v12 }
 0x159   : > { %v915_v48 = vmul.f32 -1.442695, %v505_v11  ;;  %v504_v7 = vadd.f32 %v496_v3, %v491_v2 }
 0x15a   : > { %v1038_v37 = vpop.eup %1037 }
 0x15b   : > { %v1040_v0 = vpop.eup %1039  ;;  %v509_v4 = vadd.f32 1.0, %v1038_v37  ;;  %1041 = vpow2.f32 %v915_v48 }
 0x15c   : > { %v528_v5 = vadd.f32 1.0, %v1040_v0 }
 0x15d   : > { %1043 = vrcp.f32 %v509_v4  ;;  %v521_v35 = vand.u32 2147483648, %v509_v4  ;;  %v519_v43 = vand.u32 2147483647, %v509_v4  ;;  %vm515_vm3 = vweird.f32 %v509_v4 }
 0x15e   : > { %1045 = vrcp.f32 %v528_v5  ;;  %v540_v38 = vand.u32 2147483648, %v528_v5  ;;  %v538_v44 = vand.u32 2147483647, %v528_v5  ;;  %vm534_vm4 = vweird.f32 %v528_v5 }
 0x15f   : > { %v522_v0 = vor.u32 1.1754944e-38, %v521_v35  ;;  %vm520_vm7 = vcmp.eq.f32.partialorder %v519_v43, 8.507059e+37 }
 0x160   : > { %v541_v3 = vor.u32 1.1754944e-38, %v540_v38  ;;  %vm539_vm8 = vcmp.eq.f32.partialorder %v538_v44, 8.507059e+37 }
 0x161   : > { %v1042_v6 = vpop.eup %1041 }
 0x162   : > { %v548_v8 = vadd.f32 1.0, %v1042_v6 }
 0x163   : > { %v1044_v9 = vpop.eup %1043 }
 0x164   : > { %v1046_v39 = vpop.eup %1045  ;;  %v511_v40 = vmul.f32 %v1044_v9, %v509_v4  ;;  %1047 = vrcp.f32 %v548_v8  ;;  %vm516_vm1 = vweird.f32 %v1044_v9  ;;  %vm554_vm10 = vweird.f32 %v548_v8 }
 0x165   : > { %v530_v11 = vmul.f32 %v1046_v39, %v528_v5  ;;  %1049 = vtanh.f32 %v504_v7  ;;  %vm535_vm2 = vweird.f32 %v1046_v39  ;;  %vm517_vm5 = vmor %vm515_vm3, %vm516_vm1  ;;  %v558_v35 = vand.u32 2147483647, %v548_v8 }
 0x166   : > { %v512_v10 = vsub.f32 1.0, %v511_v40  ;;  %vm536_vm6 = vmor %vm534_vm4, %vm535_vm2  ;;  %vm604_vm1 = vcmask (%p361_p0), 1045504   ;;  %vm606_vm2 = vcmask (%p361_p0), 1046528   ;;  %vm728_vm3 = vcmask (%p361_p0), 523264  }
 0x167   : > { %v531_v58 = vsub.f32 1.0, %v530_v11  ;;  %vm559_vm12 = vcmp.eq.f32.partialorder %v558_v35, 8.507059e+37 }
 0x168   : > { %v513_v41 = vmul.f32 %v1044_v9, %v512_v10 }
 0x169   : > { %v532_v12 = vmul.f32 %v1046_v39, %v531_v58 }
 0x16a   : > { %v1048_v45 = vpop.eup %1047  ;;  %v514_v48 = vadd.f32 %v1044_v9, %v513_v41  ;;  %v560_v41 = vand.u32 2147483648, %v548_v8 }
 0x16b   : > { %v1050_v37 = vpop.eup %1049  ;;  %v550_v1 = vmul.f32 %v1048_v45, %v548_v8  ;;  %v533_v2 = vadd.f32 %v1046_v39, %v532_v12  ;;  %vm555_vm9 = vweird.f32 %v1048_v45  ;;  %v1006_v8 = vld [vmem:[%s1835_s5 + $0x30] sm:$0xff] (%p361_p0) }
 0x16c   : > { %v518_v6 = vsel %vm517_vm5, %v1044_v9, %v514_v48  ;;  %vm556_vm11 = vmor %vm554_vm10, %vm555_vm9  ;;  %v561_v38 = vor.u32 1.1754944e-38, %v560_v41 }
 0x16d   : > { %v551_v7 = vsub.f32 1.0, %v550_v1  ;;  %v523_v40 = vsel %vm520_vm7, %v522_v0, %v518_v6  ;;  %v537_v11 = vsel %vm536_vm6, %v1046_v39, %v533_v2 }
 0x16e   : > { %v542_v10 = vsel %vm539_vm8, %v541_v3, %v537_v11  ;;  %v565_v58 = vmul.f32 %v1050_v37, %v523_v40  ;;  %v1011_v37 = vld [vmem:[%s1837_s7 + $0x18] sm:$0xff] (%p361_p0) }
 0x16f   : > { %v552_v13 = vmul.f32 %v1048_v45, %v551_v7  ;;  %v564_v4 = vmul.f32 %v1097_v42, %v542_v10  ;;  %736 = vmatpush.bf16.msra.mxu1 (%p361_p0), %v1011_v37 }
 0x171   : > { %v566_v42 = vadd.f32 %v565_v58, %v564_v4   ;;  %v553_v5 = vadd.f32 %v1048_v45, %v552_v13  ;;  %v1007_v13 = vld [vmem:[%s1835_s5 + $0x38] sm:$0xff] (%p361_p0) }
 0x172   :  { %677 = vmatpush.bf16.msra.mxu0 (%p361_p0), %v1007_v13 }
 0x173   : > { %1051 = vtanh.f32 %v566_v42  ;;  %v557_v9 = vsel %vm556_vm11, %v1048_v45, %v553_v5  ;;  %737 = vmatpush.bf16.msra.mxu1 (%p361_p0), %v1010_v17 }
 0x174   : > { %v562_v39 = vsel %vm559_vm12, %v561_v38, %v557_v9 }
 0x176   :  { %678 = vmatpush.bf16.msra.mxu0 (%p361_p0), %v1006_v8 }
 0x177   :  { %738 = vmatpush.bf16.msra.mxu1 (%p361_p0), %v1009_v18 }
 0x178   :  { %363 = sbr.rel (!%p361_p0) target bundleno = 177 (0xb1), region = 66 }
 0x179   : > { %v1052_v43 = vpop.eup %1051 }
 0x17a   : > { %v568_v48 = vmul.f32 %v1052_v43, %v562_v39   ;;  %679 = vmatpush.bf16.msra.mxu0 (%p361_p0), %v1005_v34 }
 0x17b   :  { %739 = vmatpush.bf16.msra.mxu1 (%p361_p0), %v1008_v19 }
 0x17c   : > { %571 = vst [vmem:[%s570_s13] sm:$0x3] %v568_v48 }
 0x17e   :  { %680 = vmatpush.bf16.msra.mxu0 %v1004_v47 }
 0x182   :  { %681 = vmatpush.bf16.msra.mxu0 %v1003_v52 }
 0x183   :  { %v573_v12 = vld [vmem:[#allocation3 + $0x2] sm:$0x3]  ;;  %v574_v44 = vld [vmem:[#allocation3 + $0x4] sm:$0x3]  ;;  %v572_v48 = vld [vmem:[#allocation3] sm:$0x3] }
 0x184   :  { %v577_v45 = vrot.slane %v573_v12, 7  ;;  %v575_v36 = vld [vmem:[#allocation3 + $0x6] sm:$0x3]  ;;  %v580_v42 = vrot.slane %v574_v44, 6  ;;  %v586_v51 = vrot.slane %v572_v48, 5  ;;  %v588_v54 = vrot.slane %v573_v12, 4 }
 0x185   :  { %v583_v49 = vrot.slane %v575_v36, 5  ;;  %v590_v57 = vrot.slane %v574_v44, 3  ;;  %v592_v61 = vrot.slane %v575_v36, 2 }
 0x186   :  { %v595_v46 = vsel %vm404_vm0, %v572_v48, %v577_v45  ;;  %vm602_vm0 = vcmask 1044480   ;;  %682 = vmatpush.bf16.msra.mxu0 %v1002_v56 }
 0x187   :  { %v597_v50 = vsel %vm596_vm13, %v595_v46, %v580_v42 }
 0x188   :  { %v599_v53 = vsel %vm598_vm14, %v597_v50, %v583_v49 }
 0x189   :  { %v601_v55 = vsel %vm600_vm15, %v599_v53, %v586_v51 }
 0x18a   :  { %v603_v59 = vsel %vm602_vm0, %v601_v55, %v588_v54  ;;  %683 = vmatpush.bf16.msra.mxu0 %v1001_v60 }
 0x18b   :  { %v605_v62 = vsel %vm604_vm1, %v603_v59, %v590_v57 }
 0x18c   :  { %v607_v15 = vsel %vm606_vm2, %v605_v62, %v592_v61 }
 0x18d   :  { %v608_v16 = vpack.c.bf16 %v607_v15, %v607_v15 }
 0x18e   :  { %684 = vmatpush.bf16.msra.mxu0 %v1000_v63 }
 0x191   :  { %685 = vmatmul.bf16.vlgmr.msra.gmra.mxu0 %v608_v16 }
 0x20e   :  { %v686_v22 = vpop.f32.mrf.mxu0 }
 0x20f   :  { %v687_v23 = vadd.f32 %v1053_v20, %v686_v22 }
 0x211   :  { %1055 = vtanh.f32 %v687_v23 }
 0x216   :  { %v688_v24 = vpop.f32.mrf.mxu0 }
 0x217   :  { %v1056_v27 = vpop.eup %1055 }
 0x218   :  { %v691_v28 = vpack.c.bf16 %v1056_v27, %v1056_v27 }
 0x21a   :  { %965 = vmatmul.msk.bf16.vlgmr.msra.gmra.mxu1 %vm728_vm3, %v691_v28 }
 0x297   :  { %v741_v31 = vpop.f32.mrf.mxu1 }
 0x298   :  { %v742_v32 = vadd.f32 %v1054_v29, %v741_v31 }
 0x29a   :  { %745 = vst [vmem:[#allocation4] sm:$0xff] %v742_v32 }
 0x29b   :  { %756 = dma.vmem_to_hbm [thread:$0]  %s752_s15, 128, %s754_s17, [#allocation5]  }
 0x29f   :  { %v743_v33 = vpop.f32.mrf.mxu1 }
 0x2a0   :  { %1093 = dma.done.wait [#allocation5], 128  }
 0x2a1   :  { %1094 = vsyncadd [#allocation5], 4294967168 }
 0x2a2   :  { %761 = vsyncpa [#allocation5], 1 }

// kernel: babyai_forward.4
= control target key start
LH: loop header
LB: loop body
LE: loop exit
PB: predicated region body
PF: predicated region fallthrough
CT: control target
= control target key end

     0   :  { %vm188_vm0 = vcmask 130048   ;;  %vm2443_vm9 = vcmask 1040384   ;;  %vm2448_vm10 = vcmask 1041408   ;;  %vm2453_vm11 = vcmask 1042432   ;;  %s10933_s1 = inlined_call_operand.vmem [shape: bf16[16,128], index: 1, kind: input, shape index: {}]   ;;  %s10934_s0 = inlined_call_operand.vmem [shape: f32[648,16], index: 0, kind: input, shape index: {}]   ;;  %s10935_s2 = inlined_call_operand.vmem [shape: f32[1,128], index: 2, kind: input, shape index: {}]   ;;  %s10936_s3 = inlined_call_operand.vmem [shape: bf16[1152,128], index: 3, kind: input, shape index: {}]   ;;  %s10937_s4 = inlined_call_operand.vmem [shape: f32[1,128], index: 4, kind: input, shape index: {}]   ;;  %s10938_s14 = inlined_call_operand.vmem [shape: bf16[128,512], index: 14, kind: input, shape index: {}]   ;;  %s10939_s5 = inlined_call_operand.vmem [shape: bf16[1152,128], index: 5, kind: input, shape index: {}]   ;;  %s10940_s13 = inlined_call_operand.vmem [shape: f32[2,128], index: 13, kind: input, shape index: {}]   ;;  %s10941_s9 = inlined_call_operand.vmem [shape: bf16[1152,128], index: 9, kind: input, shape index: {}]   ;;  %s10942_s6 = inlined_call_operand.vmem [shape: f32[1,128], index: 6, kind: input, shape index: {}]   ;;  %s10943_s15 = inlined_call_operand.vmem [shape: f32[1,512], index: 15, kind: input, shape index: {}]   ;;  %s10944_s7 = inlined_call_operand.vmem [shape: bf16[1152,128], index: 7, kind: input, shape index: {}]   ;;  %s10945_s8 = inlined_call_operand.vmem [shape: f32[1,128], index: 8, kind: input, shape index: {}]   ;;  %s10946_s10 = inlined_call_operand.vmem [shape: f32[1,128], index: 10, kind: input, shape index: {}]   ;;  %s10947_s11 = inlined_call_operand.vmem [shape: bf16[1152,128], index: 11, kind: input, shape index: {}]   ;;  %s10948_s12 = inlined_call_operand.vmem [shape: f32[1,128], index: 12, kind: input, shape index: {}]   ;;  %s10949_s16 = inlined_call_operand.vmem [shape: f32[8,128], index: 16, kind: output, shape index: {}]  }
   0x1   :  { %11024 = sst [smem:[#allocation48_spill]] %s10933_s1  ;;  %v54_v1 = vld [vmem:[%s10934_s0] sm:$0xff]  ;;  %v55_v2 = vld [vmem:[%s10934_s0 + $0x8] sm:$0xff]  ;;  %v56_v4 = vld [vmem:[%s10934_s0 + $0x10] sm:$0xff]  ;;  %vm2458_vm12 = vcmask 1043456   ;;  %vm2463_vm13 = vcmask 1044480  }
   0x2   :  { %s11025_s23 = sld [smem:[#allocation48_spill]]  ;;  %v135_v3 = vpack.c.bf16 %v55_v2, %v54_v1  ;;  %v57_v5 = vld [vmem:[%s10934_s0 + $0x18] sm:$0xff]  ;;  %v58_v7 = vld [vmem:[%s10934_s0 + $0x20] sm:$0xff]  ;;  %v59_v8 = vld [vmem:[%s10934_s0 + $0x28] sm:$0xff]  ;;  %vm2468_vm14 = vcmask 1045504   ;;  %vm2473_vm15 = vcmask 1046528  }
   0x3   :  { %v136_v6 = vpack.c.bf16 %v57_v5, %v56_v4  ;;  %v137_v9 = vpack.c.bf16 %v59_v8, %v58_v7  ;;  %v60_v10 = vld [vmem:[%s10934_s0 + $0x30] sm:$0xff]  ;;  %v61_v11 = vld [vmem:[%s10934_s0 + $0x38] sm:$0xff]  ;;  %v62_v13 = vld [vmem:[%s10934_s0 + $0x40] sm:$0xff] }
   0x4   :  { %v138_v12 = vpack.c.bf16 %v61_v11, %v60_v10  ;;  %v63_v14 = vld [vmem:[%s10934_s0 + $0x48] sm:$0xff]  ;;  %v64_v16 = vld [vmem:[%s10934_s0 + $0x50] sm:$0xff]  ;;  %v65_v17 = vld [vmem:[%s10934_s0 + $0x58] sm:$0xff] }
   0x5   :  { %v139_v15 = vpack.c.bf16 %v63_v14, %v62_v13  ;;  %v140_v18 = vpack.c.bf16 %v65_v17, %v64_v16  ;;  %v66_v19 = vld [vmem:[%s10934_s0 + $0x60] sm:$0xff]  ;;  %v67_v20 = vld [vmem:[%s10934_s0 + $0x68] sm:$0xff]  ;;  %v68_v22 = vld [vmem:[%s10934_s0 + $0x70] sm:$0xff] }
   0x6   :  { %v141_v21 = vpack.c.bf16 %v67_v20, %v66_v19  ;;  %v69_v23 = vld [vmem:[%s10934_s0 + $0x78] sm:$0xff]  ;;  %v70_v25 = vld [vmem:[%s10934_s0 + $0x80] sm:$0xff]  ;;  %v71_v26 = vld [vmem:[%s10934_s0 + $0x88] sm:$0xff] }
   0x7   :  { %v142_v24 = vpack.c.bf16 %v69_v23, %v68_v22  ;;  %v143_v27 = vpack.c.bf16 %v71_v26, %v70_v25  ;;  %v72_v30 = vld [vmem:[%s10934_s0 + $0x90] sm:$0xff]  ;;  %v73_v31 = vld [vmem:[%s10934_s0 + $0x98] sm:$0xff]  ;;  %v74_v35 = vld [vmem:[%s10934_s0 + $0xa0] sm:$0xff] }
   0x8   :  { %v7347_v0 = vld [vmem:[%s11025_s23] sm:$0xff]  ;;  %v144_v32 = vpack.c.bf16 %v73_v31, %v72_v30  ;;  %v75_v36 = vld [vmem:[%s10934_s0 + $0xa8] sm:$0xff]  ;;  %v76_v40 = vld [vmem:[%s10934_s0 + $0xb0] sm:$0xff] }
   0x9   :  { %319 = vmatpush.bf16.msra.mxu0 %v7347_v0  ;;  %v145_v37 = vpack.c.bf16 %v75_v36, %v74_v35  ;;  %v77_v41 = vld [vmem:[%s10934_s0 + $0xb8] sm:$0xff]  ;;  %v78_v45 = vld [vmem:[%s10934_s0 + $0xc0] sm:$0xff]  ;;  %v79_v46 = vld [vmem:[%s10934_s0 + $0xc8] sm:$0xff] }
   0xa   :  { %v146_v42 = vpack.c.bf16 %v77_v41, %v76_v40  ;;  %v147_v47 = vpack.c.bf16 %v79_v46, %v78_v45  ;;  %v80_v50 = vld [vmem:[%s10934_s0 + $0xd0] sm:$0xff]  ;;  %v81_v51 = vld [vmem:[%s10934_s0 + $0xd8] sm:$0xff]  ;;  %v82_v55 = vld [vmem:[%s10934_s0 + $0xe0] sm:$0xff] }
   0xb   :  { %v148_v52 = vpack.c.bf16 %v81_v51, %v80_v50  ;;  %v83_v56 = vld [vmem:[%s10934_s0 + $0xe8] sm:$0xff]  ;;  %v84_v60 = vld [vmem:[%s10934_s0 + $0xf0] sm:$0xff]  ;;  %v85_v61 = vld [vmem:[%s10934_s0 + $0xf8] sm:$0xff] }
   0xc   :  { %5738 = vmatmul.msk.bf16.vlgmr.msra.gmra.mxu0 %vm188_vm0, %v135_v3  ;;  %v149_v57 = vpack.c.bf16 %v83_v56, %v82_v55  ;;  %v150_v62 = vpack.c.bf16 %v85_v61, %v84_v60  ;;  %v86_v1 = vld [vmem:[%s10934_s0 + $0x100] sm:$0xff]  ;;  %v87_v2 = vld [vmem:[%s10934_s0 + $0x108] sm:$0xff]  ;;  %v89_v7 = vld [vmem:[%s10934_s0 + $0x118] sm:$0xff] }
   0xd   :  { %v151_v3 = vpack.c.bf16 %v87_v2, %v86_v1  ;;  %v90_v11 = vld [vmem:[%s10934_s0 + $0x120] sm:$0xff]  ;;  %v92_v16 = vld [vmem:[%s10934_s0 + $0x130] sm:$0xff]  ;;  %v93_v17 = vld [vmem:[%s10934_s0 + $0x138] sm:$0xff] }
   0xe   :  { %v95_v22 = vld [vmem:[%s10934_s0 + $0x148] sm:$0xff]  ;;  %v96_v26 = vld [vmem:[%s10934_s0 + $0x150] sm:$0xff]  ;;  %v98_v35 = vld [vmem:[%s10934_s0 + $0x160] sm:$0xff] }
   0xf   :  { %v99_v36 = vld [vmem:[%s10934_s0 + $0x168] sm:$0xff]  ;;  %v101_v45 = vld [vmem:[%s10934_s0 + $0x178] sm:$0xff]  ;;  %v102_v51 = vld [vmem:[%s10934_s0 + $0x180] sm:$0xff] }
  0x10   :  { %v104_v60 = vld [vmem:[%s10934_s0 + $0x190] sm:$0xff]  ;;  %v105_v61 = vld [vmem:[%s10934_s0 + $0x198] sm:$0xff] }
  0x1c   :  { %5739 = vmatmul.msk.bf16.gmra.mxu0 %vm188_vm0, %v136_v6  ;;  %v88_v6 = vld [vmem:[%s10934_s0 + $0x110] sm:$0xff] }
  0x1d   :  { %v152_v8 = vpack.c.bf16 %v89_v7, %v88_v6  ;;  %v107_v6 = vld [vmem:[%s10934_s0 + $0x1a8] sm:$0xff] }
  0x2c   :  { %5740 = vmatmul.msk.bf16.gmra.mxu0 %vm188_vm0, %v137_v9 }
  0x3c   :  { %5741 = vmatmul.msk.bf16.gmra.mxu0 %vm188_vm0, %v138_v12  ;;  %v91_v12 = vld [vmem:[%s10934_s0 + $0x128] sm:$0xff] }
  0x3d   :  { %v153_v13 = vpack.c.bf16 %v91_v12, %v90_v11  ;;  %v108_v12 = vld [vmem:[%s10934_s0 + $0x1b0] sm:$0xff] }
  0x4c   :  { %5742 = vmatmul.msk.bf16.gmra.mxu0 %vm188_vm0, %v139_v15 }
  0x5c   :  { %5743 = vmatmul.msk.bf16.gmra.mxu0 %vm188_vm0, %v140_v18  ;;  %v154_v18 = vpack.c.bf16 %v93_v17, %v92_v16 }
  0x6c   :  { %5744 = vmatmul.msk.bf16.gmra.mxu0 %vm188_vm0, %v141_v21  ;;  %v94_v21 = vld [vmem:[%s10934_s0 + $0x140] sm:$0xff] }
  0x6d   :  { %v155_v23 = vpack.c.bf16 %v95_v22, %v94_v21  ;;  %v110_v21 = vld [vmem:[%s10934_s0 + $0x1c0] sm:$0xff]  ;;  %v111_v22 = vld [vmem:[%s10934_s0 + $0x1c8] sm:$0xff] }
  0x7c   :  { %5745 = vmatmul.msk.bf16.gmra.mxu0 %vm188_vm0, %v142_v24 }
  0x89   :  { %v7924_v28 = vpop.f32.mrf.mxu0 }
  0x8c   :  { %5746 = vmatmul.msk.bf16.gmra.mxu0 %vm188_vm0, %v143_v27  ;;  %v97_v27 = vld [vmem:[%s10934_s0 + $0x158] sm:$0xff] }
  0x8d   :  { %v156_v30 = vpack.c.bf16 %v97_v27, %v96_v26 }
  0x91   :  { %v7927_v29 = vpop.f32.mrf.mxu0 }
  0x99   :  { %v7935_v33 = vpop.f32.mrf.mxu0 }
  0x9c   :  { %5747 = vmatmul.msk.bf16.gmra.mxu0 %vm188_vm0, %v144_v32 }
  0xa1   :  { %v7938_v34 = vpop.f32.mrf.mxu0 }
  0xa9   :  { %v7946_v38 = vpop.f32.mrf.mxu0 }
  0xac   :  { %5748 = vmatmul.msk.bf16.gmra.mxu0 %vm188_vm0, %v145_v37  ;;  %v157_v37 = vpack.c.bf16 %v99_v36, %v98_v35  ;;  %v113_v35 = vld [vmem:[%s10934_s0 + $0x1d8] sm:$0xff] }
  0xb1   :  { %v7949_v39 = vpop.f32.mrf.mxu0 }
  0xb9   :  { %v7957_v43 = vpop.f32.mrf.mxu0 }
  0xbc   :  { %5749 = vmatmul.msk.bf16.gmra.mxu0 %vm188_vm0, %v146_v42  ;;  %v100_v42 = vld [vmem:[%s10934_s0 + $0x170] sm:$0xff] }
  0xbd   :  { %v158_v46 = vpack.c.bf16 %v101_v45, %v100_v42  ;;  %v114_v45 = vld [vmem:[%s10934_s0 + $0x1e0] sm:$0xff] }
  0xc1   :  { %v7960_v44 = vpop.f32.mrf.mxu0 }
  0xc9   :  { %v7968_v48 = vpop.f32.mrf.mxu0 }
  0xcc   :  { %5750 = vmatmul.msk.bf16.gmra.mxu0 %vm188_vm0, %v147_v47 }
  0xd1   :  { %v7971_v49 = vpop.f32.mrf.mxu0 }
  0xd9   :  { %v7979_v53 = vpop.f32.mrf.mxu0 }
  0xdc   :  { %5751 = vmatmul.msk.bf16.gmra.mxu0 %vm188_vm0, %v148_v52  ;;  %v103_v52 = vld [vmem:[%s10934_s0 + $0x188] sm:$0xff] }
  0xdd   :  { %v159_v55 = vpack.c.bf16 %v103_v52, %v102_v51 }
  0xe1   :  { %v7982_v54 = vpop.f32.mrf.mxu0 }
  0xe9   :  { %v7990_v58 = vpop.f32.mrf.mxu0 }
  0xec   :  { %5752 = vmatmul.msk.bf16.gmra.mxu0 %vm188_vm0, %v149_v57 }
  0xf1   :  { %v7993_v59 = vpop.f32.mrf.mxu0 }
  0xf9   :  { %v8001_v63 = vpop.f32.mrf.mxu0 }
  0xfc   :  { %5753 = vmatmul.msk.bf16.gmra.mxu0 %vm188_vm0, %v150_v62  ;;  %v160_v62 = vpack.c.bf16 %v105_v61, %v104_v60  ;;  %v116_v60 = vld [vmem:[%s10934_s0 + $0x1f0] sm:$0xff]  ;;  %v117_v61 = vld [vmem:[%s10934_s0 + $0x1f8] sm:$0xff] }
 0x101   :  { %v8004_v0 = vpop.f32.mrf.mxu0 }
 0x109   :  { %v8012_v4 = vpop.f32.mrf.mxu0 }
 0x10c   :  { %5754 = vmatmul.msk.bf16.gmra.mxu0 %vm188_vm0, %v151_v3  ;;  %v106_v3 = vld [vmem:[%s10934_s0 + $0x1a0] sm:$0xff] }
 0x10d   :  { %v161_v7 = vpack.c.bf16 %v107_v6, %v106_v3 }
 0x111   :  { %v8015_v5 = vpop.f32.mrf.mxu0 }
 0x119   :  { %v8023_v9 = vpop.f32.mrf.mxu0 }
 0x11c   :  { %5755 = vmatmul.msk.bf16.gmra.mxu0 %vm188_vm0, %v152_v8 }
 0x121   :  { %v8026_v10 = vpop.f32.mrf.mxu0 }
 0x129   :  { %v8034_v14 = vpop.f32.mrf.mxu0 }
 0x12c   :  { %5756 = vmatmul.msk.bf16.gmra.mxu0 %vm188_vm0, %v153_v13  ;;  %v109_v13 = vld [vmem:[%s10934_s0 + $0x1b8] sm:$0xff] }
 0x12d   :  { %v162_v16 = vpack.c.bf16 %v109_v13, %v108_v12  ;;  %v119_v12 = vld [vmem:[%s10934_s0 + $0x208] sm:$0xff] }
 0x131   :  { %v8037_v15 = vpop.f32.mrf.mxu0 }
 0x139   :  { %v8045_v19 = vpop.f32.mrf.mxu0 }
 0x13c   :  { %5757 = vmatmul.msk.bf16.gmra.mxu0 %vm188_vm0, %v154_v18 }
 0x141   :  { %v8048_v20 = vpop.f32.mrf.mxu0 }
 0x149   :  { %v8056_v24 = vpop.f32.mrf.mxu0 }
 0x14c   :  { %5758 = vmatmul.msk.bf16.gmra.mxu0 %vm188_vm0, %v155_v23  ;;  %v163_v23 = vpack.c.bf16 %v111_v22, %v110_v21  ;;  %v120_v22 = vld [vmem:[%s10934_s0 + $0x210] sm:$0xff] }
 0x151   :  { %v8059_v25 = vpop.f32.mrf.mxu0 }
 0x159   :  { %v8067_v31 = vpop.f32.mrf.mxu0 }
 0x15c   :  { %5759 = vmatmul.msk.bf16.gmra.mxu0 %vm188_vm0, %v156_v30  ;;  %v112_v30 = vld [vmem:[%s10934_s0 + $0x1d0] sm:$0xff] }
 0x15d   :  { %v164_v36 = vpack.c.bf16 %v113_v35, %v112_v30 }
 0x161   :  { %v8070_v32 = vpop.f32.mrf.mxu0 }
 0x169   :  { %v8078_v40 = vpop.f32.mrf.mxu0 }
 0x16c   :  { %5760 = vmatmul.msk.bf16.gmra.mxu0 %vm188_vm0, %v157_v37 }
 0x171   :  { %v8081_v41 = vpop.f32.mrf.mxu0 }
 0x179   :  { %v8089_v47 = vpop.f32.mrf.mxu0 }
 0x17c   :  { %5761 = vmatmul.msk.bf16.gmra.mxu0 %vm188_vm0, %v158_v46  ;;  %v115_v46 = vld [vmem:[%s10934_s0 + $0x1e8] sm:$0xff] }
 0x17d   :  { %v165_v51 = vpack.c.bf16 %v115_v46, %v114_v45  ;;  %v122_v45 = vld [vmem:[%s10934_s0 + $0x220] sm:$0xff]  ;;  %v123_v46 = vld [vmem:[%s10934_s0 + $0x228] sm:$0xff] }
 0x181   :  { %v8092_v50 = vpop.f32.mrf.mxu0 }
 0x189   :  { %v8100_v56 = vpop.f32.mrf.mxu0 }
 0x18c   :  { %5762 = vmatmul.msk.bf16.gmra.mxu0 %vm188_vm0, %v159_v55 }
 0x191   :  { %v8103_v57 = vpop.f32.mrf.mxu0 }
 0x199   :  { %v8111_v1 = vpop.f32.mrf.mxu0 }
 0x19c   :  { %5763 = vmatmul.msk.bf16.gmra.mxu0 %vm188_vm0, %v160_v62  ;;  %v166_v62 = vpack.c.bf16 %v117_v61, %v116_v60 }
 0x1a1   :  { %v8114_v2 = vpop.f32.mrf.mxu0 }
 0x1a9   :  { %v8122_v8 = vpop.f32.mrf.mxu0 }
 0x1ac   :  { %5764 = vmatmul.msk.bf16.gmra.mxu0 %vm188_vm0, %v161_v7  ;;  %v118_v7 = vld [vmem:[%s10934_s0 + $0x200] sm:$0xff] }
 0x1ad   :  { %v167_v13 = vpack.c.bf16 %v119_v12, %v118_v7  ;;  %v125_v7 = vld [vmem:[%s10934_s0 + $0x238] sm:$0xff] }
 0x1b1   :  { %v8125_v11 = vpop.f32.mrf.mxu0 }
 0x1b9   :  { %v8133_v17 = vpop.f32.mrf.mxu0 }
 0x1bc   :  { %5765 = vmatmul.msk.bf16.gmra.mxu0 %vm188_vm0, %v162_v16 }
 0x1c1   :  { %v8136_v18 = vpop.f32.mrf.mxu0 }
 0x1c9   :  { %v8144_v26 = vpop.f32.mrf.mxu0 }
 0x1cc   :  { %5766 = vmatmul.msk.bf16.gmra.mxu0 %vm188_vm0, %v163_v23  ;;  %v121_v23 = vld [vmem:[%s10934_s0 + $0x218] sm:$0xff] }
 0x1cd   :  { %v168_v30 = vpack.c.bf16 %v121_v23, %v120_v22  ;;  %v126_v23 = vld [vmem:[%s10934_s0 + $0x240] sm:$0xff] }
 0x1d1   :  { %v8147_v27 = vpop.f32.mrf.mxu0 }
 0x1d9   :  { %v8155_v37 = vpop.f32.mrf.mxu0 }
 0x1dc   :  { %5767 = vmatmul.msk.bf16.gmra.mxu0 %vm188_vm0, %v164_v36 }
 0x1e1   :  { %v8158_v42 = vpop.f32.mrf.mxu0 }
 0x1e9   :  { %v8166_v52 = vpop.f32.mrf.mxu0 }
 0x1ec   :  { %5768 = vmatmul.msk.bf16.gmra.mxu0 %vm188_vm0, %v165_v51  ;;  %v169_v51 = vpack.c.bf16 %v123_v46, %v122_v45 }
 0x1f1   :  { %v8169_v55 = vpop.f32.mrf.mxu0 }
 0x1f9   :  { %v8177_v3 = vpop.f32.mrf.mxu0 }
 0x1fc   :  { %5769 = vmatmul.msk.bf16.gmra.mxu0 %vm188_vm0, %v166_v62  ;;  %v124_v62 = vld [vmem:[%s10934_s0 + $0x230] sm:$0xff] }
 0x1fd   :  { %v170_v12 = vpack.c.bf16 %v125_v7, %v124_v62  ;;  %v128_v62 = vld [vmem:[%s10934_s0 + $0x250] sm:$0xff]  ;;  %v129_v7 = vld [vmem:[%s10934_s0 + $0x258] sm:$0xff] }
 0x201   :  { %v8180_v6 = vpop.f32.mrf.mxu0 }
 0x209   :  { %v8188_v16 = vpop.f32.mrf.mxu0 }
 0x20c   :  { %5770 = vmatmul.msk.bf16.gmra.mxu0 %vm188_vm0, %v167_v13 }
 0x211   :  { %v8191_v21 = vpop.f32.mrf.mxu0 }
 0x219   :  { %v8199_v35 = vpop.f32.mrf.mxu0 }
 0x21c   :  { %5771 = vmatmul.msk.bf16.gmra.mxu0 %vm188_vm0, %v168_v30  ;;  %v127_v30 = vld [vmem:[%s10934_s0 + $0x248] sm:$0xff] }
 0x21d   :  { %v171_v45 = vpack.c.bf16 %v127_v30, %v126_v23  ;;  %v130_v30 = vld [vmem:[%s10934_s0 + $0x260] sm:$0xff] }
 0x221   :  { %v8202_v36 = vpop.f32.mrf.mxu0 }
 0x229   :  { %v8210_v60 = vpop.f32.mrf.mxu0 }
 0x22c   :  { %5772 = vmatmul.msk.bf16.gmra.mxu0 %vm188_vm0, %v169_v51 }
 0x231   :  { %v8213_v61 = vpop.f32.mrf.mxu0 }
 0x239   :  { %v8221_v13 = vpop.f32.mrf.mxu0 }
 0x23c   :  { %5773 = vmatmul.msk.bf16.gmra.mxu0 %vm188_vm0, %v170_v12  ;;  %v172_v12 = vpack.c.bf16 %v129_v7, %v128_v62  ;;  %v8259_v62 = vld [vmem:[%s10935_s2] ss:$0 sm:$0xff] }
 0x23d   :  { %v8264_v7 = vadd.f32 %v8259_v62, %v7927_v29 }
 0x23f   :  { %11031 = vst [vmem:[#allocation7_spill] sm:$0xff] %v8264_v7 }
 0x241   :  { %v8224_v22 = vpop.f32.mrf.mxu0 }
 0x242   :  { %11026 = vst [vmem:[#allocation2_spill] sm:$0xff] %v8224_v22 }
 0x249   :  { %v8232_v46 = vpop.f32.mrf.mxu0 }
 0x24a   :  { %11027 = vst [vmem:[#allocation3_spill] sm:$0xff] %v8232_v46 }
 0x24c   :  { %5774 = vmatmul.msk.bf16.gmra.mxu0 %vm188_vm0, %v171_v45  ;;  %v131_v45 = vld [vmem:[%s10934_s0 + $0x268] sm:$0xff] }
 0x251   :  { %v8235_v51 = vpop.f32.mrf.mxu0 }
 0x252   :  { %11028 = vst [vmem:[#allocation4_spill] sm:$0xff] %v8235_v51  ;;  %v173_v51 = vpack.c.bf16 %v131_v45, %v130_v30  ;;  %v8272_v30 = vadd.f32 %v8259_v62, %v7935_v33  ;;  %v8290_v33 = vadd.f32 %v8259_v62, %v7949_v39  ;;  %v8306_v39 = vadd.f32 %v8259_v62, %v7960_v44 }
 0x253   :  { %v8324_v44 = vadd.f32 %v8259_v62, %v7979_v53  ;;  %v8341_v53 = vadd.f32 %v8259_v62, %v7993_v59 }
 0x254   :  { %11033 = vst [vmem:[#allocation9_spill] sm:$0xff] %v8272_v30 }
 0x259   :  { %v8243_v22 = vpop.f32.mrf.mxu0 }
 0x25c   :  { %5775 = vmatmul.msk.bf16.gmra.mxu0 %vm188_vm0, %v172_v12  ;;  %v8268_v12 = vadd.f32 %v8259_v62, %v7924_v28 }
 0x25e   :  { %11032 = vst [vmem:[#allocation8_spill] sm:$0xff] %v8268_v12  ;;  %v525_v45 = vadd.f32 %v8264_v7, %v8268_v12  ;;  %v132_v7 = vld [vmem:[%s10934_s0 + $0x270] sm:$0xff] }
 0x260   :  { %v526_v29 = vadd.f32 %v525_v45, %v8272_v30 }
 0x261   :  { %v8246_v23 = vpop.f32.mrf.mxu0 }
 0x262   :  { %11029 = vst [vmem:[#allocation5_spill] sm:$0xff] %v8246_v23  ;;  %v8285_v23 = vadd.f32 %v8259_v62, %v7946_v38  ;;  %v8301_v38 = vadd.f32 %v8259_v62, %v7957_v43 }
 0x264   :  { %11036 = vst [vmem:[#allocation12_spill] sm:$0xff] %v8285_v23 }
 0x265   :  { %11037 = vst [vmem:[#allocation13_spill] sm:$0xff] %v8301_v38 }
 0x269   :  { %v8254_v46 = vpop.f32.mrf.mxu0 }
 0x26a   :  { %11030 = vst [vmem:[#allocation6_spill] sm:$0xff] %v8254_v46  ;;  %v8278_v46 = vadd.f32 %v8259_v62, %v7938_v34  ;;  %v133_v34 = vld [vmem:[%s10934_s0 + $0x278] sm:$0xff] }
 0x26b   :  { %v174_v30 = vpack.c.bf16 %v133_v34, %v132_v7  ;;  %v8319_v7 = vadd.f32 %v8259_v62, %v7971_v49  ;;  %v8336_v49 = vadd.f32 %v8259_v62, %v7990_v58 }
 0x26c   :  { %5776 = vmatmul.msk.bf16.gmra.mxu0 %vm188_vm0, %v173_v51  ;;  %11034 = vst [vmem:[#allocation10_spill] sm:$0xff] %v8278_v46  ;;  %v527_v28 = vadd.f32 %v526_v29, %v8278_v46 }
 0x26e   :  { %v528_v45 = vadd.f32 %v527_v28, %v8285_v23 }
 0x270   :  { %v529_v29 = vadd.f32 %v528_v45, %v8290_v33 }
 0x271   :  { %v8280_v51 = vpop.f32.mrf.mxu0 }
 0x272   :  { %11035 = vst [vmem:[#allocation11_spill] sm:$0xff] %v8280_v51  ;;  %v530_v12 = vadd.f32 %v529_v29, %v8301_v38  ;;  %v8313_v51 = vadd.f32 %v8259_v62, %v7968_v48  ;;  %v8329_v48 = vadd.f32 %v8259_v62, %v7982_v54  ;;  %v134_v29 = vld [vmem:[%s10934_s0 + $0x280] sm:$0xff] }
 0x274   :  { %v531_v43 = vadd.f32 %v530_v12, %v8306_v39  ;;  %11038 = vst [vmem:[#allocation14_spill] sm:$0xff] %v8329_v48 }
 0x276   :  { %v532_v28 = vadd.f32 %v531_v43, %v8313_v51  ;;  %v8349_v43 = vadd.f32 %v8259_v62, %v8001_v63 }
 0x278   :  { %v533_v34 = vadd.f32 %v532_v28, %v8319_v7  ;;  %v175_v28 = vpack.c.bf16 %v134_v29, %v134_v29 }
 0x279   :  { %v8308_v46 = vpop.f32.mrf.mxu0 }
 0x27a   :  { %v534_v12 = vadd.f32 %v533_v34, %v8324_v44  ;;  %v8354_v34 = vadd.f32 %v8259_v62, %v8004_v0  ;;  %v8372_v0 = vadd.f32 %v8259_v62, %v8023_v9  ;;  %v8389_v9 = vadd.f32 %v8259_v62, %v8037_v15 }
 0x27b   :  { %v8406_v15 = vadd.f32 %v8259_v62, %v8056_v24 }
 0x27c   :  { %5777 = vmatmul.msk.bf16.gmra.mxu0 %vm188_vm0, %v174_v30  ;;  %v535_v30 = vadd.f32 %v534_v12, %v8329_v48  ;;  %v8361_v48 = vadd.f32 %v8259_v62, %v8012_v4  ;;  %v8377_v4 = vadd.f32 %v8259_v62, %v8026_v10  ;;  %11040 = vst [vmem:[#allocation16_spill] sm:$0xff] %v8389_v9 }
 0x27d   :  { %v8394_v10 = vadd.f32 %v8259_v62, %v8045_v19  ;;  %v8411_v19 = vadd.f32 %v8259_v62, %v8059_v25  ;;  %v8428_v25 = vadd.f32 %v8259_v62, %v8078_v40 }
 0x27e   :  { %v536_v54 = vadd.f32 %v535_v30, %v8336_v49  ;;  %11039 = vst [vmem:[#allocation15_spill] sm:$0xff] %v8361_v48  ;;  %v8367_v30 = vadd.f32 %v8259_v62, %v8015_v5  ;;  %v8384_v5 = vadd.f32 %v8259_v62, %v8034_v14 }
 0x27f   :  { %11041 = vst [vmem:[#allocation17_spill] sm:$0xff] %v8411_v19 }
 0x280   :  { %v537_v58 = vadd.f32 %v536_v54, %v8341_v53 }
 0x281   :  { %v8331_v45 = vpop.f32.mrf.mxu0 }
 0x282   :  { %v538_v59 = vadd.f32 %v537_v58, %v8349_v43 }
 0x284   :  { %v539_v63 = vadd.f32 %v538_v59, %v8354_v34 }
 0x286   :  { %v540_v29 = vadd.f32 %v539_v63, %v8361_v48 }
 0x288   :  { %v541_v54 = vadd.f32 %v540_v29, %v8367_v30 }
 0x289   :  { %v8356_v12 = vpop.f32.mrf.mxu0 }
 0x28c   :  { %5778 = vmatmul.msk.bf16.gmra.mxu0 %vm188_vm0, %v175_v28  ;;  %v542_v28 = vadd.f32 %v541_v54, %v8372_v0  ;;  %v8399_v54 = vadd.f32 %v8259_v62, %v8048_v20  ;;  %v8416_v20 = vadd.f32 %v8259_v62, %v8067_v31  ;;  %v8433_v31 = vadd.f32 %v8259_v62, %v8081_v41 }
 0x28d   :  { %v8450_v41 = vadd.f32 %v8259_v62, %v8100_v56 }
 0x28e   :  { %v543_v59 = vadd.f32 %v542_v28, %v8377_v4  ;;  %11042 = vst [vmem:[#allocation18_spill] sm:$0xff] %v8433_v31 }
 0x28f   :  { %11043 = vst [vmem:[#allocation19_spill] sm:$0xff] %v8450_v41 }
 0x290   :  { %v544_v63 = vadd.f32 %v543_v59, %v8384_v5 }
 0x291   :  { %v8379_v58 = vpop.f32.mrf.mxu0 }
 0x292   :  { %v545_v29 = vadd.f32 %v544_v63, %v8389_v9 }
 0x294   :  { %v546_v28 = vadd.f32 %v545_v29, %v8394_v10  ;;  %v8421_v29 = vadd.f32 %v8259_v62, %v8070_v32  ;;  %v8438_v32 = vadd.f32 %v8259_v62, %v8089_v47  ;;  %v8455_v47 = vadd.f32 %v8259_v62, %v8103_v57 }
 0x295   :  { %v8472_v57 = vadd.f32 %v8259_v62, %v8122_v8 }
 0x296   :  { %v547_v59 = vadd.f32 %v546_v28, %v8399_v54  ;;  %11044 = vst [vmem:[#allocation20_spill] sm:$0xff] %v8455_v47 }
 0x298   :  { %v548_v63 = vadd.f32 %v547_v59, %v8406_v15 }
 0x299   :  { %v8401_v14 = vpop.f32.mrf.mxu0 }
 0x29a   :  { %v549_v9 = vadd.f32 %v548_v63, %v8411_v19 }
 0x29c   :  { %v550_v28 = vadd.f32 %v549_v9, %v8416_v20  ;;  %v8443_v9 = vadd.f32 %v8259_v62, %v8092_v50  ;;  %v8460_v50 = vadd.f32 %v8259_v62, %v8111_v1  ;;  %v8477_v1 = vadd.f32 %v8259_v62, %v8125_v11 }
 0x29d   :  { %v8494_v11 = vadd.f32 %v8259_v62, %v8144_v26 }
 0x29e   :  { %v551_v59 = vadd.f32 %v550_v28, %v8421_v29  ;;  %11045 = vst [vmem:[#allocation21_spill] sm:$0xff] %v8460_v50 }
 0x29f   :  { %11046 = vst [vmem:[#allocation22_spill] sm:$0xff] %v8477_v1 }
 0x2a0   :  { %v552_v63 = vadd.f32 %v551_v59, %v8428_v25 }
 0x2a1   :  { %v8423_v24 = vpop.f32.mrf.mxu0 }
 0x2a2   :  { %v553_v19 = vadd.f32 %v552_v63, %v8433_v31 }
 0x2a4   :  { %v554_v28 = vadd.f32 %v553_v19, %v8438_v32  ;;  %v8465_v19 = vadd.f32 %v8259_v62, %v8114_v2  ;;  %v8482_v2 = vadd.f32 %v8259_v62, %v8133_v17  ;;  %v8499_v17 = vadd.f32 %v8259_v62, %v8147_v27 }
 0x2a6   :  { %v555_v59 = vadd.f32 %v554_v28, %v8443_v9  ;;  %11047 = vst [vmem:[#allocation23_spill] sm:$0xff] %v8482_v2 }
 0x2a8   :  { %v556_v63 = vadd.f32 %v555_v59, %v8450_v41 }
 0x2a9   :  { %v8445_v40 = vpop.f32.mrf.mxu0 }
 0x2aa   :  { %v557_v31 = vadd.f32 %v556_v63, %v8455_v47 }
 0x2ac   :  { %v558_v28 = vadd.f32 %v557_v31, %v8460_v50  ;;  %v8487_v31 = vadd.f32 %v8259_v62, %v8136_v18  ;;  %v8504_v18 = vadd.f32 %v8259_v62, %v8155_v37 }
 0x2ae   :  { %v559_v59 = vadd.f32 %v558_v28, %v8465_v19  ;;  %11048 = vst [vmem:[#allocation24_spill] sm:$0xff] %v8504_v18 }
 0x2b0   :  { %v560_v63 = vadd.f32 %v559_v59, %v8472_v57 }
 0x2b1   :  { %v8467_v56 = vpop.f32.mrf.mxu0 }
 0x2b2   :  { %v561_v47 = vadd.f32 %v560_v63, %v8477_v1 }
 0x2b4   :  { %v562_v28 = vadd.f32 %v561_v47, %v8482_v2  ;;  %v8509_v47 = vadd.f32 %v8259_v62, %v8158_v42 }
 0x2b6   :  { %v563_v59 = vadd.f32 %v562_v28, %v8487_v31  ;;  %v8514_v28 = vadd.f32 %v8259_v62, %v8166_v52 }
 0x2b8   :  { %v564_v63 = vadd.f32 %v563_v59, %v8494_v11  ;;  %v8519_v59 = vadd.f32 %v8259_v62, %v8169_v55 }
 0x2b9   :  { %v8489_v8 = vpop.f32.mrf.mxu0 }
 0x2ba   :  { %v565_v1 = vadd.f32 %v564_v63, %v8499_v17  ;;  %v8524_v63 = vadd.f32 %v8259_v62, %v8177_v3 }
 0x2bc   :  { %v566_v2 = vadd.f32 %v565_v1, %v8504_v18  ;;  %11049 = vst [vmem:[#allocation25_spill] sm:$0xff] %v8524_v63  ;;  %v8529_v1 = vadd.f32 %v8259_v62, %v8180_v6 }
 0x2be   :  { %v567_v27 = vadd.f32 %v566_v2, %v8509_v47  ;;  %11050 = vst [vmem:[#allocation26_spill] sm:$0xff] %v8529_v1  ;;  %v8534_v2 = vadd.f32 %v8259_v62, %v8188_v16 }
 0x2c0   :  { %v568_v37 = vadd.f32 %v567_v27, %v8514_v28  ;;  %11051 = vst [vmem:[#allocation27_spill] sm:$0xff] %v8534_v2  ;;  %v8539_v27 = vadd.f32 %v8259_v62, %v8191_v21 }
 0x2c1   :  { %v498_v26 = vpop.f32.mrf.mxu0 }
 0x2c2   :  { %v569_v42 = vadd.f32 %v568_v37, %v8519_v59  ;;  %11052 = vst [vmem:[#allocation28_spill] sm:$0xff] %v8539_v27  ;;  %v8544_v37 = vadd.f32 %v8259_v62, %v8199_v35 }
 0x2c4   :  { %v570_v18 = vadd.f32 %v569_v42, %v8524_v63  ;;  %11053 = vst [vmem:[#allocation29_spill] sm:$0xff] %v8544_v37  ;;  %v8549_v42 = vadd.f32 %v8259_v62, %v8202_v36 }
 0x2c6   :  { %v571_v55 = vadd.f32 %v570_v18, %v8529_v1  ;;  %11054 = vst [vmem:[#allocation30_spill] sm:$0xff] %v8549_v42  ;;  %v8554_v18 = vadd.f32 %v8259_v62, %v8210_v60 }
 0x2c8   :  { %v572_v3 = vadd.f32 %v571_v55, %v8534_v2  ;;  %11055 = vst [vmem:[#allocation31_spill] sm:$0xff] %v8554_v18  ;;  %v8559_v55 = vadd.f32 %v8259_v62, %v8213_v61 }
 0x2c9   :  { %v501_v52 = vpop.f32.mrf.mxu0 }
 0x2ca   :  { %v573_v6 = vadd.f32 %v572_v3, %v8539_v27  ;;  %11056 = vst [vmem:[#allocation32_spill] sm:$0xff] %v8559_v55  ;;  %v8564_v3 = vadd.f32 %v8259_v62, %v8221_v13  ;;  %v11058_v27 = vld [vmem:[#allocation2_spill] sm:$0xff] }
 0x2cc   :  { %v574_v63 = vadd.f32 %v573_v6, %v8544_v37  ;;  %11057 = vst [vmem:[#allocation33_spill] sm:$0xff] %v8564_v3  ;;  %v8569_v6 = vadd.f32 %v8259_v62, %v11058_v27 }
 0x2ce   :  { %v575_v21 = vadd.f32 %v574_v63, %v8549_v42  ;;  %11059 = vst [vmem:[#allocation2_spill] sm:$0xff] %v8569_v6  ;;  %v11060_v63 = vld [vmem:[#allocation3_spill] sm:$0xff] }
 0x2cf   :  { %v8574_v42 = vadd.f32 %v8259_v62, %v11060_v63 }
 0x2d0   :  { %v576_v35 = vadd.f32 %v575_v21, %v8554_v18  ;;  %v11062_v21 = vld [vmem:[#allocation4_spill] sm:$0xff] }
 0x2d1   :  { %v503_v16 = vpop.f32.mrf.mxu0  ;;  %11061 = vst [vmem:[#allocation3_spill] sm:$0xff] %v8574_v42  ;;  %v8579_v18 = vadd.f32 %v8259_v62, %v11062_v21 }
 0x2d2   :  { %v577_v36 = vadd.f32 %v576_v35, %v8559_v55  ;;  %v8584_v35 = vadd.f32 %v8259_v62, %v8243_v22  ;;  %v11064_v55 = vld [vmem:[#allocation5_spill] sm:$0xff] }
 0x2d4   :  { %v578_v37 = vadd.f32 %v577_v36, %v8564_v3  ;;  %11063 = vst [vmem:[#allocation4_spill] sm:$0xff] %v8584_v35  ;;  %v8589_v36 = vadd.f32 %v8259_v62, %v11064_v55 }
 0x2d6   :  { %v579_v61 = vadd.f32 %v578_v37, %v8569_v6  ;;  %v11065_v37 = vld [vmem:[#allocation6_spill] sm:$0xff] }
 0x2d7   :  { %v8594_v6 = vadd.f32 %v8259_v62, %v11065_v37 }
 0x2d8   :  { %v580_v13 = vadd.f32 %v579_v61, %v8574_v42  ;;  %v11067_v61 = vld [vmem:[#allocation11_spill] sm:$0xff] }
 0x2d9   :  { %v506_v60 = vpop.f32.mrf.mxu0  ;;  %11066 = vst [vmem:[#allocation5_spill] sm:$0xff] %v8594_v6  ;;  %v8599_v42 = vadd.f32 %v8259_v62, %v11067_v61 }
 0x2da   :  { %v581_v27 = vadd.f32 %v580_v13, %v8579_v18  ;;  %v8604_v13 = vadd.f32 %v8259_v62, %v8308_v46 }
 0x2db   :  { %11068 = vst [vmem:[#allocation6_spill] sm:$0xff] %v8599_v42 }
 0x2dc   :  { %v582_v3 = vadd.f32 %v581_v27, %v8584_v35  ;;  %11069 = vst [vmem:[#allocation11_spill] sm:$0xff] %v8604_v13  ;;  %v8609_v27 = vadd.f32 %v8259_v62, %v8331_v45 }
 0x2de   :  { %v583_v21 = vadd.f32 %v582_v3, %v8589_v36  ;;  %11070 = vst [vmem:[#allocation34_spill] sm:$0xff] %v8609_v27  ;;  %v8614_v3 = vadd.f32 %v8259_v62, %v8356_v12 }
 0x2e0   :  { %v584_v22 = vadd.f32 %v583_v21, %v8594_v6  ;;  %11071 = vst [vmem:[#allocation35_spill] sm:$0xff] %v8614_v3  ;;  %v8619_v21 = vadd.f32 %v8259_v62, %v8379_v58 }
 0x2e1   :  { %v508_v63 = vpop.f32.mrf.mxu0 }
 0x2e2   :  { %v585_v55 = vadd.f32 %v584_v22, %v8599_v42  ;;  %11072 = vst [vmem:[#allocation36_spill] sm:$0xff] %v8619_v21  ;;  %v8624_v22 = vadd.f32 %v8259_v62, %v8401_v14 }
 0x2e4   :  { %v586_v35 = vadd.f32 %v585_v55, %v8604_v13  ;;  %11073 = vst [vmem:[#allocation37_spill] sm:$0xff] %v8624_v22  ;;  %v8629_v55 = vadd.f32 %v8259_v62, %v8423_v24 }
 0x2e6   :  { %v587_v61 = vadd.f32 %v586_v35, %v8609_v27  ;;  %11074 = vst [vmem:[#allocation38_spill] sm:$0xff] %v8629_v55  ;;  %v8634_v35 = vadd.f32 %v8259_v62, %v8445_v40 }
 0x2e8   :  { %v588_v46 = vadd.f32 %v587_v61, %v8614_v3  ;;  %11075 = vst [vmem:[#allocation39_spill] sm:$0xff] %v8634_v35  ;;  %v8639_v61 = vadd.f32 %v8259_v62, %v8467_v56 }
 0x2e9   :  { %v511_v37 = vpop.f32.mrf.mxu0 }
 0x2ea   :  { %v589_v45 = vadd.f32 %v588_v46, %v8619_v21  ;;  %11076 = vst [vmem:[#allocation40_spill] sm:$0xff] %v8639_v61  ;;  %v8644_v46 = vadd.f32 %v8259_v62, %v8489_v8  ;;  %v8660_v8 = vadd.f32 %v8259_v62, %v506_v60 }
 0x2ec   :  { %v590_v13 = vadd.f32 %v589_v45, %v8624_v22  ;;  %11077 = vst [vmem:[#allocation41_spill] sm:$0xff] %v8644_v46  ;;  %v8648_v45 = vadd.f32 %v8259_v62, %v498_v26  ;;  %v8664_v26 = vadd.f32 %v8259_v62, %v508_v63 }
 0x2ed   :  { %11081 = vst [vmem:[#allocation45_spill] sm:$0xff] %v8660_v8 }
 0x2ee   :  { %v591_v58 = vadd.f32 %v590_v13, %v8629_v55  ;;  %11078 = vst [vmem:[#allocation42_spill] sm:$0xff] %v8648_v45  ;;  %v8652_v13 = vadd.f32 %v8259_v62, %v501_v52  ;;  %v8656_v55 = vadd.f32 %v8259_v62, %v503_v16  ;;  %v8668_v52 = vadd.f32 %v8259_v62, %v511_v37 }
 0x2ef   :  { %11082 = vst [vmem:[#allocation46_spill] sm:$0xff] %v8664_v26 }
 0x2f0   :  { %v592_v14 = vadd.f32 %v591_v58, %v8634_v35  ;;  %11079 = vst [vmem:[#allocation43_spill] sm:$0xff] %v8652_v13 }
 0x2f1   :  { %v513_v12 = vpop.f32.mrf.mxu0  ;;  %11080 = vst [vmem:[#allocation44_spill] sm:$0xff] %v8656_v55 }
 0x2f2   :  { %v593_v24 = vadd.f32 %v592_v14, %v8639_v61  ;;  %11083 = vst [vmem:[#allocation47_spill] sm:$0xff] %v8668_v52  ;;  %v514_v16 = vadd.f32 %v8259_v62, %v513_v12 }
 0x2f4   :  { %v594_v40 = vadd.f32 %v593_v24, %v8644_v46 }
 0x2f6   :  { %v595_v56 = vadd.f32 %v594_v40, %v8648_v45 }
 0x2f8   :  { %v596_v58 = vadd.f32 %v595_v56, %v8652_v13 }
 0x2f9   :  { %v516_v22 = vpop.f32.mrf.mxu0 }
 0x2fa   :  { %v597_v14 = vadd.f32 %v596_v58, %v8656_v55  ;;  %v517_v60 = vadd.f32 %v8259_v62, %v516_v22 }
 0x2fc   :  { %v598_v24 = vadd.f32 %v597_v14, %v8660_v8  ;;  %v7769_v8 = vmov 648.0  }
 0x2fd   :  { %7751 = vrcp.f32 %v7769_v8  ;;  %v11084_v8 = vld [vmem:[#allocation8_spill] sm:$0xff] }
 0x2fe   :  { %v599_v40 = vadd.f32 %v598_v24, %v8664_v26 }
 0x300   :  { %v600_v56 = vadd.f32 %v599_v40, %v8668_v52 }
 0x301   :  { %v518_v61 = vpop.f32.mrf.mxu0 }
 0x302   :  { %v601_v13 = vadd.f32 %v600_v56, %v514_v16  ;;  %v519_v58 = vadd.f32 %v8259_v62, %v518_v61 }
 0x303   :  { %v7752_v24 = vpop.eup %7751 }
 0x304   :  { %v602_v63 = vadd.f32 %v601_v13, %v517_v60  ;;  %v612_v12 = vmul.f32 648.0, %v7752_v24  ;;  %vm616_vm1 = vweird.f32 %v7752_v24 }
 0x306   :  { %v603_v46 = vadd.f32 %v602_v63, %v519_v58  ;;  %v613_v40 = vsub.f32 1.0, %v612_v12  ;;  %v11086_v63 = vld [vmem:[#allocation9_spill] sm:$0xff] }
 0x308   :  { %v614_v22 = vmul.f32 %v7752_v24, %v613_v40 }
 0x309   :  { %v521_v55 = vpop.f32.mrf.mxu0 }
 0x30a   :  { %v522_v45 = vadd.f32 %v8259_v62, %v521_v55  ;;  %v615_v3 = vadd.f32 %v7752_v24, %v614_v22 }
 0x30c   :  { %v604_v14 = vadd.f32 %v603_v46, %v522_v45  ;;  %v8676_v13 = vsel %vm616_vm1, %v7752_v24, %v615_v3  ;;  %v11085_v3 = vld [vmem:[#allocation7_spill] sm:$0xff] }
 0x30e   :  { %v605_v35 = vrot.slane %v604_v14, 4 }
 0x310   :  { %v606_v26 = vadd.f32 %v605_v35, %v604_v14 }
 0x311   :  { %v523_v37 = vpop.f32.mrf.mxu0 }
 0x312   :  { %v607_v21 = vrot.slane %v606_v26, 2 }
 0x314   :  { %v608_v52 = vadd.f32 %v607_v21, %v606_v26 }
 0x316   :  { %v609_v56 = vrot.slane %v608_v52, 1 }
 0x318   :  { %v610_v61 = vadd.f32 %v609_v56, %v608_v52 }
 0x31a   :  { %v8679_v62 = vmul.f32 %v8676_v13, %v610_v61 }
 0x31c   :  { %v8682_v55 = vsub.f32 %v514_v16, %v8679_v62  ;;  %v8685_v46 = vsub.f32 %v517_v60, %v8679_v62  ;;  %v8688_v35 = vsub.f32 %v519_v58, %v8679_v62  ;;  %v8691_v21 = vsub.f32 %v522_v45, %v8679_v62  ;;  %v11087_v60 = vld [vmem:[#allocation10_spill] sm:$0xff] }
 0x31d   :  { %v619_v26 = vsub.f32 %v11084_v8, %v8679_v62  ;;  %v620_v52 = vsub.f32 %v11085_v3, %v8679_v62  ;;  %v621_v14 = vsub.f32 %v11086_v63, %v8679_v62  ;;  %v622_v24 = vsub.f32 %v11087_v60, %v8679_v62 }
 0x31e   :  { %v623_v58 = vsub.f32 %v8285_v23, %v8679_v62  ;;  %v624_v40 = vsub.f32 %v8290_v33, %v8679_v62  ;;  %v625_v61 = vsub.f32 %v8301_v38, %v8679_v62  ;;  %v627_v23 = vsub.f32 %v8313_v51, %v8679_v62 }
 0x31f   :  { %v700_v16 = vmul.f32 %v619_v26, %v619_v26  ;;  %v701_v37 = vmul.f32 %v620_v52, %v620_v52  ;;  %v702_v12 = vmul.f32 %v621_v14, %v621_v14  ;;  %v703_v22 = vmul.f32 %v622_v24, %v622_v24 }
 0x320   :  { %v704_v8 = vmul.f32 %v623_v58, %v623_v58  ;;  %v626_v26 = vsub.f32 %v8306_v39, %v8679_v62  ;;  %v705_v52 = vmul.f32 %v624_v40, %v624_v40  ;;  %v706_v14 = vmul.f32 %v625_v61, %v625_v61 }
 0x321   :  { %v781_v45 = vadd.f32 %v701_v37, %v700_v16  ;;  %v628_v37 = vsub.f32 %v8319_v7, %v8679_v62  ;;  %v708_v58 = vmul.f32 %v627_v23, %v627_v23  ;;  %v631_v51 = vsub.f32 %v8336_v49, %v8679_v62 }
 0x322   :  { %v707_v24 = vmul.f32 %v626_v26, %v626_v26  ;;  %v632_v61 = vsub.f32 %v8341_v53, %v8679_v62 }
 0x323   :  { %v782_v56 = vadd.f32 %v781_v45, %v702_v12  ;;  %v629_v45 = vsub.f32 %v8324_v44, %v8679_v62  ;;  %v709_v40 = vmul.f32 %v628_v37, %v628_v37  ;;  %v712_v23 = vmul.f32 %v631_v51, %v631_v51 }
 0x324   :  { %v713_v37 = vmul.f32 %v632_v61, %v632_v61 }
 0x325   :  { %v783_v63 = vadd.f32 %v782_v56, %v703_v22  ;;  %v11088_v56 = vld [vmem:[#allocation14_spill] sm:$0xff] }
 0x326   :  { %v630_v38 = vsub.f32 %v11088_v56, %v8679_v62 }
 0x327   :  { %v784_v60 = vadd.f32 %v783_v63, %v704_v8  ;;  %v710_v63 = vmul.f32 %v629_v45, %v629_v45 }
 0x328   :  { %v711_v26 = vmul.f32 %v630_v38, %v630_v38 }
 0x329   :  { %v785_v16 = vadd.f32 %v784_v60, %v705_v52 }
 0x32b   :  { %v786_v12 = vadd.f32 %v785_v16, %v706_v14  ;;  %v633_v14 = vsub.f32 %v8349_v43, %v8679_v62 }
 0x32d   :  { %v787_v22 = vadd.f32 %v786_v12, %v707_v24  ;;  %v634_v24 = vsub.f32 %v8354_v34, %v8679_v62  ;;  %v714_v45 = vmul.f32 %v633_v14, %v633_v14 }
 0x32f   :  { %v788_v8 = vadd.f32 %v787_v22, %v708_v58  ;;  %v635_v58 = vsub.f32 %v8361_v48, %v8679_v62  ;;  %v715_v38 = vmul.f32 %v634_v24, %v634_v24 }
 0x331   :  { %v789_v60 = vadd.f32 %v788_v8, %v709_v40  ;;  %v636_v40 = vsub.f32 %v8367_v30, %v8679_v62  ;;  %v716_v51 = vmul.f32 %v635_v58, %v635_v58 }
 0x333   :  { %v790_v52 = vadd.f32 %v789_v60, %v710_v63  ;;  %v637_v63 = vsub.f32 %v8372_v0, %v8679_v62  ;;  %v717_v61 = vmul.f32 %v636_v40, %v636_v40 }
 0x335   :  { %v791_v16 = vadd.f32 %v790_v52, %v711_v26  ;;  %v638_v26 = vsub.f32 %v8377_v4, %v8679_v62  ;;  %v718_v14 = vmul.f32 %v637_v63, %v637_v63 }
 0x337   :  { %v792_v12 = vadd.f32 %v791_v16, %v712_v23  ;;  %v639_v23 = vsub.f32 %v8384_v5, %v8679_v62  ;;  %v719_v24 = vmul.f32 %v638_v26, %v638_v26 }
 0x339   :  { %v793_v22 = vadd.f32 %v792_v12, %v713_v37  ;;  %v11089_v37 = vld [vmem:[#allocation16_spill] sm:$0xff]  ;;  %v720_v58 = vmul.f32 %v639_v23, %v639_v23 }
 0x33a   :  { %v640_v30 = vsub.f32 %v11089_v37, %v8679_v62 }
 0x33b   :  { %v794_v8 = vadd.f32 %v793_v22, %v714_v45  ;;  %v641_v45 = vsub.f32 %v8394_v10, %v8679_v62 }
 0x33c   :  { %v721_v40 = vmul.f32 %v640_v30, %v640_v30 }
 0x33d   :  { %v795_v60 = vadd.f32 %v794_v8, %v715_v38  ;;  %v642_v38 = vsub.f32 %v8399_v54, %v8679_v62  ;;  %v722_v63 = vmul.f32 %v641_v45, %v641_v45 }
 0x33f   :  { %v796_v52 = vadd.f32 %v795_v60, %v716_v51  ;;  %v643_v51 = vsub.f32 %v8406_v15, %v8679_v62  ;;  %v723_v26 = vmul.f32 %v642_v38, %v642_v38 }
 0x341   :  { %v797_v16 = vadd.f32 %v796_v52, %v717_v61  ;;  %v11090_v61 = vld [vmem:[#allocation17_spill] sm:$0xff]  ;;  %v724_v23 = vmul.f32 %v643_v51, %v643_v51 }
 0x342   :  { %v644_v52 = vsub.f32 %v11090_v61, %v8679_v62 }
 0x343   :  { %v798_v12 = vadd.f32 %v797_v16, %v718_v14  ;;  %v645_v16 = vsub.f32 %v8416_v20, %v8679_v62  ;;  %v649_v20 = vsub.f32 %v8438_v32, %v8679_v62 }
 0x344   :  { %v725_v30 = vmul.f32 %v644_v52, %v644_v52 }
 0x345   :  { %v799_v22 = vadd.f32 %v798_v12, %v719_v24  ;;  %v646_v12 = vsub.f32 %v8421_v29, %v8679_v62  ;;  %v726_v45 = vmul.f32 %v645_v16, %v645_v16  ;;  %v730_v16 = vmul.f32 %v649_v20, %v649_v20 }
 0x347   :  { %v800_v8 = vadd.f32 %v799_v22, %v720_v58  ;;  %v647_v22 = vsub.f32 %v8428_v25, %v8679_v62  ;;  %v727_v38 = vmul.f32 %v646_v12, %v646_v12 }
 0x349   :  { %v801_v60 = vadd.f32 %v800_v8, %v721_v40  ;;  %v11091_v8 = vld [vmem:[#allocation18_spill] sm:$0xff]  ;;  %v728_v51 = vmul.f32 %v647_v22, %v647_v22 }
 0x34a   :  { %v648_v48 = vsub.f32 %v11091_v8, %v8679_v62 }
 0x34b   :  { %v802_v14 = vadd.f32 %v801_v60, %v722_v63 }
 0x34c   :  { %v729_v52 = vmul.f32 %v648_v48, %v648_v48 }
 0x34d   :  { %v803_v24 = vadd.f32 %v802_v14, %v723_v26  ;;  %v650_v26 = vsub.f32 %v8443_v9, %v8679_v62 }
 0x34f   :  { %v804_v58 = vadd.f32 %v803_v24, %v724_v23  ;;  %v651_v23 = vsub.f32 %v8450_v41, %v8679_v62  ;;  %v731_v12 = vmul.f32 %v650_v26, %v650_v26 }
 0x351   :  { %v805_v40 = vadd.f32 %v804_v58, %v725_v30  ;;  %v11092_v30 = vld [vmem:[#allocation20_spill] sm:$0xff]  ;;  %v732_v22 = vmul.f32 %v651_v23, %v651_v23 }
 0x352   :  { %v652_v58 = vsub.f32 %v11092_v30, %v8679_v62 }
 0x353   :  { %v806_v63 = vadd.f32 %v805_v40, %v726_v45  ;;  %v653_v40 = vsub.f32 %v8460_v50, %v8679_v62 }
 0x354   :  { %v733_v48 = vmul.f32 %v652_v58, %v652_v58 }
 0x355   :  { %v807_v60 = vadd.f32 %v806_v63, %v727_v38  ;;  %v654_v63 = vsub.f32 %v8465_v19, %v8679_v62  ;;  %v734_v20 = vmul.f32 %v653_v40, %v653_v40  ;;  %v658_v19 = vsub.f32 %v8487_v31, %v8679_v62 }
 0x357   :  { %v808_v14 = vadd.f32 %v807_v60, %v728_v51  ;;  %v655_v60 = vsub.f32 %v8472_v57, %v8679_v62  ;;  %v735_v26 = vmul.f32 %v654_v63, %v654_v63  ;;  %v739_v63 = vmul.f32 %v658_v19, %v658_v19 }
 0x359   :  { %v809_v24 = vadd.f32 %v808_v14, %v729_v52  ;;  %v11093_v14 = vld [vmem:[#allocation22_spill] sm:$0xff]  ;;  %v736_v23 = vmul.f32 %v655_v60, %v655_v60 }
 0x35a   :  { %v656_v41 = vsub.f32 %v11093_v14, %v8679_v62 }
 0x35b   :  { %v810_v45 = vadd.f32 %v809_v24, %v730_v16  ;;  %v11094_v24 = vld [vmem:[#allocation23_spill] sm:$0xff] }
 0x35c   :  { %v657_v50 = vsub.f32 %v11094_v24, %v8679_v62  ;;  %v737_v58 = vmul.f32 %v656_v41, %v656_v41 }
 0x35d   :  { %v811_v38 = vadd.f32 %v810_v45, %v731_v12 }
 0x35e   :  { %v738_v40 = vmul.f32 %v657_v50, %v657_v50 }
 0x35f   :  { %v812_v51 = vadd.f32 %v811_v38, %v732_v22  ;;  %v659_v22 = vsub.f32 %v8494_v11, %v8679_v62 }
 0x361   :  { %v813_v52 = vadd.f32 %v812_v51, %v733_v48  ;;  %v660_v48 = vsub.f32 %v8499_v17, %v8679_v62  ;;  %v740_v60 = vmul.f32 %v659_v22, %v659_v22 }
 0x363   :  { %v814_v16 = vadd.f32 %v813_v52, %v734_v20  ;;  %v11095_v20 = vld [vmem:[#allocation24_spill] sm:$0xff]  ;;  %v741_v41 = vmul.f32 %v660_v48, %v660_v48 }
 0x364   :  { %v661_v52 = vsub.f32 %v11095_v20, %v8679_v62 }
 0x365   :  { %v815_v12 = vadd.f32 %v814_v16, %v735_v26  ;;  %v662_v16 = vsub.f32 %v8509_v47, %v8679_v62 }
 0x366   :  { %v742_v50 = vmul.f32 %v661_v52, %v661_v52 }
 0x367   :  { %v816_v45 = vadd.f32 %v815_v12, %v736_v23  ;;  %v663_v12 = vsub.f32 %v8514_v28, %v8679_v62  ;;  %v743_v19 = vmul.f32 %v662_v16, %v662_v16  ;;  %v667_v28 = vsub.f32 %v8534_v2, %v8679_v62 }
 0x369   :  { %v817_v38 = vadd.f32 %v816_v45, %v737_v58  ;;  %v664_v45 = vsub.f32 %v8519_v59, %v8679_v62  ;;  %v744_v22 = vmul.f32 %v663_v12, %v663_v12  ;;  %v748_v12 = vmul.f32 %v667_v28, %v667_v28 }
 0x36b   :  { %v818_v51 = vadd.f32 %v817_v38, %v738_v40  ;;  %v11096_v38 = vld [vmem:[#allocation25_spill] sm:$0xff]  ;;  %v745_v48 = vmul.f32 %v664_v45, %v664_v45 }
 0x36c   :  { %v665_v20 = vsub.f32 %v11096_v38, %v8679_v62 }
 0x36d   :  { %v819_v26 = vadd.f32 %v818_v51, %v739_v63  ;;  %v666_v51 = vsub.f32 %v8529_v1, %v8679_v62 }
 0x36e   :  { %v746_v52 = vmul.f32 %v665_v20, %v665_v20 }
 0x36f   :  { %v820_v23 = vadd.f32 %v819_v26, %v740_v60  ;;  %v747_v16 = vmul.f32 %v666_v51, %v666_v51 }
 0x371   :  { %v821_v58 = vadd.f32 %v820_v23, %v741_v41  ;;  %v11097_v41 = vld [vmem:[#allocation28_spill] sm:$0xff] }
 0x372   :  { %v668_v23 = vsub.f32 %v11097_v41, %v8679_v62 }
 0x373   :  { %v822_v40 = vadd.f32 %v821_v58, %v742_v50  ;;  %v11098_v58 = vld [vmem:[#allocation29_spill] sm:$0xff] }
 0x374   :  { %v669_v38 = vsub.f32 %v11098_v58, %v8679_v62  ;;  %v749_v45 = vmul.f32 %v668_v23, %v668_v23 }
 0x375   :  { %v823_v63 = vadd.f32 %v822_v40, %v743_v19  ;;  %v11099_v40 = vld [vmem:[#allocation30_spill] sm:$0xff] }
 0x376   :  { %v670_v1 = vsub.f32 %v11099_v40, %v8679_v62  ;;  %v750_v20 = vmul.f32 %v669_v38, %v669_v38  ;;  %v7363_v38 = vld [vmem:[%s10936_s3 + $0x78] sm:$0xff] }
 0x377   :  { %v824_v60 = vadd.f32 %v823_v63, %v744_v22  ;;  %v11100_v63 = vld [vmem:[#allocation31_spill] sm:$0xff]  ;;  %1625 = vmatpush.bf16.msra.mxu2 %v7363_v38 }
 0x378   :  { %v671_v2 = vsub.f32 %v11100_v63, %v8679_v62  ;;  %v751_v51 = vmul.f32 %v670_v1, %v670_v1  ;;  %v7350_v63 = vld [vmem:[%s10936_s3 + $0x10] sm:$0xff] }
 0x379   :  { %v825_v26 = vadd.f32 %v824_v60, %v745_v48  ;;  %v11101_v60 = vld [vmem:[#allocation32_spill] sm:$0xff] }
 0x37a   :  { %v672_v41 = vsub.f32 %v11101_v60, %v8679_v62  ;;  %v752_v28 = vmul.f32 %v671_v2, %v671_v2  ;;  %v7371_v2 = vld [vmem:[%s10936_s3 + $0xb8] sm:$0xff] }
 0x37b   :  { %v826_v50 = vadd.f32 %v825_v26, %v746_v52  ;;  %v11102_v26 = vld [vmem:[#allocation33_spill] sm:$0xff]  ;;  %1674 = vmatpush.bf16.msra.mxu3 %v7371_v2 }
 0x37c   :  { %v673_v58 = vsub.f32 %v11102_v26, %v8679_v62  ;;  %v753_v23 = vmul.f32 %v672_v41, %v672_v41  ;;  %v7355_v60 = vld [vmem:[%s10936_s3 + $0x38] sm:$0xff] }
 0x37d   :  { %v827_v19 = vadd.f32 %v826_v50, %v747_v16  ;;  %v11103_v50 = vld [vmem:[#allocation2_spill] sm:$0xff]  ;;  %1576 = vmatpush.bf16.msra.mxu1 %v7355_v60 }
 0x37e   :  { %v674_v40 = vsub.f32 %v11103_v50, %v8679_v62 }
 0x37f   :  { %v828_v22 = vadd.f32 %v827_v19, %v748_v12  ;;  %v11104_v19 = vld [vmem:[#allocation3_spill] sm:$0xff] }
 0x381   :  { %v829_v48 = vadd.f32 %v828_v22, %v749_v45  ;;  %v675_v45 = vsub.f32 %v11104_v19, %v8679_v62  ;;  %v754_v22 = vmul.f32 %v673_v58, %v673_v58  ;;  %v7362_v58 = vld [vmem:[%s10936_s3 + $0x70] sm:$0xff] }
 0x382   :  { %1626 = vmatpush.bf16.msra.mxu2 %v7362_v58 }
 0x383   :  { %v830_v52 = vadd.f32 %v829_v48, %v750_v20  ;;  %v676_v20 = vsub.f32 %v8579_v18, %v8679_v62  ;;  %v755_v48 = vmul.f32 %v674_v40, %v674_v40  ;;  %v7370_v40 = vld [vmem:[%s10936_s3 + $0xb0] sm:$0xff] }
 0x384   :  { %1675 = vmatpush.bf16.msra.mxu3 %v7370_v40 }
 0x385   :  { %v831_v16 = vadd.f32 %v830_v52, %v751_v51  ;;  %v11105_v51 = vld [vmem:[#allocation4_spill] sm:$0xff] }
 0x386   :  { %v677_v52 = vsub.f32 %v11105_v51, %v8679_v62 }
 0x387   :  { %v832_v12 = vadd.f32 %v831_v16, %v752_v28  ;;  %v756_v28 = vmul.f32 %v675_v45, %v675_v45  ;;  %v7361_v45 = vld [vmem:[%s10936_s3 + $0x68] sm:$0xff] }
 0x388   :  { %v758_v2 = vmul.f32 %v677_v52, %v677_v52  ;;  %1627 = vmatpush.bf16.msra.mxu2 %v7361_v45  ;;  %v7360_v52 = vld [vmem:[%s10936_s3 + $0x60] sm:$0xff] }
 0x389   :  { %v833_v1 = vadd.f32 %v832_v12, %v753_v23  ;;  %v678_v23 = vsub.f32 %v8589_v36, %v8679_v62  ;;  %v757_v12 = vmul.f32 %v676_v20, %v676_v20  ;;  %v7369_v20 = vld [vmem:[%s10936_s3 + $0xa8] sm:$0xff] }
 0x38a   :  { %1676 = vmatpush.bf16.msra.mxu3 %v7369_v20  ;;  %v11107_v20 = vld [vmem:[#allocation35_spill] sm:$0xff] }
 0x38b   :  { %v834_v41 = vadd.f32 %v833_v1, %v754_v22  ;;  %v7354_v22 = vld [vmem:[%s10936_s3 + $0x30] sm:$0xff]  ;;  %v679_v1 = vsub.f32 %v8594_v6, %v8679_v62  ;;  %v759_v60 = vmul.f32 %v678_v23, %v678_v23  ;;  %v7368_v23 = vld [vmem:[%s10936_s3 + $0xa0] sm:$0xff] }
 0x38c   :  { %1577 = vmatpush.bf16.msra.mxu1 %v7354_v22  ;;  %1628 = vmatpush.bf16.msra.mxu2 %v7360_v52  ;;  %v682_v22 = vsub.f32 %v8609_v27, %v8679_v62  ;;  %v11108_v52 = vld [vmem:[#allocation36_spill] sm:$0xff] }
 0x38d   :  { %v835_v16 = vadd.f32 %v834_v41, %v755_v48  ;;  %v680_v41 = vsub.f32 %v8599_v42, %v8679_v62 }
 0x38e   :  { %1677 = vmatpush.bf16.msra.mxu3 %v7368_v23  ;;  %v7351_v23 = vld [vmem:[%s10936_s3 + $0x18] sm:$0xff] }
 0x38f   :  { %v836_v38 = vadd.f32 %v835_v16, %v756_v28  ;;  %v7353_v28 = vld [vmem:[%s10936_s3 + $0x28] sm:$0xff]  ;;  %v761_v45 = vmul.f32 %v680_v41, %v680_v41  ;;  %v7367_v41 = vld [vmem:[%s10936_s3 + $0x98] sm:$0xff] }
 0x390   :  { %v11106_v16 = vld [vmem:[#allocation11_spill] sm:$0xff]  ;;  %1578 = vmatpush.bf16.msra.mxu1 %v7353_v28 }
 0x391   :  { %v837_v48 = vadd.f32 %v836_v38, %v757_v12  ;;  %v681_v40 = vsub.f32 %v11106_v16, %v8679_v62  ;;  %v760_v12 = vmul.f32 %v679_v1, %v679_v1  ;;  %v7359_v1 = vld [vmem:[%s10936_s3 + $0x58] sm:$0xff]  ;;  %v684_v16 = vsub.f32 %v11108_v52, %v8679_v62 }
 0x392   :  { %1629 = vmatpush.bf16.msra.mxu2 %v7359_v1  ;;  %1678 = vmatpush.bf16.msra.mxu3 %v7367_v41 }
 0x393   :  { %v838_v58 = vadd.f32 %v837_v48, %v758_v2  ;;  %v7352_v48 = vld [vmem:[%s10936_s3 + $0x20] sm:$0xff]  ;;  %v765_v41 = vmul.f32 %v684_v16, %v684_v16  ;;  %v7365_v16 = vld [vmem:[%s10936_s3 + $0x88] sm:$0xff] }
 0x394   :  { %1579 = vmatpush.bf16.msra.mxu1 %v7352_v48 }
 0x395   :  { %v839_v38 = vadd.f32 %v838_v58, %v759_v60  ;;  %v683_v60 = vsub.f32 %v11107_v20, %v8679_v62  ;;  %v762_v58 = vmul.f32 %v681_v40, %v681_v40  ;;  %v7358_v40 = vld [vmem:[%s10936_s3 + $0x50] sm:$0xff] }
 0x396   :  { %1630 = vmatpush.bf16.msra.mxu2 %v7358_v40 }
 0x397   :  { %v840_v2 = vadd.f32 %v839_v38, %v760_v12  ;;  %v763_v12 = vmul.f32 %v682_v22, %v682_v22  ;;  %v764_v48 = vmul.f32 %v683_v60, %v683_v60  ;;  %v7366_v22 = vld [vmem:[%s10936_s3 + $0x90] sm:$0xff]  ;;  %v7357_v60 = vld [vmem:[%s10936_s3 + $0x48] sm:$0xff] }
 0x398   :  { %1580 = vmatpush.bf16.msra.mxu1 %v7351_v23  ;;  %1679 = vmatpush.bf16.msra.mxu3 %v7366_v22 }
 0x399   :  { %v841_v28 = vadd.f32 %v840_v2, %v761_v45  ;;  %v11109_v45 = vld [vmem:[#allocation37_spill] sm:$0xff] }
 0x39a   :  { %v685_v2 = vsub.f32 %v11109_v45, %v8679_v62  ;;  %1631 = vmatpush.bf16.msra.mxu2 %v7357_v60 }
 0x39b   :  { %v842_v38 = vadd.f32 %v841_v28, %v762_v58  ;;  %v11110_v58 = vld [vmem:[#allocation38_spill] sm:$0xff] }
 0x39c   :  { %v686_v28 = vsub.f32 %v11110_v58, %v8679_v62  ;;  %v766_v23 = vmul.f32 %v685_v2, %v685_v2  ;;  %1581 = vmatpush.bf16.msra.mxu1 %v7350_v63  ;;  %1680 = vmatpush.bf16.msra.mxu3 %v7365_v16  ;;  %v7349_v58 = vld [vmem:[%s10936_s3 + $0x8] sm:$0xff]  ;;  %v11113_v63 = vld [vmem:[#allocation41_spill] sm:$0xff] }
 0x39d   :  { %v843_v1 = vadd.f32 %v842_v38, %v763_v12  ;;  %v11111_v12 = vld [vmem:[#allocation39_spill] sm:$0xff]  ;;  %v689_v2 = vsub.f32 %v11113_v63, %v8679_v62 }
 0x39e   :  { %v687_v38 = vsub.f32 %v11111_v12, %v8679_v62  ;;  %v767_v22 = vmul.f32 %v686_v28, %v686_v28  ;;  %v7364_v28 = vld [vmem:[%s10936_s3 + $0x80] sm:$0xff]  ;;  %v11115_v63 = vld [vmem:[#allocation43_spill] sm:$0xff] }
 0x39f   :  { %v844_v20 = vadd.f32 %v843_v1, %v764_v48  ;;  %v11112_v48 = vld [vmem:[#allocation40_spill] sm:$0xff] }
 0x3a0   :  { %v688_v1 = vsub.f32 %v11112_v48, %v8679_v62  ;;  %1582 = vmatpush.bf16.msra.mxu1 %v7349_v58  ;;  %1681 = vmatpush.bf16.msra.mxu3 %v7364_v28  ;;  %v7348_v48 = vld [vmem:[%s10936_s3] sm:$0xff] }
 0x3a1   :  { %v845_v40 = vadd.f32 %v844_v20, %v765_v41  ;;  %v7356_v20 = vld [vmem:[%s10936_s3 + $0x40] sm:$0xff]  ;;  %v768_v41 = vmul.f32 %v687_v38, %v687_v38  ;;  %v691_v38 = vsub.f32 %v11115_v63, %v8679_v62 }
 0x3a2   :  { %1632 = vmatpush.bf16.msra.mxu2 %v7356_v20  ;;  %v769_v16 = vmul.f32 %v688_v1, %v688_v1  ;;  %v11116_v20 = vld [vmem:[#allocation44_spill] sm:$0xff] }
 0x3a3   :  { %v846_v45 = vadd.f32 %v845_v40, %v766_v23  ;;  %v11114_v23 = vld [vmem:[#allocation42_spill] sm:$0xff]  ;;  %v692_v52 = vsub.f32 %v11116_v20, %v8679_v62  ;;  %v772_v28 = vmul.f32 %v691_v38, %v691_v38  ;;  %v777_v38 = vmul.f32 %v8682_v55, %v8682_v55 }
 0x3a4   :  { %v690_v40 = vsub.f32 %v11114_v23, %v8679_v62  ;;  %1583 = vmatpush.bf16.msra.mxu1 %v7348_v48  ;;  %v11119_v48 = vld [vmem:[#allocation47_spill] sm:$0xff] }
 0x3a5   :  { %v847_v60 = vadd.f32 %v846_v45, %v767_v22  ;;  %v770_v45 = vmul.f32 %v689_v2, %v689_v2  ;;  %v7770_v22 = vmov 0.0|0.0   ;;  %v773_v2 = vmul.f32 %v692_v52, %v692_v52 }
 0x3a6   :  { %1633 = vmatmul.bf16.vlgmr.msra.gmra.mxu2 %v7770_v22  ;;  %v771_v23 = vmul.f32 %v690_v40, %v690_v40  ;;  %1682 = vmatmul.bf16.vlgmr.msra.gmra.mxu3 %v7770_v22  ;;  %v695_v6 = vsub.f32 %v11119_v48, %v8679_v62 }
 0x3a7   :  { %v848_v12 = vadd.f32 %v847_v60, %v768_v41  ;;  %v11117_v41 = vld [vmem:[#allocation45_spill] sm:$0xff]  ;;  %1584 = vmatmul.bf16.vlgmr.msra.gmra.mxu1 %v7770_v22 }
 0x3a8   :  { %v693_v60 = vsub.f32 %v11117_v41, %v8679_v62  ;;  %v776_v42 = vmul.f32 %v695_v6, %v695_v6  ;;  %v780_v6 = vmul.f32 %v8691_v21, %v8691_v21  ;;  %v7386_v21 = vld [vmem:[%s10936_s3 + $0x130] sm:$0xff] }
 0x3a9   :  { %v849_v58 = vadd.f32 %v848_v12, %v769_v16  ;;  %v11118_v12 = vld [vmem:[#allocation46_spill] sm:$0xff] }
 0x3aa   :  { %v694_v63 = vsub.f32 %v11118_v12, %v8679_v62  ;;  %v774_v20 = vmul.f32 %v693_v60, %v693_v60  ;;  %v7394_v12 = vld [vmem:[%s10936_s3 + $0x170] sm:$0xff] }
 0x3ab   :  { %v850_v1 = vadd.f32 %v849_v58, %v770_v45 }
 0x3ac   :  { %v775_v45 = vmul.f32 %v694_v63, %v694_v63 }
 0x3ad   :  { %v851_v27 = vadd.f32 %v850_v1, %v771_v23  ;;  %v778_v1 = vmul.f32 %v8685_v46, %v8685_v46  ;;  %v7387_v46 = vld [vmem:[%s10936_s3 + $0x138] sm:$0xff] }
 0x3ae   :  { %1772 = vmatpush.bf16.msrb.mxu2 %v7387_v46  ;;  %v11124_v46 = vld [vmem:[#allocation13_spill] sm:$0xff] }
 0x3af   :  { %v852_v16 = vadd.f32 %v851_v27, %v772_v28  ;;  %v779_v27 = vmul.f32 %v8688_v35, %v8688_v35  ;;  %v7379_v35 = vld [vmem:[%s10936_s3 + $0xf8] sm:$0xff] }
 0x3b0   :  { %1723 = vmatpush.bf16.msrb.mxu1 %v7379_v35  ;;  %v894_v35 = vmax.f32 %v8384_v5, %v11089_v37 }
 0x3b1   :  { %v853_v40 = vadd.f32 %v852_v16, %v773_v2  ;;  %v7378_v2 = vld [vmem:[%s10936_s3 + $0xf0] sm:$0xff] }
 0x3b2   :  { %1773 = vmatpush.bf16.msrb.mxu2 %v7386_v21  ;;  %v895_v5 = vmax.f32 %v894_v35, %v11091_v8  ;;  %v11142_v35 = vld [vmem:[#allocation31_spill] sm:$0xff] }
 0x3b3   :  { %v854_v58 = vadd.f32 %v853_v40, %v774_v20  ;;  %v7385_v20 = vld [vmem:[%s10936_s3 + $0x128] sm:$0xff] }
 0x3b4   :  { %1724 = vmatpush.bf16.msrb.mxu1 %v7378_v2  ;;  %v7393_v40 = vld [vmem:[%s10936_s3 + $0x168] sm:$0xff]  ;;  %v11129_v2 = vld [vmem:[#allocation25_spill] sm:$0xff] }
 0x3b5   :  { %v855_v51 = vadd.f32 %v854_v58, %v775_v45  ;;  %v7377_v45 = vld [vmem:[%s10936_s3 + $0xe8] sm:$0xff] }
 0x3b6   :  { %1638 = vmatmul.bf16.gmra.mxu2 %v7770_v22  ;;  %1687 = vmatmul.bf16.gmra.mxu3 %v7770_v22 }
 0x3b7   :  { %v856_v23 = vadd.f32 %v855_v51, %v776_v42  ;;  %1589 = vmatmul.bf16.gmra.mxu1 %v7770_v22  ;;  %v7395_v51 = vld [vmem:[%s10936_s3 + $0x178] sm:$0xff]  ;;  %1774 = vmatpush.bf16.msrb.mxu2 %v7385_v20 }
 0x3b8   :  { %1821 = vmatpush.bf16.msrb.mxu3 %v7395_v51  ;;  %1725 = vmatpush.bf16.msrb.mxu1 %v7377_v45  ;;  %v11134_v45 = vld [vmem:[#allocation28_spill] sm:$0xff] }
 0x3b9   :  { %v857_v41 = vadd.f32 %v856_v23, %v777_v38  ;;  %v11120_v23 = vld [vmem:[#allocation8_spill] sm:$0xff] }
 0x3bb   :  { %v858_v52 = vadd.f32 %v857_v41, %v778_v1  ;;  %v879_v1 = vmax.f32 %v11120_v23, %v11085_v3  ;;  %v891_v3 = vmax.f32 %v8372_v0, %v8377_v4  ;;  %v903_v0 = vmax.f32 %v8472_v57, %v11093_v14  ;;  %v11127_v14 = vld [vmem:[#allocation21_spill] sm:$0xff] }
 0x3bc   :  { %1822 = vmatpush.bf16.msrb.mxu3 %v7394_v12  ;;  %v896_v57 = vmax.f32 %v895_v5, %v8438_v32  ;;  %v915_v32 = vmax.f32 %v11102_v26, %v11103_v50  ;;  %v7384_v26 = vld [vmem:[%s10936_s3 + $0x120] sm:$0xff]  ;;  %v11145_v5 = vld [vmem:[#allocation39_spill] sm:$0xff] }
 0x3bd   :  { %v859_v60 = vadd.f32 %v858_v52, %v779_v27  ;;  %v8966_v27 = vmax.f32 %v879_v1, %v8319_v7  ;;  %v11121_v52 = vld [vmem:[#allocation10_spill] sm:$0xff]  ;;  %v892_v12 = vmax.f32 %v891_v3, %v8421_v29  ;;  %v904_v29 = vmax.f32 %v903_v0, %v8519_v59  ;;  %v11137_v1 = vld [vmem:[#allocation36_spill] sm:$0xff]  ;;  %v11141_v3 = vld [vmem:[#allocation29_spill] sm:$0xff]  ;;  %1775 = vmatpush.bf16.msrb.mxu2 %v7384_v26 }
 0x3be   :  { %v11136_v50 = vld [vmem:[#allocation34_spill] sm:$0xff] }
 0x3bf   :  { %v860_v55 = vadd.f32 %v859_v60, %v780_v6  ;;  %v11122_v6 = vld [vmem:[#allocation9_spill] sm:$0xff]  ;;  %v881_v51 = vmax.f32 %v8966_v27, %v8324_v44 }
 0x3c0   :  { %1823 = vmatpush.bf16.msrb.mxu3 %v7393_v40  ;;  %v882_v60 = vmax.f32 %v11122_v6, %v11121_v52  ;;  %v11138_v6 = vld [vmem:[#allocation38_spill] sm:$0xff] }
 0x3c1   :  { %v861_v42 = vrot.slane %v860_v55, 4 }
 0x3c2   :  { %v8980_v7 = vmax.f32 %v882_v60, %v11088_v56  ;;  %v893_v56 = vmax.f32 %v892_v12, %v8428_v25  ;;  %v905_v25 = vmax.f32 %v904_v29, %v11129_v2  ;;  %v11144_v12 = vld [vmem:[#allocation37_spill] sm:$0xff] }
 0x3c3   :  { %v862_v28 = vadd.f32 %v861_v42, %v860_v55  ;;  %v11123_v55 = vld [vmem:[#allocation12_spill] sm:$0xff] }
 0x3c4   :  { %v885_v42 = vmax.f32 %v11123_v55, %v8290_v33  ;;  %v900_v33 = vmax.f32 %v8406_v15, %v11090_v61  ;;  %v884_v4 = vmax.f32 %v8980_v7, %v8336_v49  ;;  %v11126_v61 = vld [vmem:[#allocation19_spill] sm:$0xff]  ;;  %v11139_v55 = vld [vmem:[#allocation40_spill] sm:$0xff] }
 0x3c5   :  { %v863_v63 = vrot.slane %v862_v28, 2 }
 0x3c7   :  { %v864_v16 = vadd.f32 %v863_v63, %v862_v28  ;;  %v897_v28 = vmax.f32 %v8394_v10, %v8399_v54  ;;  %v901_v54 = vmax.f32 %v900_v33, %v11092_v30  ;;  %v11128_v30 = vld [vmem:[#allocation24_spill] sm:$0xff] }
 0x3c8   :  { %v912_v63 = vmax.f32 %v11128_v30, %v8509_v47 }
 0x3c9   :  { %v865_v48 = vrot.slane %v864_v16, 1  ;;  %v898_v10 = vmax.f32 %v897_v28, %v8443_v9  ;;  %v902_v8 = vmax.f32 %v901_v54, %v11127_v14  ;;  %v906_v9 = vmax.f32 %v11094_v24, %v8487_v31  ;;  %v11131_v31 = vld [vmem:[#allocation6_spill] sm:$0xff]  ;;  %v11132_v24 = vld [vmem:[#allocation5_spill] sm:$0xff] }
 0x3ca   :  { %v924_v40 = vmax.f32 %v11132_v24, %v11131_v31  ;;  %v11146_v54 = vld [vmem:[#allocation41_spill] sm:$0xff]  ;;  %v931_v14 = vsub.f32 %v893_v56, %v8679_v62  ;;  %v927_v56 = vsub.f32 %v881_v51, %v8679_v62 }
 0x3cb   :  { %v866_v58 = vadd.f32 %v865_v48, %v864_v16  ;;  %v899_v49 = vmax.f32 %v898_v10, %v11126_v61  ;;  %v918_v16 = vmax.f32 %v11104_v19, %v8579_v18  ;;  %v11130_v48 = vld [vmem:[#allocation4_spill] sm:$0xff]  ;;  %v7392_v18 = vld [vmem:[%s10936_s3 + $0x160] sm:$0xff]  ;;  %v916_v19 = vmax.f32 %v915_v32, %v11136_v50 }
 0x3cc   :  { %v921_v20 = vmax.f32 %v11130_v48, %v8589_v36  ;;  %v7376_v36 = vld [vmem:[%s10936_s3 + $0xe0] sm:$0xff]  ;;  %1824 = vmatpush.bf16.msrb.mxu3 %v7392_v18  ;;  %v934_v30 = vsub.f32 %v902_v8, %v8679_v62 }
 0x3cd   :  { %v867_v38 = vmul.f32 %v866_v58, %v8676_v13  ;;  %v888_v13 = vmax.f32 %v11124_v46, %v8306_v39  ;;  %v886_v39 = vmax.f32 %v885_v42, %v8341_v53  ;;  %v11125_v53 = vld [vmem:[#allocation15_spill] sm:$0xff]  ;;  %v11135_v58 = vld [vmem:[#allocation30_spill] sm:$0xff]  ;;  %v919_v52 = vmax.f32 %v918_v16, %v11137_v1  ;;  %1726 = vmatpush.bf16.msrb.mxu1 %v7376_v36 }
 0x3ce   :  { %v922_v60 = vmax.f32 %v921_v20, %v11138_v6  ;;  %v925_v42 = vmax.f32 %v924_v40, %v11139_v55  ;;  %v11140_v46 = vld [vmem:[#allocation27_spill] sm:$0xff]  ;;  %v7383_v55 = vld [vmem:[%s10936_s3 + $0x118] sm:$0xff] }
 0x3cf   :  { %v8963_v41 = vadd.f32 1e-05, %v867_v38  ;;  %v8990_v21 = vmax.f32 %v888_v13, %v8354_v34  ;;  %v887_v15 = vmax.f32 %v886_v39, %v8349_v43  ;;  %v909_v43 = vmax.f32 %v8494_v11, %v8499_v17  ;;  %v11133_v11 = vld [vmem:[#allocation26_spill] sm:$0xff]  ;;  %v11143_v39 = vld [vmem:[#allocation35_spill] sm:$0xff]  ;;  %1776 = vmatpush.bf16.msrb.mxu2 %v7383_v55 }
 0x3d0   :  { %v907_v17 = vmax.f32 %v906_v9, %v11133_v11  ;;  %v913_v38 = vmax.f32 %v912_v63, %v11135_v58  ;;  %v920_v0 = vmax.f32 %v919_v52, %v11144_v12  ;;  %v923_v10 = vmax.f32 %v922_v60, %v11145_v5 }
 0x3d1   :  { %7753 = vrsqrt.f32 %v8963_v41  ;;  %v890_v34 = vmax.f32 %v8990_v21, %v11125_v53  ;;  %v910_v47 = vmax.f32 %v909_v43, %v11134_v45  ;;  %v917_v21 = vmax.f32 %v916_v19, %v11143_v39 }
 0x3d2   :  { %v908_v13 = vmax.f32 %v907_v17, %v11140_v46  ;;  %v914_v28 = vmax.f32 %v913_v38, %v11142_v35  ;;  %v926_v53 = vmax.f32 %v925_v42, %v11146_v54  ;;  %v929_v61 = vsub.f32 %v887_v15, %v8679_v62  ;;  %v7375_v42 = vld [vmem:[%s10936_s3 + $0xd8] sm:$0xff] }
 0x3d3   :  { %v911_v7 = vmax.f32 %v910_v47, %v11141_v3  ;;  %v932_v9 = vsub.f32 %v896_v57, %v8679_v62  ;;  %v933_v43 = vsub.f32 %v899_v49, %v8679_v62  ;;  %v935_v63 = vsub.f32 %v905_v25, %v8679_v62  ;;  %1727 = vmatpush.bf16.msrb.mxu1 %v7375_v42 }
 0x3d4   :  { %vm875_vm3 = vweird.f32 %v8963_v41  ;;  %v938_v15 = vsub.f32 %v914_v28, %v8679_v62  ;;  %v928_v57 = vsub.f32 %v884_v4, %v8679_v62  ;;  %v930_v49 = vsub.f32 %v890_v34, %v8679_v62 }
 0x3d5   :  { %v937_v32 = vsub.f32 %v911_v7, %v8679_v62  ;;  %v939_v25 = vsub.f32 %v917_v21, %v8679_v62  ;;  %v7771_v58 = vmov 0.0   ;;  %v941_v36 = vsub.f32 %v923_v10, %v8679_v62 }
 0x3d6   :  { %v942_v50 = vsub.f32 %v926_v53, %v8679_v62 }
 0x3d7   :  { %v7754_v37 = vpop.eup %7753 }
 0x3d8   :  { %v870_v59 = vmul.f32 %v7754_v37, %v8963_v41  ;;  %vm876_vm2 = vweird.f32 %v7754_v37  ;;  %v940_v41 = vsub.f32 %v920_v0, %v8679_v62 }
 0x3d9   :  { %vm877_vm4 = vmor %vm875_vm3, %vm876_vm2 }
 0x3da   :  { %v871_v23 = vmul.f32 %v7754_v37, %v870_v59  ;;  %v936_v59 = vsub.f32 %v908_v13, %v8679_v62  ;;  %v7391_v62 = vld [vmem:[%s10936_s3 + $0x158] sm:$0xff] }
 0x3db   :  { %1825 = vmatpush.bf16.msrb.mxu3 %v7391_v62 }
 0x3dc   :  { %v872_v33 = vmul.f32 0.5, %v871_v23 }
 0x3de   :  { %v873_v29 = vsub.f32 1.5, %v872_v33 }
 0x3e0   :  { %v874_v2 = vmul.f32 %v7754_v37, %v873_v29 }
 0x3e2   :  { %v878_v8 = vsel %vm877_vm4, %v7754_v37, %v874_v2  ;;  %v7390_v2 = vld [vmem:[%s10936_s3 + $0x150] sm:$0xff] }
 0x3e3   :  { %v943_v16 = vmul.f32 %v927_v56, %v878_v8  ;;  %v944_v48 = vmul.f32 %v928_v57, %v878_v8  ;;  %v945_v20 = vmul.f32 %v929_v61, %v878_v8  ;;  %v946_v31 = vmul.f32 %v930_v49, %v878_v8  ;;  %1826 = vmatpush.bf16.msrb.mxu3 %v7390_v2  ;;  %v7389_v56 = vld [vmem:[%s10936_s3 + $0x148] sm:$0xff] }
 0x3e4   :  { %v9065_v24 = vmul.f32 %v931_v14, %v878_v8  ;;  %v948_v40 = vmul.f32 %v932_v9, %v878_v8  ;;  %v949_v11 = vmul.f32 %v933_v43, %v878_v8  ;;  %v9067_v17 = vmul.f32 %v934_v30, %v878_v8  ;;  %v7373_v57 = vld [vmem:[%s10936_s3 + $0xc8] sm:$0xff] }
 0x3e5   :  { %v959_v44 = vmax.f32 %v943_v16, 0.0  ;;  %v960_v27 = vmax.f32 %v944_v48, 0.0  ;;  %v961_v51 = vmax.f32 %v945_v20, 0.0  ;;  %v962_v4 = vmax.f32 %v946_v31, 0.0  ;;  %v9174_v48 = vld [vmem:[%s10937_s4] ss:$0 sm:$0xff] }
 0x3e6   :  { %v963_v34 = vmax.f32 %v9065_v24, 0.0  ;;  %v964_v37 = vmax.f32 %v948_v40, 0.0  ;;  %v965_v45 = vmax.f32 %v949_v11, 0.0  ;;  %v966_v47 = vmax.f32 %v9067_v17, 0.0  ;;  %v7411_v31 = vld [vmem:[%s10936_s3 + $0x1f8] sm:$0xff] }
 0x3e7   :  { %v9072_v38 = vpack.c.bf16 %v959_v44, %v7771_v58  ;;  %v9074_v23 = vpack.c.bf16 %v960_v27, %v959_v44  ;;  %v9076_v26 = vpack.c.bf16 %v961_v51, %v960_v27  ;;  %v9078_v18 = vpack.c.bf16 %v962_v4, %v961_v51  ;;  %1827 = vmatpush.bf16.msrb.mxu3 %v7389_v56  ;;  %v7419_v24 = vld [vmem:[%s10936_s3 + $0x238] sm:$0xff] }
 0x3e8   :  { %v9082_v19 = vpack.c.bf16 %v964_v37, %v963_v34  ;;  %v9084_v1 = vpack.c.bf16 %v965_v45, %v964_v37  ;;  %v9088_v52 = vpack.c.bf16 %v966_v47, %v965_v45  ;;  %v951_v6 = vmul.f32 %v935_v63, %v878_v8  ;;  %v7382_v63 = vld [vmem:[%s10936_s3 + $0x110] sm:$0xff]  ;;  %v7403_v40 = vld [vmem:[%s10936_s3 + $0x1b8] sm:$0xff] }
 0x3e9   :  { %1594 = vmatmul.bf16.gmra.mxu1 %v9072_v38  ;;  %1643 = vmatmul.bf16.gmra.mxu2 %v9074_v23  ;;  %v952_v60 = vmul.f32 %v936_v59, %v878_v8  ;;  %v953_v46 = vmul.f32 %v937_v32, %v878_v8  ;;  %v9100_v13 = vmul.f32 %v938_v15, %v878_v8  ;;  %v9125_v30 = vpack.c.bf16 0.0, %v962_v4  ;;  %v7374_v59 = vld [vmem:[%s10936_s3 + $0xd0] sm:$0xff]  ;;  %v7381_v15 = vld [vmem:[%s10936_s3 + $0x108] sm:$0xff]  ;;  %v7399_v56 = vld [vmem:[%s10936_s3 + $0x198] sm:$0xff] }
 0x3ea   :  { %1692 = vmatmul.bf16.gmra.mxu3 %v9076_v26  ;;  %v9102_v3 = vmul.f32 %v939_v25, %v878_v8  ;;  %v956_v7 = vmul.f32 %v940_v41, %v878_v8  ;;  %v967_v35 = vmax.f32 %v951_v6, 0.0  ;;  %v957_v33 = vmul.f32 %v941_v36, %v878_v8  ;;  %1777 = vmatpush.bf16.msrb.mxu2 %v7382_v63  ;;  %v7388_v25 = vld [vmem:[%s10936_s3 + $0x140] sm:$0xff]  ;;  %v7410_v36 = vld [vmem:[%s10936_s3 + $0x1f0] sm:$0xff] }
 0x3eb   :  { %v968_v28 = vmax.f32 %v952_v60, 0.0  ;;  %v9104_v39 = vmul.f32 %v942_v50, %v878_v8  ;;  %v969_v21 = vmax.f32 %v953_v46, 0.0  ;;  %v970_v12 = vmax.f32 %v9100_v13, 0.0  ;;  %1728 = vmatpush.bf16.msrb.mxu1 %v7374_v59  ;;  %v7380_v8 = vld [vmem:[%s10936_s3 + $0x100] sm:$0xff]  ;;  %1828 = vmatpush.bf16.msrb.mxu3 %v7388_v25  ;;  %v7418_v50 = vld [vmem:[%s10936_s3 + $0x230] sm:$0xff]  ;;  %v7409_v13 = vld [vmem:[%s10936_s3 + $0x1e8] sm:$0xff] }
 0x3ec   :  { %v971_v0 = vmax.f32 %v9102_v3, 0.0  ;;  %v972_v5 = vmax.f32 %v956_v7, 0.0  ;;  %v973_v54 = vmax.f32 %v957_v33, 0.0  ;;  %v9140_v32 = vpack.c.bf16 %v963_v34, %v7771_v58  ;;  %v7372_v41 = vld [vmem:[%s10936_s3 + $0xc0] sm:$0xff]  ;;  %v7402_v6 = vld [vmem:[%s10936_s3 + $0x1b0] sm:$0xff]  ;;  %v7417_v7 = vld [vmem:[%s10936_s3 + $0x228] sm:$0xff] }
 0x3ed   :  { %v9108_v10 = vpack.c.bf16 %v968_v28, %v967_v35  ;;  %v974_v53 = vmax.f32 %v9104_v39, 0.0  ;;  %v9111_v29 = vpack.c.bf16 %v969_v21, %v968_v28  ;;  %v9113_v61 = vpack.c.bf16 %v970_v12, %v969_v21 }
 0x3ee   :  { %v9117_v14 = vpack.c.bf16 %v972_v5, %v971_v0  ;;  %v9119_v9 = vpack.c.bf16 %v973_v54, %v972_v5  ;;  %1778 = vmatpush.bf16.msrb.mxu2 %v7381_v15  ;;  %v9154_v49 = vpack.c.bf16 0.0, %v966_v47  ;;  %v9169_v16 = vpack.c.bf16 %v967_v35, %v7771_v58  ;;  %v7401_v35 = vld [vmem:[%s10936_s3 + $0x1a8] sm:$0xff]  ;;  %v7415_v5 = vld [vmem:[%s10936_s3 + $0x218] sm:$0xff] }
 0x3ef   :  { %v9123_v43 = vpack.c.bf16 %v974_v53, %v973_v54  ;;  %1729 = vmatpush.bf16.msrb.mxu1 %v7373_v57  ;;  %1968 = vmatpush.bf16.msra.mxu3 %v7419_v24  ;;  %v9197_v45 = vpack.c.bf16 0.0, %v970_v12  ;;  %v7407_v12 = vld [vmem:[%s10936_s3 + $0x1d8] sm:$0xff]  ;;  %v7406_v24 = vld [vmem:[%s10936_s3 + $0x1d0] sm:$0xff] }
 0x3f2   :  { %1779 = vmatpush.bf16.msrb.mxu2 %v7380_v8 }
 0x3f3   :  { %1730 = vmatpush.bf16.msrb.mxu1 %v7372_v41  ;;  %1969 = vmatpush.bf16.msra.mxu3 %v7418_v50  ;;  %v7398_v50 = vld [vmem:[%s10936_s3 + $0x190] sm:$0xff] }
 0x3f6   :  { %1919 = vmatpush.bf16.msra.mxu2 %v7411_v31 }
 0x3f7   :  { %1870 = vmatpush.bf16.msra.mxu1 %v7403_v40  ;;  %1970 = vmatpush.bf16.msra.mxu3 %v7417_v7  ;;  %v7414_v40 = vld [vmem:[%s10936_s3 + $0x210] sm:$0xff]  ;;  %v7405_v7 = vld [vmem:[%s10936_s3 + $0x1c8] sm:$0xff] }
 0x3f9   :  { %1599 = vmatmul.bf16.gmra.mxu1 %v9076_v26  ;;  %1648 = vmatmul.bf16.gmra.mxu2 %v9078_v18 }
 0x3fa   :  { %1697 = vmatmul.bf16.gmra.mxu3 %v9125_v30  ;;  %1920 = vmatpush.bf16.msra.mxu2 %v7410_v36 }
 0x3fb   :  { %1871 = vmatpush.bf16.msra.mxu1 %v7402_v6 }
 0x3fe   :  { %1921 = vmatpush.bf16.msra.mxu2 %v7409_v13 }
 0x3ff   :  { %1872 = vmatpush.bf16.msra.mxu1 %v7401_v35  ;;  %v7413_v35 = vld [vmem:[%s10936_s3 + $0x208] sm:$0xff] }
 0x409   :  { %1604 = vmatmul.bf16.gmra.mxu1 %v9140_v32  ;;  %1653 = vmatmul.bf16.gmra.mxu2 %v9082_v19 }
 0x40a   :  { %1702 = vmatmul.bf16.gmra.mxu3 %v9084_v1 }
 0x419   :  { %1609 = vmatmul.bf16.gmra.mxu1 %v9084_v1  ;;  %1658 = vmatmul.bf16.gmra.mxu2 %v9088_v52 }
 0x41a   :  { %1707 = vmatmul.bf16.gmra.mxu3 %v9154_v49 }
 0x424   :  { %v1585_v20 = vpop.f32.mrf.mxu1 }
 0x425   :  { %v1586_v11 = vadd.f32 %v9174_v48, %v1585_v20 }
 0x429   :  { %1614 = vmatmul.bf16.gmra.mxu1 %v9169_v16  ;;  %1663 = vmatmul.bf16.gmra.mxu2 %v9108_v10  ;;  %v1634_v17 = vpop.f32.mrf.mxu2  ;;  %v1683_v27 = vpop.f32.mrf.mxu3 }
 0x42a   :  { %1712 = vmatmul.bf16.gmra.mxu3 %v9111_v29  ;;  %v1635_v44 = vadd.f32 %v1634_v17, %v1586_v11 }
 0x42c   :  { %v9189_v51 = vadd.f32 %v1683_v27, %v1635_v44  ;;  %v9191_v4 = vpop.f32.mrf.mxu1 }
 0x431   :  { %v9193_v34 = vpop.f32.mrf.mxu2  ;;  %v9195_v37 = vpop.f32.mrf.mxu3 }
 0x434   :  { %v1590_v47 = vpop.f32.mrf.mxu1 }
 0x435   :  { %v1591_v60 = vadd.f32 %v9174_v48, %v1590_v47 }
 0x439   :  { %1619 = vmatmul.bf16.gmra.mxu1 %v9111_v29  ;;  %1668 = vmatmul.bf16.gmra.mxu2 %v9113_v61  ;;  %v1639_v55 = vpop.f32.mrf.mxu2  ;;  %v1688_v42 = vpop.f32.mrf.mxu3 }
 0x43a   :  { %1717 = vmatmul.bf16.gmra.mxu3 %v9197_v45  ;;  %v1640_v62 = vadd.f32 %v1639_v55, %v1591_v60 }
 0x43c   :  { %v9212_v46 = vadd.f32 %v1688_v42, %v1640_v62  ;;  %v9235_v28 = vpop.f32.mrf.mxu1 }
 0x441   :  { %v9242_v33 = vpop.f32.mrf.mxu3 }
 0x449   :  { %1731 = vmatmul.bf16.vlgmr.msrb.gmra.mxu1 %v9072_v38  ;;  %1780 = vmatmul.bf16.vlgmr.msrb.gmra.mxu2 %v9074_v23  ;;  %v7408_v38 = vld [vmem:[%s10936_s3 + $0x1e0] sm:$0xff] }
 0x44a   :  { %1829 = vmatmul.bf16.vlgmr.msrb.gmra.mxu3 %v9076_v26  ;;  %v7416_v23 = vld [vmem:[%s10936_s3 + $0x220] sm:$0xff]  ;;  %1922 = vmatpush.bf16.msra.mxu2 %v7408_v38 }
 0x44b   :  { %1971 = vmatpush.bf16.msra.mxu3 %v7416_v23 }
 0x44e   :  { %1923 = vmatpush.bf16.msra.mxu2 %v7407_v12 }
 0x44f   :  { %1972 = vmatpush.bf16.msra.mxu3 %v7415_v5 }
 0x452   :  { %1924 = vmatpush.bf16.msra.mxu2 %v7406_v24 }
 0x453   :  { %1973 = vmatpush.bf16.msra.mxu3 %v7414_v40 }
 0x456   :  { %1925 = vmatpush.bf16.msra.mxu2 %v7405_v7 }
 0x457   :  { %1974 = vmatpush.bf16.msra.mxu3 %v7413_v35 }
 0x459   :  { %1736 = vmatmul.bf16.gmra.mxu1 %v9076_v26  ;;  %1785 = vmatmul.bf16.gmra.mxu2 %v9078_v18  ;;  %v7400_v26 = vld [vmem:[%s10936_s3 + $0x1a0] sm:$0xff]  ;;  %v9240_v18 = vpop.f32.mrf.mxu2 }
 0x45a   :  { %1834 = vmatmul.bf16.gmra.mxu3 %v9125_v30  ;;  %1873 = vmatpush.bf16.msra.mxu1 %v7400_v26 }
 0x45e   :  { %1874 = vmatpush.bf16.msra.mxu1 %v7399_v56 }
 0x462   :  { %1875 = vmatpush.bf16.msra.mxu1 %v7398_v50 }
 0x466   :  { %v1595_v21 = vpop.f32.mrf.mxu1 }
 0x467   :  { %v1596_v54 = vadd.f32 %v9174_v48, %v1595_v21 }
 0x469   :  { %1741 = vmatmul.bf16.gmra.mxu1 %v9140_v32  ;;  %1790 = vmatmul.bf16.gmra.mxu2 %v9082_v19 }
 0x46a   :  { %1839 = vmatmul.bf16.gmra.mxu3 %v9084_v1 }
 0x46c   :  { %v1644_v30 = vpop.f32.mrf.mxu2 }
 0x46d   :  { %v1645_v63 = vadd.f32 %v1644_v30, %v1596_v54  ;;  %v1693_v2 = vpop.f32.mrf.mxu3  ;;  %v7397_v54 = vld [vmem:[%s10936_s3 + $0x188] sm:$0xff] }
 0x46e   :  { %v1597_v59 = vpop.f32.mrf.mxu1  ;;  %1876 = vmatpush.bf16.msra.mxu1 %v7397_v54 }
 0x46f   :  { %v9254_v15 = vadd.f32 %v1693_v2, %v1645_v63  ;;  %v1598_v57 = vadd.f32 %v9174_v48, %v1597_v59 }
 0x474   :  { %v1646_v8 = vpop.f32.mrf.mxu2 }
 0x475   :  { %v1647_v25 = vadd.f32 %v1646_v8, %v1598_v57  ;;  %v1695_v41 = vpop.f32.mrf.mxu3  ;;  %v7404_v8 = vld [vmem:[%s10936_s3 + $0x1c0] sm:$0xff] }
 0x476   :  { %v1600_v20 = vpop.f32.mrf.mxu1  ;;  %1926 = vmatpush.bf16.msra.mxu2 %v7404_v8 }
 0x477   :  { %v9260_v31 = vadd.f32 %v1695_v41, %v1647_v25  ;;  %v1601_v11 = vadd.f32 %v9174_v48, %v1600_v20  ;;  %v7412_v25 = vld [vmem:[%s10936_s3 + $0x200] sm:$0xff] }
 0x478   :  { %1975 = vmatpush.bf16.msra.mxu3 %v7412_v25 }
 0x479   :  { %1746 = vmatmul.bf16.gmra.mxu1 %v9084_v1  ;;  %1795 = vmatmul.bf16.gmra.mxu2 %v9088_v52 }
 0x47a   :  { %1844 = vmatmul.bf16.gmra.mxu3 %v9154_v49 }
 0x47c   :  { %v1649_v17 = vpop.f32.mrf.mxu2 }
 0x47d   :  { %v1650_v44 = vadd.f32 %v1649_v17, %v1601_v11  ;;  %v1698_v27 = vpop.f32.mrf.mxu3 }
 0x47e   :  { %v1602_v47 = vpop.f32.mrf.mxu1 }
 0x47f   :  { %v9272_v36 = vadd.f32 %v1698_v27, %v1650_v44  ;;  %v1603_v6 = vadd.f32 %v9174_v48, %v1602_v47  ;;  %v7396_v44 = vld [vmem:[%s10936_s3 + $0x180] sm:$0xff] }
 0x480   :  { %1877 = vmatpush.bf16.msra.mxu1 %v7396_v44 }
 0x484   :  { %v1651_v60 = vpop.f32.mrf.mxu2 }
 0x485   :  { %v1652_v55 = vadd.f32 %v1651_v60, %v1603_v6  ;;  %v1700_v62 = vpop.f32.mrf.mxu3 }
 0x486   :  { %v1605_v42 = vpop.f32.mrf.mxu1 }
 0x487   :  { %v9278_v13 = vadd.f32 %v1700_v62, %v1652_v55  ;;  %v1606_v38 = vadd.f32 %v9174_v48, %v1605_v42  ;;  %v9319_v62 = vpack.c.bf16 %v971_v0, %v7771_v58 }
 0x489   :  { %1751 = vmatmul.bf16.gmra.mxu1 %v9169_v16  ;;  %1800 = vmatmul.bf16.gmra.mxu2 %v9108_v10 }
 0x48a   :  { %1849 = vmatmul.bf16.gmra.mxu3 %v9111_v29 }
 0x48c   :  { %v1654_v23 = vpop.f32.mrf.mxu2 }
 0x48d   :  { %v1655_v26 = vadd.f32 %v1654_v23, %v1606_v38  ;;  %v1703_v21 = vpop.f32.mrf.mxu3 }
 0x48e   :  { %v1607_v12 = vpop.f32.mrf.mxu1 }
 0x48f   :  { %v9290_v5 = vadd.f32 %v1703_v21, %v1655_v26  ;;  %v1608_v30 = vadd.f32 %v9174_v48, %v1607_v12 }
 0x494   :  { %v1656_v63 = vpop.f32.mrf.mxu2 }
 0x495   :  { %v1657_v2 = vadd.f32 %v1656_v63, %v1608_v30  ;;  %v1705_v59 = vpop.f32.mrf.mxu3  ;;  %v9332_v63 = vpack.c.bf16 0.0, %v974_v53 }
 0x496   :  { %v1610_v56 = vpop.f32.mrf.mxu1 }
 0x497   :  { %v9296_v57 = vadd.f32 %v1705_v59, %v1657_v2  ;;  %v1611_v41 = vadd.f32 %v9174_v48, %v1610_v56 }
 0x499   :  { %1756 = vmatmul.bf16.gmra.mxu1 %v9111_v29  ;;  %1805 = vmatmul.bf16.gmra.mxu2 %v9113_v61 }
 0x49a   :  { %1854 = vmatmul.bf16.gmra.mxu3 %v9197_v45 }
 0x49c   :  { %v1659_v20 = vpop.f32.mrf.mxu2 }
 0x49d   :  { %v1660_v24 = vadd.f32 %v1659_v20, %v1611_v41  ;;  %v1708_v40 = vpop.f32.mrf.mxu3 }
 0x49e   :  { %v1612_v11 = vpop.f32.mrf.mxu1 }
 0x49f   :  { %v9308_v17 = vadd.f32 %v1708_v40, %v1660_v24  ;;  %v1613_v27 = vadd.f32 %v9174_v48, %v1612_v11 }
 0x4a4   :  { %v1661_v47 = vpop.f32.mrf.mxu2 }
 0x4a5   :  { %v1662_v50 = vadd.f32 %v1661_v47, %v1613_v27  ;;  %v1710_v6 = vpop.f32.mrf.mxu3  ;;  %v1588_v27 = vadd.f32 %v9174_v48, %v9191_v4 }
 0x4a6   :  { %v1615_v60 = vpop.f32.mrf.mxu1 }
 0x4a7   :  { %v9314_v55 = vadd.f32 %v1710_v6, %v1662_v50  ;;  %v1616_v42 = vadd.f32 %v9174_v48, %v1615_v60  ;;  %v1637_v50 = vadd.f32 %v9193_v34, %v1588_v27 }
 0x4a9   :  { %1761 = vmatmul.bf16.gmra.mxu1 %v9319_v62  ;;  %1810 = vmatmul.bf16.gmra.mxu2 %v9117_v14 }
 0x4aa   :  { %1859 = vmatmul.bf16.gmra.mxu3 %v9119_v9 }
 0x4ac   :  { %v1664_v7 = vpop.f32.mrf.mxu2 }
 0x4ad   :  { %v1665_v35 = vadd.f32 %v1664_v7, %v1616_v42  ;;  %v1713_v38 = vpop.f32.mrf.mxu3 }
 0x4ae   :  { %v1617_v23 = vpop.f32.mrf.mxu1 }
 0x4af   :  { %v9325_v26 = vadd.f32 %v1713_v38, %v1665_v35  ;;  %v1618_v21 = vadd.f32 %v9174_v48, %v1617_v23  ;;  %v1686_v35 = vadd.f32 %v9195_v37, %v1637_v50 }
 0x4b4   :  { %v1666_v12 = vpop.f32.mrf.mxu2 }
 0x4b5   :  { %v1667_v3 = vadd.f32 %v1666_v12, %v1618_v21  ;;  %v1715_v0 = vpop.f32.mrf.mxu3  ;;  %v1593_v12 = vadd.f32 %v9174_v48, %v9235_v28 }
 0x4b6   :  { %v1620_v54 = vpop.f32.mrf.mxu1 }
 0x4b7   :  { %v9328_v30 = vadd.f32 %v1715_v0, %v1667_v3  ;;  %v1621_v2 = vadd.f32 %v9174_v48, %v1620_v54  ;;  %v1642_v37 = vadd.f32 %v9240_v18, %v1593_v12 }
 0x4b9   :  { %1766 = vmatmul.bf16.gmra.mxu1 %v9119_v9  ;;  %1815 = vmatmul.bf16.gmra.mxu2 %v9123_v43 }
 0x4ba   :  { %1864 = vmatmul.bf16.gmra.mxu3 %v9332_v63 }
 0x4bc   :  { %v1669_v59 = vpop.f32.mrf.mxu2 }
 0x4bd   :  { %v1670_v56 = vadd.f32 %v1669_v59, %v1621_v2  ;;  %v1718_v8 = vpop.f32.mrf.mxu3  ;;  %v1691_v59 = vadd.f32 %v9242_v33, %v1642_v37 }
 0x4be   :  { %v1622_v25 = vpop.f32.mrf.mxu1 }
 0x4bf   :  { %v9338_v41 = vadd.f32 %v1718_v8, %v1670_v56  ;;  %v1623_v20 = vadd.f32 %v9174_v48, %v1622_v25 }
 0x4c4   :  { %v1671_v24 = vpop.f32.mrf.mxu2 }
 0x4c5   :  { %v1672_v39 = vadd.f32 %v1671_v24, %v1623_v20  ;;  %v1720_v53 = vpop.f32.mrf.mxu3 }
 0x4c6   :  { %v1732_v40 = vpop.f32.mrf.mxu1 }
 0x4c7   :  { %v9341_v11 = vadd.f32 %v1720_v53, %v1672_v39  ;;  %v1733_v44 = vadd.f32 %v1732_v40, %v9189_v51 }
 0x4c9   :  { %1878 = vmatmul.bf16.vlgmr.msra.gmra.mxu1 %v9140_v32  ;;  %1927 = vmatmul.bf16.vlgmr.msra.gmra.mxu2 %v9082_v19 }
 0x4ca   :  { %1976 = vmatmul.bf16.vlgmr.msra.gmra.mxu3 %v9084_v1 }
 0x4cc   :  { %v1781_v47 = vpop.f32.mrf.mxu2 }
 0x4cd   :  { %v1782_v6 = vadd.f32 %v1781_v47, %v1733_v44  ;;  %v1830_v60 = vpop.f32.mrf.mxu3 }
 0x4ce   :  { %v1734_v42 = vpop.f32.mrf.mxu1 }
 0x4cf   :  { %v9350_v7 = vadd.f32 %v1830_v60, %v1782_v6  ;;  %v1735_v51 = vadd.f32 %v1734_v42, %v1686_v35 }
 0x4d4   :  { %v1783_v38 = vpop.f32.mrf.mxu2 }
 0x4d5   :  { %v1784_v23 = vadd.f32 %v1783_v38, %v1735_v51  ;;  %v1832_v4 = vpop.f32.mrf.mxu3 }
 0x4d6   :  { %v1737_v21 = vpop.f32.mrf.mxu1 }
 0x4d7   :  { %v9353_v32 = vadd.f32 %v1832_v4, %v1784_v23  ;;  %v1738_v19 = vadd.f32 %v1737_v21, %v9212_v46 }
 0x4d9   :  { %1883 = vmatmul.bf16.gmra.mxu1 %v9084_v1  ;;  %1932 = vmatmul.bf16.gmra.mxu2 %v9088_v52 }
 0x4da   :  { %1981 = vmatmul.bf16.gmra.mxu3 %v9154_v49 }
 0x4dc   :  { %v1786_v34 = vpop.f32.mrf.mxu2 }
 0x4dd   :  { %v1787_v3 = vadd.f32 %v1786_v34, %v1738_v19  ;;  %v1835_v0 = vpop.f32.mrf.mxu3 }
 0x4de   :  { %v1739_v54 = vpop.f32.mrf.mxu1 }
 0x4df   :  { %v9362_v2 = vadd.f32 %v1835_v0, %v1787_v3  ;;  %v1740_v46 = vadd.f32 %v1739_v54, %v1691_v59 }
 0x4e4   :  { %v1788_v56 = vpop.f32.mrf.mxu2 }
 0x4e5   :  { %v1789_v8 = vadd.f32 %v1788_v56, %v1740_v46  ;;  %v1837_v48 = vpop.f32.mrf.mxu3 }
 0x4e6   :  { %v1742_v28 = vpop.f32.mrf.mxu1 }
 0x4e7   :  { %v9365_v1 = vadd.f32 %v1837_v48, %v1789_v8  ;;  %v1743_v52 = vadd.f32 %v1742_v28, %v9254_v15 }
 0x4e9   :  { %1888 = vmatmul.bf16.gmra.mxu1 %v9169_v16  ;;  %1937 = vmatmul.bf16.gmra.mxu2 %v9108_v10 }
 0x4ea   :  { %1986 = vmatmul.bf16.gmra.mxu3 %v9111_v29 }
 0x4ec   :  { %v1791_v49 = vpop.f32.mrf.mxu2 }
 0x4ed   :  { %v1792_v18 = vadd.f32 %v1791_v49, %v1743_v52  ;;  %v1840_v25 = vpop.f32.mrf.mxu3 }
 0x4ee   :  { %v1744_v20 = vpop.f32.mrf.mxu1 }
 0x4ef   :  { %v9371_v33 = vadd.f32 %v1840_v25, %v1792_v18  ;;  %v1745_v24 = vadd.f32 %v1744_v20, %v9260_v31 }
 0x4f4   :  { %v1793_v39 = vpop.f32.mrf.mxu2 }
 0x4f5   :  { %v1794_v53 = vadd.f32 %v1793_v39, %v1745_v24  ;;  %v1842_v40 = vpop.f32.mrf.mxu3 }
 0x4f6   :  { %v1747_v44 = vpop.f32.mrf.mxu1 }
 0x4f7   :  { %v9374_v27 = vadd.f32 %v1842_v40, %v1794_v53  ;;  %v1748_v16 = vadd.f32 %v1747_v44, %v9272_v36 }
 0x4f9   :  { %1893 = vmatmul.bf16.gmra.mxu1 %v9111_v29  ;;  %1942 = vmatmul.bf16.gmra.mxu2 %v9113_v61 }
 0x4fa   :  { %1991 = vmatmul.bf16.gmra.mxu3 %v9197_v45 }
 0x4fc   :  { %v1796_v10 = vpop.f32.mrf.mxu2 }
 0x4fd   :  { %v1797_v15 = vadd.f32 %v1796_v10, %v1748_v16  ;;  %v1845_v47 = vpop.f32.mrf.mxu3 }
 0x4fe   :  { %v1749_v50 = vpop.f32.mrf.mxu1 }
 0x4ff   :  { %v9380_v6 = vadd.f32 %v1845_v47, %v1797_v15  ;;  %v1750_v31 = vadd.f32 %v1749_v50, %v9278_v13 }
 0x504   :  { %v1798_v60 = vpop.f32.mrf.mxu2 }
 0x505   :  { %v1799_v42 = vadd.f32 %v1798_v60, %v1750_v31  ;;  %v1847_v35 = vpop.f32.mrf.mxu3 }
 0x506   :  { %v1752_v51 = vpop.f32.mrf.mxu1 }
 0x507   :  { %v9383_v38 = vadd.f32 %v1847_v35, %v1799_v42  ;;  %v1753_v29 = vadd.f32 %v1752_v51, %v9290_v5 }
 0x509   :  { %1898 = vmatmul.bf16.gmra.mxu1 %v9319_v62  ;;  %1947 = vmatmul.bf16.gmra.mxu2 %v9117_v14 }
 0x50a   :  { %1996 = vmatmul.bf16.gmra.mxu3 %v9119_v9 }
 0x50c   :  { %v1801_v61 = vpop.f32.mrf.mxu2 }
 0x50d   :  { %v1802_v45 = vadd.f32 %v1801_v61, %v1753_v29  ;;  %v1850_v36 = vpop.f32.mrf.mxu3  ;;  %v7450_v61 = vld [vmem:[%s10938_s14 + $0xec] sm:$0xf0] }
 0x50e   :  { %v9389_v23 = vpop.f32.mrf.mxu1 }
 0x50f   :  { %v9391_v13 = vadd.f32 %v1850_v36, %v1802_v45  ;;  %v7448_v45 = vld [vmem:[%s10938_s14 + $0xe4] sm:$0xf] }
 0x514   :  { %v9393_v4 = vpop.f32.mrf.mxu2 }
 0x515   :  { %v9395_v21 = vpop.f32.mrf.mxu3 }
 0x516   :  { %v1757_v19 = vpop.f32.mrf.mxu1 }
 0x517   :  { %v1758_v5 = vadd.f32 %v1757_v19, %v9308_v17 }
 0x519   :  { %1903 = vmatmul.bf16.gmra.mxu1 %v9119_v9  ;;  %1952 = vmatmul.bf16.gmra.mxu2 %v9123_v43 }
 0x51a   :  { %2001 = vmatmul.bf16.gmra.mxu3 %v9332_v63 }
 0x51c   :  { %v1806_v14 = vpop.f32.mrf.mxu2 }
 0x51d   :  { %v1807_v62 = vadd.f32 %v1806_v14, %v1758_v5  ;;  %v1855_v12 = vpop.f32.mrf.mxu3 }
 0x51e   :  { %v9401_v34 = vpop.f32.mrf.mxu1 }
 0x51f   :  { %v9403_v37 = vadd.f32 %v1855_v12, %v1807_v62 }
 0x524   :  { %v9405_v3 = vpop.f32.mrf.mxu2 }
 0x525   :  { %v9407_v0 = vpop.f32.mrf.mxu3 }
 0x526   :  { %v1762_v54 = vpop.f32.mrf.mxu1 }
 0x527   :  { %v1763_v17 = vadd.f32 %v1762_v54, %v9325_v26  ;;  %v6189_v54 = vld [vmem:[%s10938_s14 + $0xe8] sm:$0xf] }
 0x529   :  { %1908 = vmatmul.bf16.gmra.mxu1 %v7770_v22  ;;  %1957 = vmatmul.bf16.gmra.mxu2 %v7770_v22 }
 0x52a   :  { %2006 = vmatmul.bf16.gmra.mxu3 %v7770_v22 }
 0x52c   :  { %v1811_v9 = vpop.f32.mrf.mxu2 }
 0x52d   :  { %v1812_v43 = vadd.f32 %v1811_v9, %v1763_v17  ;;  %v1860_v63 = vpop.f32.mrf.mxu3  ;;  %v7451_v17 = vld [vmem:[%s10938_s14 + $0xf4] sm:$0xf0] }
 0x52e   :  { %v9413_v59 = vpop.f32.mrf.mxu1  ;;  %v6190_v9 = vor.u32 %v7451_v17, %v6189_v54 }
 0x52f   :  { %v9415_v46 = vadd.f32 %v1860_v63, %v1812_v43 }
 0x530   :  { %2365 = vmatpush.bf16.msrb.mxu3 %v6190_v9 }
 0x534   :  { %v9417_v56 = vpop.f32.mrf.mxu2 }
 0x535   :  { %v9419_v8 = vpop.f32.mrf.mxu3 }
 0x536   :  { %v1767_v48 = vpop.f32.mrf.mxu1 }
 0x537   :  { %v1768_v26 = vadd.f32 %v1767_v48, %v9338_v41 }
 0x539   :  { %1913 = vmatmul.bf16.gmra.mxu1 %v7770_v22  ;;  %1962 = vmatmul.bf16.gmra.mxu2 %v7770_v22 }
 0x53a   :  { %2011 = vmatmul.bf16.gmra.mxu3 %v7770_v22 }
 0x53c   :  { %v1816_v28 = vpop.f32.mrf.mxu2 }
 0x53d   :  { %v1817_v52 = vadd.f32 %v1816_v28, %v1768_v26  ;;  %v1865_v49 = vpop.f32.mrf.mxu3 }
 0x53e   :  { %v9425_v18 = vpop.f32.mrf.mxu1 }
 0x53f   :  { %v9427_v25 = vadd.f32 %v1865_v49, %v1817_v52  ;;  %v7446_v52 = vld [vmem:[%s10938_s14 + $0xcc] sm:$0xf0]  ;;  %v7444_v49 = vld [vmem:[%s10938_s14 + $0xc4] sm:$0xf] }
 0x544   :  { %v9429_v20 = vpop.f32.mrf.mxu2 }
 0x545   :  { %v9431_v24 = vpop.f32.mrf.mxu3 }
 0x546   :  { %v1879_v39 = vpop.f32.mrf.mxu1 }
 0x547   :  { %v1880_v41 = vadd.f32 %v1879_v39, %v9350_v7  ;;  %v6181_v7 = vld [vmem:[%s10938_s14 + $0xe0] sm:$0xf] }
 0x548   :  { %v6182_v36 = vor.u32 %v7450_v61, %v6181_v7 }
 0x54a   :  { %2339 = vmatpush.bf16.msrb.mxu1 %v6182_v36  ;;  %v7442_v36 = vld [vmem:[%s10938_s14 + $0xac] sm:$0xf0] }
 0x54c   :  { %v1928_v53 = vpop.f32.mrf.mxu2 }
 0x54d   :  { %v1929_v40 = vadd.f32 %v1928_v53, %v1880_v41  ;;  %v1977_v44 = vpop.f32.mrf.mxu3  ;;  %v6167_v41 = vld [vmem:[%s10938_s14 + $0xd0] sm:$0xf0] }
 0x54e   :  { %v9434_v16 = vpop.f32.mrf.mxu1  ;;  %v6170_v53 = vor.u32 %v7444_v49, %v6167_v41 }
 0x54f   :  { %v9436_v10 = vadd.f32 %v1977_v44, %v1929_v40 }
 0x554   :  { %v9438_v15 = vpop.f32.mrf.mxu2 }
 0x555   :  { %v9440_v47 = vpop.f32.mrf.mxu3 }
 0x556   :  { %v1884_v50 = vpop.f32.mrf.mxu1 }
 0x557   :  { %v1885_v31 = vadd.f32 %v1884_v50, %v9362_v2  ;;  %v6183_v2 = vld [vmem:[%s10938_s14 + $0xf0] sm:$0xf0] }
 0x558   :  { %v6186_v19 = vor.u32 %v7448_v45, %v6183_v2  ;;  %v6149_v45 = vld [vmem:[%s10938_s14 + $0xa0] sm:$0xf]  ;;  %v7440_v2 = vld [vmem:[%s10938_s14 + $0xa4] sm:$0xf] }
 0x55a   :  { %2352 = vmatpush.bf16.msrb.mxu2 %v6186_v19  ;;  %v6150_v19 = vor.u32 %v7442_v36, %v6149_v45 }
 0x55c   :  { %v1933_v60 = vpop.f32.mrf.mxu2 }
 0x55d   :  { %v1934_v42 = vadd.f32 %v1933_v60, %v1885_v31  ;;  %v1982_v35 = vpop.f32.mrf.mxu3  ;;  %v6173_v31 = vld [vmem:[%s10938_s14 + $0xc8] sm:$0xf]  ;;  %v7447_v60 = vld [vmem:[%s10938_s14 + $0xd4] sm:$0xf0] }
 0x55e   :  { %v1886_v51 = vpop.f32.mrf.mxu1  ;;  %2353 = vmatpush.bf16.msrb.mxu2 %v6170_v53 }
 0x55f   :  { %v9443_v29 = vadd.f32 %v1982_v35, %v1934_v42  ;;  %v6174_v42 = vor.u32 %v7447_v60, %v6173_v31  ;;  %v1887_v53 = vadd.f32 %v1886_v51, %v9365_v1 }
 0x561   :  { %2366 = vmatpush.bf16.msrb.mxu3 %v6174_v42  ;;  %v6133_v42 = vld [vmem:[%s10938_s14 + $0x80] sm:$0xf] }
 0x564   :  { %v1935_v5 = vpop.f32.mrf.mxu2 }
 0x565   :  { %v9457_v14 = vpop.f32.mrf.mxu3  ;;  %v1936_v60 = vadd.f32 %v1935_v5, %v1887_v53 }
 0x566   :  { %v1889_v62 = vpop.f32.mrf.mxu1 }
 0x567   :  { %v1890_v12 = vadd.f32 %v1889_v62, %v9371_v33  ;;  %v6165_v33 = vld [vmem:[%s10938_s14 + $0xc0] sm:$0xf]  ;;  %v6151_v62 = vld [vmem:[%s10938_s14 + $0xb0] sm:$0xf0] }
 0x568   :  { %v6166_v39 = vor.u32 %v7446_v52, %v6165_v33  ;;  %v1882_v33 = vadd.f32 %v9434_v16, %v9353_v32  ;;  %v7438_v32 = vld [vmem:[%s10938_s14 + $0x8c] sm:$0xf0]  ;;  %v7436_v16 = vld [vmem:[%s10938_s14 + $0x84] sm:$0xf] }
 0x569   :  { %v6134_v1 = vor.u32 %v7438_v32, %v6133_v42 }
 0x56a   :  { %2340 = vmatpush.bf16.msrb.mxu1 %v6166_v39  ;;  %v1931_v49 = vadd.f32 %v9438_v15, %v1882_v33  ;;  %v1755_v15 = vadd.f32 %v9389_v23, %v9296_v57 }
 0x56c   :  { %v1938_v43 = vpop.f32.mrf.mxu2  ;;  %v9509_v31 = vadd.f32 %v9440_v47, %v1931_v49  ;;  %v6135_v47 = vld [vmem:[%s10938_s14 + $0x90] sm:$0xf0]  ;;  %v1804_v45 = vadd.f32 %v9393_v4, %v1755_v15 }
 0x56d   :  { %v1939_v63 = vadd.f32 %v1938_v43, %v1890_v12  ;;  %v1987_v48 = vpop.f32.mrf.mxu3  ;;  %v6154_v12 = vor.u32 %v7440_v2, %v6151_v62  ;;  %v6157_v43 = vld [vmem:[%s10938_s14 + $0xa8] sm:$0xf]  ;;  %v6138_v5 = vor.u32 %v7436_v16, %v6135_v47 }
 0x56e   :  { %v1891_v26 = vpop.f32.mrf.mxu1  ;;  %2341 = vmatpush.bf16.msrb.mxu1 %v6150_v19  ;;  %v2017_v2 = vadd.f32 %v9509_v31, %v9436_v10  ;;  %v9530_v19 = vadd.f32 %v9457_v14, %v1936_v60  ;;  %v1853_v4 = vadd.f32 %v9395_v21, %v1804_v45 }
 0x56f   :  { %v9466_v28 = vadd.f32 %v1987_v48, %v1939_v63  ;;  %2354 = vmatpush.bf16.msrb.mxu2 %v6154_v12  ;;  %v7443_v63 = vld [vmem:[%s10938_s14 + $0xb4] sm:$0xf0]  ;;  %v1892_v51 = vadd.f32 %v1891_v26, %v9374_v27 }
 0x570   :  { %v6158_v48 = vor.u32 %v7443_v63, %v6157_v43  ;;  %v2018_v43 = vadd.f32 %v2017_v2, %v9443_v29 }
 0x572   :  { %2367 = vmatpush.bf16.msrb.mxu3 %v6158_v48  ;;  %2342 = vmatpush.bf16.msrb.mxu1 %v6134_v1  ;;  %v2019_v63 = vadd.f32 %v2018_v43, %v9530_v19 }
 0x573   :  { %2355 = vmatpush.bf16.msrb.mxu2 %v6138_v5 }
 0x574   :  { %v1940_v40 = vpop.f32.mrf.mxu2  ;;  %v2020_v21 = vadd.f32 %v2019_v63, %v9466_v28 }
 0x575   :  { %v1989_v44 = vpop.f32.mrf.mxu3  ;;  %v1941_v62 = vadd.f32 %v1940_v40, %v1892_v51  ;;  %v7439_v40 = vld [vmem:[%s10938_s14 + $0x94] sm:$0xf0] }
 0x576   :  { %v1894_v50 = vpop.f32.mrf.mxu1 }
 0x577   :  { %v1895_v57 = vadd.f32 %v1894_v50, %v9380_v6  ;;  %v9537_v48 = vadd.f32 %v1989_v44, %v1941_v62  ;;  %v6141_v6 = vld [vmem:[%s10938_s14 + $0x88] sm:$0xf] }
 0x578   :  { %v6142_v50 = vor.u32 %v7439_v40, %v6141_v6 }
 0x57a   :  { %2368 = vmatpush.bf16.msrb.mxu3 %v6142_v50 }
 0x57c   :  { %v1943_v35 = vpop.f32.mrf.mxu2 }
 0x57d   :  { %v1992_v7 = vpop.f32.mrf.mxu3  ;;  %v1944_v27 = vadd.f32 %v1943_v35, %v1895_v57 }
 0x57e   :  { %v1896_v61 = vpop.f32.mrf.mxu1 }
 0x57f   :  { %v1897_v26 = vadd.f32 %v1896_v61, %v9383_v38  ;;  %v1760_v38 = vadd.f32 %v9401_v34, %v9314_v55  ;;  %v9549_v35 = vadd.f32 %v1992_v7, %v1944_v27  ;;  %v1765_v27 = vadd.f32 %v9413_v59, %v9328_v30  ;;  %v6101_v30 = vld [vmem:[%s10938_s14 + $0x40] sm:$0xf]  ;;  %v7430_v59 = vld [vmem:[%s10938_s14 + $0x4c] sm:$0xf0] }
 0x581   :  { %v1814_v63 = vadd.f32 %v9417_v56, %v1765_v27 }
 0x584   :  { %v1945_v54 = vpop.f32.mrf.mxu2 }
 0x585   :  { %v1994_v17 = vpop.f32.mrf.mxu3  ;;  %v1946_v33 = vadd.f32 %v1945_v54, %v1897_v26 }
 0x586   :  { %v1899_v9 = vpop.f32.mrf.mxu1 }
 0x587   :  { %v1900_v14 = vadd.f32 %v1899_v9, %v9391_v13  ;;  %v1809_v13 = vadd.f32 %v9405_v3, %v1760_v38  ;;  %v2021_v9 = vadd.f32 %v2020_v21, %v9537_v48  ;;  %v9553_v49 = vadd.f32 %v1994_v17, %v1946_v33  ;;  %v6117_v17 = vld [vmem:[%s10938_s14 + $0x60] sm:$0xf] }
 0x588   :  { %v1863_v38 = vadd.f32 %v9419_v8, %v1814_v63  ;;  %v6159_v63 = vld [vmem:[%s10938_s14 + $0xb8] sm:$0xf0] }
 0x589   :  { %v2022_v34 = vadd.f32 %v2021_v9, %v9549_v35 }
 0x58b   :  { %v2023_v3 = vadd.f32 %v2022_v34, %v9553_v49 }
 0x58c   :  { %v1948_v52 = vpop.f32.mrf.mxu2 }
 0x58d   :  { %v1997_v39 = vpop.f32.mrf.mxu3  ;;  %v1949_v44 = vadd.f32 %v1948_v52, %v1900_v14  ;;  %v1858_v52 = vadd.f32 %v9407_v0, %v1809_v13  ;;  %v6119_v0 = vld [vmem:[%s10938_s14 + $0x70] sm:$0xf0]  ;;  %v6102_v13 = vor.u32 %v7430_v59, %v6101_v30 }
 0x58e   :  { %v1901_v41 = vpop.f32.mrf.mxu1 }
 0x58f   :  { %v1902_v61 = vadd.f32 %v1901_v41, %v1853_v4  ;;  %v9557_v32 = vadd.f32 %v1997_v39, %v1949_v44  ;;  %v7432_v39 = vld [vmem:[%s10938_s14 + $0x64] sm:$0xf] }
 0x590   :  { %v6122_v51 = vor.u32 %v7432_v39, %v6119_v0  ;;  %v7422_v39 = vld [vmem:[%s10938_s14 + $0xc] sm:$0xf0] }
 0x591   :  { %v2024_v15 = vadd.f32 %v2023_v3, %v9557_v32  ;;  %v7772_v3 = vmov 128.0  }
 0x592   :  { %2356 = vmatpush.bf16.msrb.mxu2 %v6122_v51  ;;  %7755 = vrcp.f32 %v7772_v3 }
 0x594   :  { %v1950_v36 = vpop.f32.mrf.mxu2 }
 0x595   :  { %v1999_v23 = vpop.f32.mrf.mxu3  ;;  %v1951_v53 = vadd.f32 %v1950_v36, %v1902_v61 }
 0x596   :  { %v1904_v12 = vpop.f32.mrf.mxu1 }
 0x597   :  { %v1905_v60 = vadd.f32 %v1904_v12, %v9403_v37  ;;  %v9561_v41 = vadd.f32 %v1999_v23, %v1951_v53  ;;  %v7434_v37 = vld [vmem:[%s10938_s14 + $0x6c] sm:$0xf0]  ;;  %v6085_v53 = vld [vmem:[%s10938_s14 + $0x20] sm:$0xf] }
 0x598   :  { %v6118_v16 = vor.u32 %v7434_v37, %v6117_v17  ;;  %v6069_v37 = vld [vmem:[%s10938_s14] sm:$0xf] }
 0x599   :  { %v2025_v45 = vadd.f32 %v2024_v15, %v9561_v41 }
 0x59a   :  { %2343 = vmatpush.bf16.msrb.mxu1 %v6118_v16 }
 0x59c   :  { %v1953_v54 = vpop.f32.mrf.mxu2 }
 0x59d   :  { %v2002_v42 = vpop.f32.mrf.mxu3  ;;  %v1954_v7 = vadd.f32 %v1953_v54, %v1905_v60  ;;  %v7426_v60 = vld [vmem:[%s10938_s14 + $0x2c] sm:$0xf0] }
 0x59e   :  { %v1906_v55 = vpop.f32.mrf.mxu1  ;;  %2344 = vmatpush.bf16.msrb.mxu1 %v6102_v13  ;;  %v6086_v34 = vor.u32 %v7426_v60, %v6085_v53  ;;  %v6109_v60 = vld [vmem:[%s10938_s14 + $0x48] sm:$0xf] }
 0x59f   :  { %v9576_v1 = vadd.f32 %v2002_v42, %v1954_v7  ;;  %v1907_v47 = vadd.f32 %v1906_v55, %v1858_v52  ;;  %v1770_v7 = vadd.f32 %v9425_v18, %v9341_v11  ;;  %v7449_v11 = vld [vmem:[%s10938_s14 + $0xec] sm:$0xf]  ;;  %v6191_v18 = vld [vmem:[%s10938_s14 + $0xf8] sm:$0xf0] }
 0x5a1   :  { %v2026_v57 = vadd.f32 %v2025_v45, %v9576_v1  ;;  %v1819_v16 = vadd.f32 %v9429_v20, %v1770_v7  ;;  %v9633_v45 = vpop.eup %7755 }
 0x5a2   :  { %2345 = vmatpush.bf16.msrb.mxu1 %v6086_v34  ;;  %vm2043_vm5 = vweird.f32 %v9633_v45 }
 0x5a3   :  { %v1868_v20 = vadd.f32 %v9431_v24, %v1819_v16 }
 0x5a4   :  { %v1955_v5 = vpop.f32.mrf.mxu2 }
 0x5a5   :  { %v1956_v36 = vadd.f32 %v1955_v5, %v1907_v47  ;;  %v2004_v2 = vpop.f32.mrf.mxu3  ;;  %v6070_v47 = vor.u32 %v7422_v39, %v6069_v37  ;;  %v6087_v37 = vld [vmem:[%s10938_s14 + $0x30] sm:$0xf0]  ;;  %v7433_v39 = vld [vmem:[%s10938_s14 + $0x6c] sm:$0xf] }
 0x5a6   :  { %v1909_v62 = vpop.f32.mrf.mxu1 }
 0x5a7   :  { %v9580_v23 = vadd.f32 %v2004_v2, %v1956_v36  ;;  %v1910_v26 = vadd.f32 %v1909_v62, %v9415_v46  ;;  %v2117_v46 = vmax.f32 %v9557_v32, %v9561_v41  ;;  %2346 = vmatpush.bf16.msrb.mxu1 %v6070_v47  ;;  %v7445_v62 = vld [vmem:[%s10938_s14 + $0xcc] sm:$0xf]  ;;  %v6093_v47 = vld [vmem:[%s10938_s14 + $0x28] sm:$0xf] }
 0x5a9   :  { %v2027_v12 = vadd.f32 %v2026_v57, %v9580_v23  ;;  %v2120_v43 = vmax.f32 %v9576_v1, %v9580_v23  ;;  %v6175_v57 = vld [vmem:[%s10938_s14 + $0xd8] sm:$0xf0] }
 0x5ac   :  { %v1958_v4 = vpop.f32.mrf.mxu2 }
 0x5ad   :  { %v1959_v33 = vadd.f32 %v1958_v4, %v1910_v26  ;;  %v2007_v14 = vpop.f32.mrf.mxu3  ;;  %v2039_v4 = vmul.f32 128.0, %v9633_v45 }
 0x5ae   :  { %v1911_v6 = vpop.f32.mrf.mxu1 }
 0x5af   :  { %v9589_v40 = vadd.f32 %v2007_v14, %v1959_v33  ;;  %v1912_v21 = vadd.f32 %v1911_v6, %v1863_v38  ;;  %v6125_v38 = vld [vmem:[%s10938_s14 + $0x68] sm:$0xf] }
 0x5b1   :  { %v2028_v50 = vadd.f32 %v2027_v12, %v9589_v40  ;;  %v9602_v8 = vmax.f32 %v2117_v46, %v9589_v40  ;;  %v6178_v12 = vor.u32 %v7445_v62, %v6175_v57  ;;  %v7428_v46 = vld [vmem:[%s10938_s14 + $0x44] sm:$0xf]  ;;  %v6071_v62 = vld [vmem:[%s10938_s14 + $0x10] sm:$0xf0]  ;;  %v7429_v57 = vld [vmem:[%s10938_s14 + $0x4c] sm:$0xf] }
 0x5b4   :  { %v1960_v44 = vpop.f32.mrf.mxu2 }
 0x5b5   :  { %v1961_v56 = vadd.f32 %v1960_v44, %v1912_v21  ;;  %v2009_v61 = vpop.f32.mrf.mxu3  ;;  %v2040_v21 = vsub.f32 1.0, %v2039_v4 }
 0x5b6   :  { %v1914_v54 = vpop.f32.mrf.mxu1 }
 0x5b7   :  { %v9604_v9 = vadd.f32 %v2009_v61, %v1961_v56  ;;  %v1915_v52 = vadd.f32 %v1914_v54, %v9427_v25  ;;  %v6194_v25 = vor.u32 %v7449_v11, %v6191_v18  ;;  %v6103_v56 = vld [vmem:[%s10938_s14 + $0x50] sm:$0xf0]  ;;  %v7437_v61 = vld [vmem:[%s10938_s14 + $0x8c] sm:$0xf]  ;;  %v6143_v54 = vld [vmem:[%s10938_s14 + $0x98] sm:$0xf0]  ;;  %v2041_v7 = vmul.f32 %v9633_v45, %v2040_v21 }
 0x5b8   :  { %v6106_v13 = vor.u32 %v7428_v46, %v6103_v56  ;;  %v6146_v34 = vor.u32 %v7437_v61, %v6143_v54  ;;  %v7427_v11 = vld [vmem:[%s10938_s14 + $0x34] sm:$0xf0]  ;;  %v7425_v21 = vld [vmem:[%s10938_s14 + $0x2c] sm:$0xf]  ;;  %v7458_v46 = vld [vmem:[%s10939_s5 + $0x30] sm:$0xff] }
 0x5b9   :  { %v2029_v42 = vadd.f32 %v2028_v50, %v9604_v9  ;;  %v2119_v55 = vmax.f32 %v9602_v8, %v9604_v9  ;;  %2378 = vmatpush.bf16.msra.mxu1 %v6194_v25  ;;  %v7435_v50 = vld [vmem:[%s10938_s14 + $0x74] sm:$0xf0]  ;;  %v2042_v25 = vadd.f32 %v9633_v45, %v2041_v7 }
 0x5ba   :  { %v6126_v44 = vor.u32 %v7435_v50, %v6125_v38  ;;  %2357 = vmatpush.bf16.msrb.mxu2 %v6106_v13  ;;  %v7467_v50 = vld [vmem:[%s10939_s5 + $0x78] sm:$0xff]  ;;  %v7466_v13 = vld [vmem:[%s10939_s5 + $0x70] sm:$0xff] }
 0x5bc   :  { %v1963_v17 = vpop.f32.mrf.mxu2  ;;  %2369 = vmatpush.bf16.msrb.mxu3 %v6126_v44  ;;  %v6095_v44 = vld [vmem:[%s10938_s14 + $0x38] sm:$0xf0] }
 0x5bd   :  { %v1964_v0 = vadd.f32 %v1963_v17, %v1915_v52  ;;  %v2012_v15 = vpop.f32.mrf.mxu3  ;;  %2379 = vmatpush.bf16.msra.mxu1 %v6178_v12  ;;  %v7424_v17 = vld [vmem:[%s10938_s14 + $0x24] sm:$0xf] }
 0x5be   :  { %v1916_v5 = vpop.f32.mrf.mxu1  ;;  %v6090_v16 = vor.u32 %v7424_v17, %v6087_v37  ;;  %v7465_v17 = vld [vmem:[%s10939_s5 + $0x68] sm:$0xff] }
 0x5bf   :  { %v9631_v51 = vadd.f32 %v2012_v15, %v1964_v0  ;;  %v1917_v27 = vadd.f32 %v1916_v5, %v1868_v20  ;;  %v6127_v0 = vld [vmem:[%s10938_s14 + $0x78] sm:$0xf0]  ;;  %v6094_v5 = vor.u32 %v7427_v11, %v6093_v47  ;;  %v7421_v37 = vld [vmem:[%s10938_s14 + $0xc] sm:$0xf] }
 0x5c0   :  { %v6130_v18 = vor.u32 %v7433_v39, %v6127_v0  ;;  %2358 = vmatpush.bf16.msrb.mxu2 %v6090_v16  ;;  %v7456_v16 = vld [vmem:[%s10939_s5 + $0x20] sm:$0xff] }
 0x5c1   :  { %v2030_v36 = vadd.f32 %v2029_v42, %v9631_v51  ;;  %v9638_v2 = vmax.f32 %v2120_v43, %v9631_v51  ;;  %v7441_v43 = vld [vmem:[%s10938_s14 + $0xac] sm:$0xf]  ;;  %v7431_v42 = vld [vmem:[%s10938_s14 + $0x54] sm:$0xf0] }
 0x5c2   :  { %v6162_v14 = vor.u32 %v7441_v43, %v6159_v63  ;;  %v6110_v52 = vor.u32 %v7431_v42, %v6109_v60  ;;  %v6077_v43 = vld [vmem:[%s10938_s14 + $0x8] sm:$0xf]  ;;  %v7423_v63 = vld [vmem:[%s10938_s14 + $0x14] sm:$0xf0] }
 0x5c3   :  { %v7457_v42 = vld [vmem:[%s10939_s5 + $0x28] sm:$0xff] }
 0x5c4   :  { %v1965_v26 = vpop.f32.mrf.mxu2  ;;  %2380 = vmatpush.bf16.msra.mxu1 %v6162_v14  ;;  %2370 = vmatpush.bf16.msrb.mxu3 %v6110_v52  ;;  %v6078_v14 = vor.u32 %v7423_v63, %v6077_v43 }
 0x5c5   :  { %v1966_v24 = vadd.f32 %v1965_v26, %v1917_v27  ;;  %v2014_v33 = vpop.f32.mrf.mxu3  ;;  %v6111_v27 = vld [vmem:[%s10938_s14 + $0x58] sm:$0xf0] }
 0x5c6   :  { %v6114_v4 = vor.u32 %v7429_v57, %v6111_v27 }
 0x5c7   :  { %v9653_v6 = vadd.f32 %v2014_v33, %v1966_v24  ;;  %v7459_v24 = vld [vmem:[%s10939_s5 + $0x38] sm:$0xff]  ;;  %v9725_v33 = vsel %vm2043_vm5, %v9633_v45, %v2042_v25  ;;  %v6098_v45 = vor.u32 %v7425_v21, %v6095_v44 }
 0x5c8   :  { %2381 = vmatpush.bf16.msra.mxu1 %v6146_v34  ;;  %2371 = vmatpush.bf16.msrb.mxu3 %v6094_v5  ;;  %v7475_v5 = vld [vmem:[%s10939_s5 + $0xb8] sm:$0xff] }
 0x5c9   :  { %v2031_v30 = vadd.f32 %v2030_v36, %v9653_v6  ;;  %v2122_v59 = vmax.f32 %v9638_v2, %v9653_v6  ;;  %v7420_v36 = vld [vmem:[%s10938_s14 + $0x4] sm:$0xf] }
 0x5ca   :  { %v6074_v12 = vor.u32 %v7420_v36, %v6071_v62  ;;  %v7455_v62 = vld [vmem:[%s10939_s5 + $0x18] sm:$0xff] }
 0x5cb   :  { %v2032_v53 = vrot.slane %v2031_v30, 4 }
 0x5cc   :  { %2382 = vmatpush.bf16.msra.mxu1 %v6130_v18  ;;  %2359 = vmatpush.bf16.msrb.mxu2 %v6074_v12 }
 0x5cd   :  { %v2033_v3 = vadd.f32 %v2032_v53, %v2031_v30  ;;  %2372 = vmatpush.bf16.msrb.mxu3 %v6078_v14 }
 0x5cf   :  { %v2034_v15 = vrot.slane %v2033_v3, 2 }
 0x5d0   :  { %2383 = vmatpush.bf16.msra.mxu1 %v6114_v4  ;;  %3064 = vmatpush.bf16.msra.mxu2 %v7459_v24  ;;  %v7454_v24 = vld [vmem:[%s10939_s5 + $0x10] sm:$0xff] }
 0x5d1   :  { %v2035_v20 = vadd.f32 %v2034_v15, %v2033_v3  ;;  %3083 = vmatpush.bf16.msra.mxu3 %v7467_v50  ;;  %v7462_v50 = vld [vmem:[%s10939_s5 + $0x50] sm:$0xff] }
 0x5d3   :  { %v2036_v26 = vrot.slane %v2035_v20, 1 }
 0x5d4   :  { %2384 = vmatpush.bf16.msra.mxu1 %v6098_v45  ;;  %3065 = vmatpush.bf16.msra.mxu2 %v7458_v46 }
 0x5d5   :  { %v2037_v38 = vadd.f32 %v2036_v26, %v2035_v20  ;;  %3084 = vmatpush.bf16.msra.mxu3 %v7466_v13  ;;  %v7464_v20 = vld [vmem:[%s10939_s5 + $0x60] sm:$0xff]  ;;  %v7461_v13 = vld [vmem:[%s10939_s5 + $0x48] sm:$0xff] }
 0x5d7   :  { %v9737_v30 = vmul.f32 %v9725_v33, %v2037_v38  ;;  %v7473_v38 = vld [vmem:[%s10939_s5 + $0xa8] sm:$0xff] }
 0x5d8   :  { %3066 = vmatpush.bf16.msra.mxu2 %v7457_v42  ;;  %v7452_v42 = vld [vmem:[%s10939_s5] sm:$0xff] }
 0x5d9   :  { %v2046_v56 = vsub.f32 %v9436_v10, %v9737_v30  ;;  %v2047_v61 = vsub.f32 %v9509_v31, %v9737_v30  ;;  %v2048_v54 = vsub.f32 %v9443_v29, %v9737_v30  ;;  %v9753_v53 = vsub.f32 %v9576_v1, %v9737_v30  ;;  %3085 = vmatpush.bf16.msra.mxu3 %v7465_v17  ;;  %v7471_v17 = vld [vmem:[%s10939_s5 + $0x98] sm:$0xff] }
 0x5da   :  { %v9757_v60 = vsub.f32 %v9580_v23, %v9737_v30  ;;  %v9764_v34 = vsub.f32 %v9589_v40, %v9737_v30  ;;  %v9768_v7 = vsub.f32 %v9604_v9, %v9737_v30  ;;  %v9772_v1 = vsub.f32 %v9631_v51, %v9737_v30  ;;  %v2135_v40 = vld [vmem:[%s10940_s13] sm:$0x3]  ;;  %v6079_v51 = vld [vmem:[%s10938_s14 + $0x18] sm:$0xf0]  ;;  %v7474_v9 = vld [vmem:[%s10939_s5 + $0xb0] sm:$0xff] }
 0x5db   :  { %v9776_v23 = vsub.f32 %v9653_v6, %v9737_v30  ;;  %v2062_v52 = vmul.f32 %v2046_v56, %v2046_v56  ;;  %v2063_v3 = vmul.f32 %v2047_v61, %v2047_v61  ;;  %v2049_v39 = vsub.f32 %v9530_v19, %v9737_v30  ;;  %v7472_v61 = vld [vmem:[%s10939_s5 + $0xa0] sm:$0xff] }
 0x5dc   :  { %v2050_v0 = vsub.f32 %v9466_v28, %v9737_v30  ;;  %v2064_v15 = vmul.f32 %v2048_v54, %v2048_v54  ;;  %v9801_v11 = vsub.f32 %v2122_v59, %v9737_v30  ;;  %v2136_v18 = vpack.c.bf16 %v2135_v40, %v2135_v40  ;;  %3067 = vmatpush.bf16.msra.mxu2 %v7456_v16  ;;  %v7460_v40 = vld [vmem:[%s10939_s5 + $0x40] sm:$0xff]  ;;  %v7470_v16 = vld [vmem:[%s10939_s5 + $0x90] sm:$0xff] }
 0x5dd   :  { %v2078_v47 = vadd.f32 %v2063_v3, %v2062_v52  ;;  %v6082_v25 = vor.u32 %v7421_v37, %v6079_v51  ;;  %v9813_v36 = vsub.f32 %v2119_v55, %v9737_v30  ;;  %v2051_v2 = vsub.f32 %v9537_v48, %v9737_v30  ;;  %3086 = vmatpush.bf16.msra.mxu3 %v7464_v20  ;;  %v7463_v55 = vld [vmem:[%s10939_s5 + $0x58] sm:$0xff]  ;;  %v7490_v20 = vld [vmem:[%s10939_s5 + $0x130] sm:$0xff] }
 0x5de   :  { %v2065_v6 = vmul.f32 %v2049_v39, %v2049_v39  ;;  %2347 = vmatmul.bf16.vlgmr.msrb.gmra.mxu1 %v2136_v18  ;;  %2360 = vmatmul.bf16.vlgmr.msrb.gmra.mxu2 %v2136_v18  ;;  %v2052_v57 = vsub.f32 %v9549_v35, %v9737_v30  ;;  %v2066_v12 = vmul.f32 %v2050_v0, %v2050_v0  ;;  %v7619_v0 = vld [vmem:[%s10941_s9 + $0xb8] sm:$0xff] }
 0x5df   :  { %v2079_v59 = vadd.f32 %v2078_v47, %v2064_v15  ;;  %2385 = vmatpush.bf16.msra.mxu1 %v6082_v25  ;;  %2373 = vmatmul.bf16.vlgmr.msrb.gmra.mxu3 %v2136_v18  ;;  %v2053_v27 = vsub.f32 %v9553_v49, %v9737_v30  ;;  %v2067_v26 = vmul.f32 %v2051_v2, %v2051_v2  ;;  %v7491_v47 = vld [vmem:[%s10939_s5 + $0x138] sm:$0xff] }
 0x5e0   :  { %3068 = vmatpush.bf16.msra.mxu2 %v7455_v62  ;;  %v2054_v43 = vsub.f32 %v9557_v32, %v9737_v30  ;;  %v2068_v63 = vmul.f32 %v2052_v57, %v2052_v57  ;;  %v2055_v21 = vsub.f32 %v9561_v41, %v9737_v30  ;;  %v7453_v32 = vld [vmem:[%s10939_s5 + $0x8] sm:$0xff]  ;;  %v2072_v52 = vmul.f32 %v9753_v53, %v9753_v53  ;;  %v7468_v62 = vld [vmem:[%s10939_s5 + $0x80] sm:$0xff] }
 0x5e1   :  { %v2080_v8 = vadd.f32 %v2079_v59, %v2065_v6  ;;  %3087 = vmatpush.bf16.msra.mxu3 %v7463_v55  ;;  %v2069_v44 = vmul.f32 %v2053_v27, %v2053_v27  ;;  %v2073_v37 = vmul.f32 %v9757_v60, %v9757_v60  ;;  %v2074_v53 = vmul.f32 %v9764_v34, %v9764_v34  ;;  %v7483_v60 = vld [vmem:[%s10939_s5 + $0xf8] sm:$0xff]  ;;  %v7489_v57 = vld [vmem:[%s10939_s5 + $0x128] sm:$0xff]  ;;  %v7488_v55 = vld [vmem:[%s10939_s5 + $0x120] sm:$0xff] }
 0x5e2   :  { %v2070_v46 = vmul.f32 %v2054_v43, %v2054_v43  ;;  %v2071_v41 = vmul.f32 %v2055_v21, %v2055_v21  ;;  %v2075_v34 = vmul.f32 %v9768_v7, %v9768_v7  ;;  %4729 = vmatpush.bf16.msrb.mxu0 %v7619_v0  ;;  %v2076_v25 = vmul.f32 %v9772_v1, %v9772_v1  ;;  %v7469_v7 = vld [vmem:[%s10939_s5 + $0x88] sm:$0xff]  ;;  %v7498_v27 = vld [vmem:[%s10939_s5 + $0x170] sm:$0xff]  ;;  %v7496_v21 = vld [vmem:[%s10939_s5 + $0x160] sm:$0xff] }
 0x5e3   :  { %3102 = vmatpush.bf16.msrb.mxu1 %v7475_v5  ;;  %v2081_v4 = vadd.f32 %v2080_v8, %v2066_v12  ;;  %v2077_v2 = vmul.f32 %v9776_v23, %v9776_v23  ;;  %v7481_v1 = vld [vmem:[%s10939_s5 + $0xe8] sm:$0xff]  ;;  %v7499_v23 = vld [vmem:[%s10939_s5 + $0x178] sm:$0xff]  ;;  %v7480_v8 = vld [vmem:[%s10939_s5 + $0xe0] sm:$0xff] }
 0x5e4   :  { %3069 = vmatpush.bf16.msra.mxu2 %v7454_v24  ;;  %v7497_v24 = vld [vmem:[%s10939_s5 + $0x168] sm:$0xff]  ;;  %v7506_v0 = vld [vmem:[%s10939_s5 + $0x1b0] sm:$0xff] }
 0x5e5   :  { %v2082_v14 = vadd.f32 %v2081_v4, %v2067_v26  ;;  %3088 = vmatpush.bf16.msra.mxu3 %v7462_v50  ;;  %v7618_v50 = vld [vmem:[%s10941_s9 + $0xb0] sm:$0xff] }
 0x5e6   :  { %4730 = vmatpush.bf16.msrb.mxu0 %v7618_v50 }
 0x5e7   :  { %3103 = vmatpush.bf16.msrb.mxu1 %v7474_v9  ;;  %v2083_v45 = vadd.f32 %v2082_v14, %v2068_v63  ;;  %v7479_v63 = vld [vmem:[%s10939_s5 + $0xd8] sm:$0xff] }
 0x5e8   :  { %3070 = vmatpush.bf16.msra.mxu2 %v7453_v32  ;;  %v7487_v14 = vld [vmem:[%s10939_s5 + $0x118] sm:$0xff]  ;;  %v7486_v32 = vld [vmem:[%s10939_s5 + $0x110] sm:$0xff] }
 0x5e9   :  { %v2084_v56 = vadd.f32 %v2083_v45, %v2069_v44  ;;  %3089 = vmatpush.bf16.msra.mxu3 %v7461_v13  ;;  %v7478_v44 = vld [vmem:[%s10939_s5 + $0xd0] sm:$0xff] }
 0x5ea   :  { %v7494_v13 = vld [vmem:[%s10939_s5 + $0x150] sm:$0xff] }
 0x5eb   :  { %3104 = vmatpush.bf16.msrb.mxu1 %v7473_v38  ;;  %v2085_v54 = vadd.f32 %v2084_v56, %v2070_v46  ;;  %v7495_v56 = vld [vmem:[%s10939_s5 + $0x158] sm:$0xff] }
 0x5ec   :  { %3071 = vmatpush.bf16.msra.mxu2 %v7452_v42 }
 0x5ed   :  { %v2086_v3 = vadd.f32 %v2085_v54, %v2071_v41  ;;  %3090 = vmatpush.bf16.msra.mxu3 %v7460_v40  ;;  %v7476_v41 = vld [vmem:[%s10939_s5 + $0xc0] sm:$0xff]  ;;  %v7507_v40 = vld [vmem:[%s10939_s5 + $0x1b8] sm:$0xff] }
 0x5ee   :  { %2386 = vmatmul.bf16.vlgmr.msra.gmra.mxu1 %v2136_v18  ;;  %v7482_v18 = vld [vmem:[%s10939_s5 + $0xf0] sm:$0xff]  ;;  %v7484_v54 = vld [vmem:[%s10939_s5 + $0x100] sm:$0xff] }
 0x5ef   :  { %3105 = vmatpush.bf16.msrb.mxu1 %v7472_v61  ;;  %v2087_v51 = vadd.f32 %v2086_v3, %v2072_v52  ;;  %3072 = vmatmul.bf16.vlgmr.msra.gmra.mxu2 %v7770_v22  ;;  %v7477_v61 = vld [vmem:[%s10939_s5 + $0xc8] sm:$0xff] }
 0x5f0   :  { %3091 = vmatmul.bf16.vlgmr.msra.gmra.mxu3 %v7770_v22  ;;  %3121 = vmatpush.bf16.msrb.mxu2 %v7483_v60  ;;  %v7493_v3 = vld [vmem:[%s10939_s5 + $0x148] sm:$0xff] }
 0x5f1   :  { %v2088_v39 = vadd.f32 %v2087_v51, %v2073_v37  ;;  %3140 = vmatpush.bf16.msrb.mxu3 %v7491_v47  ;;  %v7515_v37 = vld [vmem:[%s10939_s5 + $0x1f8] sm:$0xff]  ;;  %v2111_v51 = vmax.f32 %v9436_v10, %v9509_v31 }
 0x5f2   :  { %v7523_v10 = vld [vmem:[%s10939_s5 + $0x238] sm:$0xff] }
 0x5f3   :  { %3106 = vmatpush.bf16.msrb.mxu1 %v7471_v17  ;;  %v2089_v15 = vadd.f32 %v2088_v39, %v2074_v53  ;;  %v2114_v53 = vmax.f32 %v9443_v29, %v9530_v19  ;;  %v2112_v60 = vmax.f32 %v2111_v51, %v9466_v28  ;;  %v7514_v29 = vld [vmem:[%s10939_s5 + $0x1f0] sm:$0xff]  ;;  %v7505_v28 = vld [vmem:[%s10939_s5 + $0x1a8] sm:$0xff] }
 0x5f4   :  { %3122 = vmatpush.bf16.msrb.mxu2 %v7482_v18 }
 0x5f5   :  { %v2090_v5 = vadd.f32 %v2089_v15, %v2075_v34  ;;  %3141 = vmatpush.bf16.msrb.mxu3 %v7490_v20  ;;  %v2115_v34 = vmax.f32 %v2114_v53, %v9549_v35  ;;  %v2113_v19 = vmax.f32 %v2112_v60, %v9537_v48  ;;  %v7522_v48 = vld [vmem:[%s10939_s5 + $0x230] sm:$0xff] }
 0x5f7   :  { %3107 = vmatpush.bf16.msrb.mxu1 %v7470_v16  ;;  %v2091_v6 = vadd.f32 %v2090_v5, %v2076_v25  ;;  %v7492_v16 = vld [vmem:[%s10939_s5 + $0x140] sm:$0xff]  ;;  %v2116_v15 = vmax.f32 %v2115_v34, %v9553_v49  ;;  %v2123_v35 = vsub.f32 %v2113_v19, %v9737_v30  ;;  %v7513_v49 = vld [vmem:[%s10939_s5 + $0x1e8] sm:$0xff] }
 0x5f8   :  { %3123 = vmatpush.bf16.msrb.mxu2 %v7481_v1 }
 0x5f9   :  { %v2092_v59 = vadd.f32 %v2091_v6, %v2077_v2  ;;  %3142 = vmatpush.bf16.msrb.mxu3 %v7489_v57  ;;  %v2124_v18 = vsub.f32 %v2116_v15, %v9737_v30  ;;  %v7504_v30 = vld [vmem:[%s10939_s5 + $0x1a0] sm:$0xff]  ;;  %v7521_v57 = vld [vmem:[%s10939_s5 + $0x228] sm:$0xff] }
 0x5fb   :  { %3108 = vmatpush.bf16.msrb.mxu1 %v7469_v7  ;;  %v2093_v12 = vrot.slane %v2092_v59, 4 }
 0x5fc   :  { %3124 = vmatpush.bf16.msrb.mxu2 %v7480_v8  ;;  %v7520_v8 = vld [vmem:[%s10939_s5 + $0x220] sm:$0xff] }
 0x5fd   :  { %v2094_v9 = vadd.f32 %v2093_v12, %v2092_v59  ;;  %3143 = vmatpush.bf16.msrb.mxu3 %v7488_v55  ;;  %v7512_v59 = vld [vmem:[%s10939_s5 + $0x1e0] sm:$0xff]  ;;  %v7511_v12 = vld [vmem:[%s10939_s5 + $0x1d8] sm:$0xff]  ;;  %v7510_v55 = vld [vmem:[%s10939_s5 + $0x1d0] sm:$0xff] }
 0x5ff   :  { %3109 = vmatpush.bf16.msrb.mxu1 %v7468_v62  ;;  %v2095_v26 = vrot.slane %v2094_v9, 2 }
 0x600   :  { %3125 = vmatpush.bf16.msrb.mxu2 %v7479_v63  ;;  %v7508_v63 = vld [vmem:[%s10939_s5 + $0x1c0] sm:$0xff] }
 0x601   :  { %v2096_v4 = vadd.f32 %v2095_v26, %v2094_v9  ;;  %3144 = vmatpush.bf16.msrb.mxu3 %v7487_v14  ;;  %v7502_v9 = vld [vmem:[%s10939_s5 + $0x190] sm:$0xff]  ;;  %v7501_v26 = vld [vmem:[%s10939_s5 + $0x188] sm:$0xff] }
 0x602   :  { %3110 = vmatmul.bf16.vlgmr.msrb.gmra.mxu1 %v7770_v22  ;;  %v7517_v14 = vld [vmem:[%s10939_s5 + $0x208] sm:$0xff] }
 0x603   :  { %3159 = vmatpush.bf16.msra.mxu1 %v7499_v23  ;;  %v2097_v43 = vrot.slane %v2096_v4, 1  ;;  %v7503_v23 = vld [vmem:[%s10939_s5 + $0x198] sm:$0xff] }
 0x604   :  { %3126 = vmatpush.bf16.msrb.mxu2 %v7478_v44 }
 0x605   :  { %v2098_v38 = vadd.f32 %v2097_v43, %v2096_v4  ;;  %3145 = vmatpush.bf16.msrb.mxu3 %v7486_v32  ;;  %v7509_v4 = vld [vmem:[%s10939_s5 + $0x1c8] sm:$0xff]  ;;  %v7500_v43 = vld [vmem:[%s10939_s5 + $0x180] sm:$0xff] }
 0x607   :  { %3160 = vmatpush.bf16.msra.mxu1 %v7498_v27  ;;  %v2099_v45 = vmul.f32 %v2098_v38, %v9725_v33  ;;  %v7485_v33 = vld [vmem:[%s10939_s5 + $0x108] sm:$0xff]  ;;  %v7519_v27 = vld [vmem:[%s10939_s5 + $0x218] sm:$0xff]  ;;  %v7516_v38 = vld [vmem:[%s10939_s5 + $0x200] sm:$0xff] }
 0x608   :  { %3127 = vmatpush.bf16.msrb.mxu2 %v7477_v61  ;;  %v10074_v61 = vld [vmem:[%s10943_s15] sm:$0xf] }
 0x609   :  { %v2100_v46 = vadd.f32 1e-05, %v2099_v45  ;;  %3146 = vmatpush.bf16.msrb.mxu3 %v7485_v33  ;;  %v2173_v33 = vperm.slane %v10074_v61, 2 }
 0x60b   :  { %3161 = vmatpush.bf16.msra.mxu1 %v7497_v24  ;;  %7757 = vrsqrt.f32 %v2100_v46  ;;  %vm2107_vm7 = vweird.f32 %v2100_v46  ;;  %v7518_v24 = vld [vmem:[%s10939_s5 + $0x210] sm:$0xff] }
 0x60c   :  { %3128 = vmatpush.bf16.msrb.mxu2 %v7476_v41 }
 0x60d   :  { %3147 = vmatpush.bf16.msrb.mxu3 %v7484_v54 }
 0x60f   :  { %3162 = vmatpush.bf16.msra.mxu1 %v7496_v21 }
 0x610   :  { %3178 = vmatpush.bf16.msra.mxu2 %v7507_v40 }
 0x611   :  { %v7758_v42 = vpop.eup %7757  ;;  %3197 = vmatpush.bf16.msra.mxu3 %v7515_v37 }
 0x612   :  { %v2102_v52 = vmul.f32 %v7758_v42, %v2100_v46  ;;  %vm2108_vm6 = vweird.f32 %v7758_v42  ;;  %v7617_v46 = vld [vmem:[%s10941_s9 + $0xa8] sm:$0xff] }
 0x613   :  { %3163 = vmatpush.bf16.msra.mxu1 %v7495_v56  ;;  %vm2109_vm8 = vmor %vm2107_vm7, %vm2108_vm6  ;;  %4731 = vmatpush.bf16.msrb.mxu0 %v7617_v46 }
 0x614   :  { %v2103_v17 = vmul.f32 %v7758_v42, %v2102_v52  ;;  %3179 = vmatpush.bf16.msra.mxu2 %v7506_v0  ;;  %v2174_v52 = vperm.slane %v10074_v61, 3 }
 0x615   :  { %3198 = vmatpush.bf16.msra.mxu3 %v7514_v29 }
 0x616   :  { %v2104_v39 = vmul.f32 0.5, %v2103_v17 }
 0x617   :  { %3164 = vmatpush.bf16.msra.mxu1 %v7494_v13 }
 0x618   :  { %v2105_v31 = vsub.f32 1.5, %v2104_v39  ;;  %3180 = vmatpush.bf16.msra.mxu2 %v7505_v28 }
 0x619   :  { %3199 = vmatpush.bf16.msra.mxu3 %v7513_v49 }
 0x61a   :  { %v2106_v47 = vmul.f32 %v7758_v42, %v2105_v31 }
 0x61b   :  { %3165 = vmatpush.bf16.msra.mxu1 %v7493_v3 }
 0x61c   :  { %v2110_v25 = vsel %vm2109_vm8, %v7758_v42, %v2106_v47  ;;  %3181 = vmatpush.bf16.msra.mxu2 %v7504_v30  ;;  %v7747_v47 = vld [vmem:[%s10942_s6] ss:$0 sm:$0xff] }
 0x61d   :  { %v2127_v5 = vmul.f32 %v2123_v35, %v2110_v25  ;;  %v2128_v7 = vmul.f32 %v2124_v18, %v2110_v25  ;;  %v2129_v20 = vmul.f32 %v9813_v36, %v2110_v25  ;;  %v2130_v2 = vmul.f32 %v9801_v11, %v2110_v25  ;;  %3200 = vmatpush.bf16.msra.mxu3 %v7512_v59 }
 0x61f   :  { %3166 = vmatpush.bf16.msra.mxu1 %v7492_v16  ;;  %v10003_v6 = vmax.f32 %v2127_v5, 0.0  ;;  %v10005_v1 = vmax.f32 %v2128_v7, 0.0  ;;  %v10057_v50 = vmax.f32 %v2129_v20, 0.0  ;;  %v10059_v21 = vmax.f32 %v2130_v2, 0.0 }
 0x620   :  { %3182 = vmatpush.bf16.msra.mxu2 %v7503_v23 }
 0x621   :  { %v2478_v36 = vpack.c.bf16 %v10003_v6, %v7771_v58  ;;  %v2479_v11 = vpack.c.bf16 %v10005_v1, %v10003_v6  ;;  %v2480_v62 = vpack.c.bf16 0.0, %v10005_v1  ;;  %3201 = vmatpush.bf16.msra.mxu3 %v7511_v12  ;;  %v2481_v44 = vpack.c.bf16 %v10057_v50, %v7771_v58 }
 0x622   :  { %v2482_v45 = vpack.c.bf16 %v10059_v21, %v10057_v50  ;;  %v2483_v32 = vpack.c.bf16 0.0, %v10059_v21 }
 0x623   :  { %3216 = vmatpush.bf16.msrb.mxu1 %v7523_v10  ;;  %3077 = vmatmul.bf16.gmra.mxu2 %v2478_v36 }
 0x624   :  { %3096 = vmatmul.bf16.gmra.mxu3 %v2479_v11  ;;  %3115 = vmatmul.bf16.gmra.mxu1 %v2480_v62 }
 0x625   :  { %3183 = vmatpush.bf16.msra.mxu2 %v7502_v9  ;;  %3202 = vmatpush.bf16.msra.mxu3 %v7510_v55 }
 0x627   :  { %3217 = vmatpush.bf16.msrb.mxu1 %v7522_v48 }
 0x629   :  { %3184 = vmatpush.bf16.msra.mxu2 %v7501_v26  ;;  %3203 = vmatpush.bf16.msra.mxu3 %v7509_v4 }
 0x62b   :  { %3218 = vmatpush.bf16.msrb.mxu1 %v7521_v57 }
 0x62d   :  { %3185 = vmatpush.bf16.msra.mxu2 %v7500_v43  ;;  %3204 = vmatpush.bf16.msra.mxu3 %v7508_v63 }
 0x62f   :  { %3219 = vmatpush.bf16.msrb.mxu1 %v7520_v8 }
 0x633   :  { %3220 = vmatpush.bf16.msrb.mxu1 %v7519_v27  ;;  %3129 = vmatmul.bf16.vlgmr.msrb.gmra.mxu2 %v2478_v36 }
 0x634   :  { %3148 = vmatmul.bf16.vlgmr.msrb.gmra.mxu3 %v2479_v11  ;;  %3167 = vmatmul.bf16.vlgmr.msra.gmra.mxu1 %v2480_v62 }
 0x637   :  { %3221 = vmatpush.bf16.msrb.mxu1 %v7518_v24 }
 0x63b   :  { %3222 = vmatpush.bf16.msrb.mxu1 %v7517_v14 }
 0x63f   :  { %3223 = vmatpush.bf16.msrb.mxu1 %v7516_v38  ;;  %v7616_v38 = vld [vmem:[%s10941_s9 + $0xa0] sm:$0xff] }
 0x640   :  { %4732 = vmatpush.bf16.msrb.mxu0 %v7616_v38 }
 0x643   :  { %3134 = vmatmul.bf16.gmra.mxu2 %v2481_v44 }
 0x644   :  { %3153 = vmatmul.bf16.gmra.mxu3 %v2482_v45  ;;  %3172 = vmatmul.bf16.gmra.mxu1 %v2483_v32 }
 0x653   :  { %3186 = vmatmul.bf16.vlgmr.msra.gmra.mxu2 %v2481_v44 }
 0x654   :  { %3205 = vmatmul.bf16.vlgmr.msra.gmra.mxu3 %v2482_v45  ;;  %3224 = vmatmul.bf16.vlgmr.msrb.gmra.mxu1 %v2483_v32 }
 0x65b   :  { %v10069_v56 = vpop.f32.mrf.mxu1 }
 0x661   :  { %v10079_v13 = vpop.f32.mrf.mxu2 }
 0x662   :  { %v2374_v54 = vpop.f32.mrf.mxu3 }
 0x663   :  { %3191 = vmatmul.bf16.gmra.mxu2 %v7770_v22  ;;  %v2350_v41 = vpop.f32.mrf.mxu1  ;;  %v2375_v42 = vadd.f32 %v2374_v54, %v2173_v33 }
 0x664   :  { %3210 = vmatmul.bf16.gmra.mxu3 %v7770_v22  ;;  %3229 = vmatmul.bf16.gmra.mxu1 %v7770_v22 }
 0x665   :  { %v2397_v3 = vrot.slane %v2375_v42, 7  ;;  %v2405_v40 = vrot.slane %v2375_v42, 6  ;;  %v2413_v53 = vrot.slane %v2375_v42, 5  ;;  %v2421_v60 = vrot.slane %v2375_v42, 4 }
 0x666   :  { %v2429_v19 = vrot.slane %v2375_v42, 3  ;;  %v2437_v15 = vrot.slane %v2375_v42, 2 }
 0x667   :  { %v2446_v39 = vsel %vm2443_vm9, %v2375_v42, %v2397_v3 }
 0x668   :  { %v2451_v0 = vsel %vm2448_vm10, %v2446_v39, %v2405_v40 }
 0x669   :  { %v2363_v17 = vpop.f32.mrf.mxu2  ;;  %v2456_v34 = vsel %vm2453_vm11, %v2451_v0, %v2413_v53 }
 0x66a   :  { %v2376_v51 = vpop.f32.mrf.mxu3  ;;  %v2461_v18 = vsel %vm2458_vm12, %v2456_v34, %v2413_v53 }
 0x66b   :  { %v2387_v37 = vpop.f32.mrf.mxu1  ;;  %v2466_v25 = vsel %vm2463_vm13, %v2461_v18, %v2421_v60 }
 0x66c   :  { %v2388_v16 = vadd.f32 %v2387_v37, %v2174_v52  ;;  %v2471_v20 = vsel %vm2468_vm14, %v2466_v25, %v2429_v19 }
 0x66d   :  { %v10097_v36 = vsel %vm2473_vm15, %v2471_v20, %v2437_v15 }
 0x66e   :  { %v2398_v10 = vrot.slane %v2388_v16, 7  ;;  %v2406_v29 = vrot.slane %v2388_v16, 6  ;;  %v2414_v31 = vrot.slane %v2388_v16, 5  ;;  %v2422_v28 = vrot.slane %v2388_v16, 4 }
 0x66f   :  { %v2430_v48 = vrot.slane %v2388_v16, 3  ;;  %v2438_v5 = vrot.slane %v2388_v16, 2 }
 0x670   :  { %v2447_v35 = vsel %vm2443_vm9, %v2388_v16, %v2398_v10 }
 0x671   :  { %v2452_v49 = vsel %vm2448_vm10, %v2447_v35, %v2406_v29 }
 0x672   :  { %v2457_v7 = vsel %vm2453_vm11, %v2452_v49, %v2414_v31  ;;  %v3073_v30 = vpop.f32.mrf.mxu2 }
 0x673   :  { %v2389_v2 = vpop.f32.mrf.mxu1  ;;  %v2462_v59 = vsel %vm2458_vm12, %v2457_v7, %v2414_v31  ;;  %v3074_v11 = vadd.f32 %v7747_v47, %v3073_v30  ;;  %v3092_v57 = vpop.f32.mrf.mxu3 }
 0x674   :  { %v2467_v62 = vsel %vm2463_vm13, %v2462_v59, %v2422_v28  ;;  %v7531_v59 = vld [vmem:[%s10944_s7 + $0x38] sm:$0xff] }
 0x675   :  { %v2472_v23 = vsel %vm2468_vm14, %v2467_v62, %v2430_v48  ;;  %v3093_v12 = vadd.f32 %v3092_v57, %v3074_v11  ;;  %3875 = vmatpush.bf16.msrb.mxu2 %v7531_v59 }
 0x676   :  { %v10102_v8 = vsel %vm2473_vm15, %v2472_v23, %v2438_v5  ;;  %v7539_v23 = vld [vmem:[%s10944_s7 + $0x78] sm:$0xff] }
 0x677   :  { %3894 = vmatpush.bf16.msrb.mxu3 %v7539_v23  ;;  %v7541_v23 = vld [vmem:[%s10944_s7 + $0x88] sm:$0xff] }
 0x67a   :  { %v3075_v26 = vpop.f32.mrf.mxu2 }
 0x67b   :  { %v3094_v4 = vpop.f32.mrf.mxu3  ;;  %v3076_v53 = vadd.f32 %v7747_v47, %v3075_v26  ;;  %v7773_v26 = vmov 32.0  }
 0x67c   :  { %7759 = vrcp.f32 %v7773_v26  ;;  %v7563_v26 = vld [vmem:[%s10944_s7 + $0x138] sm:$0xff] }
 0x67d   :  { %v3095_v16 = vadd.f32 %v3094_v4, %v3076_v53  ;;  %v7530_v4 = vld [vmem:[%s10944_s7 + $0x30] sm:$0xff] }
 0x67e   :  { %3876 = vmatpush.bf16.msrb.mxu2 %v7530_v4 }
 0x67f   :  { %v3111_v9 = vpop.f32.mrf.mxu1 }
 0x680   :  { %v3112_v55 = vadd.f32 %v3111_v9, %v3093_v12 }
 0x687   :  { %v3113_v27 = vpop.f32.mrf.mxu1 }
 0x688   :  { %v3114_v29 = vadd.f32 %v3113_v27, %v3095_v16 }
 0x6a1   :  { %v3116_v24 = vpop.f32.mrf.mxu1 }
 0x6a6   :  { %v3078_v43 = vpop.f32.mrf.mxu2 }
 0x6a7   :  { %v3097_v63 = vpop.f32.mrf.mxu3  ;;  %v3079_v39 = vadd.f32 %v7747_v47, %v3078_v43 }
 0x6a9   :  { %v3118_v14 = vpop.f32.mrf.mxu1  ;;  %v3098_v10 = vadd.f32 %v3097_v63, %v3079_v39  ;;  %v7547_v63 = vld [vmem:[%s10944_s7 + $0xb8] sm:$0xff] }
 0x6aa   :  { %3913 = vmatpush.bf16.msra.mxu1 %v7547_v63  ;;  %v7571_v63 = vld [vmem:[%s10944_s7 + $0x178] sm:$0xff] }
 0x6ab   :  { %v3117_v15 = vadd.f32 %v3116_v24, %v3098_v10  ;;  %v7538_v24 = vld [vmem:[%s10944_s7 + $0x70] sm:$0xff] }
 0x6ac   :  { %3895 = vmatpush.bf16.msrb.mxu3 %v7538_v24  ;;  %v7540_v24 = vld [vmem:[%s10944_s7 + $0x80] sm:$0xff] }
 0x6ae   :  { %v3080_v44 = vpop.f32.mrf.mxu2 }
 0x6af   :  { %v3099_v45 = vpop.f32.mrf.mxu3  ;;  %v3081_v31 = vadd.f32 %v7747_v47, %v3080_v44  ;;  %v7529_v44 = vld [vmem:[%s10944_s7 + $0x28] sm:$0xff] }
 0x6b0   :  { %3877 = vmatpush.bf16.msrb.mxu2 %v7529_v44 }
 0x6b1   :  { %v3168_v32 = vpop.f32.mrf.mxu1  ;;  %v3100_v49 = vadd.f32 %v3099_v45, %v3081_v31  ;;  %v7546_v45 = vld [vmem:[%s10944_s7 + $0xb0] sm:$0xff] }
 0x6b2   :  { %3914 = vmatpush.bf16.msra.mxu1 %v7546_v45 }
 0x6b3   :  { %v3119_v2 = vadd.f32 %v3118_v14, %v3100_v49  ;;  %v7543_v49 = vld [vmem:[%s10944_s7 + $0x98] sm:$0xff] }
 0x6b6   :  { %v3130_v46 = vpop.f32.mrf.mxu2 }
 0x6b7   :  { %v3149_v33 = vpop.f32.mrf.mxu3  ;;  %v3131_v28 = vadd.f32 %v3130_v46, %v3112_v55 }
 0x6b9   :  { %v3170_v41 = vpop.f32.mrf.mxu1  ;;  %v3150_v7 = vadd.f32 %v3149_v33, %v3131_v28  ;;  %v7537_v33 = vld [vmem:[%s10944_s7 + $0x68] sm:$0xff]  ;;  %v7535_v28 = vld [vmem:[%s10944_s7 + $0x58] sm:$0xff] }
 0x6ba   :  { %3896 = vmatpush.bf16.msrb.mxu3 %v7537_v33  ;;  %v7570_v33 = vld [vmem:[%s10944_s7 + $0x170] sm:$0xff] }
 0x6bb   :  { %v3169_v62 = vadd.f32 %v3168_v32, %v3150_v7 }
 0x6be   :  { %v3132_v54 = vpop.f32.mrf.mxu2 }
 0x6bf   :  { %v3151_v42 = vpop.f32.mrf.mxu3  ;;  %v3133_v19 = vadd.f32 %v3132_v54, %v3114_v29  ;;  %v7760_v54 = vpop.eup %7759  ;;  %v7527_v29 = vld [vmem:[%s10944_s7 + $0x18] sm:$0xff] }
 0x6c0   :  { %vm3249_vm0 = vweird.f32 %v7760_v54 }
 0x6c1   :  { %v3173_v52 = vpop.f32.mrf.mxu1  ;;  %v3152_v25 = vadd.f32 %v3151_v42, %v3133_v19 }
 0x6c3   :  { %v3171_v30 = vadd.f32 %v3170_v41, %v3152_v25  ;;  %v7615_v41 = vld [vmem:[%s10941_s9 + $0x98] sm:$0xff] }
 0x6c4   :  { %4733 = vmatpush.bf16.msrb.mxu0 %v7615_v41  ;;  %v7553_v41 = vld [vmem:[%s10944_s7 + $0xe8] sm:$0xff] }
 0x6c6   :  { %v3135_v3 = vpop.f32.mrf.mxu2 }
 0x6c7   :  { %v3154_v17 = vpop.f32.mrf.mxu3  ;;  %v3136_v35 = vadd.f32 %v3135_v3, %v3117_v15  ;;  %v7528_v3 = vld [vmem:[%s10944_s7 + $0x20] sm:$0xff] }
 0x6c8   :  { %3878 = vmatpush.bf16.msrb.mxu2 %v7528_v3 }
 0x6c9   :  { %v3175_v40 = vpop.f32.mrf.mxu1  ;;  %v3155_v20 = vadd.f32 %v3154_v17, %v3136_v35 }
 0x6cb   :  { %v3174_v57 = vadd.f32 %v3173_v52, %v3155_v20 }
 0x6cc   :  { %3879 = vmatpush.bf16.msrb.mxu2 %v7527_v29 }
 0x6ce   :  { %v3137_v37 = vpop.f32.mrf.mxu2 }
 0x6cf   :  { %v3156_v51 = vpop.f32.mrf.mxu3  ;;  %v3138_v11 = vadd.f32 %v3137_v37, %v3119_v2  ;;  %v7545_v37 = vld [vmem:[%s10944_s7 + $0xa8] sm:$0xff] }
 0x6d0   :  { %3915 = vmatpush.bf16.msra.mxu1 %v7545_v37  ;;  %v7525_v2 = vld [vmem:[%s10944_s7 + $0x8] sm:$0xff] }
 0x6d1   :  { %v3225_v0 = vpop.f32.mrf.mxu1  ;;  %v3157_v14 = vadd.f32 %v3156_v51, %v3138_v11  ;;  %v7533_v11 = vld [vmem:[%s10944_s7 + $0x48] sm:$0xff] }
 0x6d3   :  { %v3176_v52 = vadd.f32 %v3175_v40, %v3157_v14  ;;  %v7536_v40 = vld [vmem:[%s10944_s7 + $0x60] sm:$0xff]  ;;  %v7554_v14 = vld [vmem:[%s10944_s7 + $0xf0] sm:$0xff] }
 0x6d4   :  { %3897 = vmatpush.bf16.msrb.mxu3 %v7536_v40  ;;  %v7560_v40 = vld [vmem:[%s10944_s7 + $0x120] sm:$0xff] }
 0x6d6   :  { %v3187_v60 = vpop.f32.mrf.mxu2 }
 0x6d7   :  { %v3206_v34 = vpop.f32.mrf.mxu3  ;;  %v3188_v55 = vadd.f32 %v3187_v60, %v3169_v62  ;;  %v3245_v60 = vmul.f32 32.0, %v7760_v54 }
 0x6d8   :  { %3898 = vmatpush.bf16.msrb.mxu3 %v7535_v28  ;;  %v7567_v28 = vld [vmem:[%s10944_s7 + $0x158] sm:$0xff] }
 0x6d9   :  { %v3227_v5 = vpop.f32.mrf.mxu1  ;;  %v3207_v32 = vadd.f32 %v3206_v34, %v3188_v55  ;;  %v3246_v35 = vsub.f32 1.0, %v3245_v60  ;;  %v7532_v55 = vld [vmem:[%s10944_s7 + $0x40] sm:$0xff] }
 0x6da   :  { %v7568_v60 = vld [vmem:[%s10944_s7 + $0x160] sm:$0xff] }
 0x6db   :  { %v3226_v51 = vadd.f32 %v3225_v0, %v3207_v32  ;;  %v7544_v0 = vld [vmem:[%s10944_s7 + $0xa0] sm:$0xff]  ;;  %v3247_v7 = vmul.f32 %v7760_v54, %v3246_v35 }
 0x6dc   :  { %3916 = vmatpush.bf16.msra.mxu1 %v7544_v0 }
 0x6dd   :  { %v3248_v62 = vadd.f32 %v7760_v54, %v3247_v7  ;;  %v7549_v7 = vld [vmem:[%s10944_s7 + $0xc8] sm:$0xff] }
 0x6de   :  { %v3189_v18 = vpop.f32.mrf.mxu2 }
 0x6df   :  { %v3208_v48 = vpop.f32.mrf.mxu3  ;;  %v3190_v47 = vadd.f32 %v3189_v18, %v3171_v30  ;;  %v7542_v30 = vld [vmem:[%s10944_s7 + $0x90] sm:$0xff] }
 0x6e0   :  { %3917 = vmatpush.bf16.msra.mxu1 %v7543_v49 }
 0x6e1   :  { %v3230_v43 = vpop.f32.mrf.mxu1  ;;  %v3209_v38 = vadd.f32 %v3208_v48, %v3190_v47  ;;  %v7526_v48 = vld [vmem:[%s10944_s7 + $0x10] sm:$0xff] }
 0x6e2   :  { %3880 = vmatpush.bf16.msrb.mxu2 %v7526_v48  ;;  %v7558_v48 = vld [vmem:[%s10944_s7 + $0x110] sm:$0xff] }
 0x6e3   :  { %v10134_v42 = vadd.f32 %v3227_v5, %v3209_v38  ;;  %v7534_v5 = vld [vmem:[%s10944_s7 + $0x50] sm:$0xff] }
 0x6e4   :  { %3899 = vmatpush.bf16.msrb.mxu3 %v7534_v5  ;;  %3918 = vmatpush.bf16.msra.mxu1 %v7542_v30  ;;  %v7562_v38 = vld [vmem:[%s10944_s7 + $0x130] sm:$0xff]  ;;  %v7548_v30 = vld [vmem:[%s10944_s7 + $0xc0] sm:$0xff] }
 0x6e5   :  { %v3235_v34 = vadd.f32 %v10134_v42, %v3226_v51 }
 0x6e6   :  { %v3192_v12 = vpop.f32.mrf.mxu2  ;;  %3881 = vmatpush.bf16.msrb.mxu2 %v7525_v2  ;;  %v7565_v2 = vld [vmem:[%s10944_s7 + $0x148] sm:$0xff] }
 0x6e7   :  { %v3211_v9 = vpop.f32.mrf.mxu3  ;;  %v3193_v27 = vadd.f32 %v3192_v12, %v3174_v57  ;;  %v7524_v57 = vld [vmem:[%s10944_s7] sm:$0xff]  ;;  %v7555_v12 = vld [vmem:[%s10944_s7 + $0xf8] sm:$0xff] }
 0x6e8   :  { %3900 = vmatpush.bf16.msrb.mxu3 %v7533_v11  ;;  %3919 = vmatpush.bf16.msra.mxu1 %v7541_v23  ;;  %v7564_v11 = vld [vmem:[%s10944_s7 + $0x140] sm:$0xff]  ;;  %v7579_v23 = vld [vmem:[%s10944_s7 + $0x1b8] sm:$0xff] }
 0x6e9   :  { %v3212_v46 = vadd.f32 %v3211_v9, %v3193_v27  ;;  %v3232_v31 = vpop.f32.mrf.mxu1  ;;  %v10188_v27 = vsel %vm3249_vm0, %v7760_v54, %v3248_v62 }
 0x6ea   :  { %3882 = vmatpush.bf16.msrb.mxu2 %v7524_v57 }
 0x6eb   :  { %v10142_v53 = vadd.f32 %v3230_v43, %v3212_v46 }
 0x6ec   :  { %3901 = vmatpush.bf16.msrb.mxu3 %v7532_v55  ;;  %3920 = vmatpush.bf16.msra.mxu1 %v7540_v24  ;;  %v7594_v24 = vld [vmem:[%s10944_s7 + $0x230] sm:$0xff] }
 0x6ed   :  { %v3236_v19 = vadd.f32 %v3235_v34, %v10142_v53  ;;  %3883 = vmatmul.bf16.vlgmr.msrb.gmra.mxu2 %v7770_v22 }
 0x6ee   :  { %v3194_v17 = vpop.f32.mrf.mxu2  ;;  %3932 = vmatpush.bf16.msra.mxu2 %v7555_v12  ;;  %v7587_v12 = vld [vmem:[%s10944_s7 + $0x1f8] sm:$0xff] }
 0x6ef   :  { %v3195_v39 = vadd.f32 %v3194_v17, %v3176_v52  ;;  %v3213_v16 = vpop.f32.mrf.mxu3  ;;  %3902 = vmatmul.bf16.vlgmr.msrb.gmra.mxu3 %v7770_v22  ;;  %v7561_v52 = vld [vmem:[%s10944_s7 + $0x128] sm:$0xff]  ;;  %3921 = vmatmul.bf16.vlgmr.msra.gmra.mxu1 %v7770_v22 }
 0x6f0   :  { %3951 = vmatpush.bf16.msra.mxu3 %v7563_v26  ;;  %3970 = vmatpush.bf16.msrb.mxu1 %v7571_v63  ;;  %v7578_v26 = vld [vmem:[%s10944_s7 + $0x1b0] sm:$0xff] }
 0x6f1   :  { %v3214_v10 = vadd.f32 %v3213_v16, %v3195_v39 }
 0x6f2   :  { %3933 = vmatpush.bf16.msra.mxu2 %v7554_v14  ;;  %v7577_v14 = vld [vmem:[%s10944_s7 + $0x1a8] sm:$0xff] }
 0x6f3   :  { %v3233_v15 = vadd.f32 %v3232_v31, %v3214_v10 }
 0x6f4   :  { %3952 = vmatpush.bf16.msra.mxu3 %v7562_v38  ;;  %3971 = vmatpush.bf16.msrb.mxu1 %v7570_v33  ;;  %v7585_v38 = vld [vmem:[%s10944_s7 + $0x1e8] sm:$0xff] }
 0x6f5   :  { %v3237_v18 = vadd.f32 %v3236_v19, %v3233_v15  ;;  %v7551_v19 = vld [vmem:[%s10944_s7 + $0xd8] sm:$0xff]  ;;  %v7593_v33 = vld [vmem:[%s10944_s7 + $0x228] sm:$0xff] }
 0x6f6   :  { %3934 = vmatpush.bf16.msra.mxu2 %v7553_v41 }
 0x6f7   :  { %v3238_v25 = vrot.slane %v3237_v18, 4 }
 0x6f8   :  { %3953 = vmatpush.bf16.msra.mxu3 %v7561_v52 }
 0x6f9   :  { %v3239_v20 = vadd.f32 %v3238_v25, %v3237_v18  ;;  %v7550_v18 = vld [vmem:[%s10944_s7 + $0xd0] sm:$0xff] }
 0x6fa   :  { %v7566_v25 = vld [vmem:[%s10944_s7 + $0x150] sm:$0xff] }
 0x6fb   :  { %v3240_v59 = vrot.slane %v3239_v20, 2 }
 0x6fc   :  { %3954 = vmatpush.bf16.msra.mxu3 %v7560_v40 }
 0x6fd   :  { %v3241_v47 = vadd.f32 %v3240_v59, %v3239_v20  ;;  %v7557_v20 = vld [vmem:[%s10944_s7 + $0x108] sm:$0xff]  ;;  %v7556_v59 = vld [vmem:[%s10944_s7 + $0x100] sm:$0xff] }
 0x6ff   :  { %v3242_v9 = vrot.slane %v3241_v47, 1 }
 0x701   :  { %v3243_v4 = vadd.f32 %v3242_v9, %v3241_v47  ;;  %v7595_v9 = vld [vmem:[%s10944_s7 + $0x238] sm:$0xff] }
 0x703   :  { %v3251_v43 = vmul.f32 %v10188_v27, %v3243_v4  ;;  %v7586_v4 = vld [vmem:[%s10944_s7 + $0x1f0] sm:$0xff] }
 0x705   :  { %v10207_v44 = vsub.f32 %v3226_v51, %v3251_v43  ;;  %v10210_v45 = vsub.f32 %v10134_v42, %v3251_v43  ;;  %v10213_v32 = vsub.f32 %v10142_v53, %v3251_v43  ;;  %v10216_v46 = vsub.f32 %v3233_v15, %v3251_v43  ;;  %v7569_v51 = vld [vmem:[%s10944_s7 + $0x168] sm:$0xff]  ;;  %v7552_v53 = vld [vmem:[%s10944_s7 + $0xe0] sm:$0xff]  ;;  %v7559_v15 = vld [vmem:[%s10944_s7 + $0x118] sm:$0xff] }
 0x706   :  { %3972 = vmatpush.bf16.msrb.mxu1 %v7569_v51  ;;  %3935 = vmatpush.bf16.msra.mxu2 %v7552_v53 }
 0x707   :  { %v3256_v54 = vmul.f32 %v10207_v44, %v10207_v44  ;;  %v3257_v42 = vmul.f32 %v10210_v45, %v10210_v45  ;;  %v3258_v3 = vmul.f32 %v10213_v32, %v10213_v32  ;;  %v3259_v37 = vmul.f32 %v10216_v46, %v10216_v46  ;;  %3955 = vmatpush.bf16.msra.mxu3 %v7559_v15  ;;  %v7581_v15 = vld [vmem:[%s10944_s7 + $0x1c8] sm:$0xff] }
 0x709   :  { %v3260_v17 = vadd.f32 %v3257_v42, %v3256_v54 }
 0x70a   :  { %3973 = vmatpush.bf16.msrb.mxu1 %v7568_v60  ;;  %3936 = vmatpush.bf16.msra.mxu2 %v7551_v19  ;;  %v7575_v60 = vld [vmem:[%s10944_s7 + $0x198] sm:$0xff]  ;;  %v7573_v19 = vld [vmem:[%s10944_s7 + $0x188] sm:$0xff] }
 0x70b   :  { %v3261_v39 = vadd.f32 %v3260_v17, %v3258_v3  ;;  %3956 = vmatpush.bf16.msra.mxu3 %v7558_v48  ;;  %v7576_v17 = vld [vmem:[%s10944_s7 + $0x1a0] sm:$0xff] }
 0x70c   :  { %v7588_v48 = vld [vmem:[%s10944_s7 + $0x200] sm:$0xff] }
 0x70d   :  { %v3262_v16 = vadd.f32 %v3261_v39, %v3259_v37  ;;  %v7584_v37 = vld [vmem:[%s10944_s7 + $0x1e0] sm:$0xff] }
 0x70e   :  { %3974 = vmatpush.bf16.msrb.mxu1 %v7567_v28  ;;  %3937 = vmatpush.bf16.msra.mxu2 %v7550_v18  ;;  %v7589_v28 = vld [vmem:[%s10944_s7 + $0x208] sm:$0xff]  ;;  %v7580_v18 = vld [vmem:[%s10944_s7 + $0x1c0] sm:$0xff] }
 0x70f   :  { %v3263_v34 = vrot.slane %v3262_v16, 4  ;;  %3957 = vmatpush.bf16.msra.mxu3 %v7557_v20 }
 0x711   :  { %v3264_v10 = vadd.f32 %v3263_v34, %v3262_v16  ;;  %v7583_v34 = vld [vmem:[%s10944_s7 + $0x1d8] sm:$0xff] }
 0x712   :  { %3975 = vmatpush.bf16.msrb.mxu1 %v7566_v25  ;;  %3938 = vmatpush.bf16.msra.mxu2 %v7549_v7  ;;  %v10372_v7 = vld [vmem:[%s10945_s8] ss:$0 sm:$0xff] }
 0x713   :  { %v3265_v29 = vrot.slane %v3264_v10, 2  ;;  %3958 = vmatpush.bf16.msra.mxu3 %v7556_v59 }
 0x715   :  { %v3266_v31 = vadd.f32 %v3265_v29, %v3264_v10  ;;  %v7591_v10 = vld [vmem:[%s10944_s7 + $0x218] sm:$0xff]  ;;  %v7574_v29 = vld [vmem:[%s10944_s7 + $0x190] sm:$0xff] }
 0x716   :  { %3976 = vmatpush.bf16.msrb.mxu1 %v7565_v2  ;;  %3939 = vmatpush.bf16.msra.mxu2 %v7548_v30 }
 0x717   :  { %v3267_v0 = vrot.slane %v3266_v31, 1  ;;  %4008 = vmatpush.bf16.msrb.mxu3 %v7587_v12 }
 0x719   :  { %v3268_v35 = vadd.f32 %v3267_v0, %v3266_v31  ;;  %v7582_v31 = vld [vmem:[%s10944_s7 + $0x1d0] sm:$0xff] }
 0x71a   :  { %3977 = vmatpush.bf16.msrb.mxu1 %v7564_v11  ;;  %3989 = vmatpush.bf16.msrb.mxu2 %v7579_v23  ;;  %v7590_v0 = vld [vmem:[%s10944_s7 + $0x210] sm:$0xff] }
 0x71b   :  { %v3269_v49 = vmul.f32 %v3268_v35, %v10188_v27  ;;  %4009 = vmatpush.bf16.msrb.mxu3 %v7586_v4  ;;  %v7572_v35 = vld [vmem:[%s10944_s7 + $0x180] sm:$0xff] }
 0x71d   :  { %v3270_v5 = vadd.f32 1e-05, %v3269_v49  ;;  %v7614_v49 = vld [vmem:[%s10941_s9 + $0x90] sm:$0xff] }
 0x71e   :  { %4027 = vmatpush.bf16.msra.mxu1 %v7595_v9  ;;  %3990 = vmatpush.bf16.msrb.mxu2 %v7578_v26 }
 0x71f   :  { %7761 = vrsqrt.f32 %v3270_v5  ;;  %vm3277_vm2 = vweird.f32 %v3270_v5  ;;  %4010 = vmatpush.bf16.msrb.mxu3 %v7585_v38  ;;  %4734 = vmatpush.bf16.msrb.mxu0 %v7614_v49 }
 0x722   :  { %4028 = vmatpush.bf16.msra.mxu1 %v7594_v24  ;;  %3991 = vmatpush.bf16.msrb.mxu2 %v7577_v14 }
 0x723   :  { %4011 = vmatpush.bf16.msrb.mxu3 %v7584_v37 }
 0x725   :  { %v7762_v62 = vpop.eup %7761 }
 0x726   :  { %v3272_v47 = vmul.f32 %v7762_v62, %v3270_v5  ;;  %vm3278_vm1 = vweird.f32 %v7762_v62  ;;  %4029 = vmatpush.bf16.msra.mxu1 %v7593_v33  ;;  %3992 = vmatpush.bf16.msrb.mxu2 %v7576_v17 }
 0x727   :  { %vm3279_vm3 = vmor %vm3277_vm2, %vm3278_vm1  ;;  %4012 = vmatpush.bf16.msrb.mxu3 %v7583_v34 }
 0x728   :  { %v3273_v57 = vmul.f32 %v7762_v62, %v3272_v47  ;;  %v7613_v47 = vld [vmem:[%s10941_s9 + $0x88] sm:$0xff] }
 0x729   :  { %4735 = vmatpush.bf16.msrb.mxu0 %v7613_v47 }
 0x72a   :  { %v3274_v55 = vmul.f32 0.5, %v3273_v57  ;;  %3993 = vmatpush.bf16.msrb.mxu2 %v7575_v60 }
 0x72b   :  { %4013 = vmatpush.bf16.msrb.mxu3 %v7582_v31 }
 0x72c   :  { %v3275_v43 = vsub.f32 1.5, %v3274_v55 }
 0x72e   :  { %v3276_v63 = vmul.f32 %v7762_v62, %v3275_v43  ;;  %3994 = vmatpush.bf16.msrb.mxu2 %v7574_v29 }
 0x72f   :  { %4014 = vmatpush.bf16.msrb.mxu3 %v7581_v15 }
 0x730   :  { %v3280_v41 = vsel %vm3279_vm3, %v7762_v62, %v3276_v63 }
 0x731   :  { %v3281_v54 = vmul.f32 %v3280_v41, %v10207_v44  ;;  %v3282_v42 = vmul.f32 %v3280_v41, %v10210_v45  ;;  %v3283_v52 = vmul.f32 %v3280_v41, %v10213_v32  ;;  %v3284_v3 = vmul.f32 %v3280_v41, %v10216_v46  ;;  %v7592_v46 = vld [vmem:[%s10944_s7 + $0x220] sm:$0xff] }
 0x732   :  { %4030 = vmatpush.bf16.msra.mxu1 %v7592_v46  ;;  %3995 = vmatpush.bf16.msrb.mxu2 %v7573_v19  ;;  %v2171_v41 = vperm.slane %v10074_v61, 0 }
 0x733   :  { %v3285_v51 = vmax.f32 %v3281_v54, 0.0  ;;  %v3286_v53 = vmax.f32 %v3282_v42, 0.0  ;;  %v3287_v44 = vmax.f32 %v3283_v52, 0.0  ;;  %v3288_v39 = vmax.f32 %v3284_v3, 0.0  ;;  %4015 = vmatpush.bf16.msrb.mxu3 %v7580_v18 }
 0x734   :  { %v2172_v52 = vperm.slane %v10074_v61, 1  ;;  %v2349_v17 = vadd.f32 %v10069_v56, %v2171_v41 }
 0x735   :  { %v3289_v45 = vpack.c.bf16 %v3285_v51, %v7771_v58  ;;  %v3290_v32 = vpack.c.bf16 %v3286_v53, %v3285_v51  ;;  %v3291_v40 = vpack.c.bf16 0.0, %v3286_v53  ;;  %v3293_v16 = vpack.c.bf16 %v3288_v39, %v3287_v44 }
 0x736   :  { %4031 = vmatpush.bf16.msra.mxu1 %v7591_v10  ;;  %3996 = vmatpush.bf16.msrb.mxu2 %v7572_v35  ;;  %v3292_v25 = vpack.c.bf16 %v3287_v44, %v7771_v58  ;;  %v3294_v5 = vpack.c.bf16 0.0, %v3288_v39  ;;  %v2362_v37 = vadd.f32 %v10079_v13, %v2172_v52  ;;  %v2395_v51 = vrot.slane %v2349_v17, 7 }
 0x737   :  { %3888 = vmatmul.bf16.gmra.mxu2 %v3289_v45  ;;  %3907 = vmatmul.bf16.gmra.mxu3 %v3290_v32  ;;  %v2411_v60 = vrot.slane %v2349_v17, 5 }
 0x738   :  { %3926 = vmatmul.bf16.gmra.mxu1 %v3291_v40  ;;  %v2396_v39 = vrot.slane %v2362_v37, 7  ;;  %v2412_v29 = vrot.slane %v2362_v37, 5 }
 0x73a   :  { %4032 = vmatpush.bf16.msra.mxu1 %v7590_v0  ;;  %v2445_v61 = vsel %vm2443_vm9, %v2362_v37, %v2396_v39 }
 0x73e   :  { %4033 = vmatpush.bf16.msra.mxu1 %v7589_v28  ;;  %v2419_v28 = vrot.slane %v2349_v17, 4 }
 0x742   :  { %4034 = vmatpush.bf16.msra.mxu1 %v7588_v48 }
 0x747   :  { %3940 = vmatmul.bf16.vlgmr.msra.gmra.mxu2 %v3289_v45  ;;  %3959 = vmatmul.bf16.vlgmr.msra.gmra.mxu3 %v3290_v32  ;;  %v2403_v45 = vrot.slane %v2349_v17, 6  ;;  %v2444_v32 = vsel %vm2443_vm9, %v2349_v17, %v2395_v51 }
 0x748   :  { %3978 = vmatmul.bf16.vlgmr.msrb.gmra.mxu1 %v3291_v40  ;;  %v2404_v40 = vrot.slane %v2362_v37, 6 }
 0x749   :  { %v2449_v56 = vsel %vm2448_vm10, %v2444_v32, %v2403_v45 }
 0x74a   :  { %v2450_v0 = vsel %vm2448_vm10, %v2445_v61, %v2404_v40  ;;  %v2454_v19 = vsel %vm2453_vm11, %v2449_v56, %v2411_v60 }
 0x74b   :  { %v2455_v35 = vsel %vm2453_vm11, %v2450_v0, %v2412_v29  ;;  %v2459_v49 = vsel %vm2458_vm12, %v2454_v19, %v2411_v60 }
 0x757   :  { %3945 = vmatmul.bf16.gmra.mxu2 %v3292_v25  ;;  %3964 = vmatmul.bf16.gmra.mxu3 %v3293_v16 }
 0x758   :  { %3983 = vmatmul.bf16.gmra.mxu1 %v3294_v5 }
 0x767   :  { %3997 = vmatmul.bf16.vlgmr.msrb.gmra.mxu2 %v3292_v25  ;;  %4016 = vmatmul.bf16.vlgmr.msrb.gmra.mxu3 %v3293_v16  ;;  %v2420_v25 = vrot.slane %v2362_v37, 4 }
 0x768   :  { %4035 = vmatmul.bf16.vlgmr.msra.gmra.mxu1 %v3294_v5 }
 0x76c   :  { %v3922_v11 = vpop.f32.mrf.mxu1 }
 0x770   :  { %v3884_v20 = vpop.f32.mrf.mxu2 }
 0x771   :  { %v3885_v2 = vadd.f32 %v10372_v7, %v3884_v20 }
 0x772   :  { %v3903_v30 = vpop.f32.mrf.mxu3 }
 0x773   :  { %v3904_v59 = vadd.f32 %v3903_v30, %v3885_v2  ;;  %v2427_v30 = vrot.slane %v2349_v17, 3 }
 0x774   :  { %v3924_v57 = vpop.f32.mrf.mxu1 }
 0x775   :  { %v3923_v62 = vadd.f32 %v3922_v11, %v3904_v59  ;;  %v2460_v59 = vsel %vm2458_vm12, %v2455_v35, %v2412_v29 }
 0x777   :  { %4002 = vmatmul.bf16.gmra.mxu2 %v7770_v22  ;;  %4021 = vmatmul.bf16.gmra.mxu3 %v7770_v22 }
 0x778   :  { %4040 = vmatmul.bf16.gmra.mxu1 %v7770_v22  ;;  %v3886_v23 = vpop.f32.mrf.mxu2 }
 0x779   :  { %v3887_v46 = vadd.f32 %v10372_v7, %v3886_v23 }
 0x77a   :  { %v3905_v12 = vpop.f32.mrf.mxu3 }
 0x77b   :  { %v3906_v31 = vadd.f32 %v3905_v12, %v3887_v46 }
 0x77d   :  { %v3925_v18 = vadd.f32 %v3924_v57, %v3906_v31  ;;  %v2465_v57 = vsel %vm2463_vm13, %v2460_v59, %v2420_v25 }
 0x7b5   :  { %v3927_v9 = vpop.f32.mrf.mxu1 }
 0x7ba   :  { %v3889_v55 = vpop.f32.mrf.mxu2  ;;  %v3908_v26 = vpop.f32.mrf.mxu3 }
 0x7bb   :  { %v3890_v48 = vadd.f32 %v10372_v7, %v3889_v55 }
 0x7bd   :  { %v10378_v4 = vpop.f32.mrf.mxu1  ;;  %v3909_v23 = vadd.f32 %v3908_v26, %v3890_v48 }
 0x7bf   :  { %v3928_v51 = vadd.f32 %v3927_v9, %v3909_v23  ;;  %v7609_v23 = vld [vmem:[%s10941_s9 + $0x68] sm:$0xff] }
 0x7c2   :  { %v3891_v24 = vpop.f32.mrf.mxu2  ;;  %v10380_v43 = vpop.f32.mrf.mxu3 }
 0x7c5   :  { %v3979_v63 = vpop.f32.mrf.mxu1 }
 0x7ca   :  { %v3941_v14 = vpop.f32.mrf.mxu2  ;;  %v3960_v38 = vpop.f32.mrf.mxu3 }
 0x7cb   :  { %v3942_v34 = vadd.f32 %v3941_v14, %v3923_v62  ;;  %v2464_v62 = vsel %vm2463_vm13, %v2459_v49, %v2419_v28  ;;  %v2428_v14 = vrot.slane %v2362_v37, 3 }
 0x7cc   :  { %v2469_v41 = vsel %vm2468_vm14, %v2464_v62, %v2427_v30 }
 0x7cd   :  { %v3981_v33 = vpop.f32.mrf.mxu1  ;;  %v3961_v15 = vadd.f32 %v3960_v38, %v3942_v34  ;;  %v2435_v38 = vrot.slane %v2349_v17, 2  ;;  %v2470_v39 = vsel %vm2468_vm14, %v2465_v57, %v2428_v14  ;;  %v7600_v14 = vld [vmem:[%s10941_s9 + $0x20] sm:$0xff] }
 0x7ce   :  { %v7608_v57 = vld [vmem:[%s10941_s9 + $0x60] sm:$0xff] }
 0x7cf   :  { %v3980_v2 = vadd.f32 %v3979_v63, %v3961_v15  ;;  %v3892_v63 = vadd.f32 %v10372_v7, %v3891_v24  ;;  %v2474_v32 = vsel %vm2473_vm15, %v2469_v41, %v2435_v38  ;;  %v7599_v41 = vld [vmem:[%s10941_s9 + $0x18] sm:$0xff] }
 0x7d2   :  { %v3943_v54 = vpop.f32.mrf.mxu2  ;;  %v3962_v42 = vpop.f32.mrf.mxu3 }
 0x7d3   :  { %v3944_v5 = vadd.f32 %v3943_v54, %v3925_v18  ;;  %v2436_v54 = vrot.slane %v2362_v37, 2 }
 0x7d5   :  { %v10384_v3 = vpop.f32.mrf.mxu1  ;;  %v3963_v55 = vadd.f32 %v3962_v42, %v3944_v5  ;;  %v2475_v17 = vsel %vm2473_vm15, %v2470_v39, %v2436_v54  ;;  %v3911_v42 = vadd.f32 %v10380_v43, %v3892_v63  ;;  %v7607_v54 = vld [vmem:[%s10941_s9 + $0x58] sm:$0xff] }
 0x7d7   :  { %v3982_v46 = vadd.f32 %v3981_v33, %v3963_v55  ;;  %v3930_v24 = vadd.f32 %v10378_v4, %v3911_v42  ;;  %v7603_v4 = vld [vmem:[%s10941_s9 + $0x38] sm:$0xff]  ;;  %v7626_v42 = vld [vmem:[%s10941_s9 + $0xf0] sm:$0xff] }
 0x7d8   :  { %4691 = vmatpush.bf16.msra.mxu2 %v7603_v4  ;;  %v7643_v4 = vld [vmem:[%s10941_s9 + $0x178] sm:$0xff] }
 0x7da   :  { %v3946_v53 = vpop.f32.mrf.mxu2  ;;  %v3965_v44 = vpop.f32.mrf.mxu3 }
 0x7db   :  { %v3947_v40 = vadd.f32 %v3946_v53, %v3928_v51  ;;  %v7598_v51 = vld [vmem:[%s10941_s9 + $0x10] sm:$0xff] }
 0x7dd   :  { %v10390_v16 = vpop.f32.mrf.mxu1  ;;  %v3966_v7 = vadd.f32 %v3965_v44, %v3947_v40  ;;  %v7597_v40 = vld [vmem:[%s10941_s9 + $0x8] sm:$0xff] }
 0x7df   :  { %v3985_v53 = vadd.f32 %v10384_v3, %v3966_v7  ;;  %v7611_v3 = vld [vmem:[%s10941_s9 + $0x78] sm:$0xff] }
 0x7e0   :  { %4710 = vmatpush.bf16.msra.mxu3 %v7611_v3 }
 0x7e2   :  { %v3948_v10 = vpop.f32.mrf.mxu2  ;;  %v3967_v13 = vpop.f32.mrf.mxu3 }
 0x7e3   :  { %v3949_v31 = vadd.f32 %v3948_v10, %v3930_v24 }
 0x7e5   :  { %v4036_v20 = vpop.f32.mrf.mxu1  ;;  %v3968_v43 = vadd.f32 %v3967_v13, %v3949_v31  ;;  %v7602_v13 = vld [vmem:[%s10941_s9 + $0x30] sm:$0xff]  ;;  %v7625_v31 = vld [vmem:[%s10941_s9 + $0xe8] sm:$0xff] }
 0x7e6   :  { %4692 = vmatpush.bf16.msra.mxu2 %v7602_v13  ;;  %v7622_v13 = vld [vmem:[%s10941_s9 + $0xd0] sm:$0xff] }
 0x7e7   :  { %v3987_v49 = vadd.f32 %v10390_v16, %v3968_v43  ;;  %v7601_v16 = vld [vmem:[%s10941_s9 + $0x28] sm:$0xff] }
 0x7ea   :  { %v3998_v11 = vpop.f32.mrf.mxu2  ;;  %v4017_v47 = vpop.f32.mrf.mxu3  ;;  %4693 = vmatpush.bf16.msra.mxu2 %v7601_v16 }
 0x7eb   :  { %v3999_v12 = vadd.f32 %v3998_v11, %v3980_v2  ;;  %v7610_v2 = vld [vmem:[%s10941_s9 + $0x70] sm:$0xff] }
 0x7ec   :  { %4711 = vmatpush.bf16.msra.mxu3 %v7610_v2  ;;  %v7633_v2 = vld [vmem:[%s10941_s9 + $0x128] sm:$0xff] }
 0x7ed   :  { %v4018_v52 = vadd.f32 %v4017_v47, %v3999_v12  ;;  %v4038_v56 = vpop.f32.mrf.mxu1 }
 0x7ee   :  { %4694 = vmatpush.bf16.msra.mxu2 %v7600_v14  ;;  %v7648_v14 = vld [vmem:[%s10941_s9 + $0x1a0] sm:$0xff] }
 0x7ef   :  { %v4037_v45 = vadd.f32 %v4036_v20, %v4018_v52 }
 0x7f0   :  { %4712 = vmatpush.bf16.msra.mxu3 %v7609_v23  ;;  %v7620_v23 = vld [vmem:[%s10941_s9 + $0xc0] sm:$0xff] }
 0x7f1   :  { %v4046_v26 = vmul.f32 %v4037_v45, %v2474_v32  ;;  %v7606_v45 = vld [vmem:[%s10941_s9 + $0x50] sm:$0xff] }
 0x7f2   :  { %v4000_v60 = vpop.f32.mrf.mxu2  ;;  %v4019_v61 = vpop.f32.mrf.mxu3  ;;  %4695 = vmatpush.bf16.msra.mxu2 %v7599_v41  ;;  %v7659_v41 = vld [vmem:[%s10941_s9 + $0x1f8] sm:$0xff] }
 0x7f3   :  { %v10408_v34 = vadd.f32 %v4046_v26, %v2475_v17  ;;  %v4001_v37 = vadd.f32 %v4000_v60, %v3982_v46  ;;  %v7627_v26 = vld [vmem:[%s10941_s9 + $0xf8] sm:$0xff] }
 0x7f4   :  { %4713 = vmatpush.bf16.msra.mxu3 %v7608_v57  ;;  %4748 = vmatpush.bf16.msrb.mxu1 %v7627_v26  ;;  %v7629_v26 = vld [vmem:[%s10941_s9 + $0x108] sm:$0xff] }
 0x7f5   :  { %v4020_v9 = vadd.f32 %v4019_v61, %v4001_v37  ;;  %v4041_v35 = vpop.f32.mrf.mxu1  ;;  %v7596_v61 = vld [vmem:[%s10941_s9] sm:$0xff] }
 0x7f6   :  { %4696 = vmatpush.bf16.msra.mxu2 %v7598_v51  ;;  %v7658_v51 = vld [vmem:[%s10941_s9 + $0x1f0] sm:$0xff] }
 0x7f7   :  { %v4039_v29 = vadd.f32 %v4038_v56, %v4020_v9  ;;  %v7604_v56 = vld [vmem:[%s10941_s9 + $0x40] sm:$0xff] }
 0x7f8   :  { %4714 = vmatpush.bf16.msra.mxu3 %v7607_v54  ;;  %4749 = vmatpush.bf16.msrb.mxu1 %v7626_v42  ;;  %v7647_v54 = vld [vmem:[%s10941_s9 + $0x198] sm:$0xff] }
 0x7f9   :  { %v4047_v0 = vmul.f32 %v4039_v29, %v2474_v32 }
 0x7fa   :  { %v4003_v33 = vpop.f32.mrf.mxu2  ;;  %v4022_v19 = vpop.f32.mrf.mxu3  ;;  %4697 = vmatpush.bf16.msra.mxu2 %v7597_v40  ;;  %v7657_v40 = vld [vmem:[%s10941_s9 + $0x1e8] sm:$0xff] }
 0x7fb   :  { %v10412_v15 = vadd.f32 %v4047_v0, %v2475_v17  ;;  %v4004_v28 = vadd.f32 %v4003_v33, %v3985_v53 }
 0x7fc   :  { %4715 = vmatpush.bf16.msra.mxu3 %v7606_v45  ;;  %4750 = vmatpush.bf16.msrb.mxu1 %v7625_v31  ;;  %v7638_v45 = vld [vmem:[%s10941_s9 + $0x150] sm:$0xff]  ;;  %v7636_v31 = vld [vmem:[%s10941_s9 + $0x140] sm:$0xff] }
 0x7fd   :  { %v4054_v18 = vadd.f32 %v10412_v15, %v10408_v34  ;;  %v4023_v48 = vadd.f32 %v4022_v19, %v4004_v28  ;;  %v4043_v62 = vpop.f32.mrf.mxu1  ;;  %v7612_v19 = vld [vmem:[%s10941_s9 + $0x80] sm:$0xff] }
 0x7fe   :  { %4698 = vmatpush.bf16.msra.mxu2 %v7596_v61  ;;  %4736 = vmatpush.bf16.msrb.mxu0 %v7612_v19  ;;  %v7656_v61 = vld [vmem:[%s10941_s9 + $0x1e0] sm:$0xff] }
 0x7ff   :  { %v4042_v44 = vadd.f32 %v4041_v35, %v4023_v48  ;;  %v7623_v48 = vld [vmem:[%s10941_s9 + $0xd8] sm:$0xff] }
 0x801   :  { %v4048_v10 = vmul.f32 %v4042_v44, %v2474_v32  ;;  %4699 = vmatmul.bf16.vlgmr.msra.gmra.mxu2 %v7770_v22  ;;  %4737 = vmatmul.bf16.vlgmr.msrb.gmra.mxu0 %v7770_v22  ;;  %v7651_v44 = vld [vmem:[%s10941_s9 + $0x1b8] sm:$0xff] }
 0x802   :  { %v4005_v25 = vpop.f32.mrf.mxu2  ;;  %v4024_v30 = vpop.f32.mrf.mxu3  ;;  %4805 = vmatpush.bf16.msra.mxu0 %v7651_v44 }
 0x803   :  { %v4052_v5 = vadd.f32 %v4048_v10, %v2475_v17  ;;  %v4006_v20 = vadd.f32 %v4005_v25, %v3987_v49  ;;  %v7634_v49 = vld [vmem:[%s10941_s9 + $0x130] sm:$0xff] }
 0x804   :  { %v7642_v25 = vld [vmem:[%s10941_s9 + $0x170] sm:$0xff] }
 0x805   :  { %v4055_v59 = vadd.f32 %v4054_v18, %v4052_v5  ;;  %v4025_v11 = vadd.f32 %v4024_v30, %v4006_v20  ;;  %v7635_v18 = vld [vmem:[%s10941_s9 + $0x138] sm:$0xff]  ;;  %v7621_v30 = vld [vmem:[%s10941_s9 + $0xc8] sm:$0xff] }
 0x806   :  { %4767 = vmatpush.bf16.msrb.mxu2 %v7635_v18 }
 0x807   :  { %v4044_v47 = vadd.f32 %v4043_v62, %v4025_v11  ;;  %v7649_v11 = vld [vmem:[%s10941_s9 + $0x1a8] sm:$0xff] }
 0x809   :  { %v4049_v12 = vmul.f32 %v4044_v47, %v2474_v32  ;;  %v7632_v47 = vld [vmem:[%s10941_s9 + $0x120] sm:$0xff] }
 0x80a   :  { %4768 = vmatpush.bf16.msrb.mxu2 %v7634_v49 }
 0x80b   :  { %v4053_v38 = vadd.f32 %v4049_v12, %v2475_v17  ;;  %v7605_v17 = vld [vmem:[%s10941_s9 + $0x48] sm:$0xff]  ;;  %v7640_v12 = vld [vmem:[%s10941_s9 + $0x160] sm:$0xff] }
 0x80c   :  { %4716 = vmatpush.bf16.msra.mxu3 %v7605_v17  ;;  %v7645_v17 = vld [vmem:[%s10941_s9 + $0x188] sm:$0xff] }
 0x80d   :  { %v4056_v55 = vadd.f32 %v4055_v59, %v4053_v38  ;;  %v7641_v59 = vld [vmem:[%s10941_s9 + $0x168] sm:$0xff] }
 0x80e   :  { %4769 = vmatpush.bf16.msrb.mxu2 %v7633_v2 }
 0x80f   :  { %v4057_v52 = vrot.slane %v4056_v55, 4 }
 0x810   :  { %4717 = vmatpush.bf16.msra.mxu3 %v7604_v56 }
 0x811   :  { %v4058_v63 = vadd.f32 %v4057_v52, %v4056_v55  ;;  %v7631_v55 = vld [vmem:[%s10941_s9 + $0x118] sm:$0xff] }
 0x812   :  { %4770 = vmatpush.bf16.msrb.mxu2 %v7632_v47  ;;  %v7639_v52 = vld [vmem:[%s10941_s9 + $0x158] sm:$0xff] }
 0x813   :  { %v4059_v39 = vrot.slane %v4058_v63, 2  ;;  %4718 = vmatmul.bf16.vlgmr.msra.gmra.mxu3 %v7770_v22 }
 0x814   :  { %4786 = vmatpush.bf16.msrb.mxu3 %v7643_v4 }
 0x815   :  { %v4060_v32 = vadd.f32 %v4059_v39, %v4058_v63  ;;  %v7630_v39 = vld [vmem:[%s10941_s9 + $0x110] sm:$0xff] }
 0x816   :  { %4771 = vmatpush.bf16.msrb.mxu2 %v7631_v55 }
 0x817   :  { %v4061_v46 = vrot.slane %v4060_v32, 1 }
 0x818   :  { %4787 = vmatpush.bf16.msrb.mxu3 %v7642_v25 }
 0x819   :  { %v4062_v60 = vadd.f32 %v4061_v46, %v4060_v32  ;;  %v7646_v32 = vld [vmem:[%s10941_s9 + $0x190] sm:$0xff]  ;;  %v7637_v46 = vld [vmem:[%s10941_s9 + $0x148] sm:$0xff] }
 0x81a   :  { %4772 = vmatpush.bf16.msrb.mxu2 %v7630_v39 }
 0x81b   :  { %v4063_v37 = vmul.f32 %v4062_v60, %v10188_v27 }
 0x81c   :  { %4788 = vmatpush.bf16.msrb.mxu3 %v7641_v59 }
 0x81d   :  { %v10473_v7 = vsub.f32 %v10408_v34, %v4063_v37  ;;  %v10476_v9 = vsub.f32 %v10412_v15, %v4063_v37  ;;  %v10478_v24 = vsub.f32 %v4052_v5, %v4063_v37  ;;  %v10480_v29 = vsub.f32 %v4053_v38, %v4063_v37  ;;  %v7624_v15 = vld [vmem:[%s10941_s9 + $0xe0] sm:$0xff]  ;;  %v7650_v5 = vld [vmem:[%s10941_s9 + $0x1b0] sm:$0xff] }
 0x81e   :  { %4751 = vmatpush.bf16.msrb.mxu1 %v7624_v15  ;;  %4806 = vmatpush.bf16.msra.mxu0 %v7650_v5  ;;  %v7628_v37 = vld [vmem:[%s10941_s9 + $0x100] sm:$0xff]  ;;  %v7666_v15 = vld [vmem:[%s10941_s9 + $0x230] sm:$0xff] }
 0x81f   :  { %v4068_v0 = vmul.f32 %v10473_v7, %v10473_v7  ;;  %v4069_v34 = vmul.f32 %v10476_v9, %v10476_v9  ;;  %v4070_v53 = vmul.f32 %v10478_v24, %v10478_v24  ;;  %v4071_v28 = vmul.f32 %v10480_v29, %v10480_v29  ;;  %4773 = vmatpush.bf16.msrb.mxu2 %v7629_v26  ;;  %v7664_v5 = vld [vmem:[%s10941_s9 + $0x220] sm:$0xff] }
 0x820   :  { %4789 = vmatpush.bf16.msrb.mxu3 %v7640_v12 }
 0x821   :  { %v4072_v33 = vadd.f32 %v4069_v34, %v4068_v0  ;;  %v7644_v0 = vld [vmem:[%s10941_s9 + $0x180] sm:$0xff] }
 0x822   :  { %4752 = vmatpush.bf16.msrb.mxu1 %v7623_v48  ;;  %4807 = vmatpush.bf16.msra.mxu0 %v7649_v11  ;;  %v7660_v11 = vld [vmem:[%s10941_s9 + $0x200] sm:$0xff] }
 0x823   :  { %v4073_v35 = vadd.f32 %v4072_v33, %v4070_v53  ;;  %v7667_v53 = vld [vmem:[%s10941_s9 + $0x238] sm:$0xff]  ;;  %4774 = vmatpush.bf16.msrb.mxu2 %v7628_v37 }
 0x824   :  { %4790 = vmatpush.bf16.msrb.mxu3 %v7639_v52  ;;  %v7655_v33 = vld [vmem:[%s10941_s9 + $0x1d8] sm:$0xff] }
 0x825   :  { %v4074_v43 = vadd.f32 %v4073_v35, %v4071_v28  ;;  %v7654_v35 = vld [vmem:[%s10941_s9 + $0x1d0] sm:$0xff] }
 0x826   :  { %4753 = vmatpush.bf16.msrb.mxu1 %v7622_v13  ;;  %4808 = vmatpush.bf16.msra.mxu0 %v7648_v14 }
 0x827   :  { %v4075_v3 = vrot.slane %v4074_v43, 4  ;;  %4843 = vmatpush.bf16.msra.mxu2 %v7667_v53 }
 0x828   :  { %4791 = vmatpush.bf16.msrb.mxu3 %v7638_v45 }
 0x829   :  { %v4076_v10 = vadd.f32 %v4075_v3, %v4074_v43  ;;  %v7665_v3 = vld [vmem:[%s10941_s9 + $0x228] sm:$0xff] }
 0x82a   :  { %4754 = vmatpush.bf16.msrb.mxu1 %v7621_v30  ;;  %4809 = vmatpush.bf16.msra.mxu0 %v7647_v54  ;;  %v7661_v30 = vld [vmem:[%s10941_s9 + $0x208] sm:$0xff] }
 0x82b   :  { %v4077_v20 = vrot.slane %v4076_v10, 2  ;;  %4844 = vmatpush.bf16.msra.mxu2 %v7666_v15 }
 0x82c   :  { %4792 = vmatpush.bf16.msrb.mxu3 %v7637_v46 }
 0x82d   :  { %v4078_v16 = vadd.f32 %v4077_v20, %v4076_v10  ;;  %v7653_v10 = vld [vmem:[%s10941_s9 + $0x1c8] sm:$0xff]  ;;  %v7662_v20 = vld [vmem:[%s10941_s9 + $0x210] sm:$0xff] }
 0x82e   :  { %4755 = vmatpush.bf16.msrb.mxu1 %v7620_v23  ;;  %4810 = vmatpush.bf16.msra.mxu0 %v7646_v32 }
 0x82f   :  { %v4079_v62 = vrot.slane %v4078_v16, 1  ;;  %4845 = vmatpush.bf16.msra.mxu2 %v7665_v3 }
 0x830   :  { %4793 = vmatpush.bf16.msrb.mxu3 %v7636_v31 }
 0x831   :  { %v4080_v38 = vadd.f32 %v4079_v62, %v4078_v16 }
 0x832   :  { %4824 = vmatpush.bf16.msra.mxu1 %v7659_v41  ;;  %4811 = vmatpush.bf16.msra.mxu0 %v7645_v17 }
 0x833   :  { %v4081_v57 = vmul.f32 %v4080_v38, %v10188_v27  ;;  %4846 = vmatpush.bf16.msra.mxu2 %v7664_v5 }
 0x835   :  { %v4082_v63 = vadd.f32 1e-05, %v4081_v57 }
 0x836   :  { %4825 = vmatpush.bf16.msra.mxu1 %v7658_v51  ;;  %4812 = vmatpush.bf16.msra.mxu0 %v7644_v0 }
 0x837   :  { %7763 = vrsqrt.f32 %v4082_v63  ;;  %vm4089_vm5 = vweird.f32 %v4082_v63 }
 0x83a   :  { %4826 = vmatpush.bf16.msra.mxu1 %v7657_v40 }
 0x83d   :  { %v7764_v60 = vpop.eup %7763 }
 0x83e   :  { %v4084_v42 = vmul.f32 %v7764_v60, %v4082_v63  ;;  %4827 = vmatpush.bf16.msra.mxu1 %v7656_v61  ;;  %vm4090_vm4 = vweird.f32 %v7764_v60 }
 0x83f   :  { %vm4091_vm6 = vmor %vm4089_vm5, %vm4090_vm4 }
 0x840   :  { %v4085_v56 = vmul.f32 %v7764_v60, %v4084_v42 }
 0x842   :  { %v4086_v34 = vmul.f32 0.5, %v4085_v56  ;;  %4828 = vmatpush.bf16.msra.mxu1 %v7655_v33  ;;  %v7749_v56 = vld [vmem:[%s10946_s10] ss:$0 sm:$0xff] }
 0x844   :  { %v4087_v19 = vsub.f32 1.5, %v4086_v34 }
 0x846   :  { %v4088_v28 = vmul.f32 %v7764_v60, %v4087_v19  ;;  %4829 = vmatpush.bf16.msra.mxu1 %v7654_v35 }
 0x848   :  { %v4092_v43 = vsel %vm4091_vm6, %v7764_v60, %v4088_v28 }
 0x849   :  { %v4096_v18 = vmul.f32 %v4092_v43, %v10480_v29  ;;  %v4093_v48 = vmul.f32 %v4092_v43, %v10473_v7  ;;  %v4094_v4 = vmul.f32 %v4092_v43, %v10476_v9  ;;  %v4095_v44 = vmul.f32 %v4092_v43, %v10478_v24 }
 0x84a   :  { %4830 = vmatpush.bf16.msra.mxu1 %v7653_v10 }
 0x84b   :  { %v4097_v49 = vmax.f32 %v4093_v48, 0.0  ;;  %v4098_v13 = vmax.f32 %v4094_v4, 0.0  ;;  %v4099_v2 = vmax.f32 %v4095_v44, 0.0  ;;  %v4100_v62 = vmax.f32 %v4096_v18, 0.0 }
 0x84d   :  { %v10622_v29 = vadd.f32 %v4097_v49, %v10003_v6  ;;  %v10625_v7 = vadd.f32 %v4098_v13, %v10005_v1  ;;  %v7652_v6 = vld [vmem:[%s10941_s9 + $0x1c0] sm:$0xff]  ;;  %v7663_v1 = vld [vmem:[%s10941_s9 + $0x218] sm:$0xff]  ;;  %v10648_v59 = vadd.f32 %v4099_v2, %v10057_v50  ;;  %v10656_v47 = vadd.f32 %v4100_v62, %v10059_v21 }
 0x84e   :  { %4831 = vmatpush.bf16.msra.mxu1 %v7652_v6  ;;  %4847 = vmatpush.bf16.msra.mxu2 %v7663_v1 }
 0x84f   :  { %v4105_v9 = vpack.c.bf16 %v10622_v29, %v7771_v58  ;;  %v4106_v24 = vpack.c.bf16 %v10625_v7, %v10622_v29  ;;  %v4107_v25 = vpack.c.bf16 0.0, %v10625_v7  ;;  %v4108_v16 = vpack.c.bf16 %v10648_v59, %v7771_v58 }
 0x850   :  { %v4109_v50 = vpack.c.bf16 %v10656_v47, %v10648_v59  ;;  %v4110_v23 = vpack.c.bf16 0.0, %v10656_v47 }
 0x851   :  { %4704 = vmatmul.bf16.gmra.mxu2 %v4105_v9  ;;  %4723 = vmatmul.bf16.gmra.mxu3 %v4106_v24 }
 0x852   :  { %4742 = vmatmul.bf16.gmra.mxu0 %v4107_v25  ;;  %4756 = vmatmul.bf16.vlgmr.msrb.gmra.mxu1 %v4105_v9 }
 0x853   :  { %4848 = vmatpush.bf16.msra.mxu2 %v7662_v20 }
 0x857   :  { %4849 = vmatpush.bf16.msra.mxu2 %v7661_v30  ;;  %v7675_v30 = vld [vmem:[%s10947_s11 + $0x38] sm:$0xff] }
 0x858   :  { %5495 = vmatpush.bf16.msra.mxu3 %v7675_v30 }
 0x85b   :  { %4850 = vmatpush.bf16.msra.mxu2 %v7660_v11 }
 0x861   :  { %4775 = vmatmul.bf16.vlgmr.msrb.gmra.mxu2 %v4106_v24  ;;  %4794 = vmatmul.bf16.vlgmr.msrb.gmra.mxu3 %v4107_v25 }
 0x862   :  { %4761 = vmatmul.bf16.gmra.mxu1 %v4108_v16  ;;  %4813 = vmatmul.bf16.vlgmr.msra.gmra.mxu0 %v4108_v16 }
 0x871   :  { %4780 = vmatmul.bf16.gmra.mxu2 %v4109_v50  ;;  %4799 = vmatmul.bf16.gmra.mxu3 %v4110_v23 }
 0x872   :  { %4832 = vmatmul.bf16.vlgmr.msra.gmra.mxu1 %v4109_v50  ;;  %4818 = vmatmul.bf16.gmra.mxu0 %v7770_v22 }
 0x87e   :  { %v4738_v21 = vpop.f32.mrf.mxu0 }
 0x881   :  { %4851 = vmatmul.bf16.vlgmr.msra.gmra.mxu2 %v4110_v23 }
 0x882   :  { %4837 = vmatmul.bf16.gmra.mxu1 %v7770_v22 }
 0x884   :  { %v4700_v12 = vpop.f32.mrf.mxu2 }
 0x885   :  { %v4701_v53 = vadd.f32 %v7749_v56, %v4700_v12 }
 0x886   :  { %v4740_v52 = vpop.f32.mrf.mxu0 }
 0x88c   :  { %v4702_v14 = vpop.f32.mrf.mxu2 }
 0x88d   :  { %v4703_v0 = vadd.f32 %v7749_v56, %v4702_v14  ;;  %v7674_v14 = vld [vmem:[%s10947_s11 + $0x30] sm:$0xff] }
 0x88e   :  { %5496 = vmatpush.bf16.msra.mxu3 %v7674_v14 }
 0x891   :  { %4856 = vmatmul.bf16.gmra.mxu2 %v7770_v22 }
 0x896   :  { %v4719_v38 = vpop.f32.mrf.mxu3 }
 0x897   :  { %v4720_v43 = vadd.f32 %v4719_v38, %v4701_v53 }
 0x899   :  { %v4739_v44 = vadd.f32 %v4738_v21, %v4720_v43 }
 0x89e   :  { %v4721_v41 = vpop.f32.mrf.mxu3 }
 0x89f   :  { %v4722_v19 = vadd.f32 %v4721_v41, %v4703_v0 }
 0x8a1   :  { %v4741_v4 = vadd.f32 %v4740_v52, %v4722_v19  ;;  %v7671_v19 = vld [vmem:[%s10947_s11 + $0x18] sm:$0xff] }
 0x8cf   :  { %v4757_v57 = vpop.f32.mrf.mxu1  ;;  %v4743_v45 = vpop.f32.mrf.mxu0 }
 0x8d0   :  { %v4758_v9 = vadd.f32 %v4757_v57, %v4739_v44 }
 0x8d4   :  { %v4705_v55 = vpop.f32.mrf.mxu2  ;;  %v4724_v51 = vpop.f32.mrf.mxu3 }
 0x8d5   :  { %v4706_v33 = vadd.f32 %v7749_v56, %v4705_v55 }
 0x8d7   :  { %v4759_v54 = vpop.f32.mrf.mxu1  ;;  %v4745_v46 = vpop.f32.mrf.mxu0  ;;  %v4725_v18 = vadd.f32 %v4724_v51, %v4706_v33  ;;  %v7683_v51 = vld [vmem:[%s10947_s11 + $0x78] sm:$0xff] }
 0x8d8   :  { %v4760_v3 = vadd.f32 %v4759_v54, %v4741_v4  ;;  %5514 = vmatpush.bf16.msrb.mxu0 %v7683_v51  ;;  %v7688_v4 = vld [vmem:[%s10947_s11 + $0xa0] sm:$0xff] }
 0x8d9   :  { %v4744_v49 = vadd.f32 %v4743_v45, %v4725_v18  ;;  %v7670_v18 = vld [vmem:[%s10947_s11 + $0x10] sm:$0xff] }
 0x8dc   :  { %v4707_v63 = vpop.f32.mrf.mxu2  ;;  %v4726_v40 = vpop.f32.mrf.mxu3 }
 0x8dd   :  { %v4708_v48 = vadd.f32 %v7749_v56, %v4707_v63  ;;  %v7673_v63 = vld [vmem:[%s10947_s11 + $0x28] sm:$0xff]  ;;  %v7682_v56 = vld [vmem:[%s10947_s11 + $0x70] sm:$0xff] }
 0x8de   :  { %5497 = vmatpush.bf16.msra.mxu3 %v7673_v63  ;;  %5515 = vmatpush.bf16.msrb.mxu0 %v7682_v56 }
 0x8df   :  { %v4762_v32 = vpop.f32.mrf.mxu1  ;;  %v4814_v42 = vpop.f32.mrf.mxu0  ;;  %v4727_v10 = vadd.f32 %v4726_v40, %v4708_v48  ;;  %v7680_v48 = vld [vmem:[%s10947_s11 + $0x60] sm:$0xff] }
 0x8e0   :  { %v4763_v24 = vadd.f32 %v4762_v32, %v4744_v49  ;;  %v7679_v49 = vld [vmem:[%s10947_s11 + $0x58] sm:$0xff] }
 0x8e1   :  { %v4746_v20 = vadd.f32 %v4745_v46, %v4727_v10  ;;  %v7669_v10 = vld [vmem:[%s10947_s11 + $0x8] sm:$0xff] }
 0x8e4   :  { %v4776_v39 = vpop.f32.mrf.mxu2  ;;  %v4795_v61 = vpop.f32.mrf.mxu3 }
 0x8e5   :  { %v4777_v1 = vadd.f32 %v4776_v39, %v4758_v9  ;;  %v7691_v39 = vld [vmem:[%s10947_s11 + $0xb8] sm:$0xff] }
 0x8e6   :  { %5533 = vmatpush.bf16.msrb.mxu1 %v7691_v39  ;;  %v7699_v9 = vld [vmem:[%s10947_s11 + $0xf8] sm:$0xff] }
 0x8e7   :  { %v4764_v17 = vpop.f32.mrf.mxu1  ;;  %v4816_v15 = vpop.f32.mrf.mxu0  ;;  %v4796_v50 = vadd.f32 %v4795_v61, %v4777_v1  ;;  %5552 = vmatpush.bf16.msrb.mxu2 %v7699_v9  ;;  %v7686_v1 = vld [vmem:[%s10947_s11 + $0x90] sm:$0xff]  ;;  %v7707_v39 = vld [vmem:[%s10947_s11 + $0x138] sm:$0xff] }
 0x8e8   :  { %v4765_v16 = vadd.f32 %v4764_v17, %v4746_v20  ;;  %v7698_v20 = vld [vmem:[%s10947_s11 + $0xf0] sm:$0xff] }
 0x8e9   :  { %v4815_v55 = vadd.f32 %v4814_v42, %v4796_v50  ;;  %v7672_v42 = vld [vmem:[%s10947_s11 + $0x20] sm:$0xff]  ;;  %v7702_v9 = vld [vmem:[%s10947_s11 + $0x110] sm:$0xff] }
 0x8ea   :  { %5498 = vmatpush.bf16.msra.mxu3 %v7672_v42  ;;  %v7722_v42 = vld [vmem:[%s10947_s11 + $0x1b0] sm:$0xff] }
 0x8eb   :  { %5553 = vmatpush.bf16.msrb.mxu2 %v7698_v20  ;;  %v7717_v20 = vld [vmem:[%s10947_s11 + $0x188] sm:$0xff] }
 0x8ec   :  { %v4778_v26 = vpop.f32.mrf.mxu2  ;;  %v4797_v34 = vpop.f32.mrf.mxu3 }
 0x8ed   :  { %v4779_v25 = vadd.f32 %v4778_v26, %v4760_v3 }
 0x8ee   :  { %5499 = vmatpush.bf16.msra.mxu3 %v7671_v19  ;;  %v7704_v19 = vld [vmem:[%s10947_s11 + $0x120] sm:$0xff] }
 0x8ef   :  { %v4833_v37 = vpop.f32.mrf.mxu1  ;;  %v4819_v5 = vpop.f32.mrf.mxu0  ;;  %v4798_v62 = vadd.f32 %v4797_v34, %v4779_v25 }
 0x8f0   :  { %v4834_v32 = vadd.f32 %v4833_v37, %v4815_v55  ;;  %v7690_v37 = vld [vmem:[%s10947_s11 + $0xb0] sm:$0xff]  ;;  %v7684_v55 = vld [vmem:[%s10947_s11 + $0x80] sm:$0xff] }
 0x8f1   :  { %v4817_v38 = vadd.f32 %v4816_v15, %v4798_v62  ;;  %5534 = vmatpush.bf16.msrb.mxu1 %v7690_v37  ;;  %v7681_v15 = vld [vmem:[%s10947_s11 + $0x68] sm:$0xff] }
 0x8f2   :  { %5516 = vmatpush.bf16.msrb.mxu0 %v7681_v15  ;;  %5500 = vmatpush.bf16.msra.mxu3 %v7670_v18  ;;  %v7697_v62 = vld [vmem:[%s10947_s11 + $0xe8] sm:$0xff]  ;;  %v7692_v15 = vld [vmem:[%s10947_s11 + $0xc0] sm:$0xff] }
 0x8f3   :  { %5554 = vmatpush.bf16.msrb.mxu2 %v7697_v62  ;;  %v7708_v62 = vld [vmem:[%s10947_s11 + $0x140] sm:$0xff] }
 0x8f4   :  { %v4781_v60 = vpop.f32.mrf.mxu2  ;;  %v4800_v13 = vpop.f32.mrf.mxu3 }
 0x8f5   :  { %v4782_v2 = vadd.f32 %v4781_v60, %v4763_v24 }
 0x8f6   :  { %5517 = vmatpush.bf16.msrb.mxu0 %v7680_v48  ;;  %5501 = vmatpush.bf16.msra.mxu3 %v7669_v10  ;;  %v7703_v48 = vld [vmem:[%s10947_s11 + $0x118] sm:$0xff] }
 0x8f7   :  { %v4835_v28 = vpop.f32.mrf.mxu1  ;;  %v4801_v23 = vadd.f32 %v4800_v13, %v4782_v2  ;;  %v4821_v45 = vpop.f32.mrf.mxu0  ;;  %v7687_v13 = vld [vmem:[%s10947_s11 + $0x98] sm:$0xff] }
 0x8f8   :  { %v4836_v41 = vadd.f32 %v4835_v28, %v4817_v38  ;;  %v7689_v28 = vld [vmem:[%s10947_s11 + $0xa8] sm:$0xff]  ;;  %v7719_v10 = vld [vmem:[%s10947_s11 + $0x198] sm:$0xff] }
 0x8f9   :  { %v4820_v52 = vadd.f32 %v4819_v5, %v4801_v23  ;;  %5535 = vmatpush.bf16.msrb.mxu1 %v7689_v28  ;;  %v7668_v5 = vld [vmem:[%s10947_s11] sm:$0xff] }
 0x8fa   :  { %5518 = vmatpush.bf16.msrb.mxu0 %v7679_v49  ;;  %5502 = vmatpush.bf16.msra.mxu3 %v7668_v5  ;;  %v7712_v28 = vld [vmem:[%s10947_s11 + $0x160] sm:$0xff]  ;;  %v7730_v49 = vld [vmem:[%s10947_s11 + $0x1f0] sm:$0xff]  ;;  %v7729_v5 = vld [vmem:[%s10947_s11 + $0x1e8] sm:$0xff] }
 0x8fc   :  { %v4783_v31 = vpop.f32.mrf.mxu2  ;;  %v4802_v21 = vpop.f32.mrf.mxu3 }
 0x8fd   :  { %v4784_v12 = vadd.f32 %v4783_v31, %v4765_v16  ;;  %5536 = vmatpush.bf16.msrb.mxu1 %v7688_v4  ;;  %v7685_v16 = vld [vmem:[%s10947_s11 + $0x88] sm:$0xff]  ;;  %5503 = vmatmul.bf16.vlgmr.msra.gmra.mxu3 %v7770_v22  ;;  %v7731_v4 = vld [vmem:[%s10947_s11 + $0x1f8] sm:$0xff] }
 0x8fe   :  { %5571 = vmatpush.bf16.msrb.mxu3 %v7707_v39  ;;  %v7737_v39 = vld [vmem:[%s10947_s11 + $0x228] sm:$0xff] }
 0x8ff   :  { %v4838_v11 = vpop.f32.mrf.mxu1  ;;  %v4803_v54 = vadd.f32 %v4802_v21, %v4784_v12 }
 0x900   :  { %v4839_v40 = vadd.f32 %v4838_v11, %v4820_v52  ;;  %v7677_v11 = vld [vmem:[%s10947_s11 + $0x48] sm:$0xff] }
 0x901   :  { %v4822_v17 = vadd.f32 %v4821_v45, %v4803_v54  ;;  %5537 = vmatpush.bf16.msrb.mxu1 %v7687_v13  ;;  %v7695_v45 = vld [vmem:[%s10947_s11 + $0xd8] sm:$0xff] }
 0x904   :  { %v4852_v35 = vpop.f32.mrf.mxu2 }
 0x905   :  { %v4853_v60 = vadd.f32 %v4852_v35, %v4834_v32  ;;  %5538 = vmatpush.bf16.msrb.mxu1 %v7686_v1  ;;  %v7715_v32 = vld [vmem:[%s10947_s11 + $0x178] sm:$0xff]  ;;  %v7709_v1 = vld [vmem:[%s10947_s11 + $0x148] sm:$0xff] }
 0x907   :  { %v4840_v46 = vpop.f32.mrf.mxu1 }
 0x908   :  { %v4841_v31 = vadd.f32 %v4840_v46, %v4822_v17  ;;  %v7706_v17 = vld [vmem:[%s10947_s11 + $0x130] sm:$0xff] }
 0x909   :  { %5539 = vmatpush.bf16.msrb.mxu1 %v7685_v16  ;;  %5572 = vmatpush.bf16.msrb.mxu3 %v7706_v17 }
 0x90c   :  { %v4854_v6 = vpop.f32.mrf.mxu2 }
 0x90d   :  { %v4855_v26 = vadd.f32 %v4854_v6, %v4836_v41  ;;  %v7678_v6 = vld [vmem:[%s10947_s11 + $0x50] sm:$0xff]  ;;  %v7696_v41 = vld [vmem:[%s10947_s11 + $0xe0] sm:$0xff]  ;;  %5540 = vmatpush.bf16.msrb.mxu1 %v7684_v55  ;;  %v7727_v55 = vld [vmem:[%s10947_s11 + $0x1d8] sm:$0xff] }
 0x90e   :  { %5519 = vmatpush.bf16.msrb.mxu0 %v7678_v6  ;;  %5555 = vmatpush.bf16.msrb.mxu2 %v7696_v41  ;;  %v7701_v6 = vld [vmem:[%s10947_s11 + $0x108] sm:$0xff] }
 0x90f   :  { %v4862_v0 = vadd.f32 %v4855_v26, %v4853_v60 }
 0x910   :  { %5541 = vmatmul.bf16.vlgmr.msrb.gmra.mxu1 %v7770_v22 }
 0x912   :  { %5520 = vmatpush.bf16.msrb.mxu0 %v7677_v11  ;;  %5556 = vmatpush.bf16.msrb.mxu2 %v7695_v45  ;;  %v7700_v11 = vld [vmem:[%s10947_s11 + $0x100] sm:$0xff]  ;;  %v7725_v45 = vld [vmem:[%s10947_s11 + $0x1c8] sm:$0xff] }
 0x914   :  { %v4857_v57 = vpop.f32.mrf.mxu2 }
 0x915   :  { %v4858_v61 = vadd.f32 %v4857_v57, %v4839_v40  ;;  %v7676_v57 = vld [vmem:[%s10947_s11 + $0x40] sm:$0xff]  ;;  %v7723_v40 = vld [vmem:[%s10947_s11 + $0x1b8] sm:$0xff] }
 0x916   :  { %5521 = vmatpush.bf16.msrb.mxu0 %v7676_v57  ;;  %5609 = vmatpush.bf16.msra.mxu1 %v7723_v40  ;;  %v7739_v57 = vld [vmem:[%s10947_s11 + $0x238] sm:$0xff] }
 0x917   :  { %v4863_v53 = vadd.f32 %v4862_v0, %v4858_v61  ;;  %v7693_v0 = vld [vmem:[%s10947_s11 + $0xc8] sm:$0xff] }
 0x919   :  { %5522 = vmatmul.bf16.vlgmr.msrb.gmra.mxu0 %v7770_v22 }
 0x91a   :  { %5590 = vmatpush.bf16.msra.mxu0 %v7715_v32  ;;  %5610 = vmatpush.bf16.msra.mxu1 %v7722_v42 }
 0x91c   :  { %v4859_v34 = vpop.f32.mrf.mxu2 }
 0x91d   :  { %v4860_v33 = vadd.f32 %v4859_v34, %v4841_v31  ;;  %v7705_v31 = vld [vmem:[%s10947_s11 + $0x128] sm:$0xff] }
 0x91e   :  { %v7713_v34 = vld [vmem:[%s10947_s11 + $0x168] sm:$0xff]  ;;  %5573 = vmatpush.bf16.msrb.mxu3 %v7705_v31 }
 0x91f   :  { %v4864_v35 = vadd.f32 %v4863_v53, %v4860_v33  ;;  %v7721_v53 = vld [vmem:[%s10947_s11 + $0x1a8] sm:$0xff] }
 0x920   :  { %5611 = vmatpush.bf16.msra.mxu1 %v7721_v53  ;;  %v7733_v53 = vld [vmem:[%s10947_s11 + $0x208] sm:$0xff] }
 0x921   :  { %v4865_v43 = vrot.slane %v4864_v35, 4 }
 0x922   :  { %5574 = vmatpush.bf16.msrb.mxu3 %v7704_v19 }
 0x923   :  { %v4866_v44 = vadd.f32 %v4865_v43, %v4864_v35  ;;  %v7720_v43 = vld [vmem:[%s10947_s11 + $0x1a0] sm:$0xff] }
 0x924   :  { %5612 = vmatpush.bf16.msra.mxu1 %v7720_v43 }
 0x925   :  { %v4867_v3 = vrot.slane %v4866_v44, 2 }
 0x926   :  { %5575 = vmatpush.bf16.msrb.mxu3 %v7703_v48 }
 0x927   :  { %v4868_v24 = vadd.f32 %v4867_v3, %v4866_v44  ;;  %v7711_v44 = vld [vmem:[%s10947_s11 + $0x158] sm:$0xff] }
 0x928   :  { %5613 = vmatpush.bf16.msra.mxu1 %v7719_v10 }
 0x929   :  { %v4869_v25 = vrot.slane %v4868_v24, 1 }
 0x92a   :  { %5576 = vmatpush.bf16.msrb.mxu3 %v7702_v9 }
 0x92b   :  { %v4870_v2 = vadd.f32 %v4869_v25, %v4868_v24  ;;  %v7710_v24 = vld [vmem:[%s10947_s11 + $0x150] sm:$0xff] }
 0x92c   :  { %v7718_v25 = vld [vmem:[%s10947_s11 + $0x190] sm:$0xff] }
 0x92d   :  { %v4871_v30 = vmul.f32 %v4870_v2, %v10188_v27  ;;  %5614 = vmatpush.bf16.msra.mxu1 %v7718_v25  ;;  %v7728_v2 = vld [vmem:[%s10947_s11 + $0x1e0] sm:$0xff] }
 0x92e   :  { %5577 = vmatpush.bf16.msrb.mxu3 %v7701_v6  ;;  %v7750_v25 = vld [vmem:[%s10948_s12] ss:$0 sm:$0xff] }
 0x92f   :  { %v10744_v50 = vsub.f32 %v4853_v60, %v4871_v30  ;;  %v10746_v23 = vsub.f32 %v4855_v26, %v4871_v30  ;;  %v10748_v12 = vsub.f32 %v4858_v61, %v4871_v30  ;;  %v10750_v14 = vsub.f32 %v4860_v33, %v4871_v30  ;;  %v7694_v60 = vld [vmem:[%s10947_s11 + $0xd0] sm:$0xff] }
 0x930   :  { %v7714_v61 = vld [vmem:[%s10947_s11 + $0x170] sm:$0xff]  ;;  %5557 = vmatpush.bf16.msrb.mxu2 %v7694_v60  ;;  %v7736_v60 = vld [vmem:[%s10947_s11 + $0x220] sm:$0xff] }
 0x931   :  { %v4876_v38 = vmul.f32 %v10744_v50, %v10744_v50  ;;  %v4877_v21 = vmul.f32 %v10746_v23, %v10746_v23  ;;  %v4878_v52 = vmul.f32 %v10748_v12, %v10748_v12  ;;  %v4879_v63 = vmul.f32 %v10750_v14, %v10750_v14  ;;  %5591 = vmatpush.bf16.msra.mxu0 %v7714_v61 }
 0x932   :  { %5615 = vmatpush.bf16.msra.mxu1 %v7717_v20  ;;  %5578 = vmatpush.bf16.msrb.mxu3 %v7700_v11 }
 0x933   :  { %v4880_v54 = vadd.f32 %v4877_v21, %v4876_v38  ;;  %v7716_v38 = vld [vmem:[%s10947_s11 + $0x180] sm:$0xff] }
 0x934   :  { %5558 = vmatpush.bf16.msrb.mxu2 %v7693_v0 }
 0x935   :  { %v4881_v51 = vadd.f32 %v4880_v54, %v4878_v52  ;;  %5592 = vmatpush.bf16.msra.mxu0 %v7713_v34  ;;  %v7738_v52 = vld [vmem:[%s10947_s11 + $0x230] sm:$0xff] }
 0x936   :  { %5647 = vmatpush.bf16.msra.mxu3 %v7739_v57  ;;  %5616 = vmatpush.bf16.msra.mxu1 %v7716_v38  ;;  %v7726_v54 = vld [vmem:[%s10947_s11 + $0x1d0] sm:$0xff] }
 0x937   :  { %v4882_v26 = vadd.f32 %v4881_v51, %v4879_v63  ;;  %v7734_v34 = vld [vmem:[%s10947_s11 + $0x210] sm:$0xff] }
 0x938   :  { %5559 = vmatpush.bf16.msrb.mxu2 %v7692_v15 }
 0x939   :  { %v4883_v46 = vrot.slane %v4882_v26, 4  ;;  %5593 = vmatpush.bf16.msra.mxu0 %v7712_v28 }
 0x93a   :  { %5648 = vmatpush.bf16.msra.mxu3 %v7738_v52 }
 0x93b   :  { %v4884_v56 = vadd.f32 %v4883_v46, %v4882_v26 }
 0x93c   :  { %5628 = vmatpush.bf16.msra.mxu2 %v7731_v4 }
 0x93d   :  { %v4885_v37 = vrot.slane %v4884_v56, 2  ;;  %5594 = vmatpush.bf16.msra.mxu0 %v7711_v44 }
 0x93e   :  { %5649 = vmatpush.bf16.msra.mxu3 %v7737_v39 }
 0x93f   :  { %v4886_v33 = vadd.f32 %v4885_v37, %v4884_v56 }
 0x940   :  { %5629 = vmatpush.bf16.msra.mxu2 %v7730_v49 }
 0x941   :  { %v4887_v35 = vrot.slane %v4886_v33, 1  ;;  %5595 = vmatpush.bf16.msra.mxu0 %v7710_v24 }
 0x942   :  { %5650 = vmatpush.bf16.msra.mxu3 %v7736_v60 }
 0x943   :  { %v4888_v18 = vadd.f32 %v4887_v35, %v4886_v33  ;;  %v7732_v33 = vld [vmem:[%s10947_s11 + $0x200] sm:$0xff] }
 0x944   :  { %5630 = vmatpush.bf16.msra.mxu2 %v7729_v5 }
 0x945   :  { %v4889_v3 = vmul.f32 %v4888_v18, %v10188_v27  ;;  %5596 = vmatpush.bf16.msra.mxu0 %v7709_v1 }
 0x947   :  { %v4890_v13 = vadd.f32 1e-05, %v4889_v3 }
 0x948   :  { %5631 = vmatpush.bf16.msra.mxu2 %v7728_v2 }
 0x949   :  { %7765 = vrsqrt.f32 %v4890_v13  ;;  %5597 = vmatpush.bf16.msra.mxu0 %v7708_v62  ;;  %vm4897_vm8 = vweird.f32 %v4890_v13 }
 0x94c   :  { %5632 = vmatpush.bf16.msra.mxu2 %v7727_v55 }
 0x94f   :  { %v7766_v30 = vpop.eup %7765 }
 0x950   :  { %v4892_v16 = vmul.f32 %v7766_v30, %v4890_v13  ;;  %vm4898_vm7 = vweird.f32 %v7766_v30  ;;  %5633 = vmatpush.bf16.msra.mxu2 %v7726_v54 }
 0x951   :  { %vm4899_vm9 = vmor %vm4897_vm8, %vm4898_vm7 }
 0x952   :  { %v4893_v21 = vmul.f32 %v7766_v30, %v4892_v16 }
 0x954   :  { %v4894_v41 = vmul.f32 0.5, %v4893_v21  ;;  %5634 = vmatpush.bf16.msra.mxu2 %v7725_v45 }
 0x956   :  { %v4895_v63 = vsub.f32 1.5, %v4894_v41 }
 0x958   :  { %v4896_v51 = vmul.f32 %v7766_v30, %v4895_v63 }
 0x95a   :  { %v4900_v32 = vsel %vm4899_vm9, %v7766_v30, %v4896_v51 }
 0x95b   :  { %v4904_v40 = vmul.f32 %v4900_v32, %v10750_v14  ;;  %v4901_v26 = vmul.f32 %v4900_v32, %v10744_v50  ;;  %v4902_v46 = vmul.f32 %v4900_v32, %v10746_v23  ;;  %v4903_v17 = vmul.f32 %v4900_v32, %v10748_v12  ;;  %v7724_v50 = vld [vmem:[%s10947_s11 + $0x1c0] sm:$0xff]  ;;  %v7735_v12 = vld [vmem:[%s10947_s11 + $0x218] sm:$0xff] }
 0x95c   :  { %5635 = vmatpush.bf16.msra.mxu2 %v7724_v50  ;;  %5651 = vmatpush.bf16.msra.mxu3 %v7735_v12 }
 0x95d   :  { %v4908_v61 = vmax.f32 %v4904_v40, 0.0  ;;  %v4905_v42 = vmax.f32 %v4901_v26, 0.0  ;;  %v4906_v56 = vmax.f32 %v4902_v46, 0.0  ;;  %v4907_v37 = vmax.f32 %v4903_v17, 0.0 }
 0x95f   :  { %v4909_v31 = vpack.c.bf16 %v4905_v42, %v7771_v58  ;;  %v4910_v0 = vpack.c.bf16 %v4906_v56, %v4905_v42  ;;  %v4911_v14 = vpack.c.bf16 0.0, %v4906_v56  ;;  %v4913_v23 = vpack.c.bf16 %v4908_v61, %v4907_v37 }
 0x960   :  { %5652 = vmatpush.bf16.msra.mxu3 %v7734_v34  ;;  %v4912_v19 = vpack.c.bf16 %v4907_v37, %v7771_v58  ;;  %v4914_v15 = vpack.c.bf16 0.0, %v4908_v61 }
 0x961   :  { %5508 = vmatmul.bf16.gmra.mxu3 %v4909_v31  ;;  %5527 = vmatmul.bf16.gmra.mxu0 %v4910_v0 }
 0x962   :  { %5546 = vmatmul.bf16.gmra.mxu1 %v4911_v14  ;;  %5560 = vmatmul.bf16.vlgmr.msrb.gmra.mxu2 %v4909_v31 }
 0x964   :  { %5653 = vmatpush.bf16.msra.mxu3 %v7733_v53 }
 0x968   :  { %5654 = vmatpush.bf16.msra.mxu3 %v7732_v33 }
 0x971   :  { %5579 = vmatmul.bf16.vlgmr.msrb.gmra.mxu3 %v4910_v0  ;;  %5598 = vmatmul.bf16.vlgmr.msra.gmra.mxu0 %v4911_v14 }
 0x972   :  { %5565 = vmatmul.bf16.gmra.mxu2 %v4912_v19  ;;  %5617 = vmatmul.bf16.vlgmr.msra.gmra.mxu1 %v4912_v19 }
 0x980   :  { %v5504_v28 = vpop.f32.mrf.mxu3 }
 0x981   :  { %5584 = vmatmul.bf16.gmra.mxu3 %v4913_v23  ;;  %5603 = vmatmul.bf16.gmra.mxu0 %v4914_v15  ;;  %v5505_v6 = vadd.f32 %v7750_v25, %v5504_v28 }
 0x982   :  { %5636 = vmatmul.bf16.vlgmr.msra.gmra.mxu2 %v4913_v23  ;;  %5622 = vmatmul.bf16.gmra.mxu1 %v7770_v22 }
 0x988   :  { %v5506_v35 = vpop.f32.mrf.mxu3 }
 0x989   :  { %v5507_v16 = vadd.f32 %v7750_v25, %v5506_v35 }
 0x98d   :  { %v5542_v58 = vpop.f32.mrf.mxu1 }
 0x991   :  { %5655 = vmatmul.bf16.vlgmr.msra.gmra.mxu3 %v4914_v15 }
 0x992   :  { %5641 = vmatmul.bf16.gmra.mxu2 %v7770_v22 }
 0x995   :  { %v5544_v44 = vpop.f32.mrf.mxu1 }
 0x996   :  { %v5523_v43 = vpop.f32.mrf.mxu0 }
 0x997   :  { %v5524_v2 = vadd.f32 %v5523_v43, %v5505_v6 }
 0x999   :  { %v5543_v11 = vadd.f32 %v5542_v58, %v5524_v2 }
 0x99e   :  { %v5525_v4 = vpop.f32.mrf.mxu0 }
 0x99f   :  { %v5526_v21 = vadd.f32 %v5525_v4, %v5507_v16 }
 0x9a1   :  { %5660 = vmatmul.bf16.gmra.mxu3 %v7770_v22  ;;  %v5545_v54 = vadd.f32 %v5544_v44, %v5526_v21 }
 0x9de   :  { %v5528_v49 = vpop.f32.mrf.mxu0 }
 0x9df   :  { %v5547_v9 = vpop.f32.mrf.mxu1 }
 0x9e4   :  { %v5509_v18 = vpop.f32.mrf.mxu3 }
 0x9e5   :  { %v5561_v48 = vpop.f32.mrf.mxu2  ;;  %v5510_v63 = vadd.f32 %v7750_v25, %v5509_v18 }
 0x9e6   :  { %v5530_v5 = vpop.f32.mrf.mxu0  ;;  %v5562_v38 = vadd.f32 %v5561_v48, %v5543_v11 }
 0x9e7   :  { %v5549_v1 = vpop.f32.mrf.mxu1  ;;  %v5529_v32 = vadd.f32 %v5528_v49, %v5510_v63 }
 0x9e9   :  { %v5548_v56 = vadd.f32 %v5547_v9, %v5529_v32 }
 0x9ec   :  { %v5511_v3 = vpop.f32.mrf.mxu3 }
 0x9ed   :  { %v5563_v10 = vpop.f32.mrf.mxu2  ;;  %v5512_v42 = vadd.f32 %v7750_v25, %v5511_v3 }
 0x9ee   :  { %v5599_v62 = vpop.f32.mrf.mxu0  ;;  %v5564_v39 = vadd.f32 %v5563_v10, %v5545_v54 }
 0x9ef   :  { %v5618_v57 = vpop.f32.mrf.mxu1  ;;  %v5531_v50 = vadd.f32 %v5530_v5, %v5512_v42 }
 0x9f1   :  { %v5550_v28 = vadd.f32 %v5549_v1, %v5531_v50 }
 0x9f4   :  { %v5580_v13 = vpop.f32.mrf.mxu3 }
 0x9f5   :  { %v5566_v24 = vpop.f32.mrf.mxu2  ;;  %v5581_v55 = vadd.f32 %v5580_v13, %v5562_v38 }
 0x9f6   :  { %v5601_v45 = vpop.f32.mrf.mxu0  ;;  %v5567_v0 = vadd.f32 %v5566_v24, %v5548_v56 }
 0x9f7   :  { %v5600_v51 = vadd.f32 %v5599_v62, %v5581_v55  ;;  %v5620_v46 = vpop.f32.mrf.mxu1 }
 0x9f9   :  { %v5619_v26 = vadd.f32 %v5618_v57, %v5600_v51 }
 0x9fc   :  { %v5582_v22 = vpop.f32.mrf.mxu3 }
 0x9fd   :  { %v5568_v20 = vpop.f32.mrf.mxu2  ;;  %v5583_v40 = vadd.f32 %v5582_v22, %v5564_v39 }
 0x9fe   :  { %v5604_v53 = vpop.f32.mrf.mxu0  ;;  %v5569_v18 = vadd.f32 %v5568_v20, %v5550_v28 }
 0x9ff   :  { %v5602_v37 = vadd.f32 %v5601_v45, %v5583_v40  ;;  %v5623_v19 = vpop.f32.mrf.mxu1 }
 0xa01   :  { %v5621_v12 = vadd.f32 %v5620_v46, %v5602_v37 }
 0xa04   :  { %v5585_v30 = vpop.f32.mrf.mxu3 }
 0xa05   :  { %v5637_v41 = vpop.f32.mrf.mxu2  ;;  %v5586_v23 = vadd.f32 %v5585_v30, %v5567_v0 }
 0xa06   :  { %v5638_v17 = vadd.f32 %v5637_v41, %v5619_v26  ;;  %v5606_v13 = vpop.f32.mrf.mxu0 }
 0xa07   :  { %v5605_v35 = vadd.f32 %v5604_v53, %v5586_v23  ;;  %v5625_v5 = vpop.f32.mrf.mxu1 }
 0xa09   :  { %v5624_v4 = vadd.f32 %v5623_v19, %v5605_v35 }
 0xa0c   :  { %v5587_v52 = vpop.f32.mrf.mxu3 }
 0xa0d   :  { %v5639_v60 = vpop.f32.mrf.mxu2  ;;  %v5588_v44 = vadd.f32 %v5587_v52, %v5569_v18 }
 0xa0e   :  { %v5640_v33 = vadd.f32 %v5639_v60, %v5621_v12 }
 0xa0f   :  { %v5607_v24 = vadd.f32 %v5606_v13, %v5588_v44 }
 0xa11   :  { %v5626_v1 = vadd.f32 %v5625_v5, %v5607_v24 }
 0xa14   :  { %v5656_v61 = vpop.f32.mrf.mxu3 }
 0xa15   :  { %v5657_v31 = vadd.f32 %v5656_v61, %v5638_v17  ;;  %v5642_v58 = vpop.f32.mrf.mxu2 }
 0xa16   :  { %v5643_v10 = vadd.f32 %v5642_v58, %v5624_v4 }
 0xa17   :  { %v5666_v14 = vmul.f32 %v5657_v31, %v10097_v36 }
 0xa19   :  { %v5670_v34 = vadd.f32 %v5666_v14, %v10102_v8 }
 0xa1c   :  { %v5658_v15 = vpop.f32.mrf.mxu3 }
 0xa1d   :  { %v5659_v43 = vadd.f32 %v5658_v15, %v5640_v33  ;;  %v5644_v6 = vpop.f32.mrf.mxu2 }
 0xa1e   :  { %v5645_v20 = vadd.f32 %v5644_v6, %v5626_v1 }
 0xa1f   :  { %v5667_v48 = vmul.f32 %v5659_v43, %v10097_v36 }
 0xa21   :  { %v5671_v3 = vadd.f32 %v5667_v48, %v10102_v8 }
 0xa23   :  { %v5674_v49 = vadd.f32 %v5671_v3, %v5670_v34 }
 0xa24   :  { %v5661_v9 = vpop.f32.mrf.mxu3 }
 0xa25   :  { %v5662_v25 = vadd.f32 %v5661_v9, %v5643_v10 }
 0xa27   :  { %v5668_v22 = vmul.f32 %v5662_v25, %v10097_v36 }
 0xa29   :  { %v5672_v2 = vadd.f32 %v5668_v22, %v10102_v8 }
 0xa2b   :  { %v5675_v30 = vadd.f32 %v5674_v49, %v5672_v2 }
 0xa2c   :  { %v5663_v11 = vpop.f32.mrf.mxu3 }
 0xa2d   :  { %v5664_v16 = vadd.f32 %v5663_v11, %v5645_v20 }
 0xa2f   :  { %v5669_v62 = vmul.f32 %v5664_v16, %v10097_v36 }
 0xa31   :  { %v5673_v38 = vadd.f32 %v5669_v62, %v10102_v8 }
 0xa33   :  { %v5676_v21 = vadd.f32 %v5675_v30, %v5673_v38 }
 0xa35   :  { %v5677_v57 = vrot.slane %v5676_v21, 4 }
 0xa37   :  { %v5678_v55 = vadd.f32 %v5677_v57, %v5676_v21 }
 0xa39   :  { %v5679_v41 = vrot.slane %v5678_v55, 2 }
 0xa3b   :  { %v5680_v52 = vadd.f32 %v5679_v41, %v5678_v55 }
 0xa3d   :  { %v5681_v54 = vrot.slane %v5680_v52, 1 }
 0xa3f   :  { %v5682_v63 = vadd.f32 %v5681_v54, %v5680_v52 }
 0xa41   :  { %v5683_v51 = vmul.f32 %v5682_v63, %v10188_v27 }
 0xa43   :  { %v5684_v39 = vsub.f32 %v5670_v34, %v5683_v51  ;;  %v5685_v45 = vsub.f32 %v5671_v3, %v5683_v51  ;;  %v5686_v32 = vsub.f32 %v5672_v2, %v5683_v51  ;;  %v5687_v40 = vsub.f32 %v5673_v38, %v5683_v51 }
 0xa45   :  { %v5688_v26 = vmul.f32 %v5684_v39, %v5684_v39  ;;  %v5689_v46 = vmul.f32 %v5685_v45, %v5685_v45  ;;  %v5690_v17 = vmul.f32 %v5686_v32, %v5686_v32  ;;  %v5691_v36 = vmul.f32 %v5687_v40, %v5687_v40 }
 0xa47   :  { %v5692_v60 = vadd.f32 %v5689_v46, %v5688_v26 }
 0xa49   :  { %v5693_v61 = vadd.f32 %v5692_v60, %v5690_v17 }
 0xa4b   :  { %v5694_v8 = vadd.f32 %v5693_v61, %v5691_v36 }
 0xa4d   :  { %v5695_v42 = vrot.slane %v5694_v8, 4 }
 0xa4f   :  { %v5696_v56 = vadd.f32 %v5695_v42, %v5694_v8 }
 0xa51   :  { %v5697_v37 = vrot.slane %v5696_v56, 2 }
 0xa53   :  { %v5698_v31 = vadd.f32 %v5697_v37, %v5696_v56 }
 0xa55   :  { %v5699_v0 = vrot.slane %v5698_v31, 1 }
 0xa57   :  { %v5700_v14 = vadd.f32 %v5699_v0, %v5698_v31 }
 0xa59   :  { %v5701_v50 = vmul.f32 %v5700_v14, %v10188_v27 }
 0xa5b   :  { %v5702_v23 = vadd.f32 1e-05, %v5701_v50 }
 0xa5d   :  { %7767 = vrsqrt.f32 %v5702_v23  ;;  %vm5709_vm11 = vweird.f32 %v5702_v23 }
 0xa63   :  { %v7768_v12 = vpop.eup %7767 }
 0xa64   :  { %v5704_v34 = vmul.f32 %v7768_v12, %v5702_v23  ;;  %vm5710_vm10 = vweird.f32 %v7768_v12 }
 0xa65   :  { %vm5711_vm12 = vmor %vm5709_vm11, %vm5710_vm10 }
 0xa66   :  { %v5705_v53 = vmul.f32 %v7768_v12, %v5704_v34 }
 0xa68   :  { %v5706_v33 = vmul.f32 0.5, %v5705_v53 }
 0xa6a   :  { %v5707_v19 = vsub.f32 1.5, %v5706_v33 }
 0xa6c   :  { %v5708_v15 = vmul.f32 %v7768_v12, %v5707_v19 }
 0xa6e   :  { %v5712_v28 = vsel %vm5711_vm12, %v7768_v12, %v5708_v15 }
 0xa6f   :  { %v5713_v35 = vmul.f32 %v5712_v28, %v5684_v39  ;;  %v5714_v43 = vmul.f32 %v5712_v28, %v5685_v45  ;;  %v5715_v58 = vmul.f32 %v5712_v28, %v5686_v32  ;;  %v5716_v18 = vmul.f32 %v5712_v28, %v5687_v40 }
 0xa71   :  { %v5717_v48 = vmax.f32 %v5713_v35, 0.0  ;;  %v5718_v4 = vmax.f32 %v5714_v43, 0.0  ;;  %v5719_v44 = vmax.f32 %v5715_v58, 0.0  ;;  %v5720_v27 = vmax.f32 %v5716_v18, 0.0 }
 0xa73   :  { %v5721_v3 = vadd.f32 %v5717_v48, %v10622_v29  ;;  %v5722_v10 = vadd.f32 %v5718_v4, %v10625_v7  ;;  %v5723_v49 = vadd.f32 %v5719_v44, %v10648_v59  ;;  %v5724_v9 = vadd.f32 %v5720_v27, %v10656_v47 }
 0xa75   :  { %v5725_v13 = vmax.f32 %v5721_v3, %v5722_v10 }
 0xa77   :  { %v5726_v24 = vmax.f32 %v5725_v13, %v5723_v49 }
 0xa79   :  { %v5727_v25 = vmax.f32 %v5726_v24, %v5724_v9 }
 0xa7b   :  { %v5728_v5 = vmax.f32 %v5727_v25, 0.0 }
 0xa7d   :  { %5729 = vst [vmem:[%s10949_s16] sm:$0xff] %v5728_v5 }

</bundles_post_ra>
